<compile_context>
chip_gen: v6e
topology: v6e:2x2x1
jax: 0.10.0
libtpu: 0.0.40
codegen_flags: <defaults>
</compile_context>

<pallas_src>
import numpy as np

import jax
import jax.numpy as jnp
from jax import lax
from jax.experimental import pallas as pl
from jax.experimental.pallas import tpu as pltpu

_N_LEVELS = 4


# ---------------------------------------------------------------------------
# Bilinear (align_corners=True) interpolation matrices, built with numpy at
# pack time so they are plain device constants (no runtime XLA glue).
# ---------------------------------------------------------------------------
def _interp_matrix_np(n_in, n_out):
    if n_in == 1:
        return np.ones((n_out, 1), np.float32)
    src = np.arange(n_out, dtype=np.float64) * (n_in - 1) / (n_out - 1)
    i0 = np.clip(np.floor(src).astype(np.int64), 0, n_in - 1)
    i1 = np.clip(i0 + 1, 0, n_in - 1)
    frac = (src - i0).astype(np.float32)
    m = np.zeros((n_out, n_in), np.float32)
    m[np.arange(n_out), i0] += 1.0 - frac
    m[np.arange(n_out), i1] += frac
    return m                                           # (n_out, n_in)


def _upsample_matrix_np(h_in, w_in, scale=2):
    """U[(h*Win + w), (ho*Wout + wo)] = Ah[ho, h] * Aw[wo, w]."""
    ah = _interp_matrix_np(h_in, h_in * scale)         # (Hout, Hin)
    aw = _interp_matrix_np(w_in, w_in * scale)         # (Wout, Win)
    return np.kron(ah.T, aw.T).astype(np.float32)      # (Hin*Win, Hout*Wout)


# ---------------------------------------------------------------------------
# In-kernel helpers (traced inside the Pallas kernel body)
# ---------------------------------------------------------------------------
def _shift_flat(x, off):
    """y[:, p] = x[:, p + off] for 0 <= p+off < HW, else 0 (static off)."""
    c, hw = x.shape
    if off == 0:
        return x
    z = jnp.zeros((c, abs(off)), x.dtype)
    if off > 0:
        return jnp.concatenate([x[:, off:], z], axis=1)
    return jnp.concatenate([z, x[:, :hw + off]], axis=1)


def _conv3x3_chw(x, w_flat, b, H, W, relu):
    """3x3 same-padding conv in (C, H*W) layout as one im2col MXU matmul.

    x      : (Cin, H*W)     spatial flattened on the lane axis
    w_flat : (Cout, 9*Cin)  tap-major (kh, kw, ci) weights (BN folded in)
    b      : (Cout, 1)      folded bias
    """
    cin, hw = x.shape
    lane = lax.broadcasted_iota(jnp.int32, (1, hw), 1)
    col = (lane & (W - 1)) if (W & (W - 1)) == 0 else (lane % W)

    pieces = []
    for kh in range(3):
        for kw in range(3):
            dh, dw = kh - 1, kw - 1
            sh = _shift_flat(x, dh * W + dw)
            if dw != 0:
                # zero the columns where the flat shift crossed a row boundary
                valid = jnp.logical_and(col + dw >= 0, col + dw < W)
                sh = jnp.where(valid, sh, jnp.zeros_like(sh))
            pieces.append(sh)
    patches = jnp.concatenate(pieces, axis=0)                    # (9*Cin, H*W)

    acc = jnp.dot(w_flat, patches, preferred_element_type=jnp.float32) + b
    if relu:
        acc = jnp.maximum(acc, 0.0)
    return acc                                                   # (Cout, H*W)


def _make_decoder_kernel(level_hw):
    n_levels = len(level_hw)

    def kernel(*refs):
        # refs: [x, skip_lvl1..lvl4, (U, up_w, up_b, c1_w, c1_b, c2_w, c2_b) x4,
        #        final_w, final_b, out]
        o_ref = refs[-1]
        x = refs[0][0]                                           # (C, Hin*Win)
        p = 1 + n_levels
        for l in range(n_levels):
            skip = refs[1 + l][0]                                # (Cskip, H*W)
            u, uw, ub, c1w, c1b, c2w, c2b = (refs[p + i][...] for i in range(7))
            p += 7
            h, w = level_hw[l]
            # nn.Upsample(scale=2, bilinear, align_corners=True) as one matmul
            x = jnp.dot(x, u, preferred_element_type=jnp.float32)
            # UpConv: conv3x3 + folded BN + ReLU
            x = _conv3x3_chw(x, uw, ub, h, w, relu=True)
            # torch.cat((x, skip), dim=1)
            x = jnp.concatenate([x, skip], axis=0)
            # DoubleConv: (conv3x3 + BN + ReLU) x 2
            x = _conv3x3_chw(x, c1w, c1b, h, w, relu=True)
            x = _conv3x3_chw(x, c2w, c2b, h, w, relu=True)
        fw = refs[p][...]                                        # (Cout, Cin)
        fb = refs[p + 1][...]                                    # (Cout, 1)
        out = jnp.dot(fw, x, preferred_element_type=jnp.float32) + fb
        o_ref[0] = out.astype(o_ref.dtype)                       # lane-dense store

    return kernel


# ---------------------------------------------------------------------------
# Fused decoder forward (NCHW in / NCHW out, like the PyTorch module)
# ---------------------------------------------------------------------------
def decoder_forward(packed, x_nchw, skips_nchw):
    assert len(skips_nchw) == _N_LEVELS
    n, _, h_in, w_in = x_nchw.shape

    def flat(a):                                   # NCHW -> (N, C, H*W), free reshape
        return a.reshape(a.shape[0], a.shape[1], a.shape[2] * a.shape[3])

    x_flat = flat(x_nchw)
    skips_flat = [flat(skips_nchw[_N_LEVELS - 1 - l]) for l in range(_N_LEVELS)]
    level_hw = [(h_in * 2 ** (l + 1), w_in * 2 ** (l + 1)) for l in range(_N_LEVELS)]

    def batch_spec(a):
        zeros = (0,) * (a.ndim - 1)
        return pl.BlockSpec((1,) + a.shape[1:], lambda b, _z=zeros: (b,) + _z)

    def const_spec(a):
        zeros = (0,) * a.ndim
        return pl.BlockSpec(a.shape, lambda b, _z=zeros: _z)

    inputs, specs = [], []
    for a in [x_flat] + skips_flat:
        inputs.append(a)
        specs.append(batch_spec(a))
    for l in range(_N_LEVELS):
        lv = packed['levels'][l]
        for name in ('U', 'up_w', 'up_b', 'c1_w', 'c1_b', 'c2_w', 'c2_b'):
            inputs.append(lv[name])
            specs.append(const_spec(lv[name]))
    for a in (packed['final_w'], packed['final_b']):
        inputs.append(a)
        specs.append(const_spec(a))

    c_out = packed['final_w'].shape[0]
    h_out, w_out = level_hw[-1]
    hw_out = h_out * w_out

    y = pl.pallas_call(
        _make_decoder_kernel(level_hw),
        out_shape=jax.ShapeDtypeStruct((n, c_out, hw_out), jnp.float32),
        grid=(n,),
        in_specs=specs,
        out_specs=pl.BlockSpec((1, c_out, hw_out), lambda b: (b, 0, 0)),
        compiler_params=pltpu.CompilerParams(
            dimension_semantics=("parallel",)),      # batch across TCs (v7x megacore)
    )(*inputs)
    return y.reshape(n, c_out, h_out, w_out)


# ---------------------------------------------------------------------------
# Parameters: PyTorch-style (OIHW) weights with BN folded in, plus a packed
# kernel-layout form (tap-major flat weights, column biases, upsample mats).
# ---------------------------------------------------------------------------
def init_params(key, features, out_channels, eps=1e-5):
    f0, f1, f2, f3, f4 = features
    keys = iter(jax.random.split(key, 128))

    def conv_w(cout, cin, k):
        fan_in = cin * k * k
        return jax.random.normal(next(keys), (cout, cin, k, k),
                                 jnp.float32) / np.sqrt(float(fan_in))

    def fold(w, conv_b, cout):
        gamma = 1.0 + 0.1 * jax.random.normal(next(keys), (cout,), jnp.float32)
        beta = 0.1 * jax.random.normal(next(keys), (cout,), jnp.float32)
        mean = 0.1 * jax.random.normal(next(keys), (cout,), jnp.float32)
        var = 1.0 + 0.1 * jax.random.uniform(next(keys), (cout,), jnp.float32)
        s = gamma / jnp.sqrt(var + eps)
        return w * s[:, None, None, None], s * (conv_b - mean) + beta

    def upconv(cin, cout):                     # conv(bias=True) + BN folded
        w = conv_w(cout, cin, 3)
        b = 0.01 * jax.random.normal(next(keys), (cout,), jnp.float32)
        w, b = fold(w, b, cout)
        return {'w': w, 'b': b}

    def doubleconv(cin, cout):                 # conv(bias=False) + BN folded, x2
        w1, b1 = fold(conv_w(cout, cin, 3), jnp.zeros((cout,), jnp.float32), cout)
        w2, b2 = fold(conv_w(cout, cout, 3), jnp.zeros((cout,), jnp.float32), cout)
        return {'w1': w1, 'b1': b1, 'w2': w2, 'b2': b2}

    return {
        'up': [upconv(f4, f3), upconv(f3, f2), upconv(f2, f1), upconv(f1, f0)],
        'conv': [doubleconv(f4, f3), doubleconv(f3, f2),
                 doubleconv(f2, f1), doubleconv(f1, f0)],
        'final': {'w': conv_w(out_channels, f0, 1),
                  'b': 0.01 * jax.random.normal(next(keys), (out_channels,),
                                                jnp.float32)},
    }


def pack_params(params, input_hw):
    def flat3x3(w):                            # OIHW -> (Cout, 9*Cin), tap-major
        cout, cin = w.shape[0], w.shape[1]
        return jnp.transpose(w, (0, 2, 3, 1)).reshape(cout, 9 * cin)

    def col(b):
        return b.reshape(-1, 1)

    h_in, w_in = input_hw
    levels = []
    for l in range(_N_LEVELS):
        up, dc = params['up'][l], params['conv'][l]
        levels.append({
            'U': jnp.asarray(_upsample_matrix_np(h_in * 2 ** l, w_in * 2 ** l)),
            'up_w': flat3x3(up['w']), 'up_b': col(up['b']),
            'c1_w': flat3x3(dc['w1']), 'c1_b': col(dc['b1']),
            'c2_w': flat3x3(dc['w2']), 'c2_b': col(dc['b2']),
        })
    fin = params['final']
    return {'levels': levels,
            'final_w': fin['w'].reshape(fin['w'].shape[0], fin['w'].shape[1]),
            'final_b': col(fin['b'])}


# ---------------------------------------------------------------------------
# Pure-JAX/XLA reference (NCHW) used as a numerical cross-check
# ---------------------------------------------------------------------------
def reference_forward(params, x, skips):
    def conv(x, w, b, relu, pad):
        y = lax.conv_general_dilated(
            x, w, window_strides=(1, 1), padding=((pad, pad), (pad, pad)),
            dimension_numbers=('NCHW', 'OIHW', 'NCHW'))
        y = y + b[None, :, None, None]
        return jnp.maximum(y, 0.0) if relu else y

    def upsample(x):
        _, _, h, w = x.shape
        ah = jnp.asarray(_interp_matrix_np(h, 2 * h))
        aw = jnp.asarray(_interp_matrix_np(w, 2 * w))
        y = jnp.einsum('oh,nchw->ncow', ah, x)
        return jnp.einsum('pw,ncow->ncop', aw, y)

    for l in range(_N_LEVELS):
        up, dc = params['up'][l], params['conv'][l]
        x = conv(upsample(x), up['w'], up['b'], True, 1)
        x = jnp.concatenate([x, skips[_N_LEVELS - 1 - l]], axis=1)
        x = conv(x, dc['w1'], dc['b1'], True, 1)
        x = conv(x, dc['w2'], dc['b2'], True, 1)
    fin = params['final']
    return conv(x, fin['w'], fin['b'], False, 0)


# ---------------------------------------------------------------------------
if __name__ == "__main__":
    features = [4, 8, 16, 32, 64]
    out_channels = 3
    N = 2

    key = jax.random.PRNGKey(0)
    kp, kx, k0, k1, k2, k3 = jax.random.split(key, 6)
    params = init_params(kp, features, out_channels)

    # Bottleneck input and skips (NCHW, matching PyTorch axis convention).
    x = jax.random.normal(kx, (N, features[4], 2, 2), jnp.float32)
    skips = [
        jax.random.normal(k0, (N, features[1] - features[0], 32, 32), jnp.float32),
        jax.random.normal(k1, (N, features[2] - features[1], 16, 16), jnp.float32),
        jax.random.normal(k2, (N, features[3] - features[2], 8, 8), jnp.float32),
        jax.random.normal(k3, (N, features[4] - features[3], 4, 4), jnp.float32),
    ]

    packed = pack_params(params, (x.shape[2], x.shape[3]))

    fwd = jax.jit(decoder_forward)
    out = jax.block_until_ready(fwd(packed, x, skips))

    assert out.shape == (N, out_channels, 32, 32), out.shape
    assert bool(jnp.all(jnp.isfinite(out)))

    # Numerical cross-check against a plain-XLA reference of the same module.
    ref = jax.block_until_ready(jax.jit(reference_forward)(params, x, skips))
    rel_err = float(jnp.max(jnp.abs(out - ref)) / (jnp.max(jnp.abs(ref)) + 1e-6))
    assert rel_err < 5e-2, f"kernel/reference mismatch: rel_err={rel_err}"

    print("KERNEL_OK")
</pallas_src>

<mosaic_0001>
module attributes {stable_mosaic.version = 11 : i64} {
  func.func @kernel(%arg0: i32, %arg1: memref<1x64x4xf32, #tpu.memory_space<vmem>>, %arg2: memref<1x32x16xf32, #tpu.memory_space<vmem>>, %arg3: memref<1x16x64xf32, #tpu.memory_space<vmem>>, %arg4: memref<1x8x256xf32, #tpu.memory_space<vmem>>, %arg5: memref<1x4x1024xf32, #tpu.memory_space<vmem>>, %arg6: memref<4x16xf32, #tpu.memory_space<vmem>>, %arg7: memref<32x576xf32, #tpu.memory_space<vmem>>, %arg8: memref<32x1xf32, #tpu.memory_space<vmem>>, %arg9: memref<32x576xf32, #tpu.memory_space<vmem>>, %arg10: memref<32x1xf32, #tpu.memory_space<vmem>>, %arg11: memref<32x288xf32, #tpu.memory_space<vmem>>, %arg12: memref<32x1xf32, #tpu.memory_space<vmem>>, %arg13: memref<16x64xf32, #tpu.memory_space<vmem>>, %arg14: memref<16x288xf32, #tpu.memory_space<vmem>>, %arg15: memref<16x1xf32, #tpu.memory_space<vmem>>, %arg16: memref<16x288xf32, #tpu.memory_space<vmem>>, %arg17: memref<16x1xf32, #tpu.memory_space<vmem>>, %arg18: memref<16x144xf32, #tpu.memory_space<vmem>>, %arg19: memref<16x1xf32, #tpu.memory_space<vmem>>, %arg20: memref<64x256xf32, #tpu.memory_space<vmem>>, %arg21: memref<8x144xf32, #tpu.memory_space<vmem>>, %arg22: memref<8x1xf32, #tpu.memory_space<vmem>>, %arg23: memref<8x144xf32, #tpu.memory_space<vmem>>, %arg24: memref<8x1xf32, #tpu.memory_space<vmem>>, %arg25: memref<8x72xf32, #tpu.memory_space<vmem>>, %arg26: memref<8x1xf32, #tpu.memory_space<vmem>>, %arg27: memref<256x1024xf32, #tpu.memory_space<vmem>>, %arg28: memref<4x72xf32, #tpu.memory_space<vmem>>, %arg29: memref<4x1xf32, #tpu.memory_space<vmem>>, %arg30: memref<4x72xf32, #tpu.memory_space<vmem>>, %arg31: memref<4x1xf32, #tpu.memory_space<vmem>>, %arg32: memref<4x36xf32, #tpu.memory_space<vmem>>, %arg33: memref<4x1xf32, #tpu.memory_space<vmem>>, %arg34: memref<3x4xf32, #tpu.memory_space<vmem>>, %arg35: memref<3x1xf32, #tpu.memory_space<vmem>>, %arg36: memref<1x3x1024xf32, #tpu.memory_space<vmem>>) attributes {dimension_semantics = [#tpu.dimension_semantics<parallel>], iteration_bounds = array<i64: 2>, scalar_prefetch = 0 : i64, scratch_operands = 0 : i64, tpu.core_type = #tpu.core_type<tc>, window_params = [{transform_indices = @transform_0, window_bounds = array<i64: 1, 64, 4>}, {transform_indices = @transform_1, window_bounds = array<i64: 1, 32, 16>}, {transform_indices = @transform_2, window_bounds = array<i64: 1, 16, 64>}, {transform_indices = @transform_3, window_bounds = array<i64: 1, 8, 256>}, {transform_indices = @transform_4, window_bounds = array<i64: 1, 4, 1024>}, {pipeline_mode = #tpu.pipeline_mode<synchronous>, transform_indices = @transform_5, window_bounds = array<i64: 4, 16>}, {pipeline_mode = #tpu.pipeline_mode<synchronous>, transform_indices = @transform_6, window_bounds = array<i64: 32, 576>}, {pipeline_mode = #tpu.pipeline_mode<synchronous>, transform_indices = @transform_7, window_bounds = array<i64: 32, 1>}, {pipeline_mode = #tpu.pipeline_mode<synchronous>, transform_indices = @transform_8, window_bounds = array<i64: 32, 576>}, {pipeline_mode = #tpu.pipeline_mode<synchronous>, transform_indices = @transform_9, window_bounds = array<i64: 32, 1>}, {pipeline_mode = #tpu.pipeline_mode<synchronous>, transform_indices = @transform_10, window_bounds = array<i64: 32, 288>}, {pipeline_mode = #tpu.pipeline_mode<synchronous>, transform_indices = @transform_11, window_bounds = array<i64: 32, 1>}, {pipeline_mode = #tpu.pipeline_mode<synchronous>, transform_indices = @transform_12, window_bounds = array<i64: 16, 64>}, {pipeline_mode = #tpu.pipeline_mode<synchronous>, transform_indices = @transform_13, window_bounds = array<i64: 16, 288>}, {pipeline_mode = #tpu.pipeline_mode<synchronous>, transform_indices = @transform_14, window_bounds = array<i64: 16, 1>}, {pipeline_mode = #tpu.pipeline_mode<synchronous>, transform_indices = @transform_15, window_bounds = array<i64: 16, 288>}, {pipeline_mode = #tpu.pipeline_mode<synchronous>, transform_indices = @transform_16, window_bounds = array<i64: 16, 1>}, {pipeline_mode = #tpu.pipeline_mode<synchronous>, transform_indices = @transform_17, window_bounds = array<i64: 16, 144>}, {pipeline_mode = #tpu.pipeline_mode<synchronous>, transform_indices = @transform_18, window_bounds = array<i64: 16, 1>}, {pipeline_mode = #tpu.pipeline_mode<synchronous>, transform_indices = @transform_19, window_bounds = array<i64: 64, 256>}, {pipeline_mode = #tpu.pipeline_mode<synchronous>, transform_indices = @transform_20, window_bounds = array<i64: 8, 144>}, {pipeline_mode = #tpu.pipeline_mode<synchronous>, transform_indices = @transform_21, window_bounds = array<i64: 8, 1>}, {pipeline_mode = #tpu.pipeline_mode<synchronous>, transform_indices = @transform_22, window_bounds = array<i64: 8, 144>}, {pipeline_mode = #tpu.pipeline_mode<synchronous>, transform_indices = @transform_23, window_bounds = array<i64: 8, 1>}, {pipeline_mode = #tpu.pipeline_mode<synchronous>, transform_indices = @transform_24, window_bounds = array<i64: 8, 72>}, {pipeline_mode = #tpu.pipeline_mode<synchronous>, transform_indices = @transform_25, window_bounds = array<i64: 8, 1>}, {pipeline_mode = #tpu.pipeline_mode<synchronous>, transform_indices = @transform_26, window_bounds = array<i64: 256, 1024>}, {pipeline_mode = #tpu.pipeline_mode<synchronous>, transform_indices = @transform_27, window_bounds = array<i64: 4, 72>}, {pipeline_mode = #tpu.pipeline_mode<synchronous>, transform_indices = @transform_28, window_bounds = array<i64: 4, 1>}, {pipeline_mode = #tpu.pipeline_mode<synchronous>, transform_indices = @transform_29, window_bounds = array<i64: 4, 72>}, {pipeline_mode = #tpu.pipeline_mode<synchronous>, transform_indices = @transform_30, window_bounds = array<i64: 4, 1>}, {pipeline_mode = #tpu.pipeline_mode<synchronous>, transform_indices = @transform_31, window_bounds = array<i64: 4, 36>}, {pipeline_mode = #tpu.pipeline_mode<synchronous>, transform_indices = @transform_32, window_bounds = array<i64: 4, 1>}, {pipeline_mode = #tpu.pipeline_mode<synchronous>, transform_indices = @transform_33, window_bounds = array<i64: 3, 4>}, {pipeline_mode = #tpu.pipeline_mode<synchronous>, transform_indices = @transform_34, window_bounds = array<i64: 3, 1>}, {transform_indices = @transform_35, window_bounds = array<i64: 1, 3, 1024>}]} {
    %c0 = arith.constant 0 : index
    %c0_0 = arith.constant 0 : index
    %c0_1 = arith.constant 0 : index
    %0 = vector.load %arg1[%c0, %c0_0, %c0_1] : memref<1x64x4xf32, #tpu.memory_space<vmem>>, vector<1x64x4xf32>
    %1 = vector.shape_cast %0 : vector<1x64x4xf32> to vector<64x4xf32>
    %c0_2 = arith.constant 0 : index
    %c0_3 = arith.constant 0 : index
    %c0_4 = arith.constant 0 : index
    %2 = vector.load %arg2[%c0_2, %c0_3, %c0_4] : memref<1x32x16xf32, #tpu.memory_space<vmem>>, vector<1x32x16xf32>
    %3 = vector.shape_cast %2 : vector<1x32x16xf32> to vector<32x16xf32>
    %c0_5 = arith.constant 0 : index
    %c0_6 = arith.constant 0 : index
    %4 = vector.load %arg6[%c0_5, %c0_6] : memref<4x16xf32, #tpu.memory_space<vmem>>, vector<4x16xf32>
    %c0_7 = arith.constant 0 : index
    %c0_8 = arith.constant 0 : index
    %5 = vector.load %arg7[%c0_7, %c0_8] : memref<32x576xf32, #tpu.memory_space<vmem>>, vector<32x576xf32>
    %c0_9 = arith.constant 0 : index
    %c0_10 = arith.constant 0 : index
    %6 = vector.load %arg8[%c0_9, %c0_10] : memref<32x1xf32, #tpu.memory_space<vmem>>, vector<32x1xf32>
    %c0_11 = arith.constant 0 : index
    %c0_12 = arith.constant 0 : index
    %7 = vector.load %arg9[%c0_11, %c0_12] : memref<32x576xf32, #tpu.memory_space<vmem>>, vector<32x576xf32>
    %c0_13 = arith.constant 0 : index
    %c0_14 = arith.constant 0 : index
    %8 = vector.load %arg10[%c0_13, %c0_14] : memref<32x1xf32, #tpu.memory_space<vmem>>, vector<32x1xf32>
    %c0_15 = arith.constant 0 : index
    %c0_16 = arith.constant 0 : index
    %9 = vector.load %arg11[%c0_15, %c0_16] : memref<32x288xf32, #tpu.memory_space<vmem>>, vector<32x288xf32>
    %c0_17 = arith.constant 0 : index
    %c0_18 = arith.constant 0 : index
    %10 = vector.load %arg12[%c0_17, %c0_18] : memref<32x1xf32, #tpu.memory_space<vmem>>, vector<32x1xf32>
    %cst = arith.constant dense<0.000000e+00> : vector<64x16xf32>
    %11 = tpu.matmul %1, %4, %cst {dimension_numbers = #tpu.dot_dimension_numbers<[1], [0], [0], [1], [0, 0, 1, 1], [], []>} : vector<64x4xf32>, vector<4x16xf32>, vector<64x16xf32> -> vector<64x16xf32>
    %12 = tpu.iota {dimensions = array<i32: 1>} : vector<1x16xi32>
    %c3_i32 = arith.constant 3 : i32
    %13 = vector.broadcast %c3_i32 : i32 to vector<1x16xi32>
    %14 = arith.andi %12, %13 : vector<1x16xi32>
    %cst_19 = arith.constant 0.000000e+00 : f32
    %15 = vector.broadcast %cst_19 : f32 to vector<64x5xf32>
    %16 = vector.extract_strided_slice %11 {offsets = [0, 0], sizes = [64, 11], strides = [1, 1]} : vector<64x16xf32> to vector<64x11xf32>
    %17 = tpu.concatenate %15, %16 in 1 : vector<64x5xf32>, vector<64x11xf32> -> vector<64x16xf32>
    %c-1_i32 = arith.constant -1 : i32
    %18 = vector.broadcast %c-1_i32 : i32 to vector<1x16xi32>
    %19 = arith.addi %14, %18 : vector<1x16xi32>
    %c0_i32 = arith.constant 0 : i32
    %20 = vector.broadcast %c0_i32 : i32 to vector<1x16xi32>
    %21 = arith.cmpi sge, %19, %20 : vector<1x16xi32>
    %c-1_i32_20 = arith.constant -1 : i32
    %22 = vector.broadcast %c-1_i32_20 : i32 to vector<1x16xi32>
    %23 = arith.addi %14, %22 : vector<1x16xi32>
    %c4_i32 = arith.constant 4 : i32
    %24 = vector.broadcast %c4_i32 : i32 to vector<1x16xi32>
    %25 = arith.cmpi slt, %23, %24 : vector<1x16xi32>
    %26 = arith.andi %21, %25 : vector<1x16xi1>
    %cst_21 = arith.constant 0.000000e+00 : f32
    %27 = vector.broadcast %cst_21 : f32 to vector<64x16xf32>
    %28 = vector.shape_cast %26 : vector<1x16xi1> to vector<1x16xi1>
    %29 = vector.broadcast %28 : vector<1x16xi1> to vector<64x16xi1>
    %30 = arith.select %29, %17, %27 : vector<64x16xi1>, vector<64x16xf32>
    %cst_22 = arith.constant 0.000000e+00 : f32
    %31 = vector.broadcast %cst_22 : f32 to vector<64x4xf32>
    %32 = vector.extract_strided_slice %11 {offsets = [0, 0], sizes = [64, 12], strides = [1, 1]} : vector<64x16xf32> to vector<64x12xf32>
    %33 = tpu.concatenate %31, %32 in 1 : vector<64x4xf32>, vector<64x12xf32> -> vector<64x16xf32>
    %cst_23 = arith.constant 0.000000e+00 : f32
    %34 = vector.broadcast %cst_23 : f32 to vector<64x3xf32>
    %35 = vector.extract_strided_slice %11 {offsets = [0, 0], sizes = [64, 13], strides = [1, 1]} : vector<64x16xf32> to vector<64x13xf32>
    %36 = tpu.concatenate %34, %35 in 1 : vector<64x3xf32>, vector<64x13xf32> -> vector<64x16xf32>
    %c1_i32 = arith.constant 1 : i32
    %37 = vector.broadcast %c1_i32 : i32 to vector<1x16xi32>
    %38 = arith.addi %14, %37 : vector<1x16xi32>
    %c0_i32_24 = arith.constant 0 : i32
    %39 = vector.broadcast %c0_i32_24 : i32 to vector<1x16xi32>
    %40 = arith.cmpi sge, %38, %39 : vector<1x16xi32>
    %c1_i32_25 = arith.constant 1 : i32
    %41 = vector.broadcast %c1_i32_25 : i32 to vector<1x16xi32>
    %42 = arith.addi %14, %41 : vector<1x16xi32>
    %c4_i32_26 = arith.constant 4 : i32
    %43 = vector.broadcast %c4_i32_26 : i32 to vector<1x16xi32>
    %44 = arith.cmpi slt, %42, %43 : vector<1x16xi32>
    %45 = arith.andi %40, %44 : vector<1x16xi1>
    %cst_27 = arith.constant 0.000000e+00 : f32
    %46 = vector.broadcast %cst_27 : f32 to vector<64x16xf32>
    %47 = vector.shape_cast %45 : vector<1x16xi1> to vector<1x16xi1>
    %48 = vector.broadcast %47 : vector<1x16xi1> to vector<64x16xi1>
    %49 = arith.select %48, %36, %46 : vector<64x16xi1>, vector<64x16xf32>
    %cst_28 = arith.constant 0.000000e+00 : f32
    %50 = vector.broadcast %cst_28 : f32 to vector<64x1xf32>
    %51 = vector.extract_strided_slice %11 {offsets = [0, 0], sizes = [64, 15], strides = [1, 1]} : vector<64x16xf32> to vector<64x15xf32>
    %52 = tpu.concatenate %50, %51 in 1 : vector<64x1xf32>, vector<64x15xf32> -> vector<64x16xf32>
    %c-1_i32_29 = arith.constant -1 : i32
    %53 = vector.broadcast %c-1_i32_29 : i32 to vector<1x16xi32>
    %54 = arith.addi %14, %53 : vector<1x16xi32>
    %c0_i32_30 = arith.constant 0 : i32
    %55 = vector.broadcast %c0_i32_30 : i32 to vector<1x16xi32>
    %56 = arith.cmpi sge, %54, %55 : vector<1x16xi32>
    %c-1_i32_31 = arith.constant -1 : i32
    %57 = vector.broadcast %c-1_i32_31 : i32 to vector<1x16xi32>
    %58 = arith.addi %14, %57 : vector<1x16xi32>
    %c4_i32_32 = arith.constant 4 : i32
    %59 = vector.broadcast %c4_i32_32 : i32 to vector<1x16xi32>
    %60 = arith.cmpi slt, %58, %59 : vector<1x16xi32>
    %61 = arith.andi %56, %60 : vector<1x16xi1>
    %cst_33 = arith.constant 0.000000e+00 : f32
    %62 = vector.broadcast %cst_33 : f32 to vector<64x16xf32>
    %63 = vector.shape_cast %61 : vector<1x16xi1> to vector<1x16xi1>
    %64 = vector.broadcast %63 : vector<1x16xi1> to vector<64x16xi1>
    %65 = arith.select %64, %52, %62 : vector<64x16xi1>, vector<64x16xf32>
    %cst_34 = arith.constant 0.000000e+00 : f32
    %66 = vector.broadcast %cst_34 : f32 to vector<64x1xf32>
    %67 = vector.extract_strided_slice %11 {offsets = [0, 1], sizes = [64, 15], strides = [1, 1]} : vector<64x16xf32> to vector<64x15xf32>
    %68 = tpu.concatenate %67, %66 in 1 : vector<64x15xf32>, vector<64x1xf32> -> vector<64x16xf32>
    %c1_i32_35 = arith.constant 1 : i32
    %69 = vector.broadcast %c1_i32_35 : i32 to vector<1x16xi32>
    %70 = arith.addi %14, %69 : vector<1x16xi32>
    %c0_i32_36 = arith.constant 0 : i32
    %71 = vector.broadcast %c0_i32_36 : i32 to vector<1x16xi32>
    %72 = arith.cmpi sge, %70, %71 : vector<1x16xi32>
    %c1_i32_37 = arith.constant 1 : i32
    %73 = vector.broadcast %c1_i32_37 : i32 to vector<1x16xi32>
    %74 = arith.addi %14, %73 : vector<1x16xi32>
    %c4_i32_38 = arith.constant 4 : i32
    %75 = vector.broadcast %c4_i32_38 : i32 to vector<1x16xi32>
    %76 = arith.cmpi slt, %74, %75 : vector<1x16xi32>
    %77 = arith.andi %72, %76 : vector<1x16xi1>
    %cst_39 = arith.constant 0.000000e+00 : f32
    %78 = vector.broadcast %cst_39 : f32 to vector<64x16xf32>
    %79 = vector.shape_cast %77 : vector<1x16xi1> to vector<1x16xi1>
    %80 = vector.broadcast %79 : vector<1x16xi1> to vector<64x16xi1>
    %81 = arith.select %80, %68, %78 : vector<64x16xi1>, vector<64x16xf32>
    %cst_40 = arith.constant 0.000000e+00 : f32
    %82 = vector.broadcast %cst_40 : f32 to vector<64x3xf32>
    %83 = vector.extract_strided_slice %11 {offsets = [0, 3], sizes = [64, 13], strides = [1, 1]} : vector<64x16xf32> to vector<64x13xf32>
    %84 = tpu.concatenate %83, %82 in 1 : vector<64x13xf32>, vector<64x3xf32> -> vector<64x16xf32>
    %c-1_i32_41 = arith.constant -1 : i32
    %85 = vector.broadcast %c-1_i32_41 : i32 to vector<1x16xi32>
    %86 = arith.addi %14, %85 : vector<1x16xi32>
    %c0_i32_42 = arith.constant 0 : i32
    %87 = vector.broadcast %c0_i32_42 : i32 to vector<1x16xi32>
    %88 = arith.cmpi sge, %86, %87 : vector<1x16xi32>
    %c-1_i32_43 = arith.constant -1 : i32
    %89 = vector.broadcast %c-1_i32_43 : i32 to vector<1x16xi32>
    %90 = arith.addi %14, %89 : vector<1x16xi32>
    %c4_i32_44 = arith.constant 4 : i32
    %91 = vector.broadcast %c4_i32_44 : i32 to vector<1x16xi32>
    %92 = arith.cmpi slt, %90, %91 : vector<1x16xi32>
    %93 = arith.andi %88, %92 : vector<1x16xi1>
    %cst_45 = arith.constant 0.000000e+00 : f32
    %94 = vector.broadcast %cst_45 : f32 to vector<64x16xf32>
    %95 = vector.shape_cast %93 : vector<1x16xi1> to vector<1x16xi1>
    %96 = vector.broadcast %95 : vector<1x16xi1> to vector<64x16xi1>
    %97 = arith.select %96, %84, %94 : vector<64x16xi1>, vector<64x16xf32>
    %cst_46 = arith.constant 0.000000e+00 : f32
    %98 = vector.broadcast %cst_46 : f32 to vector<64x4xf32>
    %99 = vector.extract_strided_slice %11 {offsets = [0, 4], sizes = [64, 12], strides = [1, 1]} : vector<64x16xf32> to vector<64x12xf32>
    %100 = tpu.concatenate %99, %98 in 1 : vector<64x12xf32>, vector<64x4xf32> -> vector<64x16xf32>
    %cst_47 = arith.constant 0.000000e+00 : f32
    %101 = vector.broadcast %cst_47 : f32 to vector<64x5xf32>
    %102 = vector.extract_strided_slice %11 {offsets = [0, 5], sizes = [64, 11], strides = [1, 1]} : vector<64x16xf32> to vector<64x11xf32>
    %103 = tpu.concatenate %102, %101 in 1 : vector<64x11xf32>, vector<64x5xf32> -> vector<64x16xf32>
    %c1_i32_48 = arith.constant 1 : i32
    %104 = vector.broadcast %c1_i32_48 : i32 to vector<1x16xi32>
    %105 = arith.addi %14, %104 : vector<1x16xi32>
    %c0_i32_49 = arith.constant 0 : i32
    %106 = vector.broadcast %c0_i32_49 : i32 to vector<1x16xi32>
    %107 = arith.cmpi sge, %105, %106 : vector<1x16xi32>
    %c1_i32_50 = arith.constant 1 : i32
    %108 = vector.broadcast %c1_i32_50 : i32 to vector<1x16xi32>
    %109 = arith.addi %14, %108 : vector<1x16xi32>
    %c4_i32_51 = arith.constant 4 : i32
    %110 = vector.broadcast %c4_i32_51 : i32 to vector<1x16xi32>
    %111 = arith.cmpi slt, %109, %110 : vector<1x16xi32>
    %112 = arith.andi %107, %111 : vector<1x16xi1>
    %cst_52 = arith.constant 0.000000e+00 : f32
    %113 = vector.broadcast %cst_52 : f32 to vector<64x16xf32>
    %114 = vector.shape_cast %112 : vector<1x16xi1> to vector<1x16xi1>
    %115 = vector.broadcast %114 : vector<1x16xi1> to vector<64x16xi1>
    %116 = arith.select %115, %103, %113 : vector<64x16xi1>, vector<64x16xf32>
    %117 = tpu.concatenate %30, %33, %49, %65, %11, %81, %97, %100, %116 in 0 : vector<64x16xf32>, vector<64x16xf32>, vector<64x16xf32>, vector<64x16xf32>, vector<64x16xf32>, vector<64x16xf32>, vector<64x16xf32>, vector<64x16xf32>, vector<64x16xf32> -> vector<576x16xf32>
    %cst_53 = arith.constant dense<0.000000e+00> : vector<32x16xf32>
    %118 = tpu.matmul %5, %117, %cst_53 {dimension_numbers = #tpu.dot_dimension_numbers<[1], [0], [0], [1], [0, 0, 1, 1], [], []>} : vector<32x576xf32>, vector<576x16xf32>, vector<32x16xf32> -> vector<32x16xf32>
    %119 = vector.broadcast %6 : vector<32x1xf32> to vector<32x16xf32>
    %120 = arith.addf %118, %119 : vector<32x16xf32>
    %cst_54 = arith.constant 0.000000e+00 : f32
    %121 = vector.broadcast %cst_54 : f32 to vector<32x16xf32>
    %122 = arith.maximumf %120, %121 : vector<32x16xf32>
    %123 = tpu.concatenate %122, %3 in 0 : vector<32x16xf32>, vector<32x16xf32> -> vector<64x16xf32>
    %124 = tpu.iota {dimensions = array<i32: 1>} : vector<1x16xi32>
    %c3_i32_55 = arith.constant 3 : i32
    %125 = vector.broadcast %c3_i32_55 : i32 to vector<1x16xi32>
    %126 = arith.andi %124, %125 : vector<1x16xi32>
    %cst_56 = arith.constant 0.000000e+00 : f32
    %127 = vector.broadcast %cst_56 : f32 to vector<64x5xf32>
    %128 = vector.extract_strided_slice %123 {offsets = [0, 0], sizes = [64, 11], strides = [1, 1]} : vector<64x16xf32> to vector<64x11xf32>
    %129 = tpu.concatenate %127, %128 in 1 : vector<64x5xf32>, vector<64x11xf32> -> vector<64x16xf32>
    %c-1_i32_57 = arith.constant -1 : i32
    %130 = vector.broadcast %c-1_i32_57 : i32 to vector<1x16xi32>
    %131 = arith.addi %126, %130 : vector<1x16xi32>
    %c0_i32_58 = arith.constant 0 : i32
    %132 = vector.broadcast %c0_i32_58 : i32 to vector<1x16xi32>
    %133 = arith.cmpi sge, %131, %132 : vector<1x16xi32>
    %c-1_i32_59 = arith.constant -1 : i32
    %134 = vector.broadcast %c-1_i32_59 : i32 to vector<1x16xi32>
    %135 = arith.addi %126, %134 : vector<1x16xi32>
    %c4_i32_60 = arith.constant 4 : i32
    %136 = vector.broadcast %c4_i32_60 : i32 to vector<1x16xi32>
    %137 = arith.cmpi slt, %135, %136 : vector<1x16xi32>
    %138 = arith.andi %133, %137 : vector<1x16xi1>
    %cst_61 = arith.constant 0.000000e+00 : f32
    %139 = vector.broadcast %cst_61 : f32 to vector<64x16xf32>
    %140 = vector.shape_cast %138 : vector<1x16xi1> to vector<1x16xi1>
    %141 = vector.broadcast %140 : vector<1x16xi1> to vector<64x16xi1>
    %142 = arith.select %141, %129, %139 : vector<64x16xi1>, vector<64x16xf32>
    %cst_62 = arith.constant 0.000000e+00 : f32
    %143 = vector.broadcast %cst_62 : f32 to vector<64x4xf32>
    %144 = vector.extract_strided_slice %123 {offsets = [0, 0], sizes = [64, 12], strides = [1, 1]} : vector<64x16xf32> to vector<64x12xf32>
    %145 = tpu.concatenate %143, %144 in 1 : vector<64x4xf32>, vector<64x12xf32> -> vector<64x16xf32>
    %cst_63 = arith.constant 0.000000e+00 : f32
    %146 = vector.broadcast %cst_63 : f32 to vector<64x3xf32>
    %147 = vector.extract_strided_slice %123 {offsets = [0, 0], sizes = [64, 13], strides = [1, 1]} : vector<64x16xf32> to vector<64x13xf32>
    %148 = tpu.concatenate %146, %147 in 1 : vector<64x3xf32>, vector<64x13xf32> -> vector<64x16xf32>
    %c1_i32_64 = arith.constant 1 : i32
    %149 = vector.broadcast %c1_i32_64 : i32 to vector<1x16xi32>
    %150 = arith.addi %126, %149 : vector<1x16xi32>
    %c0_i32_65 = arith.constant 0 : i32
    %151 = vector.broadcast %c0_i32_65 : i32 to vector<1x16xi32>
    %152 = arith.cmpi sge, %150, %151 : vector<1x16xi32>
    %c1_i32_66 = arith.constant 1 : i32
    %153 = vector.broadcast %c1_i32_66 : i32 to vector<1x16xi32>
    %154 = arith.addi %126, %153 : vector<1x16xi32>
    %c4_i32_67 = arith.constant 4 : i32
    %155 = vector.broadcast %c4_i32_67 : i32 to vector<1x16xi32>
    %156 = arith.cmpi slt, %154, %155 : vector<1x16xi32>
    %157 = arith.andi %152, %156 : vector<1x16xi1>
    %cst_68 = arith.constant 0.000000e+00 : f32
    %158 = vector.broadcast %cst_68 : f32 to vector<64x16xf32>
    %159 = vector.shape_cast %157 : vector<1x16xi1> to vector<1x16xi1>
    %160 = vector.broadcast %159 : vector<1x16xi1> to vector<64x16xi1>
    %161 = arith.select %160, %148, %158 : vector<64x16xi1>, vector<64x16xf32>
    %cst_69 = arith.constant 0.000000e+00 : f32
    %162 = vector.broadcast %cst_69 : f32 to vector<64x1xf32>
    %163 = vector.extract_strided_slice %123 {offsets = [0, 0], sizes = [64, 15], strides = [1, 1]} : vector<64x16xf32> to vector<64x15xf32>
    %164 = tpu.concatenate %162, %163 in 1 : vector<64x1xf32>, vector<64x15xf32> -> vector<64x16xf32>
    %c-1_i32_70 = arith.constant -1 : i32
    %165 = vector.broadcast %c-1_i32_70 : i32 to vector<1x16xi32>
    %166 = arith.addi %126, %165 : vector<1x16xi32>
    %c0_i32_71 = arith.constant 0 : i32
    %167 = vector.broadcast %c0_i32_71 : i32 to vector<1x16xi32>
    %168 = arith.cmpi sge, %166, %167 : vector<1x16xi32>
    %c-1_i32_72 = arith.constant -1 : i32
    %169 = vector.broadcast %c-1_i32_72 : i32 to vector<1x16xi32>
    %170 = arith.addi %126, %169 : vector<1x16xi32>
    %c4_i32_73 = arith.constant 4 : i32
    %171 = vector.broadcast %c4_i32_73 : i32 to vector<1x16xi32>
    %172 = arith.cmpi slt, %170, %171 : vector<1x16xi32>
    %173 = arith.andi %168, %172 : vector<1x16xi1>
    %cst_74 = arith.constant 0.000000e+00 : f32
    %174 = vector.broadcast %cst_74 : f32 to vector<64x16xf32>
    %175 = vector.shape_cast %173 : vector<1x16xi1> to vector<1x16xi1>
    %176 = vector.broadcast %175 : vector<1x16xi1> to vector<64x16xi1>
    %177 = arith.select %176, %164, %174 : vector<64x16xi1>, vector<64x16xf32>
    %cst_75 = arith.constant 0.000000e+00 : f32
    %178 = vector.broadcast %cst_75 : f32 to vector<64x1xf32>
    %179 = vector.extract_strided_slice %123 {offsets = [0, 1], sizes = [64, 15], strides = [1, 1]} : vector<64x16xf32> to vector<64x15xf32>
    %180 = tpu.concatenate %179, %178 in 1 : vector<64x15xf32>, vector<64x1xf32> -> vector<64x16xf32>
    %c1_i32_76 = arith.constant 1 : i32
    %181 = vector.broadcast %c1_i32_76 : i32 to vector<1x16xi32>
    %182 = arith.addi %126, %181 : vector<1x16xi32>
    %c0_i32_77 = arith.constant 0 : i32
    %183 = vector.broadcast %c0_i32_77 : i32 to vector<1x16xi32>
    %184 = arith.cmpi sge, %182, %183 : vector<1x16xi32>
    %c1_i32_78 = arith.constant 1 : i32
    %185 = vector.broadcast %c1_i32_78 : i32 to vector<1x16xi32>
    %186 = arith.addi %126, %185 : vector<1x16xi32>
    %c4_i32_79 = arith.constant 4 : i32
    %187 = vector.broadcast %c4_i32_79 : i32 to vector<1x16xi32>
    %188 = arith.cmpi slt, %186, %187 : vector<1x16xi32>
    %189 = arith.andi %184, %188 : vector<1x16xi1>
    %cst_80 = arith.constant 0.000000e+00 : f32
    %190 = vector.broadcast %cst_80 : f32 to vector<64x16xf32>
    %191 = vector.shape_cast %189 : vector<1x16xi1> to vector<1x16xi1>
    %192 = vector.broadcast %191 : vector<1x16xi1> to vector<64x16xi1>
    %193 = arith.select %192, %180, %190 : vector<64x16xi1>, vector<64x16xf32>
    %cst_81 = arith.constant 0.000000e+00 : f32
    %194 = vector.broadcast %cst_81 : f32 to vector<64x3xf32>
    %195 = vector.extract_strided_slice %123 {offsets = [0, 3], sizes = [64, 13], strides = [1, 1]} : vector<64x16xf32> to vector<64x13xf32>
    %196 = tpu.concatenate %195, %194 in 1 : vector<64x13xf32>, vector<64x3xf32> -> vector<64x16xf32>
    %c-1_i32_82 = arith.constant -1 : i32
    %197 = vector.broadcast %c-1_i32_82 : i32 to vector<1x16xi32>
    %198 = arith.addi %126, %197 : vector<1x16xi32>
    %c0_i32_83 = arith.constant 0 : i32
    %199 = vector.broadcast %c0_i32_83 : i32 to vector<1x16xi32>
    %200 = arith.cmpi sge, %198, %199 : vector<1x16xi32>
    %c-1_i32_84 = arith.constant -1 : i32
    %201 = vector.broadcast %c-1_i32_84 : i32 to vector<1x16xi32>
    %202 = arith.addi %126, %201 : vector<1x16xi32>
    %c4_i32_85 = arith.constant 4 : i32
    %203 = vector.broadcast %c4_i32_85 : i32 to vector<1x16xi32>
    %204 = arith.cmpi slt, %202, %203 : vector<1x16xi32>
    %205 = arith.andi %200, %204 : vector<1x16xi1>
    %cst_86 = arith.constant 0.000000e+00 : f32
    %206 = vector.broadcast %cst_86 : f32 to vector<64x16xf32>
    %207 = vector.shape_cast %205 : vector<1x16xi1> to vector<1x16xi1>
    %208 = vector.broadcast %207 : vector<1x16xi1> to vector<64x16xi1>
    %209 = arith.select %208, %196, %206 : vector<64x16xi1>, vector<64x16xf32>
    %cst_87 = arith.constant 0.000000e+00 : f32
    %210 = vector.broadcast %cst_87 : f32 to vector<64x4xf32>
    %211 = vector.extract_strided_slice %123 {offsets = [0, 4], sizes = [64, 12], strides = [1, 1]} : vector<64x16xf32> to vector<64x12xf32>
    %212 = tpu.concatenate %211, %210 in 1 : vector<64x12xf32>, vector<64x4xf32> -> vector<64x16xf32>
    %cst_88 = arith.constant 0.000000e+00 : f32
    %213 = vector.broadcast %cst_88 : f32 to vector<64x5xf32>
    %214 = vector.extract_strided_slice %123 {offsets = [0, 5], sizes = [64, 11], strides = [1, 1]} : vector<64x16xf32> to vector<64x11xf32>
    %215 = tpu.concatenate %214, %213 in 1 : vector<64x11xf32>, vector<64x5xf32> -> vector<64x16xf32>
    %c1_i32_89 = arith.constant 1 : i32
    %216 = vector.broadcast %c1_i32_89 : i32 to vector<1x16xi32>
    %217 = arith.addi %126, %216 : vector<1x16xi32>
    %c0_i32_90 = arith.constant 0 : i32
    %218 = vector.broadcast %c0_i32_90 : i32 to vector<1x16xi32>
    %219 = arith.cmpi sge, %217, %218 : vector<1x16xi32>
    %c1_i32_91 = arith.constant 1 : i32
    %220 = vector.broadcast %c1_i32_91 : i32 to vector<1x16xi32>
    %221 = arith.addi %126, %220 : vector<1x16xi32>
    %c4_i32_92 = arith.constant 4 : i32
    %222 = vector.broadcast %c4_i32_92 : i32 to vector<1x16xi32>
    %223 = arith.cmpi slt, %221, %222 : vector<1x16xi32>
    %224 = arith.andi %219, %223 : vector<1x16xi1>
    %cst_93 = arith.constant 0.000000e+00 : f32
    %225 = vector.broadcast %cst_93 : f32 to vector<64x16xf32>
    %226 = vector.shape_cast %224 : vector<1x16xi1> to vector<1x16xi1>
    %227 = vector.broadcast %226 : vector<1x16xi1> to vector<64x16xi1>
    %228 = arith.select %227, %215, %225 : vector<64x16xi1>, vector<64x16xf32>
    %229 = tpu.concatenate %142, %145, %161, %177, %123, %193, %209, %212, %228 in 0 : vector<64x16xf32>, vector<64x16xf32>, vector<64x16xf32>, vector<64x16xf32>, vector<64x16xf32>, vector<64x16xf32>, vector<64x16xf32>, vector<64x16xf32>, vector<64x16xf32> -> vector<576x16xf32>
    %cst_94 = arith.constant dense<0.000000e+00> : vector<32x16xf32>
    %230 = tpu.matmul %7, %229, %cst_94 {dimension_numbers = #tpu.dot_dimension_numbers<[1], [0], [0], [1], [0, 0, 1, 1], [], []>} : vector<32x576xf32>, vector<576x16xf32>, vector<32x16xf32> -> vector<32x16xf32>
    %231 = vector.broadcast %8 : vector<32x1xf32> to vector<32x16xf32>
    %232 = arith.addf %230, %231 : vector<32x16xf32>
    %cst_95 = arith.constant 0.000000e+00 : f32
    %233 = vector.broadcast %cst_95 : f32 to vector<32x16xf32>
    %234 = arith.maximumf %232, %233 : vector<32x16xf32>
    %235 = tpu.iota {dimensions = array<i32: 1>} : vector<1x16xi32>
    %c3_i32_96 = arith.constant 3 : i32
    %236 = vector.broadcast %c3_i32_96 : i32 to vector<1x16xi32>
    %237 = arith.andi %235, %236 : vector<1x16xi32>
    %cst_97 = arith.constant 0.000000e+00 : f32
    %238 = vector.broadcast %cst_97 : f32 to vector<32x5xf32>
    %239 = vector.extract_strided_slice %234 {offsets = [0, 0], sizes = [32, 11], strides = [1, 1]} : vector<32x16xf32> to vector<32x11xf32>
    %240 = tpu.concatenate %238, %239 in 1 : vector<32x5xf32>, vector<32x11xf32> -> vector<32x16xf32>
    %c-1_i32_98 = arith.constant -1 : i32
    %241 = vector.broadcast %c-1_i32_98 : i32 to vector<1x16xi32>
    %242 = arith.addi %237, %241 : vector<1x16xi32>
    %c0_i32_99 = arith.constant 0 : i32
    %243 = vector.broadcast %c0_i32_99 : i32 to vector<1x16xi32>
    %244 = arith.cmpi sge, %242, %243 : vector<1x16xi32>
    %c-1_i32_100 = arith.constant -1 : i32
    %245 = vector.broadcast %c-1_i32_100 : i32 to vector<1x16xi32>
    %246 = arith.addi %237, %245 : vector<1x16xi32>
    %c4_i32_101 = arith.constant 4 : i32
    %247 = vector.broadcast %c4_i32_101 : i32 to vector<1x16xi32>
    %248 = arith.cmpi slt, %246, %247 : vector<1x16xi32>
    %249 = arith.andi %244, %248 : vector<1x16xi1>
    %cst_102 = arith.constant 0.000000e+00 : f32
    %250 = vector.broadcast %cst_102 : f32 to vector<32x16xf32>
    %251 = vector.shape_cast %249 : vector<1x16xi1> to vector<1x16xi1>
    %252 = vector.broadcast %251 : vector<1x16xi1> to vector<32x16xi1>
    %253 = arith.select %252, %240, %250 : vector<32x16xi1>, vector<32x16xf32>
    %cst_103 = arith.constant 0.000000e+00 : f32
    %254 = vector.broadcast %cst_103 : f32 to vector<32x4xf32>
    %255 = vector.extract_strided_slice %234 {offsets = [0, 0], sizes = [32, 12], strides = [1, 1]} : vector<32x16xf32> to vector<32x12xf32>
    %256 = tpu.concatenate %254, %255 in 1 : vector<32x4xf32>, vector<32x12xf32> -> vector<32x16xf32>
    %cst_104 = arith.constant 0.000000e+00 : f32
    %257 = vector.broadcast %cst_104 : f32 to vector<32x3xf32>
    %258 = vector.extract_strided_slice %234 {offsets = [0, 0], sizes = [32, 13], strides = [1, 1]} : vector<32x16xf32> to vector<32x13xf32>
    %259 = tpu.concatenate %257, %258 in 1 : vector<32x3xf32>, vector<32x13xf32> -> vector<32x16xf32>
    %c1_i32_105 = arith.constant 1 : i32
    %260 = vector.broadcast %c1_i32_105 : i32 to vector<1x16xi32>
    %261 = arith.addi %237, %260 : vector<1x16xi32>
    %c0_i32_106 = arith.constant 0 : i32
    %262 = vector.broadcast %c0_i32_106 : i32 to vector<1x16xi32>
    %263 = arith.cmpi sge, %261, %262 : vector<1x16xi32>
    %c1_i32_107 = arith.constant 1 : i32
    %264 = vector.broadcast %c1_i32_107 : i32 to vector<1x16xi32>
    %265 = arith.addi %237, %264 : vector<1x16xi32>
    %c4_i32_108 = arith.constant 4 : i32
    %266 = vector.broadcast %c4_i32_108 : i32 to vector<1x16xi32>
    %267 = arith.cmpi slt, %265, %266 : vector<1x16xi32>
    %268 = arith.andi %263, %267 : vector<1x16xi1>
    %cst_109 = arith.constant 0.000000e+00 : f32
    %269 = vector.broadcast %cst_109 : f32 to vector<32x16xf32>
    %270 = vector.shape_cast %268 : vector<1x16xi1> to vector<1x16xi1>
    %271 = vector.broadcast %270 : vector<1x16xi1> to vector<32x16xi1>
    %272 = arith.select %271, %259, %269 : vector<32x16xi1>, vector<32x16xf32>
    %cst_110 = arith.constant 0.000000e+00 : f32
    %273 = vector.broadcast %cst_110 : f32 to vector<32x1xf32>
    %274 = vector.extract_strided_slice %234 {offsets = [0, 0], sizes = [32, 15], strides = [1, 1]} : vector<32x16xf32> to vector<32x15xf32>
    %275 = tpu.concatenate %273, %274 in 1 : vector<32x1xf32>, vector<32x15xf32> -> vector<32x16xf32>
    %c-1_i32_111 = arith.constant -1 : i32
    %276 = vector.broadcast %c-1_i32_111 : i32 to vector<1x16xi32>
    %277 = arith.addi %237, %276 : vector<1x16xi32>
    %c0_i32_112 = arith.constant 0 : i32
    %278 = vector.broadcast %c0_i32_112 : i32 to vector<1x16xi32>
    %279 = arith.cmpi sge, %277, %278 : vector<1x16xi32>
    %c-1_i32_113 = arith.constant -1 : i32
    %280 = vector.broadcast %c-1_i32_113 : i32 to vector<1x16xi32>
    %281 = arith.addi %237, %280 : vector<1x16xi32>
    %c4_i32_114 = arith.constant 4 : i32
    %282 = vector.broadcast %c4_i32_114 : i32 to vector<1x16xi32>
    %283 = arith.cmpi slt, %281, %282 : vector<1x16xi32>
    %284 = arith.andi %279, %283 : vector<1x16xi1>
    %cst_115 = arith.constant 0.000000e+00 : f32
    %285 = vector.broadcast %cst_115 : f32 to vector<32x16xf32>
    %286 = vector.shape_cast %284 : vector<1x16xi1> to vector<1x16xi1>
    %287 = vector.broadcast %286 : vector<1x16xi1> to vector<32x16xi1>
    %288 = arith.select %287, %275, %285 : vector<32x16xi1>, vector<32x16xf32>
    %cst_116 = arith.constant 0.000000e+00 : f32
    %289 = vector.broadcast %cst_116 : f32 to vector<32x1xf32>
    %290 = vector.extract_strided_slice %234 {offsets = [0, 1], sizes = [32, 15], strides = [1, 1]} : vector<32x16xf32> to vector<32x15xf32>
    %291 = tpu.concatenate %290, %289 in 1 : vector<32x15xf32>, vector<32x1xf32> -> vector<32x16xf32>
    %c1_i32_117 = arith.constant 1 : i32
    %292 = vector.broadcast %c1_i32_117 : i32 to vector<1x16xi32>
    %293 = arith.addi %237, %292 : vector<1x16xi32>
    %c0_i32_118 = arith.constant 0 : i32
    %294 = vector.broadcast %c0_i32_118 : i32 to vector<1x16xi32>
    %295 = arith.cmpi sge, %293, %294 : vector<1x16xi32>
    %c1_i32_119 = arith.constant 1 : i32
    %296 = vector.broadcast %c1_i32_119 : i32 to vector<1x16xi32>
    %297 = arith.addi %237, %296 : vector<1x16xi32>
    %c4_i32_120 = arith.constant 4 : i32
    %298 = vector.broadcast %c4_i32_120 : i32 to vector<1x16xi32>
    %299 = arith.cmpi slt, %297, %298 : vector<1x16xi32>
    %300 = arith.andi %295, %299 : vector<1x16xi1>
    %cst_121 = arith.constant 0.000000e+00 : f32
    %301 = vector.broadcast %cst_121 : f32 to vector<32x16xf32>
    %302 = vector.shape_cast %300 : vector<1x16xi1> to vector<1x16xi1>
    %303 = vector.broadcast %302 : vector<1x16xi1> to vector<32x16xi1>
    %304 = arith.select %303, %291, %301 : vector<32x16xi1>, vector<32x16xf32>
    %cst_122 = arith.constant 0.000000e+00 : f32
    %305 = vector.broadcast %cst_122 : f32 to vector<32x3xf32>
    %306 = vector.extract_strided_slice %234 {offsets = [0, 3], sizes = [32, 13], strides = [1, 1]} : vector<32x16xf32> to vector<32x13xf32>
    %307 = tpu.concatenate %306, %305 in 1 : vector<32x13xf32>, vector<32x3xf32> -> vector<32x16xf32>
    %c-1_i32_123 = arith.constant -1 : i32
    %308 = vector.broadcast %c-1_i32_123 : i32 to vector<1x16xi32>
    %309 = arith.addi %237, %308 : vector<1x16xi32>
    %c0_i32_124 = arith.constant 0 : i32
    %310 = vector.broadcast %c0_i32_124 : i32 to vector<1x16xi32>
    %311 = arith.cmpi sge, %309, %310 : vector<1x16xi32>
    %c-1_i32_125 = arith.constant -1 : i32
    %312 = vector.broadcast %c-1_i32_125 : i32 to vector<1x16xi32>
    %313 = arith.addi %237, %312 : vector<1x16xi32>
    %c4_i32_126 = arith.constant 4 : i32
    %314 = vector.broadcast %c4_i32_126 : i32 to vector<1x16xi32>
    %315 = arith.cmpi slt, %313, %314 : vector<1x16xi32>
    %316 = arith.andi %311, %315 : vector<1x16xi1>
    %cst_127 = arith.constant 0.000000e+00 : f32
    %317 = vector.broadcast %cst_127 : f32 to vector<32x16xf32>
    %318 = vector.shape_cast %316 : vector<1x16xi1> to vector<1x16xi1>
    %319 = vector.broadcast %318 : vector<1x16xi1> to vector<32x16xi1>
    %320 = arith.select %319, %307, %317 : vector<32x16xi1>, vector<32x16xf32>
    %cst_128 = arith.constant 0.000000e+00 : f32
    %321 = vector.broadcast %cst_128 : f32 to vector<32x4xf32>
    %322 = vector.extract_strided_slice %234 {offsets = [0, 4], sizes = [32, 12], strides = [1, 1]} : vector<32x16xf32> to vector<32x12xf32>
    %323 = tpu.concatenate %322, %321 in 1 : vector<32x12xf32>, vector<32x4xf32> -> vector<32x16xf32>
    %cst_129 = arith.constant 0.000000e+00 : f32
    %324 = vector.broadcast %cst_129 : f32 to vector<32x5xf32>
    %325 = vector.extract_strided_slice %234 {offsets = [0, 5], sizes = [32, 11], strides = [1, 1]} : vector<32x16xf32> to vector<32x11xf32>
    %326 = tpu.concatenate %325, %324 in 1 : vector<32x11xf32>, vector<32x5xf32> -> vector<32x16xf32>
    %c1_i32_130 = arith.constant 1 : i32
    %327 = vector.broadcast %c1_i32_130 : i32 to vector<1x16xi32>
    %328 = arith.addi %237, %327 : vector<1x16xi32>
    %c0_i32_131 = arith.constant 0 : i32
    %329 = vector.broadcast %c0_i32_131 : i32 to vector<1x16xi32>
    %330 = arith.cmpi sge, %328, %329 : vector<1x16xi32>
    %c1_i32_132 = arith.constant 1 : i32
    %331 = vector.broadcast %c1_i32_132 : i32 to vector<1x16xi32>
    %332 = arith.addi %237, %331 : vector<1x16xi32>
    %c4_i32_133 = arith.constant 4 : i32
    %333 = vector.broadcast %c4_i32_133 : i32 to vector<1x16xi32>
    %334 = arith.cmpi slt, %332, %333 : vector<1x16xi32>
    %335 = arith.andi %330, %334 : vector<1x16xi1>
    %cst_134 = arith.constant 0.000000e+00 : f32
    %336 = vector.broadcast %cst_134 : f32 to vector<32x16xf32>
    %337 = vector.shape_cast %335 : vector<1x16xi1> to vector<1x16xi1>
    %338 = vector.broadcast %337 : vector<1x16xi1> to vector<32x16xi1>
    %339 = arith.select %338, %326, %336 : vector<32x16xi1>, vector<32x16xf32>
    %340 = tpu.concatenate %253, %256, %272, %288, %234, %304, %320, %323, %339 in 0 : vector<32x16xf32>, vector<32x16xf32>, vector<32x16xf32>, vector<32x16xf32>, vector<32x16xf32>, vector<32x16xf32>, vector<32x16xf32>, vector<32x16xf32>, vector<32x16xf32> -> vector<288x16xf32>
    %cst_135 = arith.constant dense<0.000000e+00> : vector<32x16xf32>
    %341 = tpu.matmul %9, %340, %cst_135 {dimension_numbers = #tpu.dot_dimension_numbers<[1], [0], [0], [1], [0, 0, 1, 1], [], []>} : vector<32x288xf32>, vector<288x16xf32>, vector<32x16xf32> -> vector<32x16xf32>
    %342 = vector.broadcast %10 : vector<32x1xf32> to vector<32x16xf32>
    %343 = arith.addf %341, %342 : vector<32x16xf32>
    %cst_136 = arith.constant 0.000000e+00 : f32
    %344 = vector.broadcast %cst_136 : f32 to vector<32x16xf32>
    %345 = arith.maximumf %343, %344 : vector<32x16xf32>
    %c0_137 = arith.constant 0 : index
    %c0_138 = arith.constant 0 : index
    %c0_139 = arith.constant 0 : index
    %346 = vector.load %arg3[%c0_137, %c0_138, %c0_139] : memref<1x16x64xf32, #tpu.memory_space<vmem>>, vector<1x16x64xf32>
    %347 = vector.shape_cast %346 : vector<1x16x64xf32> to vector<16x64xf32>
    %c0_140 = arith.constant 0 : index
    %c0_141 = arith.constant 0 : index
    %348 = vector.load %arg13[%c0_140, %c0_141] : memref<16x64xf32, #tpu.memory_space<vmem>>, vector<16x64xf32>
    %c0_142 = arith.constant 0 : index
    %c0_143 = arith.constant 0 : index
    %349 = vector.load %arg14[%c0_142, %c0_143] : memref<16x288xf32, #tpu.memory_space<vmem>>, vector<16x288xf32>
    %c0_144 = arith.constant 0 : index
    %c0_145 = arith.constant 0 : index
    %350 = vector.load %arg15[%c0_144, %c0_145] : memref<16x1xf32, #tpu.memory_space<vmem>>, vector<16x1xf32>
    %c0_146 = arith.constant 0 : index
    %c0_147 = arith.constant 0 : index
    %351 = vector.load %arg16[%c0_146, %c0_147] : memref<16x288xf32, #tpu.memory_space<vmem>>, vector<16x288xf32>
    %c0_148 = arith.constant 0 : index
    %c0_149 = arith.constant 0 : index
    %352 = vector.load %arg17[%c0_148, %c0_149] : memref<16x1xf32, #tpu.memory_space<vmem>>, vector<16x1xf32>
    %c0_150 = arith.constant 0 : index
    %c0_151 = arith.constant 0 : index
    %353 = vector.load %arg18[%c0_150, %c0_151] : memref<16x144xf32, #tpu.memory_space<vmem>>, vector<16x144xf32>
    %c0_152 = arith.constant 0 : index
    %c0_153 = arith.constant 0 : index
    %354 = vector.load %arg19[%c0_152, %c0_153] : memref<16x1xf32, #tpu.memory_space<vmem>>, vector<16x1xf32>
    %cst_154 = arith.constant dense<0.000000e+00> : vector<32x64xf32>
    %355 = tpu.matmul %345, %348, %cst_154 {dimension_numbers = #tpu.dot_dimension_numbers<[1], [0], [0], [1], [0, 0, 1, 1], [], []>} : vector<32x16xf32>, vector<16x64xf32>, vector<32x64xf32> -> vector<32x64xf32>
    %356 = tpu.iota {dimensions = array<i32: 1>} : vector<1x64xi32>
    %c7_i32 = arith.constant 7 : i32
    %357 = vector.broadcast %c7_i32 : i32 to vector<1x64xi32>
    %358 = arith.andi %356, %357 : vector<1x64xi32>
    %cst_155 = arith.constant 0.000000e+00 : f32
    %359 = vector.broadcast %cst_155 : f32 to vector<32x9xf32>
    %360 = vector.extract_strided_slice %355 {offsets = [0, 0], sizes = [32, 55], strides = [1, 1]} : vector<32x64xf32> to vector<32x55xf32>
    %361 = tpu.concatenate %359, %360 in 1 : vector<32x9xf32>, vector<32x55xf32> -> vector<32x64xf32>
    %c-1_i32_156 = arith.constant -1 : i32
    %362 = vector.broadcast %c-1_i32_156 : i32 to vector<1x64xi32>
    %363 = arith.addi %358, %362 : vector<1x64xi32>
    %c0_i32_157 = arith.constant 0 : i32
    %364 = vector.broadcast %c0_i32_157 : i32 to vector<1x64xi32>
    %365 = arith.cmpi sge, %363, %364 : vector<1x64xi32>
    %c-1_i32_158 = arith.constant -1 : i32
    %366 = vector.broadcast %c-1_i32_158 : i32 to vector<1x64xi32>
    %367 = arith.addi %358, %366 : vector<1x64xi32>
    %c8_i32 = arith.constant 8 : i32
    %368 = vector.broadcast %c8_i32 : i32 to vector<1x64xi32>
    %369 = arith.cmpi slt, %367, %368 : vector<1x64xi32>
    %370 = arith.andi %365, %369 : vector<1x64xi1>
    %cst_159 = arith.constant 0.000000e+00 : f32
    %371 = vector.broadcast %cst_159 : f32 to vector<32x64xf32>
    %372 = vector.shape_cast %370 : vector<1x64xi1> to vector<1x64xi1>
    %373 = vector.broadcast %372 : vector<1x64xi1> to vector<32x64xi1>
    %374 = arith.select %373, %361, %371 : vector<32x64xi1>, vector<32x64xf32>
    %cst_160 = arith.constant 0.000000e+00 : f32
    %375 = vector.broadcast %cst_160 : f32 to vector<32x8xf32>
    %376 = vector.extract_strided_slice %355 {offsets = [0, 0], sizes = [32, 56], strides = [1, 1]} : vector<32x64xf32> to vector<32x56xf32>
    %377 = tpu.concatenate %375, %376 in 1 : vector<32x8xf32>, vector<32x56xf32> -> vector<32x64xf32>
    %cst_161 = arith.constant 0.000000e+00 : f32
    %378 = vector.broadcast %cst_161 : f32 to vector<32x7xf32>
    %379 = vector.extract_strided_slice %355 {offsets = [0, 0], sizes = [32, 57], strides = [1, 1]} : vector<32x64xf32> to vector<32x57xf32>
    %380 = tpu.concatenate %378, %379 in 1 : vector<32x7xf32>, vector<32x57xf32> -> vector<32x64xf32>
    %c1_i32_162 = arith.constant 1 : i32
    %381 = vector.broadcast %c1_i32_162 : i32 to vector<1x64xi32>
    %382 = arith.addi %358, %381 : vector<1x64xi32>
    %c0_i32_163 = arith.constant 0 : i32
    %383 = vector.broadcast %c0_i32_163 : i32 to vector<1x64xi32>
    %384 = arith.cmpi sge, %382, %383 : vector<1x64xi32>
    %c1_i32_164 = arith.constant 1 : i32
    %385 = vector.broadcast %c1_i32_164 : i32 to vector<1x64xi32>
    %386 = arith.addi %358, %385 : vector<1x64xi32>
    %c8_i32_165 = arith.constant 8 : i32
    %387 = vector.broadcast %c8_i32_165 : i32 to vector<1x64xi32>
    %388 = arith.cmpi slt, %386, %387 : vector<1x64xi32>
    %389 = arith.andi %384, %388 : vector<1x64xi1>
    %cst_166 = arith.constant 0.000000e+00 : f32
    %390 = vector.broadcast %cst_166 : f32 to vector<32x64xf32>
    %391 = vector.shape_cast %389 : vector<1x64xi1> to vector<1x64xi1>
    %392 = vector.broadcast %391 : vector<1x64xi1> to vector<32x64xi1>
    %393 = arith.select %392, %380, %390 : vector<32x64xi1>, vector<32x64xf32>
    %cst_167 = arith.constant 0.000000e+00 : f32
    %394 = vector.broadcast %cst_167 : f32 to vector<32x1xf32>
    %395 = vector.extract_strided_slice %355 {offsets = [0, 0], sizes = [32, 63], strides = [1, 1]} : vector<32x64xf32> to vector<32x63xf32>
    %396 = tpu.concatenate %394, %395 in 1 : vector<32x1xf32>, vector<32x63xf32> -> vector<32x64xf32>
    %c-1_i32_168 = arith.constant -1 : i32
    %397 = vector.broadcast %c-1_i32_168 : i32 to vector<1x64xi32>
    %398 = arith.addi %358, %397 : vector<1x64xi32>
    %c0_i32_169 = arith.constant 0 : i32
    %399 = vector.broadcast %c0_i32_169 : i32 to vector<1x64xi32>
    %400 = arith.cmpi sge, %398, %399 : vector<1x64xi32>
    %c-1_i32_170 = arith.constant -1 : i32
    %401 = vector.broadcast %c-1_i32_170 : i32 to vector<1x64xi32>
    %402 = arith.addi %358, %401 : vector<1x64xi32>
    %c8_i32_171 = arith.constant 8 : i32
    %403 = vector.broadcast %c8_i32_171 : i32 to vector<1x64xi32>
    %404 = arith.cmpi slt, %402, %403 : vector<1x64xi32>
    %405 = arith.andi %400, %404 : vector<1x64xi1>
    %cst_172 = arith.constant 0.000000e+00 : f32
    %406 = vector.broadcast %cst_172 : f32 to vector<32x64xf32>
    %407 = vector.shape_cast %405 : vector<1x64xi1> to vector<1x64xi1>
    %408 = vector.broadcast %407 : vector<1x64xi1> to vector<32x64xi1>
    %409 = arith.select %408, %396, %406 : vector<32x64xi1>, vector<32x64xf32>
    %cst_173 = arith.constant 0.000000e+00 : f32
    %410 = vector.broadcast %cst_173 : f32 to vector<32x1xf32>
    %411 = vector.extract_strided_slice %355 {offsets = [0, 1], sizes = [32, 63], strides = [1, 1]} : vector<32x64xf32> to vector<32x63xf32>
    %412 = tpu.concatenate %411, %410 in 1 : vector<32x63xf32>, vector<32x1xf32> -> vector<32x64xf32>
    %c1_i32_174 = arith.constant 1 : i32
    %413 = vector.broadcast %c1_i32_174 : i32 to vector<1x64xi32>
    %414 = arith.addi %358, %413 : vector<1x64xi32>
    %c0_i32_175 = arith.constant 0 : i32
    %415 = vector.broadcast %c0_i32_175 : i32 to vector<1x64xi32>
    %416 = arith.cmpi sge, %414, %415 : vector<1x64xi32>
    %c1_i32_176 = arith.constant 1 : i32
    %417 = vector.broadcast %c1_i32_176 : i32 to vector<1x64xi32>
    %418 = arith.addi %358, %417 : vector<1x64xi32>
    %c8_i32_177 = arith.constant 8 : i32
    %419 = vector.broadcast %c8_i32_177 : i32 to vector<1x64xi32>
    %420 = arith.cmpi slt, %418, %419 : vector<1x64xi32>
    %421 = arith.andi %416, %420 : vector<1x64xi1>
    %cst_178 = arith.constant 0.000000e+00 : f32
    %422 = vector.broadcast %cst_178 : f32 to vector<32x64xf32>
    %423 = vector.shape_cast %421 : vector<1x64xi1> to vector<1x64xi1>
    %424 = vector.broadcast %423 : vector<1x64xi1> to vector<32x64xi1>
    %425 = arith.select %424, %412, %422 : vector<32x64xi1>, vector<32x64xf32>
    %cst_179 = arith.constant 0.000000e+00 : f32
    %426 = vector.broadcast %cst_179 : f32 to vector<32x7xf32>
    %427 = vector.extract_strided_slice %355 {offsets = [0, 7], sizes = [32, 57], strides = [1, 1]} : vector<32x64xf32> to vector<32x57xf32>
    %428 = tpu.concatenate %427, %426 in 1 : vector<32x57xf32>, vector<32x7xf32> -> vector<32x64xf32>
    %c-1_i32_180 = arith.constant -1 : i32
    %429 = vector.broadcast %c-1_i32_180 : i32 to vector<1x64xi32>
    %430 = arith.addi %358, %429 : vector<1x64xi32>
    %c0_i32_181 = arith.constant 0 : i32
    %431 = vector.broadcast %c0_i32_181 : i32 to vector<1x64xi32>
    %432 = arith.cmpi sge, %430, %431 : vector<1x64xi32>
    %c-1_i32_182 = arith.constant -1 : i32
    %433 = vector.broadcast %c-1_i32_182 : i32 to vector<1x64xi32>
    %434 = arith.addi %358, %433 : vector<1x64xi32>
    %c8_i32_183 = arith.constant 8 : i32
    %435 = vector.broadcast %c8_i32_183 : i32 to vector<1x64xi32>
    %436 = arith.cmpi slt, %434, %435 : vector<1x64xi32>
    %437 = arith.andi %432, %436 : vector<1x64xi1>
    %cst_184 = arith.constant 0.000000e+00 : f32
    %438 = vector.broadcast %cst_184 : f32 to vector<32x64xf32>
    %439 = vector.shape_cast %437 : vector<1x64xi1> to vector<1x64xi1>
    %440 = vector.broadcast %439 : vector<1x64xi1> to vector<32x64xi1>
    %441 = arith.select %440, %428, %438 : vector<32x64xi1>, vector<32x64xf32>
    %cst_185 = arith.constant 0.000000e+00 : f32
    %442 = vector.broadcast %cst_185 : f32 to vector<32x8xf32>
    %443 = vector.extract_strided_slice %355 {offsets = [0, 8], sizes = [32, 56], strides = [1, 1]} : vector<32x64xf32> to vector<32x56xf32>
    %444 = tpu.concatenate %443, %442 in 1 : vector<32x56xf32>, vector<32x8xf32> -> vector<32x64xf32>
    %cst_186 = arith.constant 0.000000e+00 : f32
    %445 = vector.broadcast %cst_186 : f32 to vector<32x9xf32>
    %446 = vector.extract_strided_slice %355 {offsets = [0, 9], sizes = [32, 55], strides = [1, 1]} : vector<32x64xf32> to vector<32x55xf32>
    %447 = tpu.concatenate %446, %445 in 1 : vector<32x55xf32>, vector<32x9xf32> -> vector<32x64xf32>
    %c1_i32_187 = arith.constant 1 : i32
    %448 = vector.broadcast %c1_i32_187 : i32 to vector<1x64xi32>
    %449 = arith.addi %358, %448 : vector<1x64xi32>
    %c0_i32_188 = arith.constant 0 : i32
    %450 = vector.broadcast %c0_i32_188 : i32 to vector<1x64xi32>
    %451 = arith.cmpi sge, %449, %450 : vector<1x64xi32>
    %c1_i32_189 = arith.constant 1 : i32
    %452 = vector.broadcast %c1_i32_189 : i32 to vector<1x64xi32>
    %453 = arith.addi %358, %452 : vector<1x64xi32>
    %c8_i32_190 = arith.constant 8 : i32
    %454 = vector.broadcast %c8_i32_190 : i32 to vector<1x64xi32>
    %455 = arith.cmpi slt, %453, %454 : vector<1x64xi32>
    %456 = arith.andi %451, %455 : vector<1x64xi1>
    %cst_191 = arith.constant 0.000000e+00 : f32
    %457 = vector.broadcast %cst_191 : f32 to vector<32x64xf32>
    %458 = vector.shape_cast %456 : vector<1x64xi1> to vector<1x64xi1>
    %459 = vector.broadcast %458 : vector<1x64xi1> to vector<32x64xi1>
    %460 = arith.select %459, %447, %457 : vector<32x64xi1>, vector<32x64xf32>
    %461 = tpu.concatenate %374, %377, %393, %409, %355, %425, %441, %444, %460 in 0 : vector<32x64xf32>, vector<32x64xf32>, vector<32x64xf32>, vector<32x64xf32>, vector<32x64xf32>, vector<32x64xf32>, vector<32x64xf32>, vector<32x64xf32>, vector<32x64xf32> -> vector<288x64xf32>
    %cst_192 = arith.constant dense<0.000000e+00> : vector<16x64xf32>
    %462 = tpu.matmul %349, %461, %cst_192 {dimension_numbers = #tpu.dot_dimension_numbers<[1], [0], [0], [1], [0, 0, 1, 1], [], []>} : vector<16x288xf32>, vector<288x64xf32>, vector<16x64xf32> -> vector<16x64xf32>
    %463 = vector.broadcast %350 : vector<16x1xf32> to vector<16x64xf32>
    %464 = arith.addf %462, %463 : vector<16x64xf32>
    %cst_193 = arith.constant 0.000000e+00 : f32
    %465 = vector.broadcast %cst_193 : f32 to vector<16x64xf32>
    %466 = arith.maximumf %464, %465 : vector<16x64xf32>
    %467 = tpu.concatenate %466, %347 in 0 : vector<16x64xf32>, vector<16x64xf32> -> vector<32x64xf32>
    %468 = tpu.iota {dimensions = array<i32: 1>} : vector<1x64xi32>
    %c7_i32_194 = arith.constant 7 : i32
    %469 = vector.broadcast %c7_i32_194 : i32 to vector<1x64xi32>
    %470 = arith.andi %468, %469 : vector<1x64xi32>
    %cst_195 = arith.constant 0.000000e+00 : f32
    %471 = vector.broadcast %cst_195 : f32 to vector<32x9xf32>
    %472 = vector.extract_strided_slice %467 {offsets = [0, 0], sizes = [32, 55], strides = [1, 1]} : vector<32x64xf32> to vector<32x55xf32>
    %473 = tpu.concatenate %471, %472 in 1 : vector<32x9xf32>, vector<32x55xf32> -> vector<32x64xf32>
    %c-1_i32_196 = arith.constant -1 : i32
    %474 = vector.broadcast %c-1_i32_196 : i32 to vector<1x64xi32>
    %475 = arith.addi %470, %474 : vector<1x64xi32>
    %c0_i32_197 = arith.constant 0 : i32
    %476 = vector.broadcast %c0_i32_197 : i32 to vector<1x64xi32>
    %477 = arith.cmpi sge, %475, %476 : vector<1x64xi32>
    %c-1_i32_198 = arith.constant -1 : i32
    %478 = vector.broadcast %c-1_i32_198 : i32 to vector<1x64xi32>
    %479 = arith.addi %470, %478 : vector<1x64xi32>
    %c8_i32_199 = arith.constant 8 : i32
    %480 = vector.broadcast %c8_i32_199 : i32 to vector<1x64xi32>
    %481 = arith.cmpi slt, %479, %480 : vector<1x64xi32>
    %482 = arith.andi %477, %481 : vector<1x64xi1>
    %cst_200 = arith.constant 0.000000e+00 : f32
    %483 = vector.broadcast %cst_200 : f32 to vector<32x64xf32>
    %484 = vector.shape_cast %482 : vector<1x64xi1> to vector<1x64xi1>
    %485 = vector.broadcast %484 : vector<1x64xi1> to vector<32x64xi1>
    %486 = arith.select %485, %473, %483 : vector<32x64xi1>, vector<32x64xf32>
    %cst_201 = arith.constant 0.000000e+00 : f32
    %487 = vector.broadcast %cst_201 : f32 to vector<32x8xf32>
    %488 = vector.extract_strided_slice %467 {offsets = [0, 0], sizes = [32, 56], strides = [1, 1]} : vector<32x64xf32> to vector<32x56xf32>
    %489 = tpu.concatenate %487, %488 in 1 : vector<32x8xf32>, vector<32x56xf32> -> vector<32x64xf32>
    %cst_202 = arith.constant 0.000000e+00 : f32
    %490 = vector.broadcast %cst_202 : f32 to vector<32x7xf32>
    %491 = vector.extract_strided_slice %467 {offsets = [0, 0], sizes = [32, 57], strides = [1, 1]} : vector<32x64xf32> to vector<32x57xf32>
    %492 = tpu.concatenate %490, %491 in 1 : vector<32x7xf32>, vector<32x57xf32> -> vector<32x64xf32>
    %c1_i32_203 = arith.constant 1 : i32
    %493 = vector.broadcast %c1_i32_203 : i32 to vector<1x64xi32>
    %494 = arith.addi %470, %493 : vector<1x64xi32>
    %c0_i32_204 = arith.constant 0 : i32
    %495 = vector.broadcast %c0_i32_204 : i32 to vector<1x64xi32>
    %496 = arith.cmpi sge, %494, %495 : vector<1x64xi32>
    %c1_i32_205 = arith.constant 1 : i32
    %497 = vector.broadcast %c1_i32_205 : i32 to vector<1x64xi32>
    %498 = arith.addi %470, %497 : vector<1x64xi32>
    %c8_i32_206 = arith.constant 8 : i32
    %499 = vector.broadcast %c8_i32_206 : i32 to vector<1x64xi32>
    %500 = arith.cmpi slt, %498, %499 : vector<1x64xi32>
    %501 = arith.andi %496, %500 : vector<1x64xi1>
    %cst_207 = arith.constant 0.000000e+00 : f32
    %502 = vector.broadcast %cst_207 : f32 to vector<32x64xf32>
    %503 = vector.shape_cast %501 : vector<1x64xi1> to vector<1x64xi1>
    %504 = vector.broadcast %503 : vector<1x64xi1> to vector<32x64xi1>
    %505 = arith.select %504, %492, %502 : vector<32x64xi1>, vector<32x64xf32>
    %cst_208 = arith.constant 0.000000e+00 : f32
    %506 = vector.broadcast %cst_208 : f32 to vector<32x1xf32>
    %507 = vector.extract_strided_slice %467 {offsets = [0, 0], sizes = [32, 63], strides = [1, 1]} : vector<32x64xf32> to vector<32x63xf32>
    %508 = tpu.concatenate %506, %507 in 1 : vector<32x1xf32>, vector<32x63xf32> -> vector<32x64xf32>
    %c-1_i32_209 = arith.constant -1 : i32
    %509 = vector.broadcast %c-1_i32_209 : i32 to vector<1x64xi32>
    %510 = arith.addi %470, %509 : vector<1x64xi32>
    %c0_i32_210 = arith.constant 0 : i32
    %511 = vector.broadcast %c0_i32_210 : i32 to vector<1x64xi32>
    %512 = arith.cmpi sge, %510, %511 : vector<1x64xi32>
    %c-1_i32_211 = arith.constant -1 : i32
    %513 = vector.broadcast %c-1_i32_211 : i32 to vector<1x64xi32>
    %514 = arith.addi %470, %513 : vector<1x64xi32>
    %c8_i32_212 = arith.constant 8 : i32
    %515 = vector.broadcast %c8_i32_212 : i32 to vector<1x64xi32>
    %516 = arith.cmpi slt, %514, %515 : vector<1x64xi32>
    %517 = arith.andi %512, %516 : vector<1x64xi1>
    %cst_213 = arith.constant 0.000000e+00 : f32
    %518 = vector.broadcast %cst_213 : f32 to vector<32x64xf32>
    %519 = vector.shape_cast %517 : vector<1x64xi1> to vector<1x64xi1>
    %520 = vector.broadcast %519 : vector<1x64xi1> to vector<32x64xi1>
    %521 = arith.select %520, %508, %518 : vector<32x64xi1>, vector<32x64xf32>
    %cst_214 = arith.constant 0.000000e+00 : f32
    %522 = vector.broadcast %cst_214 : f32 to vector<32x1xf32>
    %523 = vector.extract_strided_slice %467 {offsets = [0, 1], sizes = [32, 63], strides = [1, 1]} : vector<32x64xf32> to vector<32x63xf32>
    %524 = tpu.concatenate %523, %522 in 1 : vector<32x63xf32>, vector<32x1xf32> -> vector<32x64xf32>
    %c1_i32_215 = arith.constant 1 : i32
    %525 = vector.broadcast %c1_i32_215 : i32 to vector<1x64xi32>
    %526 = arith.addi %470, %525 : vector<1x64xi32>
    %c0_i32_216 = arith.constant 0 : i32
    %527 = vector.broadcast %c0_i32_216 : i32 to vector<1x64xi32>
    %528 = arith.cmpi sge, %526, %527 : vector<1x64xi32>
    %c1_i32_217 = arith.constant 1 : i32
    %529 = vector.broadcast %c1_i32_217 : i32 to vector<1x64xi32>
    %530 = arith.addi %470, %529 : vector<1x64xi32>
    %c8_i32_218 = arith.constant 8 : i32
    %531 = vector.broadcast %c8_i32_218 : i32 to vector<1x64xi32>
    %532 = arith.cmpi slt, %530, %531 : vector<1x64xi32>
    %533 = arith.andi %528, %532 : vector<1x64xi1>
    %cst_219 = arith.constant 0.000000e+00 : f32
    %534 = vector.broadcast %cst_219 : f32 to vector<32x64xf32>
    %535 = vector.shape_cast %533 : vector<1x64xi1> to vector<1x64xi1>
    %536 = vector.broadcast %535 : vector<1x64xi1> to vector<32x64xi1>
    %537 = arith.select %536, %524, %534 : vector<32x64xi1>, vector<32x64xf32>
    %cst_220 = arith.constant 0.000000e+00 : f32
    %538 = vector.broadcast %cst_220 : f32 to vector<32x7xf32>
    %539 = vector.extract_strided_slice %467 {offsets = [0, 7], sizes = [32, 57], strides = [1, 1]} : vector<32x64xf32> to vector<32x57xf32>
    %540 = tpu.concatenate %539, %538 in 1 : vector<32x57xf32>, vector<32x7xf32> -> vector<32x64xf32>
    %c-1_i32_221 = arith.constant -1 : i32
    %541 = vector.broadcast %c-1_i32_221 : i32 to vector<1x64xi32>
    %542 = arith.addi %470, %541 : vector<1x64xi32>
    %c0_i32_222 = arith.constant 0 : i32
    %543 = vector.broadcast %c0_i32_222 : i32 to vector<1x64xi32>
    %544 = arith.cmpi sge, %542, %543 : vector<1x64xi32>
    %c-1_i32_223 = arith.constant -1 : i32
    %545 = vector.broadcast %c-1_i32_223 : i32 to vector<1x64xi32>
    %546 = arith.addi %470, %545 : vector<1x64xi32>
    %c8_i32_224 = arith.constant 8 : i32
    %547 = vector.broadcast %c8_i32_224 : i32 to vector<1x64xi32>
    %548 = arith.cmpi slt, %546, %547 : vector<1x64xi32>
    %549 = arith.andi %544, %548 : vector<1x64xi1>
    %cst_225 = arith.constant 0.000000e+00 : f32
    %550 = vector.broadcast %cst_225 : f32 to vector<32x64xf32>
    %551 = vector.shape_cast %549 : vector<1x64xi1> to vector<1x64xi1>
    %552 = vector.broadcast %551 : vector<1x64xi1> to vector<32x64xi1>
    %553 = arith.select %552, %540, %550 : vector<32x64xi1>, vector<32x64xf32>
    %cst_226 = arith.constant 0.000000e+00 : f32
    %554 = vector.broadcast %cst_226 : f32 to vector<32x8xf32>
    %555 = vector.extract_strided_slice %467 {offsets = [0, 8], sizes = [32, 56], strides = [1, 1]} : vector<32x64xf32> to vector<32x56xf32>
    %556 = tpu.concatenate %555, %554 in 1 : vector<32x56xf32>, vector<32x8xf32> -> vector<32x64xf32>
    %cst_227 = arith.constant 0.000000e+00 : f32
    %557 = vector.broadcast %cst_227 : f32 to vector<32x9xf32>
    %558 = vector.extract_strided_slice %467 {offsets = [0, 9], sizes = [32, 55], strides = [1, 1]} : vector<32x64xf32> to vector<32x55xf32>
    %559 = tpu.concatenate %558, %557 in 1 : vector<32x55xf32>, vector<32x9xf32> -> vector<32x64xf32>
    %c1_i32_228 = arith.constant 1 : i32
    %560 = vector.broadcast %c1_i32_228 : i32 to vector<1x64xi32>
    %561 = arith.addi %470, %560 : vector<1x64xi32>
    %c0_i32_229 = arith.constant 0 : i32
    %562 = vector.broadcast %c0_i32_229 : i32 to vector<1x64xi32>
    %563 = arith.cmpi sge, %561, %562 : vector<1x64xi32>
    %c1_i32_230 = arith.constant 1 : i32
    %564 = vector.broadcast %c1_i32_230 : i32 to vector<1x64xi32>
    %565 = arith.addi %470, %564 : vector<1x64xi32>
    %c8_i32_231 = arith.constant 8 : i32
    %566 = vector.broadcast %c8_i32_231 : i32 to vector<1x64xi32>
    %567 = arith.cmpi slt, %565, %566 : vector<1x64xi32>
    %568 = arith.andi %563, %567 : vector<1x64xi1>
    %cst_232 = arith.constant 0.000000e+00 : f32
    %569 = vector.broadcast %cst_232 : f32 to vector<32x64xf32>
    %570 = vector.shape_cast %568 : vector<1x64xi1> to vector<1x64xi1>
    %571 = vector.broadcast %570 : vector<1x64xi1> to vector<32x64xi1>
    %572 = arith.select %571, %559, %569 : vector<32x64xi1>, vector<32x64xf32>
    %573 = tpu.concatenate %486, %489, %505, %521, %467, %537, %553, %556, %572 in 0 : vector<32x64xf32>, vector<32x64xf32>, vector<32x64xf32>, vector<32x64xf32>, vector<32x64xf32>, vector<32x64xf32>, vector<32x64xf32>, vector<32x64xf32>, vector<32x64xf32> -> vector<288x64xf32>
    %cst_233 = arith.constant dense<0.000000e+00> : vector<16x64xf32>
    %574 = tpu.matmul %351, %573, %cst_233 {dimension_numbers = #tpu.dot_dimension_numbers<[1], [0], [0], [1], [0, 0, 1, 1], [], []>} : vector<16x288xf32>, vector<288x64xf32>, vector<16x64xf32> -> vector<16x64xf32>
    %575 = vector.broadcast %352 : vector<16x1xf32> to vector<16x64xf32>
    %576 = arith.addf %574, %575 : vector<16x64xf32>
    %cst_234 = arith.constant 0.000000e+00 : f32
    %577 = vector.broadcast %cst_234 : f32 to vector<16x64xf32>
    %578 = arith.maximumf %576, %577 : vector<16x64xf32>
    %579 = tpu.iota {dimensions = array<i32: 1>} : vector<1x64xi32>
    %c7_i32_235 = arith.constant 7 : i32
    %580 = vector.broadcast %c7_i32_235 : i32 to vector<1x64xi32>
    %581 = arith.andi %579, %580 : vector<1x64xi32>
    %cst_236 = arith.constant 0.000000e+00 : f32
    %582 = vector.broadcast %cst_236 : f32 to vector<16x9xf32>
    %583 = vector.extract_strided_slice %578 {offsets = [0, 0], sizes = [16, 55], strides = [1, 1]} : vector<16x64xf32> to vector<16x55xf32>
    %584 = tpu.concatenate %582, %583 in 1 : vector<16x9xf32>, vector<16x55xf32> -> vector<16x64xf32>
    %c-1_i32_237 = arith.constant -1 : i32
    %585 = vector.broadcast %c-1_i32_237 : i32 to vector<1x64xi32>
    %586 = arith.addi %581, %585 : vector<1x64xi32>
    %c0_i32_238 = arith.constant 0 : i32
    %587 = vector.broadcast %c0_i32_238 : i32 to vector<1x64xi32>
    %588 = arith.cmpi sge, %586, %587 : vector<1x64xi32>
    %c-1_i32_239 = arith.constant -1 : i32
    %589 = vector.broadcast %c-1_i32_239 : i32 to vector<1x64xi32>
    %590 = arith.addi %581, %589 : vector<1x64xi32>
    %c8_i32_240 = arith.constant 8 : i32
    %591 = vector.broadcast %c8_i32_240 : i32 to vector<1x64xi32>
    %592 = arith.cmpi slt, %590, %591 : vector<1x64xi32>
    %593 = arith.andi %588, %592 : vector<1x64xi1>
    %cst_241 = arith.constant 0.000000e+00 : f32
    %594 = vector.broadcast %cst_241 : f32 to vector<16x64xf32>
    %595 = vector.shape_cast %593 : vector<1x64xi1> to vector<1x64xi1>
    %596 = vector.broadcast %595 : vector<1x64xi1> to vector<16x64xi1>
    %597 = arith.select %596, %584, %594 : vector<16x64xi1>, vector<16x64xf32>
    %cst_242 = arith.constant 0.000000e+00 : f32
    %598 = vector.broadcast %cst_242 : f32 to vector<16x8xf32>
    %599 = vector.extract_strided_slice %578 {offsets = [0, 0], sizes = [16, 56], strides = [1, 1]} : vector<16x64xf32> to vector<16x56xf32>
    %600 = tpu.concatenate %598, %599 in 1 : vector<16x8xf32>, vector<16x56xf32> -> vector<16x64xf32>
    %cst_243 = arith.constant 0.000000e+00 : f32
    %601 = vector.broadcast %cst_243 : f32 to vector<16x7xf32>
    %602 = vector.extract_strided_slice %578 {offsets = [0, 0], sizes = [16, 57], strides = [1, 1]} : vector<16x64xf32> to vector<16x57xf32>
    %603 = tpu.concatenate %601, %602 in 1 : vector<16x7xf32>, vector<16x57xf32> -> vector<16x64xf32>
    %c1_i32_244 = arith.constant 1 : i32
    %604 = vector.broadcast %c1_i32_244 : i32 to vector<1x64xi32>
    %605 = arith.addi %581, %604 : vector<1x64xi32>
    %c0_i32_245 = arith.constant 0 : i32
    %606 = vector.broadcast %c0_i32_245 : i32 to vector<1x64xi32>
    %607 = arith.cmpi sge, %605, %606 : vector<1x64xi32>
    %c1_i32_246 = arith.constant 1 : i32
    %608 = vector.broadcast %c1_i32_246 : i32 to vector<1x64xi32>
    %609 = arith.addi %581, %608 : vector<1x64xi32>
    %c8_i32_247 = arith.constant 8 : i32
    %610 = vector.broadcast %c8_i32_247 : i32 to vector<1x64xi32>
    %611 = arith.cmpi slt, %609, %610 : vector<1x64xi32>
    %612 = arith.andi %607, %611 : vector<1x64xi1>
    %cst_248 = arith.constant 0.000000e+00 : f32
    %613 = vector.broadcast %cst_248 : f32 to vector<16x64xf32>
    %614 = vector.shape_cast %612 : vector<1x64xi1> to vector<1x64xi1>
    %615 = vector.broadcast %614 : vector<1x64xi1> to vector<16x64xi1>
    %616 = arith.select %615, %603, %613 : vector<16x64xi1>, vector<16x64xf32>
    %cst_249 = arith.constant 0.000000e+00 : f32
    %617 = vector.broadcast %cst_249 : f32 to vector<16x1xf32>
    %618 = vector.extract_strided_slice %578 {offsets = [0, 0], sizes = [16, 63], strides = [1, 1]} : vector<16x64xf32> to vector<16x63xf32>
    %619 = tpu.concatenate %617, %618 in 1 : vector<16x1xf32>, vector<16x63xf32> -> vector<16x64xf32>
    %c-1_i32_250 = arith.constant -1 : i32
    %620 = vector.broadcast %c-1_i32_250 : i32 to vector<1x64xi32>
    %621 = arith.addi %581, %620 : vector<1x64xi32>
    %c0_i32_251 = arith.constant 0 : i32
    %622 = vector.broadcast %c0_i32_251 : i32 to vector<1x64xi32>
    %623 = arith.cmpi sge, %621, %622 : vector<1x64xi32>
    %c-1_i32_252 = arith.constant -1 : i32
    %624 = vector.broadcast %c-1_i32_252 : i32 to vector<1x64xi32>
    %625 = arith.addi %581, %624 : vector<1x64xi32>
    %c8_i32_253 = arith.constant 8 : i32
    %626 = vector.broadcast %c8_i32_253 : i32 to vector<1x64xi32>
    %627 = arith.cmpi slt, %625, %626 : vector<1x64xi32>
    %628 = arith.andi %623, %627 : vector<1x64xi1>
    %cst_254 = arith.constant 0.000000e+00 : f32
    %629 = vector.broadcast %cst_254 : f32 to vector<16x64xf32>
    %630 = vector.shape_cast %628 : vector<1x64xi1> to vector<1x64xi1>
    %631 = vector.broadcast %630 : vector<1x64xi1> to vector<16x64xi1>
    %632 = arith.select %631, %619, %629 : vector<16x64xi1>, vector<16x64xf32>
    %cst_255 = arith.constant 0.000000e+00 : f32
    %633 = vector.broadcast %cst_255 : f32 to vector<16x1xf32>
    %634 = vector.extract_strided_slice %578 {offsets = [0, 1], sizes = [16, 63], strides = [1, 1]} : vector<16x64xf32> to vector<16x63xf32>
    %635 = tpu.concatenate %634, %633 in 1 : vector<16x63xf32>, vector<16x1xf32> -> vector<16x64xf32>
    %c1_i32_256 = arith.constant 1 : i32
    %636 = vector.broadcast %c1_i32_256 : i32 to vector<1x64xi32>
    %637 = arith.addi %581, %636 : vector<1x64xi32>
    %c0_i32_257 = arith.constant 0 : i32
    %638 = vector.broadcast %c0_i32_257 : i32 to vector<1x64xi32>
    %639 = arith.cmpi sge, %637, %638 : vector<1x64xi32>
    %c1_i32_258 = arith.constant 1 : i32
    %640 = vector.broadcast %c1_i32_258 : i32 to vector<1x64xi32>
    %641 = arith.addi %581, %640 : vector<1x64xi32>
    %c8_i32_259 = arith.constant 8 : i32
    %642 = vector.broadcast %c8_i32_259 : i32 to vector<1x64xi32>
    %643 = arith.cmpi slt, %641, %642 : vector<1x64xi32>
    %644 = arith.andi %639, %643 : vector<1x64xi1>
    %cst_260 = arith.constant 0.000000e+00 : f32
    %645 = vector.broadcast %cst_260 : f32 to vector<16x64xf32>
    %646 = vector.shape_cast %644 : vector<1x64xi1> to vector<1x64xi1>
    %647 = vector.broadcast %646 : vector<1x64xi1> to vector<16x64xi1>
    %648 = arith.select %647, %635, %645 : vector<16x64xi1>, vector<16x64xf32>
    %cst_261 = arith.constant 0.000000e+00 : f32
    %649 = vector.broadcast %cst_261 : f32 to vector<16x7xf32>
    %650 = vector.extract_strided_slice %578 {offsets = [0, 7], sizes = [16, 57], strides = [1, 1]} : vector<16x64xf32> to vector<16x57xf32>
    %651 = tpu.concatenate %650, %649 in 1 : vector<16x57xf32>, vector<16x7xf32> -> vector<16x64xf32>
    %c-1_i32_262 = arith.constant -1 : i32
    %652 = vector.broadcast %c-1_i32_262 : i32 to vector<1x64xi32>
    %653 = arith.addi %581, %652 : vector<1x64xi32>
    %c0_i32_263 = arith.constant 0 : i32
    %654 = vector.broadcast %c0_i32_263 : i32 to vector<1x64xi32>
    %655 = arith.cmpi sge, %653, %654 : vector<1x64xi32>
    %c-1_i32_264 = arith.constant -1 : i32
    %656 = vector.broadcast %c-1_i32_264 : i32 to vector<1x64xi32>
    %657 = arith.addi %581, %656 : vector<1x64xi32>
    %c8_i32_265 = arith.constant 8 : i32
    %658 = vector.broadcast %c8_i32_265 : i32 to vector<1x64xi32>
    %659 = arith.cmpi slt, %657, %658 : vector<1x64xi32>
    %660 = arith.andi %655, %659 : vector<1x64xi1>
    %cst_266 = arith.constant 0.000000e+00 : f32
    %661 = vector.broadcast %cst_266 : f32 to vector<16x64xf32>
    %662 = vector.shape_cast %660 : vector<1x64xi1> to vector<1x64xi1>
    %663 = vector.broadcast %662 : vector<1x64xi1> to vector<16x64xi1>
    %664 = arith.select %663, %651, %661 : vector<16x64xi1>, vector<16x64xf32>
    %cst_267 = arith.constant 0.000000e+00 : f32
    %665 = vector.broadcast %cst_267 : f32 to vector<16x8xf32>
    %666 = vector.extract_strided_slice %578 {offsets = [0, 8], sizes = [16, 56], strides = [1, 1]} : vector<16x64xf32> to vector<16x56xf32>
    %667 = tpu.concatenate %666, %665 in 1 : vector<16x56xf32>, vector<16x8xf32> -> vector<16x64xf32>
    %cst_268 = arith.constant 0.000000e+00 : f32
    %668 = vector.broadcast %cst_268 : f32 to vector<16x9xf32>
    %669 = vector.extract_strided_slice %578 {offsets = [0, 9], sizes = [16, 55], strides = [1, 1]} : vector<16x64xf32> to vector<16x55xf32>
    %670 = tpu.concatenate %669, %668 in 1 : vector<16x55xf32>, vector<16x9xf32> -> vector<16x64xf32>
    %c1_i32_269 = arith.constant 1 : i32
    %671 = vector.broadcast %c1_i32_269 : i32 to vector<1x64xi32>
    %672 = arith.addi %581, %671 : vector<1x64xi32>
    %c0_i32_270 = arith.constant 0 : i32
    %673 = vector.broadcast %c0_i32_270 : i32 to vector<1x64xi32>
    %674 = arith.cmpi sge, %672, %673 : vector<1x64xi32>
    %c1_i32_271 = arith.constant 1 : i32
    %675 = vector.broadcast %c1_i32_271 : i32 to vector<1x64xi32>
    %676 = arith.addi %581, %675 : vector<1x64xi32>
    %c8_i32_272 = arith.constant 8 : i32
    %677 = vector.broadcast %c8_i32_272 : i32 to vector<1x64xi32>
    %678 = arith.cmpi slt, %676, %677 : vector<1x64xi32>
    %679 = arith.andi %674, %678 : vector<1x64xi1>
    %cst_273 = arith.constant 0.000000e+00 : f32
    %680 = vector.broadcast %cst_273 : f32 to vector<16x64xf32>
    %681 = vector.shape_cast %679 : vector<1x64xi1> to vector<1x64xi1>
    %682 = vector.broadcast %681 : vector<1x64xi1> to vector<16x64xi1>
    %683 = arith.select %682, %670, %680 : vector<16x64xi1>, vector<16x64xf32>
    %684 = tpu.concatenate %597, %600, %616, %632, %578, %648, %664, %667, %683 in 0 : vector<16x64xf32>, vector<16x64xf32>, vector<16x64xf32>, vector<16x64xf32>, vector<16x64xf32>, vector<16x64xf32>, vector<16x64xf32>, vector<16x64xf32>, vector<16x64xf32> -> vector<144x64xf32>
    %cst_274 = arith.constant dense<0.000000e+00> : vector<16x64xf32>
    %685 = tpu.matmul %353, %684, %cst_274 {dimension_numbers = #tpu.dot_dimension_numbers<[1], [0], [0], [1], [0, 0, 1, 1], [], []>} : vector<16x144xf32>, vector<144x64xf32>, vector<16x64xf32> -> vector<16x64xf32>
    %686 = vector.broadcast %354 : vector<16x1xf32> to vector<16x64xf32>
    %687 = arith.addf %685, %686 : vector<16x64xf32>
    %cst_275 = arith.constant 0.000000e+00 : f32
    %688 = vector.broadcast %cst_275 : f32 to vector<16x64xf32>
    %689 = arith.maximumf %687, %688 : vector<16x64xf32>
    %c0_276 = arith.constant 0 : index
    %c0_277 = arith.constant 0 : index
    %c0_278 = arith.constant 0 : index
    %690 = vector.load %arg4[%c0_276, %c0_277, %c0_278] : memref<1x8x256xf32, #tpu.memory_space<vmem>>, vector<1x8x256xf32>
    %691 = vector.shape_cast %690 : vector<1x8x256xf32> to vector<8x256xf32>
    %c0_279 = arith.constant 0 : index
    %c0_280 = arith.constant 0 : index
    %692 = vector.load %arg20[%c0_279, %c0_280] : memref<64x256xf32, #tpu.memory_space<vmem>>, vector<64x256xf32>
    %c0_281 = arith.constant 0 : index
    %c0_282 = arith.constant 0 : index
    %693 = vector.load %arg21[%c0_281, %c0_282] : memref<8x144xf32, #tpu.memory_space<vmem>>, vector<8x144xf32>
    %c0_283 = arith.constant 0 : index
    %c0_284 = arith.constant 0 : index
    %694 = vector.load %arg22[%c0_283, %c0_284] : memref<8x1xf32, #tpu.memory_space<vmem>>, vector<8x1xf32>
    %c0_285 = arith.constant 0 : index
    %c0_286 = arith.constant 0 : index
    %695 = vector.load %arg23[%c0_285, %c0_286] : memref<8x144xf32, #tpu.memory_space<vmem>>, vector<8x144xf32>
    %c0_287 = arith.constant 0 : index
    %c0_288 = arith.constant 0 : index
    %696 = vector.load %arg24[%c0_287, %c0_288] : memref<8x1xf32, #tpu.memory_space<vmem>>, vector<8x1xf32>
    %c0_289 = arith.constant 0 : index
    %c0_290 = arith.constant 0 : index
    %697 = vector.load %arg25[%c0_289, %c0_290] : memref<8x72xf32, #tpu.memory_space<vmem>>, vector<8x72xf32>
    %c0_291 = arith.constant 0 : index
    %c0_292 = arith.constant 0 : index
    %698 = vector.load %arg26[%c0_291, %c0_292] : memref<8x1xf32, #tpu.memory_space<vmem>>, vector<8x1xf32>
    %cst_293 = arith.constant dense<0.000000e+00> : vector<16x256xf32>
    %699 = tpu.matmul %689, %692, %cst_293 {dimension_numbers = #tpu.dot_dimension_numbers<[1], [0], [0], [1], [0, 0, 1, 1], [], []>} : vector<16x64xf32>, vector<64x256xf32>, vector<16x256xf32> -> vector<16x256xf32>
    %700 = tpu.iota {dimensions = array<i32: 1>} : vector<1x256xi32>
    %c15_i32 = arith.constant 15 : i32
    %701 = vector.broadcast %c15_i32 : i32 to vector<1x256xi32>
    %702 = arith.andi %700, %701 : vector<1x256xi32>
    %cst_294 = arith.constant 0.000000e+00 : f32
    %703 = vector.broadcast %cst_294 : f32 to vector<16x17xf32>
    %704 = vector.extract_strided_slice %699 {offsets = [0, 0], sizes = [16, 239], strides = [1, 1]} : vector<16x256xf32> to vector<16x239xf32>
    %705 = tpu.concatenate %703, %704 in 1 : vector<16x17xf32>, vector<16x239xf32> -> vector<16x256xf32>
    %c-1_i32_295 = arith.constant -1 : i32
    %706 = vector.broadcast %c-1_i32_295 : i32 to vector<1x256xi32>
    %707 = arith.addi %702, %706 : vector<1x256xi32>
    %c0_i32_296 = arith.constant 0 : i32
    %708 = vector.broadcast %c0_i32_296 : i32 to vector<1x256xi32>
    %709 = arith.cmpi sge, %707, %708 : vector<1x256xi32>
    %c-1_i32_297 = arith.constant -1 : i32
    %710 = vector.broadcast %c-1_i32_297 : i32 to vector<1x256xi32>
    %711 = arith.addi %702, %710 : vector<1x256xi32>
    %c16_i32 = arith.constant 16 : i32
    %712 = vector.broadcast %c16_i32 : i32 to vector<1x256xi32>
    %713 = arith.cmpi slt, %711, %712 : vector<1x256xi32>
    %714 = arith.andi %709, %713 : vector<1x256xi1>
    %cst_298 = arith.constant 0.000000e+00 : f32
    %715 = vector.broadcast %cst_298 : f32 to vector<16x256xf32>
    %716 = vector.shape_cast %714 : vector<1x256xi1> to vector<1x256xi1>
    %717 = vector.broadcast %716 : vector<1x256xi1> to vector<16x256xi1>
    %718 = arith.select %717, %705, %715 : vector<16x256xi1>, vector<16x256xf32>
    %cst_299 = arith.constant 0.000000e+00 : f32
    %719 = vector.broadcast %cst_299 : f32 to vector<16x16xf32>
    %720 = vector.extract_strided_slice %699 {offsets = [0, 0], sizes = [16, 240], strides = [1, 1]} : vector<16x256xf32> to vector<16x240xf32>
    %721 = tpu.concatenate %719, %720 in 1 : vector<16x16xf32>, vector<16x240xf32> -> vector<16x256xf32>
    %cst_300 = arith.constant 0.000000e+00 : f32
    %722 = vector.broadcast %cst_300 : f32 to vector<16x15xf32>
    %723 = vector.extract_strided_slice %699 {offsets = [0, 0], sizes = [16, 241], strides = [1, 1]} : vector<16x256xf32> to vector<16x241xf32>
    %724 = tpu.concatenate %722, %723 in 1 : vector<16x15xf32>, vector<16x241xf32> -> vector<16x256xf32>
    %c1_i32_301 = arith.constant 1 : i32
    %725 = vector.broadcast %c1_i32_301 : i32 to vector<1x256xi32>
    %726 = arith.addi %702, %725 : vector<1x256xi32>
    %c0_i32_302 = arith.constant 0 : i32
    %727 = vector.broadcast %c0_i32_302 : i32 to vector<1x256xi32>
    %728 = arith.cmpi sge, %726, %727 : vector<1x256xi32>
    %c1_i32_303 = arith.constant 1 : i32
    %729 = vector.broadcast %c1_i32_303 : i32 to vector<1x256xi32>
    %730 = arith.addi %702, %729 : vector<1x256xi32>
    %c16_i32_304 = arith.constant 16 : i32
    %731 = vector.broadcast %c16_i32_304 : i32 to vector<1x256xi32>
    %732 = arith.cmpi slt, %730, %731 : vector<1x256xi32>
    %733 = arith.andi %728, %732 : vector<1x256xi1>
    %cst_305 = arith.constant 0.000000e+00 : f32
    %734 = vector.broadcast %cst_305 : f32 to vector<16x256xf32>
    %735 = vector.shape_cast %733 : vector<1x256xi1> to vector<1x256xi1>
    %736 = vector.broadcast %735 : vector<1x256xi1> to vector<16x256xi1>
    %737 = arith.select %736, %724, %734 : vector<16x256xi1>, vector<16x256xf32>
    %cst_306 = arith.constant 0.000000e+00 : f32
    %738 = vector.broadcast %cst_306 : f32 to vector<16x1xf32>
    %739 = vector.extract_strided_slice %699 {offsets = [0, 0], sizes = [16, 255], strides = [1, 1]} : vector<16x256xf32> to vector<16x255xf32>
    %740 = tpu.concatenate %738, %739 in 1 : vector<16x1xf32>, vector<16x255xf32> -> vector<16x256xf32>
    %c-1_i32_307 = arith.constant -1 : i32
    %741 = vector.broadcast %c-1_i32_307 : i32 to vector<1x256xi32>
    %742 = arith.addi %702, %741 : vector<1x256xi32>
    %c0_i32_308 = arith.constant 0 : i32
    %743 = vector.broadcast %c0_i32_308 : i32 to vector<1x256xi32>
    %744 = arith.cmpi sge, %742, %743 : vector<1x256xi32>
    %c-1_i32_309 = arith.constant -1 : i32
    %745 = vector.broadcast %c-1_i32_309 : i32 to vector<1x256xi32>
    %746 = arith.addi %702, %745 : vector<1x256xi32>
    %c16_i32_310 = arith.constant 16 : i32
    %747 = vector.broadcast %c16_i32_310 : i32 to vector<1x256xi32>
    %748 = arith.cmpi slt, %746, %747 : vector<1x256xi32>
    %749 = arith.andi %744, %748 : vector<1x256xi1>
    %cst_311 = arith.constant 0.000000e+00 : f32
    %750 = vector.broadcast %cst_311 : f32 to vector<16x256xf32>
    %751 = vector.shape_cast %749 : vector<1x256xi1> to vector<1x256xi1>
    %752 = vector.broadcast %751 : vector<1x256xi1> to vector<16x256xi1>
    %753 = arith.select %752, %740, %750 : vector<16x256xi1>, vector<16x256xf32>
    %cst_312 = arith.constant 0.000000e+00 : f32
    %754 = vector.broadcast %cst_312 : f32 to vector<16x1xf32>
    %755 = vector.extract_strided_slice %699 {offsets = [0, 1], sizes = [16, 255], strides = [1, 1]} : vector<16x256xf32> to vector<16x255xf32>
    %756 = tpu.concatenate %755, %754 in 1 : vector<16x255xf32>, vector<16x1xf32> -> vector<16x256xf32>
    %c1_i32_313 = arith.constant 1 : i32
    %757 = vector.broadcast %c1_i32_313 : i32 to vector<1x256xi32>
    %758 = arith.addi %702, %757 : vector<1x256xi32>
    %c0_i32_314 = arith.constant 0 : i32
    %759 = vector.broadcast %c0_i32_314 : i32 to vector<1x256xi32>
    %760 = arith.cmpi sge, %758, %759 : vector<1x256xi32>
    %c1_i32_315 = arith.constant 1 : i32
    %761 = vector.broadcast %c1_i32_315 : i32 to vector<1x256xi32>
    %762 = arith.addi %702, %761 : vector<1x256xi32>
    %c16_i32_316 = arith.constant 16 : i32
    %763 = vector.broadcast %c16_i32_316 : i32 to vector<1x256xi32>
    %764 = arith.cmpi slt, %762, %763 : vector<1x256xi32>
    %765 = arith.andi %760, %764 : vector<1x256xi1>
    %cst_317 = arith.constant 0.000000e+00 : f32
    %766 = vector.broadcast %cst_317 : f32 to vector<16x256xf32>
    %767 = vector.shape_cast %765 : vector<1x256xi1> to vector<1x256xi1>
    %768 = vector.broadcast %767 : vector<1x256xi1> to vector<16x256xi1>
    %769 = arith.select %768, %756, %766 : vector<16x256xi1>, vector<16x256xf32>
    %cst_318 = arith.constant 0.000000e+00 : f32
    %770 = vector.broadcast %cst_318 : f32 to vector<16x15xf32>
    %771 = vector.extract_strided_slice %699 {offsets = [0, 15], sizes = [16, 241], strides = [1, 1]} : vector<16x256xf32> to vector<16x241xf32>
    %772 = tpu.concatenate %771, %770 in 1 : vector<16x241xf32>, vector<16x15xf32> -> vector<16x256xf32>
    %c-1_i32_319 = arith.constant -1 : i32
    %773 = vector.broadcast %c-1_i32_319 : i32 to vector<1x256xi32>
    %774 = arith.addi %702, %773 : vector<1x256xi32>
    %c0_i32_320 = arith.constant 0 : i32
    %775 = vector.broadcast %c0_i32_320 : i32 to vector<1x256xi32>
    %776 = arith.cmpi sge, %774, %775 : vector<1x256xi32>
    %c-1_i32_321 = arith.constant -1 : i32
    %777 = vector.broadcast %c-1_i32_321 : i32 to vector<1x256xi32>
    %778 = arith.addi %702, %777 : vector<1x256xi32>
    %c16_i32_322 = arith.constant 16 : i32
    %779 = vector.broadcast %c16_i32_322 : i32 to vector<1x256xi32>
    %780 = arith.cmpi slt, %778, %779 : vector<1x256xi32>
    %781 = arith.andi %776, %780 : vector<1x256xi1>
    %cst_323 = arith.constant 0.000000e+00 : f32
    %782 = vector.broadcast %cst_323 : f32 to vector<16x256xf32>
    %783 = vector.shape_cast %781 : vector<1x256xi1> to vector<1x256xi1>
    %784 = vector.broadcast %783 : vector<1x256xi1> to vector<16x256xi1>
    %785 = arith.select %784, %772, %782 : vector<16x256xi1>, vector<16x256xf32>
    %cst_324 = arith.constant 0.000000e+00 : f32
    %786 = vector.broadcast %cst_324 : f32 to vector<16x16xf32>
    %787 = vector.extract_strided_slice %699 {offsets = [0, 16], sizes = [16, 240], strides = [1, 1]} : vector<16x256xf32> to vector<16x240xf32>
    %788 = tpu.concatenate %787, %786 in 1 : vector<16x240xf32>, vector<16x16xf32> -> vector<16x256xf32>
    %cst_325 = arith.constant 0.000000e+00 : f32
    %789 = vector.broadcast %cst_325 : f32 to vector<16x17xf32>
    %790 = vector.extract_strided_slice %699 {offsets = [0, 17], sizes = [16, 239], strides = [1, 1]} : vector<16x256xf32> to vector<16x239xf32>
    %791 = tpu.concatenate %790, %789 in 1 : vector<16x239xf32>, vector<16x17xf32> -> vector<16x256xf32>
    %c1_i32_326 = arith.constant 1 : i32
    %792 = vector.broadcast %c1_i32_326 : i32 to vector<1x256xi32>
    %793 = arith.addi %702, %792 : vector<1x256xi32>
    %c0_i32_327 = arith.constant 0 : i32
    %794 = vector.broadcast %c0_i32_327 : i32 to vector<1x256xi32>
    %795 = arith.cmpi sge, %793, %794 : vector<1x256xi32>
    %c1_i32_328 = arith.constant 1 : i32
    %796 = vector.broadcast %c1_i32_328 : i32 to vector<1x256xi32>
    %797 = arith.addi %702, %796 : vector<1x256xi32>
    %c16_i32_329 = arith.constant 16 : i32
    %798 = vector.broadcast %c16_i32_329 : i32 to vector<1x256xi32>
    %799 = arith.cmpi slt, %797, %798 : vector<1x256xi32>
    %800 = arith.andi %795, %799 : vector<1x256xi1>
    %cst_330 = arith.constant 0.000000e+00 : f32
    %801 = vector.broadcast %cst_330 : f32 to vector<16x256xf32>
    %802 = vector.shape_cast %800 : vector<1x256xi1> to vector<1x256xi1>
    %803 = vector.broadcast %802 : vector<1x256xi1> to vector<16x256xi1>
    %804 = arith.select %803, %791, %801 : vector<16x256xi1>, vector<16x256xf32>
    %805 = tpu.concatenate %718, %721, %737, %753, %699, %769, %785, %788, %804 in 0 : vector<16x256xf32>, vector<16x256xf32>, vector<16x256xf32>, vector<16x256xf32>, vector<16x256xf32>, vector<16x256xf32>, vector<16x256xf32>, vector<16x256xf32>, vector<16x256xf32> -> vector<144x256xf32>
    %cst_331 = arith.constant dense<0.000000e+00> : vector<8x256xf32>
    %806 = tpu.matmul %693, %805, %cst_331 {dimension_numbers = #tpu.dot_dimension_numbers<[1], [0], [0], [1], [0, 0, 1, 1], [], []>} : vector<8x144xf32>, vector<144x256xf32>, vector<8x256xf32> -> vector<8x256xf32>
    %807 = vector.broadcast %694 : vector<8x1xf32> to vector<8x256xf32>
    %808 = arith.addf %806, %807 : vector<8x256xf32>
    %cst_332 = arith.constant 0.000000e+00 : f32
    %809 = vector.broadcast %cst_332 : f32 to vector<8x256xf32>
    %810 = arith.maximumf %808, %809 : vector<8x256xf32>
    %811 = tpu.concatenate %810, %691 in 0 : vector<8x256xf32>, vector<8x256xf32> -> vector<16x256xf32>
    %812 = tpu.iota {dimensions = array<i32: 1>} : vector<1x256xi32>
    %c15_i32_333 = arith.constant 15 : i32
    %813 = vector.broadcast %c15_i32_333 : i32 to vector<1x256xi32>
    %814 = arith.andi %812, %813 : vector<1x256xi32>
    %cst_334 = arith.constant 0.000000e+00 : f32
    %815 = vector.broadcast %cst_334 : f32 to vector<16x17xf32>
    %816 = vector.extract_strided_slice %811 {offsets = [0, 0], sizes = [16, 239], strides = [1, 1]} : vector<16x256xf32> to vector<16x239xf32>
    %817 = tpu.concatenate %815, %816 in 1 : vector<16x17xf32>, vector<16x239xf32> -> vector<16x256xf32>
    %c-1_i32_335 = arith.constant -1 : i32
    %818 = vector.broadcast %c-1_i32_335 : i32 to vector<1x256xi32>
    %819 = arith.addi %814, %818 : vector<1x256xi32>
    %c0_i32_336 = arith.constant 0 : i32
    %820 = vector.broadcast %c0_i32_336 : i32 to vector<1x256xi32>
    %821 = arith.cmpi sge, %819, %820 : vector<1x256xi32>
    %c-1_i32_337 = arith.constant -1 : i32
    %822 = vector.broadcast %c-1_i32_337 : i32 to vector<1x256xi32>
    %823 = arith.addi %814, %822 : vector<1x256xi32>
    %c16_i32_338 = arith.constant 16 : i32
    %824 = vector.broadcast %c16_i32_338 : i32 to vector<1x256xi32>
    %825 = arith.cmpi slt, %823, %824 : vector<1x256xi32>
    %826 = arith.andi %821, %825 : vector<1x256xi1>
    %cst_339 = arith.constant 0.000000e+00 : f32
    %827 = vector.broadcast %cst_339 : f32 to vector<16x256xf32>
    %828 = vector.shape_cast %826 : vector<1x256xi1> to vector<1x256xi1>
    %829 = vector.broadcast %828 : vector<1x256xi1> to vector<16x256xi1>
    %830 = arith.select %829, %817, %827 : vector<16x256xi1>, vector<16x256xf32>
    %cst_340 = arith.constant 0.000000e+00 : f32
    %831 = vector.broadcast %cst_340 : f32 to vector<16x16xf32>
    %832 = vector.extract_strided_slice %811 {offsets = [0, 0], sizes = [16, 240], strides = [1, 1]} : vector<16x256xf32> to vector<16x240xf32>
    %833 = tpu.concatenate %831, %832 in 1 : vector<16x16xf32>, vector<16x240xf32> -> vector<16x256xf32>
    %cst_341 = arith.constant 0.000000e+00 : f32
    %834 = vector.broadcast %cst_341 : f32 to vector<16x15xf32>
    %835 = vector.extract_strided_slice %811 {offsets = [0, 0], sizes = [16, 241], strides = [1, 1]} : vector<16x256xf32> to vector<16x241xf32>
    %836 = tpu.concatenate %834, %835 in 1 : vector<16x15xf32>, vector<16x241xf32> -> vector<16x256xf32>
    %c1_i32_342 = arith.constant 1 : i32
    %837 = vector.broadcast %c1_i32_342 : i32 to vector<1x256xi32>
    %838 = arith.addi %814, %837 : vector<1x256xi32>
    %c0_i32_343 = arith.constant 0 : i32
    %839 = vector.broadcast %c0_i32_343 : i32 to vector<1x256xi32>
    %840 = arith.cmpi sge, %838, %839 : vector<1x256xi32>
    %c1_i32_344 = arith.constant 1 : i32
    %841 = vector.broadcast %c1_i32_344 : i32 to vector<1x256xi32>
    %842 = arith.addi %814, %841 : vector<1x256xi32>
    %c16_i32_345 = arith.constant 16 : i32
    %843 = vector.broadcast %c16_i32_345 : i32 to vector<1x256xi32>
    %844 = arith.cmpi slt, %842, %843 : vector<1x256xi32>
    %845 = arith.andi %840, %844 : vector<1x256xi1>
    %cst_346 = arith.constant 0.000000e+00 : f32
    %846 = vector.broadcast %cst_346 : f32 to vector<16x256xf32>
    %847 = vector.shape_cast %845 : vector<1x256xi1> to vector<1x256xi1>
    %848 = vector.broadcast %847 : vector<1x256xi1> to vector<16x256xi1>
    %849 = arith.select %848, %836, %846 : vector<16x256xi1>, vector<16x256xf32>
    %cst_347 = arith.constant 0.000000e+00 : f32
    %850 = vector.broadcast %cst_347 : f32 to vector<16x1xf32>
    %851 = vector.extract_strided_slice %811 {offsets = [0, 0], sizes = [16, 255], strides = [1, 1]} : vector<16x256xf32> to vector<16x255xf32>
    %852 = tpu.concatenate %850, %851 in 1 : vector<16x1xf32>, vector<16x255xf32> -> vector<16x256xf32>
    %c-1_i32_348 = arith.constant -1 : i32
    %853 = vector.broadcast %c-1_i32_348 : i32 to vector<1x256xi32>
    %854 = arith.addi %814, %853 : vector<1x256xi32>
    %c0_i32_349 = arith.constant 0 : i32
    %855 = vector.broadcast %c0_i32_349 : i32 to vector<1x256xi32>
    %856 = arith.cmpi sge, %854, %855 : vector<1x256xi32>
    %c-1_i32_350 = arith.constant -1 : i32
    %857 = vector.broadcast %c-1_i32_350 : i32 to vector<1x256xi32>
    %858 = arith.addi %814, %857 : vector<1x256xi32>
    %c16_i32_351 = arith.constant 16 : i32
    %859 = vector.broadcast %c16_i32_351 : i32 to vector<1x256xi32>
    %860 = arith.cmpi slt, %858, %859 : vector<1x256xi32>
    %861 = arith.andi %856, %860 : vector<1x256xi1>
    %cst_352 = arith.constant 0.000000e+00 : f32
    %862 = vector.broadcast %cst_352 : f32 to vector<16x256xf32>
    %863 = vector.shape_cast %861 : vector<1x256xi1> to vector<1x256xi1>
    %864 = vector.broadcast %863 : vector<1x256xi1> to vector<16x256xi1>
    %865 = arith.select %864, %852, %862 : vector<16x256xi1>, vector<16x256xf32>
    %cst_353 = arith.constant 0.000000e+00 : f32
    %866 = vector.broadcast %cst_353 : f32 to vector<16x1xf32>
    %867 = vector.extract_strided_slice %811 {offsets = [0, 1], sizes = [16, 255], strides = [1, 1]} : vector<16x256xf32> to vector<16x255xf32>
    %868 = tpu.concatenate %867, %866 in 1 : vector<16x255xf32>, vector<16x1xf32> -> vector<16x256xf32>
    %c1_i32_354 = arith.constant 1 : i32
    %869 = vector.broadcast %c1_i32_354 : i32 to vector<1x256xi32>
    %870 = arith.addi %814, %869 : vector<1x256xi32>
    %c0_i32_355 = arith.constant 0 : i32
    %871 = vector.broadcast %c0_i32_355 : i32 to vector<1x256xi32>
    %872 = arith.cmpi sge, %870, %871 : vector<1x256xi32>
    %c1_i32_356 = arith.constant 1 : i32
    %873 = vector.broadcast %c1_i32_356 : i32 to vector<1x256xi32>
    %874 = arith.addi %814, %873 : vector<1x256xi32>
    %c16_i32_357 = arith.constant 16 : i32
    %875 = vector.broadcast %c16_i32_357 : i32 to vector<1x256xi32>
    %876 = arith.cmpi slt, %874, %875 : vector<1x256xi32>
    %877 = arith.andi %872, %876 : vector<1x256xi1>
    %cst_358 = arith.constant 0.000000e+00 : f32
    %878 = vector.broadcast %cst_358 : f32 to vector<16x256xf32>
    %879 = vector.shape_cast %877 : vector<1x256xi1> to vector<1x256xi1>
    %880 = vector.broadcast %879 : vector<1x256xi1> to vector<16x256xi1>
    %881 = arith.select %880, %868, %878 : vector<16x256xi1>, vector<16x256xf32>
    %cst_359 = arith.constant 0.000000e+00 : f32
    %882 = vector.broadcast %cst_359 : f32 to vector<16x15xf32>
    %883 = vector.extract_strided_slice %811 {offsets = [0, 15], sizes = [16, 241], strides = [1, 1]} : vector<16x256xf32> to vector<16x241xf32>
    %884 = tpu.concatenate %883, %882 in 1 : vector<16x241xf32>, vector<16x15xf32> -> vector<16x256xf32>
    %c-1_i32_360 = arith.constant -1 : i32
    %885 = vector.broadcast %c-1_i32_360 : i32 to vector<1x256xi32>
    %886 = arith.addi %814, %885 : vector<1x256xi32>
    %c0_i32_361 = arith.constant 0 : i32
    %887 = vector.broadcast %c0_i32_361 : i32 to vector<1x256xi32>
    %888 = arith.cmpi sge, %886, %887 : vector<1x256xi32>
    %c-1_i32_362 = arith.constant -1 : i32
    %889 = vector.broadcast %c-1_i32_362 : i32 to vector<1x256xi32>
    %890 = arith.addi %814, %889 : vector<1x256xi32>
    %c16_i32_363 = arith.constant 16 : i32
    %891 = vector.broadcast %c16_i32_363 : i32 to vector<1x256xi32>
    %892 = arith.cmpi slt, %890, %891 : vector<1x256xi32>
    %893 = arith.andi %888, %892 : vector<1x256xi1>
    %cst_364 = arith.constant 0.000000e+00 : f32
    %894 = vector.broadcast %cst_364 : f32 to vector<16x256xf32>
    %895 = vector.shape_cast %893 : vector<1x256xi1> to vector<1x256xi1>
    %896 = vector.broadcast %895 : vector<1x256xi1> to vector<16x256xi1>
    %897 = arith.select %896, %884, %894 : vector<16x256xi1>, vector<16x256xf32>
    %cst_365 = arith.constant 0.000000e+00 : f32
    %898 = vector.broadcast %cst_365 : f32 to vector<16x16xf32>
    %899 = vector.extract_strided_slice %811 {offsets = [0, 16], sizes = [16, 240], strides = [1, 1]} : vector<16x256xf32> to vector<16x240xf32>
    %900 = tpu.concatenate %899, %898 in 1 : vector<16x240xf32>, vector<16x16xf32> -> vector<16x256xf32>
    %cst_366 = arith.constant 0.000000e+00 : f32
    %901 = vector.broadcast %cst_366 : f32 to vector<16x17xf32>
    %902 = vector.extract_strided_slice %811 {offsets = [0, 17], sizes = [16, 239], strides = [1, 1]} : vector<16x256xf32> to vector<16x239xf32>
    %903 = tpu.concatenate %902, %901 in 1 : vector<16x239xf32>, vector<16x17xf32> -> vector<16x256xf32>
    %c1_i32_367 = arith.constant 1 : i32
    %904 = vector.broadcast %c1_i32_367 : i32 to vector<1x256xi32>
    %905 = arith.addi %814, %904 : vector<1x256xi32>
    %c0_i32_368 = arith.constant 0 : i32
    %906 = vector.broadcast %c0_i32_368 : i32 to vector<1x256xi32>
    %907 = arith.cmpi sge, %905, %906 : vector<1x256xi32>
    %c1_i32_369 = arith.constant 1 : i32
    %908 = vector.broadcast %c1_i32_369 : i32 to vector<1x256xi32>
    %909 = arith.addi %814, %908 : vector<1x256xi32>
    %c16_i32_370 = arith.constant 16 : i32
    %910 = vector.broadcast %c16_i32_370 : i32 to vector<1x256xi32>
    %911 = arith.cmpi slt, %909, %910 : vector<1x256xi32>
    %912 = arith.andi %907, %911 : vector<1x256xi1>
    %cst_371 = arith.constant 0.000000e+00 : f32
    %913 = vector.broadcast %cst_371 : f32 to vector<16x256xf32>
    %914 = vector.shape_cast %912 : vector<1x256xi1> to vector<1x256xi1>
    %915 = vector.broadcast %914 : vector<1x256xi1> to vector<16x256xi1>
    %916 = arith.select %915, %903, %913 : vector<16x256xi1>, vector<16x256xf32>
    %917 = tpu.concatenate %830, %833, %849, %865, %811, %881, %897, %900, %916 in 0 : vector<16x256xf32>, vector<16x256xf32>, vector<16x256xf32>, vector<16x256xf32>, vector<16x256xf32>, vector<16x256xf32>, vector<16x256xf32>, vector<16x256xf32>, vector<16x256xf32> -> vector<144x256xf32>
    %cst_372 = arith.constant dense<0.000000e+00> : vector<8x256xf32>
    %918 = tpu.matmul %695, %917, %cst_372 {dimension_numbers = #tpu.dot_dimension_numbers<[1], [0], [0], [1], [0, 0, 1, 1], [], []>} : vector<8x144xf32>, vector<144x256xf32>, vector<8x256xf32> -> vector<8x256xf32>
    %919 = vector.broadcast %696 : vector<8x1xf32> to vector<8x256xf32>
    %920 = arith.addf %918, %919 : vector<8x256xf32>
    %cst_373 = arith.constant 0.000000e+00 : f32
    %921 = vector.broadcast %cst_373 : f32 to vector<8x256xf32>
    %922 = arith.maximumf %920, %921 : vector<8x256xf32>
    %923 = tpu.iota {dimensions = array<i32: 1>} : vector<1x256xi32>
    %c15_i32_374 = arith.constant 15 : i32
    %924 = vector.broadcast %c15_i32_374 : i32 to vector<1x256xi32>
    %925 = arith.andi %923, %924 : vector<1x256xi32>
    %cst_375 = arith.constant 0.000000e+00 : f32
    %926 = vector.broadcast %cst_375 : f32 to vector<8x17xf32>
    %927 = vector.extract_strided_slice %922 {offsets = [0, 0], sizes = [8, 239], strides = [1, 1]} : vector<8x256xf32> to vector<8x239xf32>
    %928 = tpu.concatenate %926, %927 in 1 : vector<8x17xf32>, vector<8x239xf32> -> vector<8x256xf32>
    %c-1_i32_376 = arith.constant -1 : i32
    %929 = vector.broadcast %c-1_i32_376 : i32 to vector<1x256xi32>
    %930 = arith.addi %925, %929 : vector<1x256xi32>
    %c0_i32_377 = arith.constant 0 : i32
    %931 = vector.broadcast %c0_i32_377 : i32 to vector<1x256xi32>
    %932 = arith.cmpi sge, %930, %931 : vector<1x256xi32>
    %c-1_i32_378 = arith.constant -1 : i32
    %933 = vector.broadcast %c-1_i32_378 : i32 to vector<1x256xi32>
    %934 = arith.addi %925, %933 : vector<1x256xi32>
    %c16_i32_379 = arith.constant 16 : i32
    %935 = vector.broadcast %c16_i32_379 : i32 to vector<1x256xi32>
    %936 = arith.cmpi slt, %934, %935 : vector<1x256xi32>
    %937 = arith.andi %932, %936 : vector<1x256xi1>
    %cst_380 = arith.constant 0.000000e+00 : f32
    %938 = vector.broadcast %cst_380 : f32 to vector<8x256xf32>
    %939 = vector.shape_cast %937 : vector<1x256xi1> to vector<1x256xi1>
    %940 = vector.broadcast %939 : vector<1x256xi1> to vector<8x256xi1>
    %941 = arith.select %940, %928, %938 : vector<8x256xi1>, vector<8x256xf32>
    %cst_381 = arith.constant 0.000000e+00 : f32
    %942 = vector.broadcast %cst_381 : f32 to vector<8x16xf32>
    %943 = vector.extract_strided_slice %922 {offsets = [0, 0], sizes = [8, 240], strides = [1, 1]} : vector<8x256xf32> to vector<8x240xf32>
    %944 = tpu.concatenate %942, %943 in 1 : vector<8x16xf32>, vector<8x240xf32> -> vector<8x256xf32>
    %cst_382 = arith.constant 0.000000e+00 : f32
    %945 = vector.broadcast %cst_382 : f32 to vector<8x15xf32>
    %946 = vector.extract_strided_slice %922 {offsets = [0, 0], sizes = [8, 241], strides = [1, 1]} : vector<8x256xf32> to vector<8x241xf32>
    %947 = tpu.concatenate %945, %946 in 1 : vector<8x15xf32>, vector<8x241xf32> -> vector<8x256xf32>
    %c1_i32_383 = arith.constant 1 : i32
    %948 = vector.broadcast %c1_i32_383 : i32 to vector<1x256xi32>
    %949 = arith.addi %925, %948 : vector<1x256xi32>
    %c0_i32_384 = arith.constant 0 : i32
    %950 = vector.broadcast %c0_i32_384 : i32 to vector<1x256xi32>
    %951 = arith.cmpi sge, %949, %950 : vector<1x256xi32>
    %c1_i32_385 = arith.constant 1 : i32
    %952 = vector.broadcast %c1_i32_385 : i32 to vector<1x256xi32>
    %953 = arith.addi %925, %952 : vector<1x256xi32>
    %c16_i32_386 = arith.constant 16 : i32
    %954 = vector.broadcast %c16_i32_386 : i32 to vector<1x256xi32>
    %955 = arith.cmpi slt, %953, %954 : vector<1x256xi32>
    %956 = arith.andi %951, %955 : vector<1x256xi1>
    %cst_387 = arith.constant 0.000000e+00 : f32
    %957 = vector.broadcast %cst_387 : f32 to vector<8x256xf32>
    %958 = vector.shape_cast %956 : vector<1x256xi1> to vector<1x256xi1>
    %959 = vector.broadcast %958 : vector<1x256xi1> to vector<8x256xi1>
    %960 = arith.select %959, %947, %957 : vector<8x256xi1>, vector<8x256xf32>
    %cst_388 = arith.constant 0.000000e+00 : f32
    %961 = vector.broadcast %cst_388 : f32 to vector<8x1xf32>
    %962 = vector.extract_strided_slice %922 {offsets = [0, 0], sizes = [8, 255], strides = [1, 1]} : vector<8x256xf32> to vector<8x255xf32>
    %963 = tpu.concatenate %961, %962 in 1 : vector<8x1xf32>, vector<8x255xf32> -> vector<8x256xf32>
    %c-1_i32_389 = arith.constant -1 : i32
    %964 = vector.broadcast %c-1_i32_389 : i32 to vector<1x256xi32>
    %965 = arith.addi %925, %964 : vector<1x256xi32>
    %c0_i32_390 = arith.constant 0 : i32
    %966 = vector.broadcast %c0_i32_390 : i32 to vector<1x256xi32>
    %967 = arith.cmpi sge, %965, %966 : vector<1x256xi32>
    %c-1_i32_391 = arith.constant -1 : i32
    %968 = vector.broadcast %c-1_i32_391 : i32 to vector<1x256xi32>
    %969 = arith.addi %925, %968 : vector<1x256xi32>
    %c16_i32_392 = arith.constant 16 : i32
    %970 = vector.broadcast %c16_i32_392 : i32 to vector<1x256xi32>
    %971 = arith.cmpi slt, %969, %970 : vector<1x256xi32>
    %972 = arith.andi %967, %971 : vector<1x256xi1>
    %cst_393 = arith.constant 0.000000e+00 : f32
    %973 = vector.broadcast %cst_393 : f32 to vector<8x256xf32>
    %974 = vector.shape_cast %972 : vector<1x256xi1> to vector<1x256xi1>
    %975 = vector.broadcast %974 : vector<1x256xi1> to vector<8x256xi1>
    %976 = arith.select %975, %963, %973 : vector<8x256xi1>, vector<8x256xf32>
    %cst_394 = arith.constant 0.000000e+00 : f32
    %977 = vector.broadcast %cst_394 : f32 to vector<8x1xf32>
    %978 = vector.extract_strided_slice %922 {offsets = [0, 1], sizes = [8, 255], strides = [1, 1]} : vector<8x256xf32> to vector<8x255xf32>
    %979 = tpu.concatenate %978, %977 in 1 : vector<8x255xf32>, vector<8x1xf32> -> vector<8x256xf32>
    %c1_i32_395 = arith.constant 1 : i32
    %980 = vector.broadcast %c1_i32_395 : i32 to vector<1x256xi32>
    %981 = arith.addi %925, %980 : vector<1x256xi32>
    %c0_i32_396 = arith.constant 0 : i32
    %982 = vector.broadcast %c0_i32_396 : i32 to vector<1x256xi32>
    %983 = arith.cmpi sge, %981, %982 : vector<1x256xi32>
    %c1_i32_397 = arith.constant 1 : i32
    %984 = vector.broadcast %c1_i32_397 : i32 to vector<1x256xi32>
    %985 = arith.addi %925, %984 : vector<1x256xi32>
    %c16_i32_398 = arith.constant 16 : i32
    %986 = vector.broadcast %c16_i32_398 : i32 to vector<1x256xi32>
    %987 = arith.cmpi slt, %985, %986 : vector<1x256xi32>
    %988 = arith.andi %983, %987 : vector<1x256xi1>
    %cst_399 = arith.constant 0.000000e+00 : f32
    %989 = vector.broadcast %cst_399 : f32 to vector<8x256xf32>
    %990 = vector.shape_cast %988 : vector<1x256xi1> to vector<1x256xi1>
    %991 = vector.broadcast %990 : vector<1x256xi1> to vector<8x256xi1>
    %992 = arith.select %991, %979, %989 : vector<8x256xi1>, vector<8x256xf32>
    %cst_400 = arith.constant 0.000000e+00 : f32
    %993 = vector.broadcast %cst_400 : f32 to vector<8x15xf32>
    %994 = vector.extract_strided_slice %922 {offsets = [0, 15], sizes = [8, 241], strides = [1, 1]} : vector<8x256xf32> to vector<8x241xf32>
    %995 = tpu.concatenate %994, %993 in 1 : vector<8x241xf32>, vector<8x15xf32> -> vector<8x256xf32>
    %c-1_i32_401 = arith.constant -1 : i32
    %996 = vector.broadcast %c-1_i32_401 : i32 to vector<1x256xi32>
    %997 = arith.addi %925, %996 : vector<1x256xi32>
    %c0_i32_402 = arith.constant 0 : i32
    %998 = vector.broadcast %c0_i32_402 : i32 to vector<1x256xi32>
    %999 = arith.cmpi sge, %997, %998 : vector<1x256xi32>
    %c-1_i32_403 = arith.constant -1 : i32
    %1000 = vector.broadcast %c-1_i32_403 : i32 to vector<1x256xi32>
    %1001 = arith.addi %925, %1000 : vector<1x256xi32>
    %c16_i32_404 = arith.constant 16 : i32
    %1002 = vector.broadcast %c16_i32_404 : i32 to vector<1x256xi32>
    %1003 = arith.cmpi slt, %1001, %1002 : vector<1x256xi32>
    %1004 = arith.andi %999, %1003 : vector<1x256xi1>
    %cst_405 = arith.constant 0.000000e+00 : f32
    %1005 = vector.broadcast %cst_405 : f32 to vector<8x256xf32>
    %1006 = vector.shape_cast %1004 : vector<1x256xi1> to vector<1x256xi1>
    %1007 = vector.broadcast %1006 : vector<1x256xi1> to vector<8x256xi1>
    %1008 = arith.select %1007, %995, %1005 : vector<8x256xi1>, vector<8x256xf32>
    %cst_406 = arith.constant 0.000000e+00 : f32
    %1009 = vector.broadcast %cst_406 : f32 to vector<8x16xf32>
    %1010 = vector.extract_strided_slice %922 {offsets = [0, 16], sizes = [8, 240], strides = [1, 1]} : vector<8x256xf32> to vector<8x240xf32>
    %1011 = tpu.concatenate %1010, %1009 in 1 : vector<8x240xf32>, vector<8x16xf32> -> vector<8x256xf32>
    %cst_407 = arith.constant 0.000000e+00 : f32
    %1012 = vector.broadcast %cst_407 : f32 to vector<8x17xf32>
    %1013 = vector.extract_strided_slice %922 {offsets = [0, 17], sizes = [8, 239], strides = [1, 1]} : vector<8x256xf32> to vector<8x239xf32>
    %1014 = tpu.concatenate %1013, %1012 in 1 : vector<8x239xf32>, vector<8x17xf32> -> vector<8x256xf32>
    %c1_i32_408 = arith.constant 1 : i32
    %1015 = vector.broadcast %c1_i32_408 : i32 to vector<1x256xi32>
    %1016 = arith.addi %925, %1015 : vector<1x256xi32>
    %c0_i32_409 = arith.constant 0 : i32
    %1017 = vector.broadcast %c0_i32_409 : i32 to vector<1x256xi32>
    %1018 = arith.cmpi sge, %1016, %1017 : vector<1x256xi32>
    %c1_i32_410 = arith.constant 1 : i32
    %1019 = vector.broadcast %c1_i32_410 : i32 to vector<1x256xi32>
    %1020 = arith.addi %925, %1019 : vector<1x256xi32>
    %c16_i32_411 = arith.constant 16 : i32
    %1021 = vector.broadcast %c16_i32_411 : i32 to vector<1x256xi32>
    %1022 = arith.cmpi slt, %1020, %1021 : vector<1x256xi32>
    %1023 = arith.andi %1018, %1022 : vector<1x256xi1>
    %cst_412 = arith.constant 0.000000e+00 : f32
    %1024 = vector.broadcast %cst_412 : f32 to vector<8x256xf32>
    %1025 = vector.shape_cast %1023 : vector<1x256xi1> to vector<1x256xi1>
    %1026 = vector.broadcast %1025 : vector<1x256xi1> to vector<8x256xi1>
    %1027 = arith.select %1026, %1014, %1024 : vector<8x256xi1>, vector<8x256xf32>
    %1028 = tpu.concatenate %941, %944, %960, %976, %922, %992, %1008, %1011, %1027 in 0 : vector<8x256xf32>, vector<8x256xf32>, vector<8x256xf32>, vector<8x256xf32>, vector<8x256xf32>, vector<8x256xf32>, vector<8x256xf32>, vector<8x256xf32>, vector<8x256xf32> -> vector<72x256xf32>
    %cst_413 = arith.constant dense<0.000000e+00> : vector<8x256xf32>
    %1029 = tpu.matmul %697, %1028, %cst_413 {dimension_numbers = #tpu.dot_dimension_numbers<[1], [0], [0], [1], [0, 0, 1, 1], [], []>} : vector<8x72xf32>, vector<72x256xf32>, vector<8x256xf32> -> vector<8x256xf32>
    %1030 = vector.broadcast %698 : vector<8x1xf32> to vector<8x256xf32>
    %1031 = arith.addf %1029, %1030 : vector<8x256xf32>
    %cst_414 = arith.constant 0.000000e+00 : f32
    %1032 = vector.broadcast %cst_414 : f32 to vector<8x256xf32>
    %1033 = arith.maximumf %1031, %1032 : vector<8x256xf32>
    %c0_415 = arith.constant 0 : index
    %c0_416 = arith.constant 0 : index
    %c0_417 = arith.constant 0 : index
    %1034 = vector.load %arg5[%c0_415, %c0_416, %c0_417] : memref<1x4x1024xf32, #tpu.memory_space<vmem>>, vector<1x4x1024xf32>
    %1035 = vector.shape_cast %1034 : vector<1x4x1024xf32> to vector<4x1024xf32>
    %c0_418 = arith.constant 0 : index
    %c0_419 = arith.constant 0 : index
    %1036 = vector.load %arg27[%c0_418, %c0_419] : memref<256x1024xf32, #tpu.memory_space<vmem>>, vector<256x1024xf32>
    %c0_420 = arith.constant 0 : index
    %c0_421 = arith.constant 0 : index
    %1037 = vector.load %arg28[%c0_420, %c0_421] : memref<4x72xf32, #tpu.memory_space<vmem>>, vector<4x72xf32>
    %c0_422 = arith.constant 0 : index
    %c0_423 = arith.constant 0 : index
    %1038 = vector.load %arg29[%c0_422, %c0_423] : memref<4x1xf32, #tpu.memory_space<vmem>>, vector<4x1xf32>
    %c0_424 = arith.constant 0 : index
    %c0_425 = arith.constant 0 : index
    %1039 = vector.load %arg30[%c0_424, %c0_425] : memref<4x72xf32, #tpu.memory_space<vmem>>, vector<4x72xf32>
    %c0_426 = arith.constant 0 : index
    %c0_427 = arith.constant 0 : index
    %1040 = vector.load %arg31[%c0_426, %c0_427] : memref<4x1xf32, #tpu.memory_space<vmem>>, vector<4x1xf32>
    %c0_428 = arith.constant 0 : index
    %c0_429 = arith.constant 0 : index
    %1041 = vector.load %arg32[%c0_428, %c0_429] : memref<4x36xf32, #tpu.memory_space<vmem>>, vector<4x36xf32>
    %c0_430 = arith.constant 0 : index
    %c0_431 = arith.constant 0 : index
    %1042 = vector.load %arg33[%c0_430, %c0_431] : memref<4x1xf32, #tpu.memory_space<vmem>>, vector<4x1xf32>
    %cst_432 = arith.constant dense<0.000000e+00> : vector<8x1024xf32>
    %1043 = tpu.matmul %1033, %1036, %cst_432 {dimension_numbers = #tpu.dot_dimension_numbers<[1], [0], [0], [1], [0, 0, 1, 1], [], []>} : vector<8x256xf32>, vector<256x1024xf32>, vector<8x1024xf32> -> vector<8x1024xf32>
    %1044 = tpu.iota {dimensions = array<i32: 1>} : vector<1x1024xi32>
    %c31_i32 = arith.constant 31 : i32
    %1045 = vector.broadcast %c31_i32 : i32 to vector<1x1024xi32>
    %1046 = arith.andi %1044, %1045 : vector<1x1024xi32>
    %cst_433 = arith.constant 0.000000e+00 : f32
    %1047 = vector.broadcast %cst_433 : f32 to vector<8x33xf32>
    %1048 = vector.extract_strided_slice %1043 {offsets = [0, 0], sizes = [8, 991], strides = [1, 1]} : vector<8x1024xf32> to vector<8x991xf32>
    %1049 = tpu.concatenate %1047, %1048 in 1 : vector<8x33xf32>, vector<8x991xf32> -> vector<8x1024xf32>
    %c-1_i32_434 = arith.constant -1 : i32
    %1050 = vector.broadcast %c-1_i32_434 : i32 to vector<1x1024xi32>
    %1051 = arith.addi %1046, %1050 : vector<1x1024xi32>
    %c0_i32_435 = arith.constant 0 : i32
    %1052 = vector.broadcast %c0_i32_435 : i32 to vector<1x1024xi32>
    %1053 = arith.cmpi sge, %1051, %1052 : vector<1x1024xi32>
    %c-1_i32_436 = arith.constant -1 : i32
    %1054 = vector.broadcast %c-1_i32_436 : i32 to vector<1x1024xi32>
    %1055 = arith.addi %1046, %1054 : vector<1x1024xi32>
    %c32_i32 = arith.constant 32 : i32
    %1056 = vector.broadcast %c32_i32 : i32 to vector<1x1024xi32>
    %1057 = arith.cmpi slt, %1055, %1056 : vector<1x1024xi32>
    %1058 = arith.andi %1053, %1057 : vector<1x1024xi1>
    %cst_437 = arith.constant 0.000000e+00 : f32
    %1059 = vector.broadcast %cst_437 : f32 to vector<8x1024xf32>
    %1060 = vector.shape_cast %1058 : vector<1x1024xi1> to vector<1x1024xi1>
    %1061 = vector.broadcast %1060 : vector<1x1024xi1> to vector<8x1024xi1>
    %1062 = arith.select %1061, %1049, %1059 : vector<8x1024xi1>, vector<8x1024xf32>
    %cst_438 = arith.constant 0.000000e+00 : f32
    %1063 = vector.broadcast %cst_438 : f32 to vector<8x32xf32>
    %1064 = vector.extract_strided_slice %1043 {offsets = [0, 0], sizes = [8, 992], strides = [1, 1]} : vector<8x1024xf32> to vector<8x992xf32>
    %1065 = tpu.concatenate %1063, %1064 in 1 : vector<8x32xf32>, vector<8x992xf32> -> vector<8x1024xf32>
    %cst_439 = arith.constant 0.000000e+00 : f32
    %1066 = vector.broadcast %cst_439 : f32 to vector<8x31xf32>
    %1067 = vector.extract_strided_slice %1043 {offsets = [0, 0], sizes = [8, 993], strides = [1, 1]} : vector<8x1024xf32> to vector<8x993xf32>
    %1068 = tpu.concatenate %1066, %1067 in 1 : vector<8x31xf32>, vector<8x993xf32> -> vector<8x1024xf32>
    %c1_i32_440 = arith.constant 1 : i32
    %1069 = vector.broadcast %c1_i32_440 : i32 to vector<1x1024xi32>
    %1070 = arith.addi %1046, %1069 : vector<1x1024xi32>
    %c0_i32_441 = arith.constant 0 : i32
    %1071 = vector.broadcast %c0_i32_441 : i32 to vector<1x1024xi32>
    %1072 = arith.cmpi sge, %1070, %1071 : vector<1x1024xi32>
    %c1_i32_442 = arith.constant 1 : i32
    %1073 = vector.broadcast %c1_i32_442 : i32 to vector<1x1024xi32>
    %1074 = arith.addi %1046, %1073 : vector<1x1024xi32>
    %c32_i32_443 = arith.constant 32 : i32
    %1075 = vector.broadcast %c32_i32_443 : i32 to vector<1x1024xi32>
    %1076 = arith.cmpi slt, %1074, %1075 : vector<1x1024xi32>
    %1077 = arith.andi %1072, %1076 : vector<1x1024xi1>
    %cst_444 = arith.constant 0.000000e+00 : f32
    %1078 = vector.broadcast %cst_444 : f32 to vector<8x1024xf32>
    %1079 = vector.shape_cast %1077 : vector<1x1024xi1> to vector<1x1024xi1>
    %1080 = vector.broadcast %1079 : vector<1x1024xi1> to vector<8x1024xi1>
    %1081 = arith.select %1080, %1068, %1078 : vector<8x1024xi1>, vector<8x1024xf32>
    %cst_445 = arith.constant 0.000000e+00 : f32
    %1082 = vector.broadcast %cst_445 : f32 to vector<8x1xf32>
    %1083 = vector.extract_strided_slice %1043 {offsets = [0, 0], sizes = [8, 1023], strides = [1, 1]} : vector<8x1024xf32> to vector<8x1023xf32>
    %1084 = tpu.concatenate %1082, %1083 in 1 : vector<8x1xf32>, vector<8x1023xf32> -> vector<8x1024xf32>
    %c-1_i32_446 = arith.constant -1 : i32
    %1085 = vector.broadcast %c-1_i32_446 : i32 to vector<1x1024xi32>
    %1086 = arith.addi %1046, %1085 : vector<1x1024xi32>
    %c0_i32_447 = arith.constant 0 : i32
    %1087 = vector.broadcast %c0_i32_447 : i32 to vector<1x1024xi32>
    %1088 = arith.cmpi sge, %1086, %1087 : vector<1x1024xi32>
    %c-1_i32_448 = arith.constant -1 : i32
    %1089 = vector.broadcast %c-1_i32_448 : i32 to vector<1x1024xi32>
    %1090 = arith.addi %1046, %1089 : vector<1x1024xi32>
    %c32_i32_449 = arith.constant 32 : i32
    %1091 = vector.broadcast %c32_i32_449 : i32 to vector<1x1024xi32>
    %1092 = arith.cmpi slt, %1090, %1091 : vector<1x1024xi32>
    %1093 = arith.andi %1088, %1092 : vector<1x1024xi1>
    %cst_450 = arith.constant 0.000000e+00 : f32
    %1094 = vector.broadcast %cst_450 : f32 to vector<8x1024xf32>
    %1095 = vector.shape_cast %1093 : vector<1x1024xi1> to vector<1x1024xi1>
    %1096 = vector.broadcast %1095 : vector<1x1024xi1> to vector<8x1024xi1>
    %1097 = arith.select %1096, %1084, %1094 : vector<8x1024xi1>, vector<8x1024xf32>
    %cst_451 = arith.constant 0.000000e+00 : f32
    %1098 = vector.broadcast %cst_451 : f32 to vector<8x1xf32>
    %1099 = vector.extract_strided_slice %1043 {offsets = [0, 1], sizes = [8, 1023], strides = [1, 1]} : vector<8x1024xf32> to vector<8x1023xf32>
    %1100 = tpu.concatenate %1099, %1098 in 1 : vector<8x1023xf32>, vector<8x1xf32> -> vector<8x1024xf32>
    %c1_i32_452 = arith.constant 1 : i32
    %1101 = vector.broadcast %c1_i32_452 : i32 to vector<1x1024xi32>
    %1102 = arith.addi %1046, %1101 : vector<1x1024xi32>
    %c0_i32_453 = arith.constant 0 : i32
    %1103 = vector.broadcast %c0_i32_453 : i32 to vector<1x1024xi32>
    %1104 = arith.cmpi sge, %1102, %1103 : vector<1x1024xi32>
    %c1_i32_454 = arith.constant 1 : i32
    %1105 = vector.broadcast %c1_i32_454 : i32 to vector<1x1024xi32>
    %1106 = arith.addi %1046, %1105 : vector<1x1024xi32>
    %c32_i32_455 = arith.constant 32 : i32
    %1107 = vector.broadcast %c32_i32_455 : i32 to vector<1x1024xi32>
    %1108 = arith.cmpi slt, %1106, %1107 : vector<1x1024xi32>
    %1109 = arith.andi %1104, %1108 : vector<1x1024xi1>
    %cst_456 = arith.constant 0.000000e+00 : f32
    %1110 = vector.broadcast %cst_456 : f32 to vector<8x1024xf32>
    %1111 = vector.shape_cast %1109 : vector<1x1024xi1> to vector<1x1024xi1>
    %1112 = vector.broadcast %1111 : vector<1x1024xi1> to vector<8x1024xi1>
    %1113 = arith.select %1112, %1100, %1110 : vector<8x1024xi1>, vector<8x1024xf32>
    %cst_457 = arith.constant 0.000000e+00 : f32
    %1114 = vector.broadcast %cst_457 : f32 to vector<8x31xf32>
    %1115 = vector.extract_strided_slice %1043 {offsets = [0, 31], sizes = [8, 993], strides = [1, 1]} : vector<8x1024xf32> to vector<8x993xf32>
    %1116 = tpu.concatenate %1115, %1114 in 1 : vector<8x993xf32>, vector<8x31xf32> -> vector<8x1024xf32>
    %c-1_i32_458 = arith.constant -1 : i32
    %1117 = vector.broadcast %c-1_i32_458 : i32 to vector<1x1024xi32>
    %1118 = arith.addi %1046, %1117 : vector<1x1024xi32>
    %c0_i32_459 = arith.constant 0 : i32
    %1119 = vector.broadcast %c0_i32_459 : i32 to vector<1x1024xi32>
    %1120 = arith.cmpi sge, %1118, %1119 : vector<1x1024xi32>
    %c-1_i32_460 = arith.constant -1 : i32
    %1121 = vector.broadcast %c-1_i32_460 : i32 to vector<1x1024xi32>
    %1122 = arith.addi %1046, %1121 : vector<1x1024xi32>
    %c32_i32_461 = arith.constant 32 : i32
    %1123 = vector.broadcast %c32_i32_461 : i32 to vector<1x1024xi32>
    %1124 = arith.cmpi slt, %1122, %1123 : vector<1x1024xi32>
    %1125 = arith.andi %1120, %1124 : vector<1x1024xi1>
    %cst_462 = arith.constant 0.000000e+00 : f32
    %1126 = vector.broadcast %cst_462 : f32 to vector<8x1024xf32>
    %1127 = vector.shape_cast %1125 : vector<1x1024xi1> to vector<1x1024xi1>
    %1128 = vector.broadcast %1127 : vector<1x1024xi1> to vector<8x1024xi1>
    %1129 = arith.select %1128, %1116, %1126 : vector<8x1024xi1>, vector<8x1024xf32>
    %cst_463 = arith.constant 0.000000e+00 : f32
    %1130 = vector.broadcast %cst_463 : f32 to vector<8x32xf32>
    %1131 = vector.extract_strided_slice %1043 {offsets = [0, 32], sizes = [8, 992], strides = [1, 1]} : vector<8x1024xf32> to vector<8x992xf32>
    %1132 = tpu.concatenate %1131, %1130 in 1 : vector<8x992xf32>, vector<8x32xf32> -> vector<8x1024xf32>
    %cst_464 = arith.constant 0.000000e+00 : f32
    %1133 = vector.broadcast %cst_464 : f32 to vector<8x33xf32>
    %1134 = vector.extract_strided_slice %1043 {offsets = [0, 33], sizes = [8, 991], strides = [1, 1]} : vector<8x1024xf32> to vector<8x991xf32>
    %1135 = tpu.concatenate %1134, %1133 in 1 : vector<8x991xf32>, vector<8x33xf32> -> vector<8x1024xf32>
    %c1_i32_465 = arith.constant 1 : i32
    %1136 = vector.broadcast %c1_i32_465 : i32 to vector<1x1024xi32>
    %1137 = arith.addi %1046, %1136 : vector<1x1024xi32>
    %c0_i32_466 = arith.constant 0 : i32
    %1138 = vector.broadcast %c0_i32_466 : i32 to vector<1x1024xi32>
    %1139 = arith.cmpi sge, %1137, %1138 : vector<1x1024xi32>
    %c1_i32_467 = arith.constant 1 : i32
    %1140 = vector.broadcast %c1_i32_467 : i32 to vector<1x1024xi32>
    %1141 = arith.addi %1046, %1140 : vector<1x1024xi32>
    %c32_i32_468 = arith.constant 32 : i32
    %1142 = vector.broadcast %c32_i32_468 : i32 to vector<1x1024xi32>
    %1143 = arith.cmpi slt, %1141, %1142 : vector<1x1024xi32>
    %1144 = arith.andi %1139, %1143 : vector<1x1024xi1>
    %cst_469 = arith.constant 0.000000e+00 : f32
    %1145 = vector.broadcast %cst_469 : f32 to vector<8x1024xf32>
    %1146 = vector.shape_cast %1144 : vector<1x1024xi1> to vector<1x1024xi1>
    %1147 = vector.broadcast %1146 : vector<1x1024xi1> to vector<8x1024xi1>
    %1148 = arith.select %1147, %1135, %1145 : vector<8x1024xi1>, vector<8x1024xf32>
    %1149 = tpu.concatenate %1062, %1065, %1081, %1097, %1043, %1113, %1129, %1132, %1148 in 0 : vector<8x1024xf32>, vector<8x1024xf32>, vector<8x1024xf32>, vector<8x1024xf32>, vector<8x1024xf32>, vector<8x1024xf32>, vector<8x1024xf32>, vector<8x1024xf32>, vector<8x1024xf32> -> vector<72x1024xf32>
    %cst_470 = arith.constant dense<0.000000e+00> : vector<4x1024xf32>
    %1150 = tpu.matmul %1037, %1149, %cst_470 {dimension_numbers = #tpu.dot_dimension_numbers<[1], [0], [0], [1], [0, 0, 1, 1], [], []>} : vector<4x72xf32>, vector<72x1024xf32>, vector<4x1024xf32> -> vector<4x1024xf32>
    %1151 = vector.broadcast %1038 : vector<4x1xf32> to vector<4x1024xf32>
    %1152 = arith.addf %1150, %1151 : vector<4x1024xf32>
    %cst_471 = arith.constant 0.000000e+00 : f32
    %1153 = vector.broadcast %cst_471 : f32 to vector<4x1024xf32>
    %1154 = arith.maximumf %1152, %1153 : vector<4x1024xf32>
    %1155 = tpu.concatenate %1154, %1035 in 0 : vector<4x1024xf32>, vector<4x1024xf32> -> vector<8x1024xf32>
    %1156 = tpu.iota {dimensions = array<i32: 1>} : vector<1x1024xi32>
    %c31_i32_472 = arith.constant 31 : i32
    %1157 = vector.broadcast %c31_i32_472 : i32 to vector<1x1024xi32>
    %1158 = arith.andi %1156, %1157 : vector<1x1024xi32>
    %cst_473 = arith.constant 0.000000e+00 : f32
    %1159 = vector.broadcast %cst_473 : f32 to vector<8x33xf32>
    %1160 = vector.extract_strided_slice %1155 {offsets = [0, 0], sizes = [8, 991], strides = [1, 1]} : vector<8x1024xf32> to vector<8x991xf32>
    %1161 = tpu.concatenate %1159, %1160 in 1 : vector<8x33xf32>, vector<8x991xf32> -> vector<8x1024xf32>
    %c-1_i32_474 = arith.constant -1 : i32
    %1162 = vector.broadcast %c-1_i32_474 : i32 to vector<1x1024xi32>
    %1163 = arith.addi %1158, %1162 : vector<1x1024xi32>
    %c0_i32_475 = arith.constant 0 : i32
    %1164 = vector.broadcast %c0_i32_475 : i32 to vector<1x1024xi32>
    %1165 = arith.cmpi sge, %1163, %1164 : vector<1x1024xi32>
    %c-1_i32_476 = arith.constant -1 : i32
    %1166 = vector.broadcast %c-1_i32_476 : i32 to vector<1x1024xi32>
    %1167 = arith.addi %1158, %1166 : vector<1x1024xi32>
    %c32_i32_477 = arith.constant 32 : i32
    %1168 = vector.broadcast %c32_i32_477 : i32 to vector<1x1024xi32>
    %1169 = arith.cmpi slt, %1167, %1168 : vector<1x1024xi32>
    %1170 = arith.andi %1165, %1169 : vector<1x1024xi1>
    %cst_478 = arith.constant 0.000000e+00 : f32
    %1171 = vector.broadcast %cst_478 : f32 to vector<8x1024xf32>
    %1172 = vector.shape_cast %1170 : vector<1x1024xi1> to vector<1x1024xi1>
    %1173 = vector.broadcast %1172 : vector<1x1024xi1> to vector<8x1024xi1>
    %1174 = arith.select %1173, %1161, %1171 : vector<8x1024xi1>, vector<8x1024xf32>
    %cst_479 = arith.constant 0.000000e+00 : f32
    %1175 = vector.broadcast %cst_479 : f32 to vector<8x32xf32>
    %1176 = vector.extract_strided_slice %1155 {offsets = [0, 0], sizes = [8, 992], strides = [1, 1]} : vector<8x1024xf32> to vector<8x992xf32>
    %1177 = tpu.concatenate %1175, %1176 in 1 : vector<8x32xf32>, vector<8x992xf32> -> vector<8x1024xf32>
    %cst_480 = arith.constant 0.000000e+00 : f32
    %1178 = vector.broadcast %cst_480 : f32 to vector<8x31xf32>
    %1179 = vector.extract_strided_slice %1155 {offsets = [0, 0], sizes = [8, 993], strides = [1, 1]} : vector<8x1024xf32> to vector<8x993xf32>
    %1180 = tpu.concatenate %1178, %1179 in 1 : vector<8x31xf32>, vector<8x993xf32> -> vector<8x1024xf32>
    %c1_i32_481 = arith.constant 1 : i32
    %1181 = vector.broadcast %c1_i32_481 : i32 to vector<1x1024xi32>
    %1182 = arith.addi %1158, %1181 : vector<1x1024xi32>
    %c0_i32_482 = arith.constant 0 : i32
    %1183 = vector.broadcast %c0_i32_482 : i32 to vector<1x1024xi32>
    %1184 = arith.cmpi sge, %1182, %1183 : vector<1x1024xi32>
    %c1_i32_483 = arith.constant 1 : i32
    %1185 = vector.broadcast %c1_i32_483 : i32 to vector<1x1024xi32>
    %1186 = arith.addi %1158, %1185 : vector<1x1024xi32>
    %c32_i32_484 = arith.constant 32 : i32
    %1187 = vector.broadcast %c32_i32_484 : i32 to vector<1x1024xi32>
    %1188 = arith.cmpi slt, %1186, %1187 : vector<1x1024xi32>
    %1189 = arith.andi %1184, %1188 : vector<1x1024xi1>
    %cst_485 = arith.constant 0.000000e+00 : f32
    %1190 = vector.broadcast %cst_485 : f32 to vector<8x1024xf32>
    %1191 = vector.shape_cast %1189 : vector<1x1024xi1> to vector<1x1024xi1>
    %1192 = vector.broadcast %1191 : vector<1x1024xi1> to vector<8x1024xi1>
    %1193 = arith.select %1192, %1180, %1190 : vector<8x1024xi1>, vector<8x1024xf32>
    %cst_486 = arith.constant 0.000000e+00 : f32
    %1194 = vector.broadcast %cst_486 : f32 to vector<8x1xf32>
    %1195 = vector.extract_strided_slice %1155 {offsets = [0, 0], sizes = [8, 1023], strides = [1, 1]} : vector<8x1024xf32> to vector<8x1023xf32>
    %1196 = tpu.concatenate %1194, %1195 in 1 : vector<8x1xf32>, vector<8x1023xf32> -> vector<8x1024xf32>
    %c-1_i32_487 = arith.constant -1 : i32
    %1197 = vector.broadcast %c-1_i32_487 : i32 to vector<1x1024xi32>
    %1198 = arith.addi %1158, %1197 : vector<1x1024xi32>
    %c0_i32_488 = arith.constant 0 : i32
    %1199 = vector.broadcast %c0_i32_488 : i32 to vector<1x1024xi32>
    %1200 = arith.cmpi sge, %1198, %1199 : vector<1x1024xi32>
    %c-1_i32_489 = arith.constant -1 : i32
    %1201 = vector.broadcast %c-1_i32_489 : i32 to vector<1x1024xi32>
    %1202 = arith.addi %1158, %1201 : vector<1x1024xi32>
    %c32_i32_490 = arith.constant 32 : i32
    %1203 = vector.broadcast %c32_i32_490 : i32 to vector<1x1024xi32>
    %1204 = arith.cmpi slt, %1202, %1203 : vector<1x1024xi32>
    %1205 = arith.andi %1200, %1204 : vector<1x1024xi1>
    %cst_491 = arith.constant 0.000000e+00 : f32
    %1206 = vector.broadcast %cst_491 : f32 to vector<8x1024xf32>
    %1207 = vector.shape_cast %1205 : vector<1x1024xi1> to vector<1x1024xi1>
    %1208 = vector.broadcast %1207 : vector<1x1024xi1> to vector<8x1024xi1>
    %1209 = arith.select %1208, %1196, %1206 : vector<8x1024xi1>, vector<8x1024xf32>
    %cst_492 = arith.constant 0.000000e+00 : f32
    %1210 = vector.broadcast %cst_492 : f32 to vector<8x1xf32>
    %1211 = vector.extract_strided_slice %1155 {offsets = [0, 1], sizes = [8, 1023], strides = [1, 1]} : vector<8x1024xf32> to vector<8x1023xf32>
    %1212 = tpu.concatenate %1211, %1210 in 1 : vector<8x1023xf32>, vector<8x1xf32> -> vector<8x1024xf32>
    %c1_i32_493 = arith.constant 1 : i32
    %1213 = vector.broadcast %c1_i32_493 : i32 to vector<1x1024xi32>
    %1214 = arith.addi %1158, %1213 : vector<1x1024xi32>
    %c0_i32_494 = arith.constant 0 : i32
    %1215 = vector.broadcast %c0_i32_494 : i32 to vector<1x1024xi32>
    %1216 = arith.cmpi sge, %1214, %1215 : vector<1x1024xi32>
    %c1_i32_495 = arith.constant 1 : i32
    %1217 = vector.broadcast %c1_i32_495 : i32 to vector<1x1024xi32>
    %1218 = arith.addi %1158, %1217 : vector<1x1024xi32>
    %c32_i32_496 = arith.constant 32 : i32
    %1219 = vector.broadcast %c32_i32_496 : i32 to vector<1x1024xi32>
    %1220 = arith.cmpi slt, %1218, %1219 : vector<1x1024xi32>
    %1221 = arith.andi %1216, %1220 : vector<1x1024xi1>
    %cst_497 = arith.constant 0.000000e+00 : f32
    %1222 = vector.broadcast %cst_497 : f32 to vector<8x1024xf32>
    %1223 = vector.shape_cast %1221 : vector<1x1024xi1> to vector<1x1024xi1>
    %1224 = vector.broadcast %1223 : vector<1x1024xi1> to vector<8x1024xi1>
    %1225 = arith.select %1224, %1212, %1222 : vector<8x1024xi1>, vector<8x1024xf32>
    %cst_498 = arith.constant 0.000000e+00 : f32
    %1226 = vector.broadcast %cst_498 : f32 to vector<8x31xf32>
    %1227 = vector.extract_strided_slice %1155 {offsets = [0, 31], sizes = [8, 993], strides = [1, 1]} : vector<8x1024xf32> to vector<8x993xf32>
    %1228 = tpu.concatenate %1227, %1226 in 1 : vector<8x993xf32>, vector<8x31xf32> -> vector<8x1024xf32>
    %c-1_i32_499 = arith.constant -1 : i32
    %1229 = vector.broadcast %c-1_i32_499 : i32 to vector<1x1024xi32>
    %1230 = arith.addi %1158, %1229 : vector<1x1024xi32>
    %c0_i32_500 = arith.constant 0 : i32
    %1231 = vector.broadcast %c0_i32_500 : i32 to vector<1x1024xi32>
    %1232 = arith.cmpi sge, %1230, %1231 : vector<1x1024xi32>
    %c-1_i32_501 = arith.constant -1 : i32
    %1233 = vector.broadcast %c-1_i32_501 : i32 to vector<1x1024xi32>
    %1234 = arith.addi %1158, %1233 : vector<1x1024xi32>
    %c32_i32_502 = arith.constant 32 : i32
    %1235 = vector.broadcast %c32_i32_502 : i32 to vector<1x1024xi32>
    %1236 = arith.cmpi slt, %1234, %1235 : vector<1x1024xi32>
    %1237 = arith.andi %1232, %1236 : vector<1x1024xi1>
    %cst_503 = arith.constant 0.000000e+00 : f32
    %1238 = vector.broadcast %cst_503 : f32 to vector<8x1024xf32>
    %1239 = vector.shape_cast %1237 : vector<1x1024xi1> to vector<1x1024xi1>
    %1240 = vector.broadcast %1239 : vector<1x1024xi1> to vector<8x1024xi1>
    %1241 = arith.select %1240, %1228, %1238 : vector<8x1024xi1>, vector<8x1024xf32>
    %cst_504 = arith.constant 0.000000e+00 : f32
    %1242 = vector.broadcast %cst_504 : f32 to vector<8x32xf32>
    %1243 = vector.extract_strided_slice %1155 {offsets = [0, 32], sizes = [8, 992], strides = [1, 1]} : vector<8x1024xf32> to vector<8x992xf32>
    %1244 = tpu.concatenate %1243, %1242 in 1 : vector<8x992xf32>, vector<8x32xf32> -> vector<8x1024xf32>
    %cst_505 = arith.constant 0.000000e+00 : f32
    %1245 = vector.broadcast %cst_505 : f32 to vector<8x33xf32>
    %1246 = vector.extract_strided_slice %1155 {offsets = [0, 33], sizes = [8, 991], strides = [1, 1]} : vector<8x1024xf32> to vector<8x991xf32>
    %1247 = tpu.concatenate %1246, %1245 in 1 : vector<8x991xf32>, vector<8x33xf32> -> vector<8x1024xf32>
    %c1_i32_506 = arith.constant 1 : i32
    %1248 = vector.broadcast %c1_i32_506 : i32 to vector<1x1024xi32>
    %1249 = arith.addi %1158, %1248 : vector<1x1024xi32>
    %c0_i32_507 = arith.constant 0 : i32
    %1250 = vector.broadcast %c0_i32_507 : i32 to vector<1x1024xi32>
    %1251 = arith.cmpi sge, %1249, %1250 : vector<1x1024xi32>
    %c1_i32_508 = arith.constant 1 : i32
    %1252 = vector.broadcast %c1_i32_508 : i32 to vector<1x1024xi32>
    %1253 = arith.addi %1158, %1252 : vector<1x1024xi32>
    %c32_i32_509 = arith.constant 32 : i32
    %1254 = vector.broadcast %c32_i32_509 : i32 to vector<1x1024xi32>
    %1255 = arith.cmpi slt, %1253, %1254 : vector<1x1024xi32>
    %1256 = arith.andi %1251, %1255 : vector<1x1024xi1>
    %cst_510 = arith.constant 0.000000e+00 : f32
    %1257 = vector.broadcast %cst_510 : f32 to vector<8x1024xf32>
    %1258 = vector.shape_cast %1256 : vector<1x1024xi1> to vector<1x1024xi1>
    %1259 = vector.broadcast %1258 : vector<1x1024xi1> to vector<8x1024xi1>
    %1260 = arith.select %1259, %1247, %1257 : vector<8x1024xi1>, vector<8x1024xf32>
    %1261 = tpu.concatenate %1174, %1177, %1193, %1209, %1155, %1225, %1241, %1244, %1260 in 0 : vector<8x1024xf32>, vector<8x1024xf32>, vector<8x1024xf32>, vector<8x1024xf32>, vector<8x1024xf32>, vector<8x1024xf32>, vector<8x1024xf32>, vector<8x1024xf32>, vector<8x1024xf32> -> vector<72x1024xf32>
    %cst_511 = arith.constant dense<0.000000e+00> : vector<4x1024xf32>
    %1262 = tpu.matmul %1039, %1261, %cst_511 {dimension_numbers = #tpu.dot_dimension_numbers<[1], [0], [0], [1], [0, 0, 1, 1], [], []>} : vector<4x72xf32>, vector<72x1024xf32>, vector<4x1024xf32> -> vector<4x1024xf32>
    %1263 = vector.broadcast %1040 : vector<4x1xf32> to vector<4x1024xf32>
    %1264 = arith.addf %1262, %1263 : vector<4x1024xf32>
    %cst_512 = arith.constant 0.000000e+00 : f32
    %1265 = vector.broadcast %cst_512 : f32 to vector<4x1024xf32>
    %1266 = arith.maximumf %1264, %1265 : vector<4x1024xf32>
    %1267 = tpu.iota {dimensions = array<i32: 1>} : vector<1x1024xi32>
    %c31_i32_513 = arith.constant 31 : i32
    %1268 = vector.broadcast %c31_i32_513 : i32 to vector<1x1024xi32>
    %1269 = arith.andi %1267, %1268 : vector<1x1024xi32>
    %cst_514 = arith.constant 0.000000e+00 : f32
    %1270 = vector.broadcast %cst_514 : f32 to vector<4x33xf32>
    %1271 = vector.extract_strided_slice %1266 {offsets = [0, 0], sizes = [4, 991], strides = [1, 1]} : vector<4x1024xf32> to vector<4x991xf32>
    %1272 = tpu.concatenate %1270, %1271 in 1 : vector<4x33xf32>, vector<4x991xf32> -> vector<4x1024xf32>
    %c-1_i32_515 = arith.constant -1 : i32
    %1273 = vector.broadcast %c-1_i32_515 : i32 to vector<1x1024xi32>
    %1274 = arith.addi %1269, %1273 : vector<1x1024xi32>
    %c0_i32_516 = arith.constant 0 : i32
    %1275 = vector.broadcast %c0_i32_516 : i32 to vector<1x1024xi32>
    %1276 = arith.cmpi sge, %1274, %1275 : vector<1x1024xi32>
    %c-1_i32_517 = arith.constant -1 : i32
    %1277 = vector.broadcast %c-1_i32_517 : i32 to vector<1x1024xi32>
    %1278 = arith.addi %1269, %1277 : vector<1x1024xi32>
    %c32_i32_518 = arith.constant 32 : i32
    %1279 = vector.broadcast %c32_i32_518 : i32 to vector<1x1024xi32>
    %1280 = arith.cmpi slt, %1278, %1279 : vector<1x1024xi32>
    %1281 = arith.andi %1276, %1280 : vector<1x1024xi1>
    %cst_519 = arith.constant 0.000000e+00 : f32
    %1282 = vector.broadcast %cst_519 : f32 to vector<4x1024xf32>
    %1283 = vector.shape_cast %1281 : vector<1x1024xi1> to vector<1x1024xi1>
    %1284 = vector.broadcast %1283 : vector<1x1024xi1> to vector<4x1024xi1>
    %1285 = arith.select %1284, %1272, %1282 : vector<4x1024xi1>, vector<4x1024xf32>
    %cst_520 = arith.constant 0.000000e+00 : f32
    %1286 = vector.broadcast %cst_520 : f32 to vector<4x32xf32>
    %1287 = vector.extract_strided_slice %1266 {offsets = [0, 0], sizes = [4, 992], strides = [1, 1]} : vector<4x1024xf32> to vector<4x992xf32>
    %1288 = tpu.concatenate %1286, %1287 in 1 : vector<4x32xf32>, vector<4x992xf32> -> vector<4x1024xf32>
    %cst_521 = arith.constant 0.000000e+00 : f32
    %1289 = vector.broadcast %cst_521 : f32 to vector<4x31xf32>
    %1290 = vector.extract_strided_slice %1266 {offsets = [0, 0], sizes = [4, 993], strides = [1, 1]} : vector<4x1024xf32> to vector<4x993xf32>
    %1291 = tpu.concatenate %1289, %1290 in 1 : vector<4x31xf32>, vector<4x993xf32> -> vector<4x1024xf32>
    %c1_i32_522 = arith.constant 1 : i32
    %1292 = vector.broadcast %c1_i32_522 : i32 to vector<1x1024xi32>
    %1293 = arith.addi %1269, %1292 : vector<1x1024xi32>
    %c0_i32_523 = arith.constant 0 : i32
    %1294 = vector.broadcast %c0_i32_523 : i32 to vector<1x1024xi32>
    %1295 = arith.cmpi sge, %1293, %1294 : vector<1x1024xi32>
    %c1_i32_524 = arith.constant 1 : i32
    %1296 = vector.broadcast %c1_i32_524 : i32 to vector<1x1024xi32>
    %1297 = arith.addi %1269, %1296 : vector<1x1024xi32>
    %c32_i32_525 = arith.constant 32 : i32
    %1298 = vector.broadcast %c32_i32_525 : i32 to vector<1x1024xi32>
    %1299 = arith.cmpi slt, %1297, %1298 : vector<1x1024xi32>
    %1300 = arith.andi %1295, %1299 : vector<1x1024xi1>
    %cst_526 = arith.constant 0.000000e+00 : f32
    %1301 = vector.broadcast %cst_526 : f32 to vector<4x1024xf32>
    %1302 = vector.shape_cast %1300 : vector<1x1024xi1> to vector<1x1024xi1>
    %1303 = vector.broadcast %1302 : vector<1x1024xi1> to vector<4x1024xi1>
    %1304 = arith.select %1303, %1291, %1301 : vector<4x1024xi1>, vector<4x1024xf32>
    %cst_527 = arith.constant 0.000000e+00 : f32
    %1305 = vector.broadcast %cst_527 : f32 to vector<4x1xf32>
    %1306 = vector.extract_strided_slice %1266 {offsets = [0, 0], sizes = [4, 1023], strides = [1, 1]} : vector<4x1024xf32> to vector<4x1023xf32>
    %1307 = tpu.concatenate %1305, %1306 in 1 : vector<4x1xf32>, vector<4x1023xf32> -> vector<4x1024xf32>
    %c-1_i32_528 = arith.constant -1 : i32
    %1308 = vector.broadcast %c-1_i32_528 : i32 to vector<1x1024xi32>
    %1309 = arith.addi %1269, %1308 : vector<1x1024xi32>
    %c0_i32_529 = arith.constant 0 : i32
    %1310 = vector.broadcast %c0_i32_529 : i32 to vector<1x1024xi32>
    %1311 = arith.cmpi sge, %1309, %1310 : vector<1x1024xi32>
    %c-1_i32_530 = arith.constant -1 : i32
    %1312 = vector.broadcast %c-1_i32_530 : i32 to vector<1x1024xi32>
    %1313 = arith.addi %1269, %1312 : vector<1x1024xi32>
    %c32_i32_531 = arith.constant 32 : i32
    %1314 = vector.broadcast %c32_i32_531 : i32 to vector<1x1024xi32>
    %1315 = arith.cmpi slt, %1313, %1314 : vector<1x1024xi32>
    %1316 = arith.andi %1311, %1315 : vector<1x1024xi1>
    %cst_532 = arith.constant 0.000000e+00 : f32
    %1317 = vector.broadcast %cst_532 : f32 to vector<4x1024xf32>
    %1318 = vector.shape_cast %1316 : vector<1x1024xi1> to vector<1x1024xi1>
    %1319 = vector.broadcast %1318 : vector<1x1024xi1> to vector<4x1024xi1>
    %1320 = arith.select %1319, %1307, %1317 : vector<4x1024xi1>, vector<4x1024xf32>
    %cst_533 = arith.constant 0.000000e+00 : f32
    %1321 = vector.broadcast %cst_533 : f32 to vector<4x1xf32>
    %1322 = vector.extract_strided_slice %1266 {offsets = [0, 1], sizes = [4, 1023], strides = [1, 1]} : vector<4x1024xf32> to vector<4x1023xf32>
    %1323 = tpu.concatenate %1322, %1321 in 1 : vector<4x1023xf32>, vector<4x1xf32> -> vector<4x1024xf32>
    %c1_i32_534 = arith.constant 1 : i32
    %1324 = vector.broadcast %c1_i32_534 : i32 to vector<1x1024xi32>
    %1325 = arith.addi %1269, %1324 : vector<1x1024xi32>
    %c0_i32_535 = arith.constant 0 : i32
    %1326 = vector.broadcast %c0_i32_535 : i32 to vector<1x1024xi32>
    %1327 = arith.cmpi sge, %1325, %1326 : vector<1x1024xi32>
    %c1_i32_536 = arith.constant 1 : i32
    %1328 = vector.broadcast %c1_i32_536 : i32 to vector<1x1024xi32>
    %1329 = arith.addi %1269, %1328 : vector<1x1024xi32>
    %c32_i32_537 = arith.constant 32 : i32
    %1330 = vector.broadcast %c32_i32_537 : i32 to vector<1x1024xi32>
    %1331 = arith.cmpi slt, %1329, %1330 : vector<1x1024xi32>
    %1332 = arith.andi %1327, %1331 : vector<1x1024xi1>
    %cst_538 = arith.constant 0.000000e+00 : f32
    %1333 = vector.broadcast %cst_538 : f32 to vector<4x1024xf32>
    %1334 = vector.shape_cast %1332 : vector<1x1024xi1> to vector<1x1024xi1>
    %1335 = vector.broadcast %1334 : vector<1x1024xi1> to vector<4x1024xi1>
    %1336 = arith.select %1335, %1323, %1333 : vector<4x1024xi1>, vector<4x1024xf32>
    %cst_539 = arith.constant 0.000000e+00 : f32
    %1337 = vector.broadcast %cst_539 : f32 to vector<4x31xf32>
    %1338 = vector.extract_strided_slice %1266 {offsets = [0, 31], sizes = [4, 993], strides = [1, 1]} : vector<4x1024xf32> to vector<4x993xf32>
    %1339 = tpu.concatenate %1338, %1337 in 1 : vector<4x993xf32>, vector<4x31xf32> -> vector<4x1024xf32>
    %c-1_i32_540 = arith.constant -1 : i32
    %1340 = vector.broadcast %c-1_i32_540 : i32 to vector<1x1024xi32>
    %1341 = arith.addi %1269, %1340 : vector<1x1024xi32>
    %c0_i32_541 = arith.constant 0 : i32
    %1342 = vector.broadcast %c0_i32_541 : i32 to vector<1x1024xi32>
    %1343 = arith.cmpi sge, %1341, %1342 : vector<1x1024xi32>
    %c-1_i32_542 = arith.constant -1 : i32
    %1344 = vector.broadcast %c-1_i32_542 : i32 to vector<1x1024xi32>
    %1345 = arith.addi %1269, %1344 : vector<1x1024xi32>
    %c32_i32_543 = arith.constant 32 : i32
    %1346 = vector.broadcast %c32_i32_543 : i32 to vector<1x1024xi32>
    %1347 = arith.cmpi slt, %1345, %1346 : vector<1x1024xi32>
    %1348 = arith.andi %1343, %1347 : vector<1x1024xi1>
    %cst_544 = arith.constant 0.000000e+00 : f32
    %1349 = vector.broadcast %cst_544 : f32 to vector<4x1024xf32>
    %1350 = vector.shape_cast %1348 : vector<1x1024xi1> to vector<1x1024xi1>
    %1351 = vector.broadcast %1350 : vector<1x1024xi1> to vector<4x1024xi1>
    %1352 = arith.select %1351, %1339, %1349 : vector<4x1024xi1>, vector<4x1024xf32>
    %cst_545 = arith.constant 0.000000e+00 : f32
    %1353 = vector.broadcast %cst_545 : f32 to vector<4x32xf32>
    %1354 = vector.extract_strided_slice %1266 {offsets = [0, 32], sizes = [4, 992], strides = [1, 1]} : vector<4x1024xf32> to vector<4x992xf32>
    %1355 = tpu.concatenate %1354, %1353 in 1 : vector<4x992xf32>, vector<4x32xf32> -> vector<4x1024xf32>
    %cst_546 = arith.constant 0.000000e+00 : f32
    %1356 = vector.broadcast %cst_546 : f32 to vector<4x33xf32>
    %1357 = vector.extract_strided_slice %1266 {offsets = [0, 33], sizes = [4, 991], strides = [1, 1]} : vector<4x1024xf32> to vector<4x991xf32>
    %1358 = tpu.concatenate %1357, %1356 in 1 : vector<4x991xf32>, vector<4x33xf32> -> vector<4x1024xf32>
    %c1_i32_547 = arith.constant 1 : i32
    %1359 = vector.broadcast %c1_i32_547 : i32 to vector<1x1024xi32>
    %1360 = arith.addi %1269, %1359 : vector<1x1024xi32>
    %c0_i32_548 = arith.constant 0 : i32
    %1361 = vector.broadcast %c0_i32_548 : i32 to vector<1x1024xi32>
    %1362 = arith.cmpi sge, %1360, %1361 : vector<1x1024xi32>
    %c1_i32_549 = arith.constant 1 : i32
    %1363 = vector.broadcast %c1_i32_549 : i32 to vector<1x1024xi32>
    %1364 = arith.addi %1269, %1363 : vector<1x1024xi32>
    %c32_i32_550 = arith.constant 32 : i32
    %1365 = vector.broadcast %c32_i32_550 : i32 to vector<1x1024xi32>
    %1366 = arith.cmpi slt, %1364, %1365 : vector<1x1024xi32>
    %1367 = arith.andi %1362, %1366 : vector<1x1024xi1>
    %cst_551 = arith.constant 0.000000e+00 : f32
    %1368 = vector.broadcast %cst_551 : f32 to vector<4x1024xf32>
    %1369 = vector.shape_cast %1367 : vector<1x1024xi1> to vector<1x1024xi1>
    %1370 = vector.broadcast %1369 : vector<1x1024xi1> to vector<4x1024xi1>
    %1371 = arith.select %1370, %1358, %1368 : vector<4x1024xi1>, vector<4x1024xf32>
    %1372 = tpu.concatenate %1285, %1288, %1304, %1320, %1266, %1336, %1352, %1355, %1371 in 0 : vector<4x1024xf32>, vector<4x1024xf32>, vector<4x1024xf32>, vector<4x1024xf32>, vector<4x1024xf32>, vector<4x1024xf32>, vector<4x1024xf32>, vector<4x1024xf32>, vector<4x1024xf32> -> vector<36x1024xf32>
    %cst_552 = arith.constant dense<0.000000e+00> : vector<4x1024xf32>
    %1373 = tpu.matmul %1041, %1372, %cst_552 {dimension_numbers = #tpu.dot_dimension_numbers<[1], [0], [0], [1], [0, 0, 1, 1], [], []>} : vector<4x36xf32>, vector<36x1024xf32>, vector<4x1024xf32> -> vector<4x1024xf32>
    %1374 = vector.broadcast %1042 : vector<4x1xf32> to vector<4x1024xf32>
    %1375 = arith.addf %1373, %1374 : vector<4x1024xf32>
    %cst_553 = arith.constant 0.000000e+00 : f32
    %1376 = vector.broadcast %cst_553 : f32 to vector<4x1024xf32>
    %1377 = arith.maximumf %1375, %1376 : vector<4x1024xf32>
    %c0_554 = arith.constant 0 : index
    %c0_555 = arith.constant 0 : index
    %1378 = vector.load %arg34[%c0_554, %c0_555] : memref<3x4xf32, #tpu.memory_space<vmem>>, vector<3x4xf32>
    %c0_556 = arith.constant 0 : index
    %c0_557 = arith.constant 0 : index
    %1379 = vector.load %arg35[%c0_556, %c0_557] : memref<3x1xf32, #tpu.memory_space<vmem>>, vector<3x1xf32>
    %cst_558 = arith.constant dense<0.000000e+00> : vector<3x1024xf32>
    %1380 = tpu.matmul %1378, %1377, %cst_558 {dimension_numbers = #tpu.dot_dimension_numbers<[1], [0], [0], [1], [0, 0, 1, 1], [], []>} : vector<3x4xf32>, vector<4x1024xf32>, vector<3x1024xf32> -> vector<3x1024xf32>
    %1381 = vector.broadcast %1379 : vector<3x1xf32> to vector<3x1024xf32>
    %1382 = arith.addf %1380, %1381 : vector<3x1024xf32>
    %c0_559 = arith.constant 0 : index
    %c0_560 = arith.constant 0 : index
    %c0_561 = arith.constant 0 : index
    %1383 = vector.load %arg36[%c0_559, %c0_560, %c0_561] : memref<1x3x1024xf32, #tpu.memory_space<vmem>>, vector<1x3x1024xf32>
    %1384 = vector.shape_cast %1383 : vector<1x3x1024xf32> to vector<3x1024xf32>
    %1385 = vector.shape_cast %1382 : vector<3x1024xf32> to vector<1x3x1024xf32>
    tpu.vector_store %arg36[%c0_559, %c0_560, %c0_561], %1385 {strides = array<i32>} : memref<1x3x1024xf32, #tpu.memory_space<vmem>>, vector<1x3x1024xf32>,
    return
  }
  func.func @transform_0(%arg0: i32) -> (i32, i32, i32) {
    %c0_i32 = arith.constant 0 : i32
    %c0_i32_0 = arith.constant 0 : i32
    %c0_i32_1 = arith.constant 0 : i32
    return %arg0, %c0_i32, %c0_i32_0 : i32, i32, i32
  }
  func.func @transform_1(%arg0: i32) -> (i32, i32, i32) {
    %c0_i32 = arith.constant 0 : i32
    %c0_i32_0 = arith.constant 0 : i32
    %c0_i32_1 = arith.constant 0 : i32
    return %arg0, %c0_i32, %c0_i32_0 : i32, i32, i32
  }
  func.func @transform_2(%arg0: i32) -> (i32, i32, i32) {
    %c0_i32 = arith.constant 0 : i32
    %c0_i32_0 = arith.constant 0 : i32
    %c0_i32_1 = arith.constant 0 : i32
    return %arg0, %c0_i32, %c0_i32_0 : i32, i32, i32
  }
  func.func @transform_3(%arg0: i32) -> (i32, i32, i32) {
    %c0_i32 = arith.constant 0 : i32
    %c0_i32_0 = arith.constant 0 : i32
    %c0_i32_1 = arith.constant 0 : i32
    return %arg0, %c0_i32, %c0_i32_0 : i32, i32, i32
  }
  func.func @transform_4(%arg0: i32) -> (i32, i32, i32) {
    %c0_i32 = arith.constant 0 : i32
    %c0_i32_0 = arith.constant 0 : i32
    %c0_i32_1 = arith.constant 0 : i32
    return %arg0, %c0_i32, %c0_i32_0 : i32, i32, i32
  }
  func.func @transform_5(%arg0: i32) -> (i32, i32) {
    %c0_i32 = arith.constant 0 : i32
    %c0_i32_0 = arith.constant 0 : i32
    %c0_i32_1 = arith.constant 0 : i32
    return %c0_i32, %c0_i32_0 : i32, i32
  }
  func.func @transform_6(%arg0: i32) -> (i32, i32) {
    %c0_i32 = arith.constant 0 : i32
    %c0_i32_0 = arith.constant 0 : i32
    %c0_i32_1 = arith.constant 0 : i32
    return %c0_i32, %c0_i32_0 : i32, i32
  }
  func.func @transform_7(%arg0: i32) -> (i32, i32) {
    %c0_i32 = arith.constant 0 : i32
    %c0_i32_0 = arith.constant 0 : i32
    %c0_i32_1 = arith.constant 0 : i32
    return %c0_i32, %c0_i32_0 : i32, i32
  }
  func.func @transform_8(%arg0: i32) -> (i32, i32) {
    %c0_i32 = arith.constant 0 : i32
    %c0_i32_0 = arith.constant 0 : i32
    %c0_i32_1 = arith.constant 0 : i32
    return %c0_i32, %c0_i32_0 : i32, i32
  }
  func.func @transform_9(%arg0: i32) -> (i32, i32) {
    %c0_i32 = arith.constant 0 : i32
    %c0_i32_0 = arith.constant 0 : i32
    %c0_i32_1 = arith.constant 0 : i32
    return %c0_i32, %c0_i32_0 : i32, i32
  }
  func.func @transform_10(%arg0: i32) -> (i32, i32) {
    %c0_i32 = arith.constant 0 : i32
    %c0_i32_0 = arith.constant 0 : i32
    %c0_i32_1 = arith.constant 0 : i32
    return %c0_i32, %c0_i32_0 : i32, i32
  }
  func.func @transform_11(%arg0: i32) -> (i32, i32) {
    %c0_i32 = arith.constant 0 : i32
    %c0_i32_0 = arith.constant 0 : i32
    %c0_i32_1 = arith.constant 0 : i32
    return %c0_i32, %c0_i32_0 : i32, i32
  }
  func.func @transform_12(%arg0: i32) -> (i32, i32) {
    %c0_i32 = arith.constant 0 : i32
    %c0_i32_0 = arith.constant 0 : i32
    %c0_i32_1 = arith.constant 0 : i32
    return %c0_i32, %c0_i32_0 : i32, i32
  }
  func.func @transform_13(%arg0: i32) -> (i32, i32) {
    %c0_i32 = arith.constant 0 : i32
    %c0_i32_0 = arith.constant 0 : i32
    %c0_i32_1 = arith.constant 0 : i32
    return %c0_i32, %c0_i32_0 : i32, i32
  }
  func.func @transform_14(%arg0: i32) -> (i32, i32) {
    %c0_i32 = arith.constant 0 : i32
    %c0_i32_0 = arith.constant 0 : i32
    %c0_i32_1 = arith.constant 0 : i32
    return %c0_i32, %c0_i32_0 : i32, i32
  }
  func.func @transform_15(%arg0: i32) -> (i32, i32) {
    %c0_i32 = arith.constant 0 : i32
    %c0_i32_0 = arith.constant 0 : i32
    %c0_i32_1 = arith.constant 0 : i32
    return %c0_i32, %c0_i32_0 : i32, i32
  }
  func.func @transform_16(%arg0: i32) -> (i32, i32) {
    %c0_i32 = arith.constant 0 : i32
    %c0_i32_0 = arith.constant 0 : i32
    %c0_i32_1 = arith.constant 0 : i32
    return %c0_i32, %c0_i32_0 : i32, i32
  }
  func.func @transform_17(%arg0: i32) -> (i32, i32) {
    %c0_i32 = arith.constant 0 : i32
    %c0_i32_0 = arith.constant 0 : i32
    %c0_i32_1 = arith.constant 0 : i32
    return %c0_i32, %c0_i32_0 : i32, i32
  }
  func.func @transform_18(%arg0: i32) -> (i32, i32) {
    %c0_i32 = arith.constant 0 : i32
    %c0_i32_0 = arith.constant 0 : i32
    %c0_i32_1 = arith.constant 0 : i32
    return %c0_i32, %c0_i32_0 : i32, i32
  }
  func.func @transform_19(%arg0: i32) -> (i32, i32) {
    %c0_i32 = arith.constant 0 : i32
    %c0_i32_0 = arith.constant 0 : i32
    %c0_i32_1 = arith.constant 0 : i32
    return %c0_i32, %c0_i32_0 : i32, i32
  }
  func.func @transform_20(%arg0: i32) -> (i32, i32) {
    %c0_i32 = arith.constant 0 : i32
    %c0_i32_0 = arith.constant 0 : i32
    %c0_i32_1 = arith.constant 0 : i32
    return %c0_i32, %c0_i32_0 : i32, i32
  }
  func.func @transform_21(%arg0: i32) -> (i32, i32) {
    %c0_i32 = arith.constant 0 : i32
    %c0_i32_0 = arith.constant 0 : i32
    %c0_i32_1 = arith.constant 0 : i32
    return %c0_i32, %c0_i32_0 : i32, i32
  }
  func.func @transform_22(%arg0: i32) -> (i32, i32) {
    %c0_i32 = arith.constant 0 : i32
    %c0_i32_0 = arith.constant 0 : i32
    %c0_i32_1 = arith.constant 0 : i32
    return %c0_i32, %c0_i32_0 : i32, i32
  }
  func.func @transform_23(%arg0: i32) -> (i32, i32) {
    %c0_i32 = arith.constant 0 : i32
    %c0_i32_0 = arith.constant 0 : i32
    %c0_i32_1 = arith.constant 0 : i32
    return %c0_i32, %c0_i32_0 : i32, i32
  }
  func.func @transform_24(%arg0: i32) -> (i32, i32) {
    %c0_i32 = arith.constant 0 : i32
    %c0_i32_0 = arith.constant 0 : i32
    %c0_i32_1 = arith.constant 0 : i32
    return %c0_i32, %c0_i32_0 : i32, i32
  }
  func.func @transform_25(%arg0: i32) -> (i32, i32) {
    %c0_i32 = arith.constant 0 : i32
    %c0_i32_0 = arith.constant 0 : i32
    %c0_i32_1 = arith.constant 0 : i32
    return %c0_i32, %c0_i32_0 : i32, i32
  }
  func.func @transform_26(%arg0: i32) -> (i32, i32) {
    %c0_i32 = arith.constant 0 : i32
    %c0_i32_0 = arith.constant 0 : i32
    %c0_i32_1 = arith.constant 0 : i32
    return %c0_i32, %c0_i32_0 : i32, i32
  }
  func.func @transform_27(%arg0: i32) -> (i32, i32) {
    %c0_i32 = arith.constant 0 : i32
    %c0_i32_0 = arith.constant 0 : i32
    %c0_i32_1 = arith.constant 0 : i32
    return %c0_i32, %c0_i32_0 : i32, i32
  }
  func.func @transform_28(%arg0: i32) -> (i32, i32) {
    %c0_i32 = arith.constant 0 : i32
    %c0_i32_0 = arith.constant 0 : i32
    %c0_i32_1 = arith.constant 0 : i32
    return %c0_i32, %c0_i32_0 : i32, i32
  }
  func.func @transform_29(%arg0: i32) -> (i32, i32) {
    %c0_i32 = arith.constant 0 : i32
    %c0_i32_0 = arith.constant 0 : i32
    %c0_i32_1 = arith.constant 0 : i32
    return %c0_i32, %c0_i32_0 : i32, i32
  }
  func.func @transform_30(%arg0: i32) -> (i32, i32) {
    %c0_i32 = arith.constant 0 : i32
    %c0_i32_0 = arith.constant 0 : i32
    %c0_i32_1 = arith.constant 0 : i32
    return %c0_i32, %c0_i32_0 : i32, i32
  }
  func.func @transform_31(%arg0: i32) -> (i32, i32) {
    %c0_i32 = arith.constant 0 : i32
    %c0_i32_0 = arith.constant 0 : i32
    %c0_i32_1 = arith.constant 0 : i32
    return %c0_i32, %c0_i32_0 : i32, i32
  }
  func.func @transform_32(%arg0: i32) -> (i32, i32) {
    %c0_i32 = arith.constant 0 : i32
    %c0_i32_0 = arith.constant 0 : i32
    %c0_i32_1 = arith.constant 0 : i32
    return %c0_i32, %c0_i32_0 : i32, i32
  }
  func.func @transform_33(%arg0: i32) -> (i32, i32) {
    %c0_i32 = arith.constant 0 : i32
    %c0_i32_0 = arith.constant 0 : i32
    %c0_i32_1 = arith.constant 0 : i32
    return %c0_i32, %c0_i32_0 : i32, i32
  }
  func.func @transform_34(%arg0: i32) -> (i32, i32) {
    %c0_i32 = arith.constant 0 : i32
    %c0_i32_0 = arith.constant 0 : i32
    %c0_i32_1 = arith.constant 0 : i32
    return %c0_i32, %c0_i32_0 : i32, i32
  }
  func.func @transform_35(%arg0: i32) -> (i32, i32, i32) {
    %c0_i32 = arith.constant 0 : i32
    %c0_i32_0 = arith.constant 0 : i32
    %c0_i32_1 = arith.constant 0 : i32
    return %arg0, %c0_i32, %c0_i32_0 : i32, i32, i32
  }
}

</mosaic_0001>

<bundles_post_ra>
// kernel: decoder_forward.1
= control target key start
LH: loop header
LB: loop body
LE: loop exit
PB: predicated region body
PF: predicated region fallthrough
CT: control target
= control target key end

     0   :  { %s9474_s6 = smov 1   ;;  %s9475_s10 = smov 2   ;;  %s13287_s0 = inlined_call_operand.smem [shape: u32[36], index: -1, kind: input, shape index: {}] }
   0x1   :  { %s9560_s5 = sld [smem:[%s13287_s0]]   ;;  %s9476_s14 = smov 3  }
   0x2   :  { %s9565_s9 = sld [smem:[%s13287_s0 + %s9474_s6]]   ;;  %s9477_s18 = smov 4  }
   0x3   :  { %s9570_s13 = sld [smem:[%s13287_s0 + %s9475_s10]]   ;;  %s9478_s22 = smov 5  }
   0x4   :  { %s9575_s17 = sld [smem:[%s13287_s0 + %s9476_s14]]   ;;  %s9479_s26 = smov 6  }
   0x5   :  { %s9580_s21 = sld [smem:[%s13287_s0 + %s9477_s18]]   ;;  %s9480_s30 = smov 7  }
   0x6   :  { %s9585_s25 = sld [smem:[%s13287_s0 + %s9478_s22]]   ;;  %s9481_s4 = smov 8  }
   0x7   :  { %13347 = sst [smem:[#allocation21_spill]] %s9560_s5  ;;  %s9482_s10 = smov 9  }
   0x8   :  { %s9590_s29 = sld [smem:[%s13287_s0 + %s9479_s26]]   ;;  %s9483_s15 = smov 10  }
   0x9   :  { %13348 = sst [smem:[#allocation22_spill]] %s9570_s13  ;;  %s9484_s20 = smov 11  }
   0xa   :  { %13349 = sst [smem:[#allocation23_spill]] %s9575_s17  ;;  %s9485_s26 = smov 12  }
   0xb   :  { %13350 = sst [smem:[#allocation24_spill]] %s9580_s21  ;;  %s9486_s1 = smov 13  }
   0xc   :  { %s9595_s3 = sld [smem:[%s13287_s0 + %s9480_s30]]   ;;  %s9487_s7 = smov 14  }
   0xd   :  { %s9600_s8 = sld [smem:[%s13287_s0 + %s9481_s4]]   ;;  %s9489_s22 = smov 16  }
   0xe   :  { %s9605_s14 = sld [smem:[%s13287_s0 + %s9482_s10]]   ;;  %s9490_s28 = smov 17  }
   0xf   :  { %s9610_s19 = sld [smem:[%s13287_s0 + %s9483_s15]]   ;;  %s9488_s15 = smov 15  }
  0x10   :  { %s9615_s24 = sld [smem:[%s13287_s0 + %s9484_s20]]  }
  0x11   :  { %s9620_s30 = sld [smem:[%s13287_s0 + %s9485_s26]]  }
  0x12   :  { %13351 = sst [smem:[#allocation25_spill]] %s9595_s3 }
  0x13   :  { %s9625_s6 = sld [smem:[%s13287_s0 + %s9486_s1]]  }
  0x14   :  { %13352 = sst [smem:[#allocation26_spill]] %s9605_s14 }
  0x15   :  { %13353 = sst [smem:[#allocation27_spill]] %s9610_s19 }
  0x16   :  { %13354 = sst [smem:[#allocation28_spill]] %s9615_s24 }
  0x17   :  { %13355 = sst [smem:[#allocation29_spill]] %s9620_s30 }
  0x18   :  { %s9630_s12 = sld [smem:[%s13287_s0 + %s9487_s7]]   ;;  %s9491_s7 = smov 18  }
  0x19   :  { %13356 = sst [smem:[#allocation30_spill]] %s9625_s6 }
  0x1a   :  { %s9635_s20 = sld [smem:[%s13287_s0 + %s9488_s15]]   ;;  %s9492_s15 = smov 19  }
  0x1b   :  { %s9640_s27 = sld [smem:[%s13287_s0 + %s9489_s22]]   ;;  %s9493_s22 = smov 20  }
  0x1c   :  { %s9645_s4 = sld [smem:[%s13287_s0 + %s9490_s28]]   ;;  %s9494_s28 = smov 21  }
  0x1d   :  { %s9650_s21 = sld [smem:[%s13287_s0 + %s9491_s7]]   ;;  %s9495_s7 = smov 22  }
  0x1e   :  { %13357 = sst [smem:[#allocation31_spill]] %s9630_s12 }
  0x1f   :  { %s9655_s17 = sld [smem:[%s13287_s0 + %s9492_s15]]   ;;  %s9496_s15 = smov 23  }
  0x20   :  { %s9665_s13 = sld [smem:[%s13287_s0 + %s9494_s28]]   ;;  %s9498_s28 = smov 25  }
  0x21   :  { %13358 = sst [smem:[#allocation32_spill]] %s9640_s27 }
  0x22   :  { %13359 = sst [smem:[#allocation33_spill]] %s9645_s4 }
  0x23   :  { %13360 = sst [smem:[#allocation34_spill]] %s9650_s21 }
  0x24   :  { %s9660_s27 = sld [smem:[%s13287_s0 + %s9493_s22]]   ;;  %s9497_s22 = smov 24  }
  0x25   :  { %13361 = sst [smem:[#allocation35_spill]] %s9655_s17 }
  0x26   :  { %13362 = sst [smem:[#allocation36_spill]] %s9665_s13 }
  0x27   :  { %s9670_s21 = sld [smem:[%s13287_s0 + %s9495_s7]]   ;;  %s9499_s7 = smov 26  }
  0x28   :  { %s9675_s17 = sld [smem:[%s13287_s0 + %s9496_s15]]   ;;  %s9500_s15 = smov 27  }
  0x29   :  { %s9680_s12 = sld [smem:[%s13287_s0 + %s9497_s22]]   ;;  %s9501_s22 = smov 28  }
  0x2a   :  { %s9685_s13 = sld [smem:[%s13287_s0 + %s9498_s28]]   ;;  %s9502_s28 = smov 29  }
  0x2b   :  { %s9690_s6 = sld [smem:[%s13287_s0 + %s9499_s7]]   ;;  %s9503_s7 = smov 30  }
  0x2c   :  { %s9710_s30 = sld [smem:[%s13287_s0 + %s9503_s7]]   ;;  %s9507_s7 = smov 34  }
  0x2e   :  { %13363 = sst [smem:[#allocation37_spill]] %s9675_s17 }
  0x2f   :  { %13364 = sst [smem:[#allocation38_spill]] %s9680_s12 }
  0x30   :  { %13365 = sst [smem:[#allocation39_spill]] %s9685_s13 }
  0x31   :  { %13366 = sst [smem:[#allocation40_spill]] %s9690_s6 }
  0x32   :  { %s9695_s17 = sld [smem:[%s13287_s0 + %s9500_s15]]   ;;  %s9504_s15 = smov 31  }
  0x33   :  { %s9700_s12 = sld [smem:[%s13287_s0 + %s9501_s22]]   ;;  %s9505_s22 = smov 32  }
  0x34   :  { %s9705_s13 = sld [smem:[%s13287_s0 + %s9502_s28]]   ;;  %s9506_s28 = smov 33  }
  0x35   :  { %13368 = sst [smem:[#allocation42_spill]] %s9710_s30 }
  0x36   :  { %s9715_s24 = sld [smem:[%s13287_s0 + %s9504_s15]]   ;;  %s9508_s15 = smov 35  }
  0x37   :  { %s9725_s19 = sld [smem:[%s13287_s0 + %s9506_s28]]  }
  0x38   :  { %s9730_s30 = sld [smem:[%s13287_s0 + %s9507_s7]]  }
  0x39   :  { %13367 = sst [smem:[#allocation41_spill]] %s9700_s12 }
  0x3a   :  { %s9720_s12 = sld [smem:[%s13287_s0 + %s9505_s22]]  }
  0x3b   :  { %s9735_s14 = sld [smem:[%s13287_s0 + %s9508_s15]]  }
  0x3c   :  { %76 = vsyncpa [#allocation3], 0 }
  0x3d   :  { %77 = vsyncpa [#allocation5], 0 }
  0x3e   :  { %78 = vsyncpa [#allocation8], 0 }
  0x3f   :  { %79 = vsyncpa [#allocation11], 0 }
  0x40   :  { %80 = vsyncpa [#allocation14], 0  ;;  %s9737_s22 = smov 0  }
  0x41 LB: > { %s13369_s3 = sld [smem:[#allocation25_spill]]  ;;  %s9509_s23 = smov [#allocation4]   ;;  %s9472_s22 = sphi %s9737_s22, %s86_s22  }
  0x42   : > { %s935_s26 = sshll.u32 %s9509_s23, 4  ;;  %s9743_s28 = sadd.s32 4294967295, %s9472_s22   ;;  %s936_s26 = int_to_ptr.vmem [resolvable:$true] %s935_s26 }
  0x43   : > { %p8023_p0 = scmp.ge.s32.totalorder %s9472_s22, 1  ;;  %p877_p1 = scmp.lt.s32.totalorder %s9472_s22, 3 }
  0x44   : > { %p13297_p2 = scmp.eq.s32.totalorder %s9743_s28, 0  ;;  %s9510_s1 = smov [#allocation7]  }
  0x45   : > { %p9748_p3 = pnand %p8023_p0, %p877_p1  ;;  %s969_s2 = sshll.u32 %s9510_s1, 4  ;;  %s9754_s2 = int_to_ptr.vmem [resolvable:$true] %s969_s2 }
  0x46   : > { %s9511_s10 = smov [#allocation10]   ;;  %s9512_s15 = smov [#allocation13]  }
  0x47   : > { %s13370_s0 = scalar_select %p9748_p3, 1, 0 }
  0x48   : > { %p9074_p4 = pneg %p9748_p3  ;;  %s1002_s11 = sshll.u32 %s9511_s10, 4  ;;  %s9762_s11 = int_to_ptr.vmem [resolvable:$true] %s1002_s11 }
  0x49   : > { %s9764_s16 = sshll.u32 %s9512_s15, 4  ;;  %s9223_s23 = scalar_lea.vmem %s936_s26, 512  ;;  %s1031_s16 = int_to_ptr.vmem [resolvable:$true] %s9764_s16 }
  0x4a   : > { %p9758_p5 = pnand %p13297_p2, %p9074_p4  ;;  %p9224_p7 = scmp.ne.s32.totalorder %s936_s26, %s9223_s23 }
  0x4b   : > { %p9231_p10 = scmp.lt.s32.totalorder %s936_s26, %s936_s26  ;;  %p9232_p11 = scmp.lt.s32.totalorder %s9223_s23, %s9223_s23 }
  0x4c   : > { %p9768_p6 = pneg %p9758_p5 }
  0x4d   : > { %p9233_p12 = por %p9232_p11, %p9231_p10 }
  0x4e   : > { %p9226_p8 = pnand %p9224_p7, %p9768_p6 }
  0x50   : > { %p9227_p9 = pneg %p9226_p8 }
  0x52   : > { %p9234_p13 = pnand %p9233_p12, %p9227_p9 }
  0x54   : > { %9237 = shalt.err (!%p9234_p13)
}
  0x55   : > { %s9513_s1 = smov 256   ;;  %s13373_s4 = sld [smem:[#allocation33_spill]] }
  0x56   : > { %s9514_s10 = smov 16   ;;  %s9249_s15 = scalar_lea.vmem %s9754_s2, 256 }
  0x57   : > { %p9250_p0 = scmp.ne.s32.totalorder %s9754_s2, %s9249_s15  ;;  %p9257_p7 = scmp.lt.s32.totalorder %s9754_s2, %s9754_s2 }
  0x58   : > { %p9258_p8 = scmp.lt.s32.totalorder %s9249_s15, %s9249_s15 }
  0x59   : > { %p9252_p1 = pnand %p9250_p0, %p9768_p6 }
  0x5a   : > { %p9259_p9 = por %p9258_p8, %p9257_p7 }
  0x5b   : > { %9080 = dma.hbm_to_vmem [thread:$0]  (!%p9758_p5), %s13373_s4, 512, %s936_s26, [#allocation5], %s9513_s1, %s9513_s1, %s9514_s10  }
  0x5c   : > { %p9253_p4 = pneg %p9252_p1 }
  0x5e   : > { %p9260_p10 = pnand %p9259_p9, %p9253_p4 }
  0x60   : > { %9263 = shalt.err (!%p9260_p10)
}
  0x61   : > { %9086 = dma.hbm_to_vmem [thread:$0]  (!%p9758_p5), %s9670_s21, 256, %s9754_s2, [#allocation8]  }
  0x62   : > { %s9275_s26 = scalar_lea.vmem %s9762_s11, 64  ;;  %p9283_p0 = scmp.lt.s32.totalorder %s9762_s11, %s9762_s11 }
  0x63   : > { %p9276_p11 = scmp.ne.s32.totalorder %s9762_s11, %s9275_s26  ;;  %p9284_p1 = scmp.lt.s32.totalorder %s9275_s26, %s9275_s26 }
  0x65   : > { %p9278_p12 = pnand %p9276_p11, %p9768_p6  ;;  %p9285_p7 = por %p9284_p1, %p9283_p0 }
  0x67   : > { %p9279_p13 = pneg %p9278_p12 }
  0x69   : > { %p9286_p4 = pnand %p9285_p7, %p9279_p13 }
  0x6b   : > { %9289 = shalt.err (!%p9286_p4)
}
  0x6c   : > { %9092 = dma.hbm_to_vmem [thread:$0]  (!%p9758_p5), %s9695_s17, 64, %s9762_s11, [#allocation11]  }
  0x6d   : > { %s9301_s2 = scalar_lea.vmem %s1031_s16, 64  ;;  %p9309_p11 = scmp.lt.s32.totalorder %s1031_s16, %s1031_s16 }
  0x6e   : > { %p9302_p8 = scmp.ne.s32.totalorder %s1031_s16, %s9301_s2  ;;  %p9310_p12 = scmp.lt.s32.totalorder %s9301_s2, %s9301_s2 }
  0x70   : > { %p9304_p9 = pnand %p9302_p8, %p9768_p6  ;;  %p9311_p2 = por %p9310_p12, %p9309_p11 }
  0x72   : > { %p9305_p10 = pneg %p9304_p9 }
  0x74   : > { %p9312_p3 = pnand %p9311_p2, %p9305_p10 }
  0x76   : > { %9315 = shalt.err (!%p9312_p3)
}
  0x77   : > { %9098 = dma.hbm_to_vmem [thread:$0]  (!%p9758_p5), %s9715_s24, 64, %s1031_s16, [#allocation14]  }
  0x78   : > { %s9515_s23 = smov [#allocation2]  }
  0x79   : > { %s919_s1 = sshll.u32 %s9515_s23, 4  ;;  %s920_s1 = int_to_ptr.vmem [resolvable:$true] %s919_s1 }
  0x7a   : > { %s9327_s11 = scalar_lea.vmem %s920_s1, 768  ;;  %p9335_p7 = scmp.lt.s32.totalorder %s920_s1, %s920_s1 }
  0x7b   : > { %p9328_p13 = scmp.ne.s32.totalorder %s920_s1, %s9327_s11  ;;  %p9336_p4 = scmp.lt.s32.totalorder %s9327_s11, %s9327_s11 }
  0x7d   : > { %p9330_p0 = pnand %p9328_p13, %p9768_p6  ;;  %p9337_p8 = por %p9336_p4, %p9335_p7 }
  0x7f   : > { %p9331_p1 = pneg %p9330_p0 }
  0x81   : > { %p9338_p9 = pnand %p9337_p8, %p9331_p1 }
  0x83   : > { %9341 = shalt.err (!%p9338_p9)
}
  0x84   : > { %s9516_s10 = smov 384   ;;  %s9517_s15 = smov 24  }
  0x85   : > { %9077 = dma.hbm_to_vmem [thread:$0]  (!%p9758_p5), %s9635_s20, 768, %s920_s1, [#allocation3], %s9516_s10, %s9516_s10, %s9517_s15  }
  0x86   : > { %s9518_s16 = smov [#allocation6]   ;;  %s9519_s2 = smov [#allocation9]  }
  0x87   : > { %s955_s26 = sshll.u32 %s9518_s16, 4  ;;  %s988_s23 = sshll.u32 %s9519_s2, 4  ;;  %s956_s26 = int_to_ptr.vmem [resolvable:$true] %s955_s26  ;;  %s989_s23 = int_to_ptr.vmem [resolvable:$true] %s988_s23 }
  0x88   : > { %s9353_s4 = scalar_lea.vmem %s956_s26, 256  ;;  %p9361_p11 = scmp.lt.s32.totalorder %s956_s26, %s956_s26 }
  0x89   : > { %p9354_p2 = scmp.ne.s32.totalorder %s956_s26, %s9353_s4  ;;  %p9362_p12 = scmp.lt.s32.totalorder %s9353_s4, %s9353_s4 }
  0x8b   : > { %p9356_p3 = pnand %p9354_p2, %p9768_p6  ;;  %p9363_p13 = por %p9362_p12, %p9361_p11 }
  0x8d   : > { %p9357_p10 = pneg %p9356_p3 }
  0x8f   : > { %p9364_p0 = pnand %p9363_p13, %p9357_p10 }
  0x91   : > { %9367 = shalt.err (!%p9364_p0)
}
  0x92   : > { %9083 = dma.hbm_to_vmem [thread:$0]  (!%p9758_p5), %s9660_s27, 256, %s956_s26, [#allocation5]  }
  0x93   : > { %s9379_s1 = scalar_lea.vmem %s989_s23, 32768  ;;  %p9387_p8 = scmp.lt.s32.totalorder %s989_s23, %s989_s23 }
  0x94   : > { %p9380_p1 = scmp.ne.s32.totalorder %s989_s23, %s9379_s1  ;;  %p9388_p9 = scmp.lt.s32.totalorder %s9379_s1, %s9379_s1 }
  0x96   : > { %p9382_p7 = pnand %p9380_p1, %p9768_p6  ;;  %p9389_p2 = por %p9388_p9, %p9387_p8 }
  0x98   : > { %p9383_p4 = pneg %p9382_p7 }
  0x9a   : > { %p9390_p3 = pnand %p9389_p2, %p9383_p4 }
  0x9c   : > { %9393 = shalt.err (!%p9390_p3)
}
  0x9d   : > { %s9520_s11 = smov 1024   ;;  %s13374_s6 = sld [smem:[#allocation40_spill]] }
  0x9e   : > { %s9521_s4 = smov 64   ;;  %s9522_s10 = smov [#allocation12]  }
  0x9f   : > { %s1016_s15 = sshll.u32 %s9522_s10, 4  ;;  %s9523_s16 = smov [#allocation15]   ;;  %s1017_s15 = int_to_ptr.vmem [resolvable:$true] %s1016_s15 }
  0xa0   : > { %s1044_s26 = sshll.u32 %s9523_s16, 4  ;;  %s9405_s2 = scalar_lea.vmem %s1017_s15, 64  ;;  %s1045_s26 = int_to_ptr.vmem [resolvable:$true] %s1044_s26 }
  0xa1   : > { %p9406_p10 = scmp.ne.s32.totalorder %s1017_s15, %s9405_s2  ;;  %p9413_p13 = scmp.lt.s32.totalorder %s1017_s15, %s1017_s15 }
  0xa2   : > { %p9414_p0 = scmp.lt.s32.totalorder %s9405_s2, %s9405_s2 }
  0xa3   : > { %9089 = dma.hbm_to_vmem [thread:$0]  (!%p9758_p5), %s13374_s6, 32768, %s989_s23, [#allocation8], %s9520_s11, %s9520_s11, %s9521_s4  }
  0xa4   : > { %p9408_p11 = pnand %p9406_p10, %p9768_p6  ;;  %p9415_p1 = por %p9414_p0, %p9413_p13 }
  0xa6   : > { %p9409_p12 = pneg %p9408_p11 }
  0xa8   : > { %p9416_p7 = pnand %p9415_p1, %p9409_p12 }
  0xaa   : > { %9419 = shalt.err (!%p9416_p7)
}
  0xab   : > { %9095 = dma.hbm_to_vmem [thread:$0]  (!%p9758_p5), %s9705_s13, 64, %s1017_s15, [#allocation11]  }
  0xac   : > { %s9431_s23 = scalar_lea.vmem %s1045_s26, 64  ;;  %p9439_p2 = scmp.lt.s32.totalorder %s1045_s26, %s1045_s26 }
  0xad   : > { %p9432_p4 = scmp.ne.s32.totalorder %s1045_s26, %s9431_s23  ;;  %p9440_p3 = scmp.lt.s32.totalorder %s9431_s23, %s9431_s23 }
  0xaf   : > { %p9434_p8 = pnand %p9432_p4, %p9768_p6  ;;  %p9441_p10 = por %p9440_p3, %p9439_p2 }
  0xb1   : > { %p9435_p9 = pneg %p9434_p8 }
  0xb3   : > { %p9442_p11 = pnand %p9441_p10, %p9435_p9 }
  0xb5   : > { %9445 = shalt.err (!%p9442_p11)
}
  0xb6   : > { %9101 = dma.hbm_to_vmem [thread:$0]  (!%p9758_p5), %s9725_s19, 64, %s1045_s26, [#allocation14]  }
  0xb7   : > { %p13375_p12 = scmp.ne.s32.totalorder %s13370_s0, 0 }
  0xb8   : > { %p13376_p13 = scmp.eq.s32.totalorder (!%p13375_p12), %s9743_s28, 0 }
  0xb9   : > { %1100 = sbr.rel (%p13375_p12) target bundleno = 5768 (0x1688), region = 160 }
  0xbe   : > { %9451 = dma.done.wait (%p13376_p13), [#allocation3], 768   ;;  %p13377_p0 = pmov %p13376_p13 }
  0xc0   : > { %9453 = vsyncadd (%p13377_p0), [#allocation3], 4294966528  ;;  %p13378_p6 = pmov %p13377_p0 }
  0xc1   : > { %p13379_p1 = pmov %p13377_p0 }
  0xc2   : > { %9455 = dma.done.wait (%p13378_p6), [#allocation5], 768  }
  0xc3   : > { %9457 = vsyncadd (%p13379_p1), [#allocation5], 4294966528  ;;  %p13380_p7 = pmov %p13377_p0 }
  0xc4   : > { %p13381_p5 = pmov %p13377_p0 }
  0xc5   : > { %9459 = dma.done.wait (%p13380_p7), [#allocation8], 33024  }
  0xc6   : > { %9461 = vsyncadd (%p13381_p5), [#allocation8], 4294934272  ;;  %p13382_p4 = pmov %p13377_p0 }
  0xc7   : > { %p13383_p8 = pmov %p13377_p0 }
  0xc8   : > { %9463 = dma.done.wait (%p13382_p4), [#allocation11], 128  }
  0xc9   : > { %9465 = vsyncadd (%p13383_p8), [#allocation11], 4294967168  ;;  %p13384_p9 = pmov %p13377_p0 }
  0xca   : > { %p13385_p2 = pmov %p13377_p0 }
  0xcb   : > { %9467 = dma.done.wait (%p13384_p9), [#allocation14], 128  }
  0xcc   : > { %9469 = vsyncadd (%p13385_p2), [#allocation14], 4294967168  ;;  %s13386_s5 = sld [smem:[#allocation21_spill]]  ;;  %p1240_p3 = scmp.lt.s32.totalorder %s9743_s28, 1  ;;  %vm13334_vm0 = vcmask 1043456   ;;  %vm13329_vm1 = vcmask 31744   ;;  %v1481_v47 = vlaneseq }
  0xcd   : > { %v1282_v0 = vld [vmem:[%s9585_s25] sm:$0xf]  ;;  %s9524_s18 = smov 4   ;;  %s13309_s1 = smov 1   ;;  %v1284_v17 = vld [vmem:[%s9590_s29 + $0x8] sm:$0xff]  ;;  %v1286_v18 = vld [vmem:[%s9590_s29 + $0x18] sm:$0xff] }
  0xce   : > { %s13595_s28 = smov (!%p1240_p3, %s9743_s28), 1  ;;  %8934 = vmatprep.subr.msk.mxu1 %vm13334_vm0, %v1282_v0  ;;  %s13307_s11 = smov 127   ;;  %1997 = vmatprep.mubr.f32.mxu0 %v1286_v18  ;;  %v9532_v25 = vmov 0   ;;  %v1306_v26 = vld [vmem:[%s13369_s3 + $0x18] sm:$0xff]  ;;  %v1305_v27 = vld [vmem:[%s13369_s3 + $0x10] sm:$0xff]  ;;  %v1303_v30 = vld [vmem:[%s13369_s3] sm:$0xff] }
  0xcf   : > { %s8573_s0 = sshll.u32 %s13595_s28, 6  ;;  %8935 = vmatpush3.msk.msra.mxu1 %vm13334_vm0, %v1282_v0  ;;  %s9527_s4 = smov 124   ;;  %9206 = vset.pattern.permute.xlu0 %v9532_v25  ;;  %v1304_v31 = vld [vmem:[%s13369_s3 + $0x8] sm:$0xff]  ;;  %v10096_v51 = vand.u32 127, %v1481_v47  ;;  %vm1642_vm3 = vcmask 7168   ;;  %vm10128_vm4 = vmneg %vm13329_vm1  ;;  %vm1765_vm5 = vcmask 97280  }
  0xd0   : > { %s9528_s10 = smov 3   ;;  %s9529_s15 = smov 5   ;;  %9207 = vset.pattern.permute.xlu1 %v9532_v25  ;;  %vm1683_vm7 = vcmask 121856   ;;  %vm1595_vm8 = vcmask 23552   ;;  %vm1516_vm9 = vcmask 39936   ;;  %vm1724_vm10 = vcmask 105472  }
  0xd1   : > { %s9530_s16 = smov 125   ;;  %s9531_s26 = smov 123   ;;  %v1483_v54 = vand.u32 3, %v10096_v51  ;;  %vm1798_vm11 = vcmask 89088   ;;  %vm1835_vm12 = vcmask 523264   ;;  %vm2886_vm13 = vcmask 261120  }
  0xd2   : > { %s1244_s7 = scalar_lea.vmem %s13386_s5, %s8573_s0  ;;  %s10032_s2 = sshll.u32 %s13595_s28, 5  ;;  %vm3099_vm14 = vcmask 130048   ;;  %vm3347_vm15 = vcmask 457728  }
  0xd3   : > { %v1270_v1 = vld [vmem:[%s1244_s7] sm:$0xff]  ;;  %v1271_v2 = vld [vmem:[%s1244_s7 + $0x8] sm:$0xff]  ;;  %v1272_v3 = vld [vmem:[%s1244_s7 + $0x10] sm:$0xff]  ;;  %s1249_s23 = scalar_lea.vmem %s9565_s9, %s10032_s2  ;;  %v10115_v57 = vadd.s32 4294967295, %v1483_v54  ;;  %v10136_v0 = vadd.s32 1, %v1483_v54  ;;  %s13389_s0 = sld [smem:[#allocation26_spill]] }
  0xd4   : > { %8936 = vmatprep.mubr.msk.f32.mxu1 %vm13329_vm1, %v1270_v1  ;;  %v1273_v4 = vld [vmem:[%s1244_s7 + $0x18] sm:$0xff]  ;;  %v1274_v5 = vld [vmem:[%s1244_s7 + $0x20] sm:$0xff]  ;;  %v1275_v6 = vld [vmem:[%s1244_s7 + $0x28] sm:$0xff]  ;;  %s13404_s3 = sld [smem:[#allocation32_spill]]  ;;  %s13406_s5 = smov 119  }
  0xd5   : > { %8937 = vmatmul.mubr.msk.f32.vlgmr.msra.gmra.mxu1 %vm13329_vm1, %v1271_v2  ;;  %v1276_v7 = vld [vmem:[%s1244_s7 + $0x30] sm:$0xff]  ;;  %v1277_v8 = vld [vmem:[%s1244_s7 + $0x38] sm:$0xff]  ;;  %v10070_v42 = vld [vmem:[%s1249_s23 + $0x8] sm:$0xff]  ;;  %vm1526_vm2 = vcmp.ge.s32.totalorder %v10115_v57, 0  ;;  %vm1606_vm6 = vcmp.lt.s32.totalorder %v10136_v0, 4  ;;  %s13390_s7 = sld [smem:[#allocation27_spill]] }
  0xd6   : > { %8939 = vmatprep.mubr.msk.f32.mxu1 %vm13329_vm1, %v1272_v3  ;;  %v10042_v34 = vld [vmem:[%s1249_s23 + $0x18] sm:$0xff]  ;;  %v10052_v37 = vld [vmem:[%s1249_s23 + $0x10] sm:$0xff]  ;;  %v10088_v48 = vld [vmem:[%s1249_s23] sm:$0xff]  ;;  %s13305_s23 = smov 8   ;;  %s13408_s6 = sld [smem:[#allocation34_spill]] }
  0xd9   : > { %8940 = vmatmul.mubr.msk.f32.gmra.mxu1 %vm13329_vm1, %v1273_v4 }
  0xda   : > { %8942 = vmatprep.mubr.msk.f32.mxu1 %vm13329_vm1, %v1274_v5 }
  0xdb   : > { %v1338_v57 = vld [vmem:[%s13390_s7 + $0x38] sm:$0xff] }
  0xdd   : > { %8943 = vmatmul.mubr.msk.f32.gmra.mxu1 %vm13329_vm1, %v1275_v6 }
  0xde   : > { %8945 = vmatprep.mubr.msk.f32.mxu1 %vm13329_vm1, %v1276_v7 }
  0xe1   : > { %8946 = vmatmul.mubr.msk.f32.gmra.mxu1 %vm13329_vm1, %v1277_v8 }
  0xe2   : > { %1912 = vmatprep.mubr.f32.mxu1 %v1284_v17 }
 0x195   : > { %v9867_v9 = vpop.f32.mrf.mxu1 }
 0x196   : > { %1541 = vrot.lane.b32.xlu1 %v9867_v9, %s9524_s18  ;;  %1620 = vrot.lane.b32.xlu0 %v9867_v9, %s13309_s1 }
 0x197   : > { %v9877_v10 = vpop.f32.mrf.mxu1 }
 0x199   : > { %v9887_v11 = vpop.f32.mrf.mxu1 }
 0x19a   : > { %1661 = vrot.lane.b32.xlu1 %v9867_v9, %s13307_s11  ;;  %1743 = vrot.lane.b32.xlu0 %v9867_v9, %s9527_s4 }
 0x19b   : > { %v9897_v12 = vpop.f32.mrf.mxu1 }
 0x19d   : > { %v9907_v13 = vpop.f32.mrf.mxu1 }
 0x19e   : > { %1539 = vrot.lane.b32.xlu1 %v9877_v10, %s9524_s18  ;;  %1618 = vrot.lane.b32.xlu0 %v9877_v10, %s13309_s1 }
 0x19f   : > { %v9917_v14 = vpop.f32.mrf.mxu1 }
 0x1a1   : > { %v9935_v15 = vpop.f32.mrf.mxu1 }
 0x1a2   : > { %1741 = vrot.lane.b32.xlu1 %v9877_v10, %s9527_s4  ;;  %1659 = vrot.lane.b32.xlu0 %v9877_v10, %s13307_s11 }
 0x1a3   : > { %v9953_v16 = vpop.f32.mrf.mxu1 }
 0x1a6   : > { %1545 = vrot.lane.b32.xlu1 %v9887_v11, %s9524_s18  ;;  %1624 = vrot.lane.b32.xlu0 %v9887_v11, %s13309_s1 }
 0x1aa   : > { %1665 = vrot.lane.b32.xlu1 %v9887_v11, %s13307_s11  ;;  %1747 = vrot.lane.b32.xlu0 %v9887_v11, %s9527_s4 }
 0x1ae   : > { %1543 = vrot.lane.b32.xlu1 %v9897_v12, %s9524_s18  ;;  %1622 = vrot.lane.b32.xlu0 %v9897_v12, %s13309_s1 }
 0x1b2   : > { %1663 = vrot.lane.b32.xlu1 %v9897_v12, %s13307_s11  ;;  %1745 = vrot.lane.b32.xlu0 %v9897_v12, %s9527_s4 }
 0x1b6   : > { %1549 = vrot.lane.b32.xlu1 %v9907_v13, %s9524_s18  ;;  %1628 = vrot.lane.b32.xlu0 %v9907_v13, %s13309_s1 }
 0x1ba   : > { %1669 = vrot.lane.b32.xlu1 %v9907_v13, %s13307_s11  ;;  %1751 = vrot.lane.b32.xlu0 %v9907_v13, %s9527_s4 }
 0x1be   : > { %1581 = vrot.lane.b32.xlu1 %v9907_v13, %s9528_s10  ;;  %1626 = vrot.lane.b32.xlu0 %v9917_v14, %s13309_s1 }
 0x1c2   : > { %1502 = vrot.lane.b32.xlu1 %v9907_v13, %s9529_s15  ;;  %1749 = vrot.lane.b32.xlu0 %v9917_v14, %s9527_s4 }
 0x1c6   : > { %1710 = vrot.lane.b32.xlu1 %v9907_v13, %s9530_s16  ;;  %1579 = vrot.lane.b32.xlu0 %v9917_v14, %s9528_s10 }
 0x1ca   : > { %1547 = vrot.lane.b32.xlu1 %v9917_v14, %s9524_s18  ;;  %1500 = vrot.lane.b32.xlu0 %v9917_v14, %s9529_s15 }
 0x1ce   : > { %1667 = vrot.lane.b32.xlu1 %v9917_v14, %s13307_s11  ;;  %1632 = vrot.lane.b32.xlu0 %v9935_v15, %s13309_s1 }
 0x1d2   : > { %1673 = vrot.lane.b32.xlu1 %v9935_v15, %s13307_s11  ;;  %1553 = vrot.lane.b32.xlu0 %v9935_v15, %s9524_s18 }
 0x1d6   : > { %1506 = vrot.lane.b32.xlu1 %v9935_v15, %s9529_s15  ;;  %1755 = vrot.lane.b32.xlu0 %v9935_v15, %s9527_s4 }
 0x1da   : > { %1714 = vrot.lane.b32.xlu1 %v9935_v15, %s9530_s16  ;;  %1585 = vrot.lane.b32.xlu0 %v9935_v15, %s9528_s10 }
 0x1de   : > { %1708 = vrot.lane.b32.xlu0 %v9917_v14, %s9530_s16  ;;  %1630 = vrot.lane.b32.xlu1 %v9953_v16, %s13309_s1 }
 0x1e2   : > { %1575 = vrot.lane.b32.xlu0 %v9897_v12, %s9528_s10  ;;  %1551 = vrot.lane.b32.xlu1 %v9953_v16, %s9524_s18 }
 0x1e6   : > { %1496 = vrot.lane.b32.xlu0 %v9897_v12, %s9529_s15  ;;  %1671 = vrot.lane.b32.xlu1 %v9953_v16, %s13307_s11 }
 0x1ea   : > { %1753 = vrot.lane.b32.xlu0 %v9953_v16, %s9527_s4  ;;  %1577 = vrot.lane.b32.xlu1 %v9887_v11, %s9528_s10 }
 0x1ee   : > { %1704 = vrot.lane.b32.xlu0 %v9897_v12, %s9530_s16  ;;  %1498 = vrot.lane.b32.xlu1 %v9887_v11, %s9529_s15 }
 0x1f2   : > { %1583 = vrot.lane.b32.xlu0 %v9953_v16, %s9528_s10  ;;  %1706 = vrot.lane.b32.xlu1 %v9887_v11, %s9530_s16 }
 0x1f6   : > { %1504 = vrot.lane.b32.xlu0 %v9953_v16, %s9529_s15  ;;  %1573 = vrot.lane.b32.xlu1 %v9867_v9, %s9528_s10 }
 0x1fa   : > { %1712 = vrot.lane.b32.xlu0 %v9953_v16, %s9530_s16  ;;  %1494 = vrot.lane.b32.xlu1 %v9867_v9, %s9529_s15 }
 0x1fe   : > { %1571 = vrot.lane.b32.xlu0 %v9877_v10, %s9528_s10  ;;  %1702 = vrot.lane.b32.xlu1 %v9867_v9, %s9530_s16 }
 0x202   : > { %1492 = vrot.lane.b32.xlu0 %v9877_v10, %s9529_s15  ;;  %1700 = vrot.lane.b32.xlu1 %v9877_v10, %s9530_s16 }
 0x206   : > { %1788 = vrot.lane.b32.xlu0 %v9935_v15, %s9531_s26  ;;  %1786 = vrot.lane.b32.xlu1 %v9953_v16, %s9531_s26 }
 0x208   : > { %v10001_v19 = vpop.permute.xlu1 %1541  ;;  %v10003_v20 = vpop.permute.xlu0 %1620 }
 0x20a   : > { %1784 = vrot.lane.b32.xlu0 %v9907_v13, %s9531_s26  ;;  %1782 = vrot.lane.b32.xlu1 %v9917_v14, %s9531_s26 }
 0x20c   : > { %v10009_v21 = vpop.permute.xlu1 %1661  ;;  %v10011_v22 = vpop.permute.xlu0 %1743 }
 0x20e   : > { %1780 = vrot.lane.b32.xlu0 %v9887_v11, %s9531_s26  ;;  %1778 = vrot.lane.b32.xlu1 %v9897_v12, %s9531_s26 }
 0x210   : > { %v10017_v23 = vpop.permute.xlu1 %1539  ;;  %v10019_v24 = vpop.permute.xlu0 %1618 }
 0x212   : > { %1776 = vrot.lane.b32.xlu0 %v9867_v9, %s9531_s26  ;;  %1774 = vrot.lane.b32.xlu1 %v9877_v10, %s9531_s26 }
 0x214   : > { %v10027_v28 = vpop.permute.xlu1 %1741  ;;  %v10029_v29 = vpop.permute.xlu0 %1659 }
 0x216   : > { %1832 = vperm.xlu0 %9206, %v1306_v26   ;;  %1827 = vperm.xlu1 %9207, %v1305_v27  }
 0x218   : > { %v10036_v32 = vpop.permute.xlu1 %1545  ;;  %v10038_v33 = vpop.permute.xlu0 %1624 }
 0x219   : > { %v1646_v47 = vsel %vm1642_vm3, 0.0, %v10038_v33  ;;  %v1644_v33 = vsel %vm1642_vm3, 0.0, %v10003_v20 }
 0x21a   : > { %1817 = vperm.xlu0 %9206, %v1303_v30   ;;  %1822 = vperm.xlu1 %9207, %v1304_v31  }
 0x21c   : > { %v10044_v35 = vpop.permute.xlu1 %1665  ;;  %v10046_v36 = vpop.permute.xlu0 %1747 }
 0x21e   : > { %2241 = vrot.lane.b32.xlu1 %v10042_v34, %s13309_s1  ;;  %2169 = vrot.lane.b32.xlu0 %v10042_v34, %s9524_s18 }
 0x220   : > { %v10054_v38 = vpop.permute.xlu1 %1543  ;;  %v10056_v39 = vpop.permute.xlu0 %1622 }
 0x222   : > { %2239 = vrot.lane.b32.xlu1 %v10052_v37, %s13309_s1  ;;  %2281 = vrot.lane.b32.xlu0 %v10042_v34, %s13307_s11 }
 0x224   : > { %v10062_v40 = vpop.permute.xlu1 %1663  ;;  %v10064_v41 = vpop.permute.xlu0 %1745 }
 0x226   : > { %2361 = vrot.lane.b32.xlu1 %v10042_v34, %s9527_s4  ;;  %2167 = vrot.lane.b32.xlu0 %v10052_v37, %s9524_s18 }
 0x228   : > { %v10072_v43 = vpop.permute.xlu1 %1549  ;;  %v10074_v44 = vpop.permute.xlu0 %1628 }
 0x229   : > { %v1648_v27 = vsel %vm1642_vm3, 0.0, %v10074_v44 }
 0x22a   : > { %2237 = vrot.lane.b32.xlu1 %v10070_v42, %s13309_s1  ;;  %2279 = vrot.lane.b32.xlu0 %v10052_v37, %s13307_s11 }
 0x22c   : > { %v10080_v45 = vpop.permute.xlu1 %1669  ;;  %v10082_v46 = vpop.permute.xlu0 %1751 }
 0x22d   : > { %v1689_v20 = vsel %vm1683_vm7, %v10080_v45, 0.0 }
 0x22e   : > { %2359 = vrot.lane.b32.xlu1 %v10052_v37, %s9527_s4  ;;  %2165 = vrot.lane.b32.xlu0 %v10070_v42, %s9524_s18 }
 0x230   : > { %v10090_v49 = vpop.permute.xlu1 %1581  ;;  %v1627_v50 = vpop.permute.xlu0 %1626 }
 0x231   : > { %v1647_v30 = vsel %vm1642_vm3, 0.0, %v1627_v50  ;;  %v1645_v50 = vsel %vm1642_vm3, 0.0, %v10056_v39 }
 0x232   : > { %2235 = vrot.lane.b32.xlu1 %v10088_v48, %s13309_s1  ;;  %2277 = vrot.lane.b32.xlu0 %v10070_v42, %s13307_s11 }
 0x234   : > { %v10098_v52 = vpop.permute.xlu1 %1502  ;;  %v10100_v53 = vpop.permute.xlu0 %1749 }
 0x236   : > { %2357 = vrot.lane.b32.xlu1 %v10070_v42, %s9527_s4  ;;  %2163 = vrot.lane.b32.xlu0 %v10088_v48, %s9524_s18 }
 0x238   : > { %v10107_v55 = vpop.permute.xlu1 %1710  ;;  %v10109_v56 = vpop.permute.xlu0 %1579 }
 0x23a   : > { %2355 = vrot.lane.b32.xlu1 %v10088_v48, %s9527_s4  ;;  %2275 = vrot.lane.b32.xlu0 %v10088_v48, %s13307_s11 }
 0x23c   : > { %v1548_v58 = vpop.permute.xlu1 %1547  ;;  %v10117_v59 = vpop.permute.xlu0 %1500 }
 0x23e   : > { %2201 = vrot.lane.b32.xlu1 %v10042_v34, %s9528_s10  ;;  %2129 = vrot.lane.b32.xlu0 %v10042_v34, %s9529_s15 }
 0x240   : > { %v10124_v60 = vpop.permute.xlu1 %1667  ;;  %v1633_v61 = vpop.permute.xlu0 %1632 }
 0x241   : > { %v1650_v62 = vsel %vm1642_vm3, 0.0, %v1633_v61  ;;  %v1688_v39 = vsel %vm1683_vm7, %v10124_v60, 0.0  ;;  %v1686_v60 = vsel %vm1683_vm7, %v10062_v40, 0.0 }
 0x242   : > { %8588 = vmatprep.subr.msk.mxu1 %vm1526_vm2, %v1650_v62  ;;  %2199 = vrot.lane.b32.xlu1 %v10052_v37, %s9528_s10 }
 0x243   : > { %2321 = vrot.lane.b32.xlu0 %v10042_v34, %s9530_s16 }
 0x244   : > { %v1674_v1 = vpop.permute.xlu1 %1673  ;;  %v1554_v2 = vpop.permute.xlu0 %1553 }
 0x245   : > { %8589 = vmatpush3.msk.msra.mxu1 %vm10128_vm4, %v1554_v2  ;;  %v1691_v5 = vsel %vm1683_vm7, %v1674_v1, 0.0  ;;  %v1521_v2 = vsel %vm1516_vm9, 0.0, %v10117_v59 }
 0x246   : > { %2127 = vrot.lane.b32.xlu1 %v10052_v37, %s9529_s15 }
 0x247   : > { %2197 = vrot.lane.b32.xlu0 %v10070_v42, %s9528_s10 }
 0x248   : > { %v1507_v3 = vpop.permute.xlu1 %1506  ;;  %v1756_v4 = vpop.permute.xlu0 %1755 }
 0x249   : > { %8632 = vmatprep.subr.msk.mxu0 %vm1765_vm5, %v1756_v4 }
 0x24a   : > { %8633 = vmatpush3.msk.msra.mxu0 %vm1606_vm6, %v1691_v5  ;;  %2319 = vrot.lane.b32.xlu1 %v10052_v37, %s9530_s16 }
 0x24b   : > { %2125 = vrot.lane.b32.xlu0 %v10070_v42, %s9529_s15 }
 0x24c   : > { %v10155_v6 = vpop.permute.xlu1 %1714  ;;  %v1586_v7 = vpop.permute.xlu0 %1585 }
 0x24d   : > { %v1603_v45 = vsel %vm1595_vm8, 0.0, %v1586_v7 }
 0x24e   : > { %2195 = vrot.lane.b32.xlu1 %v10088_v48, %s9528_s10 }
 0x24f   : > { %2317 = vrot.lane.b32.xlu0 %v10070_v42, %s9530_s16 }
 0x250   : > { %v10161_v8 = vpop.permute.xlu0 %1708  ;;  %v1631_v17 = vpop.permute.xlu1 %1630 }
 0x251   : > { %v1649_v18 = vsel %vm1642_vm3, 0.0, %v1631_v17 }
 0x252   : > { %8590 = vmatprep.subr.msk.mxu1 %vm1526_vm2, %v1649_v18  ;;  %2123 = vrot.lane.b32.xlu1 %v10088_v48, %s9529_s15 }
 0x254   : > { %v10168_v25 = vpop.permute.xlu0 %1575  ;;  %v1552_v26 = vpop.permute.xlu1 %1551 }
 0x255   : > { %8591 = vmatpush3.msk.msra.mxu1 %vm10128_vm4, %v1552_v26  ;;  %v1598_v59 = vsel %vm1595_vm8, 0.0, %v10168_v25  ;;  %v1283_v25 = vld [vmem:[%s9590_s29] sm:$0xff] }
 0x256   : > { %8592 = vmatprep.subr.msk.mxu1 %vm1526_vm2, %v1648_v27  ;;  %2315 = vrot.lane.b32.xlu1 %v10088_v48, %s9530_s16 }
 0x257   : > { %8593 = vmatpush3.msk.msra.mxu1 %vm10128_vm4, %v10072_v43 }
 0x258   : > { %v10182_v31 = vpop.permute.xlu0 %1496  ;;  %8594 = vmatprep.subr.msk.mxu1 %vm1526_vm2, %v1647_v30  ;;  %v1672_v44 = vpop.permute.xlu1 %1671 }
 0x259   : > { %8595 = vmatpush3.msk.msra.mxu1 %vm10128_vm4, %v1548_v58  ;;  %v1690_v58 = vsel %vm1683_vm7, %v1672_v44, 0.0  ;;  %v1288_v44 = vld [vmem:[%s9590_s29 + $0x28] sm:$0xff] }
 0x25a   : > { %8596 = vmatprep.subr.msk.mxu1 %vm1526_vm2, %v1646_v47 }
 0x25b   : > { %8597 = vmatpush3.msk.msra.mxu1 %vm10128_vm4, %v10036_v32  ;;  %v1643_v32 = vsel %vm1642_vm3, 0.0, %v10019_v24 }
 0x25c   : > { %v1754_v43 = vpop.permute.xlu0 %1753  ;;  %8598 = vmatprep.subr.msk.mxu1 %vm1526_vm2, %v1645_v50  ;;  %v1578_v54 = vpop.permute.xlu1 %1577 }
 0x25d   : > { %8599 = vmatpush3.msk.msra.mxu1 %vm10128_vm4, %v10054_v38  ;;  %8634 = vmatprep.subr.msk.mxu0 %vm1765_vm5, %v1754_v43  ;;  %v1285_v43 = vld [vmem:[%s9590_s29 + $0x10] sm:$0xff] }
 0x25e   : > { %8600 = vmatprep.subr.msk.mxu1 %vm1526_vm2, %v1644_v33  ;;  %8635 = vmatpush3.msk.msra.mxu0 %vm1606_vm6, %v1690_v58 }
 0x25f   : > { %8601 = vmatpush3.msk.msra.mxu1 %vm10128_vm4, %v10001_v19  ;;  %8636 = vmatprep.subr.msk.mxu0 %vm1765_vm5, %v10082_v46  ;;  %v1524_v19 = vsel %vm1516_vm9, 0.0, %v1507_v3  ;;  %v1687_v46 = vsel %vm1683_vm7, %v10044_v35, 0.0  ;;  %v1685_v35 = vsel %vm1683_vm7, %v10009_v21, 0.0  ;;  %v1601_v21 = vsel %vm1595_vm8, 0.0, %v10090_v49 }
 0x260   : > { %v10219_v38 = vpop.permute.xlu0 %1704  ;;  %8602 = vmatprep.subr.msk.mxu1 %vm1526_vm2, %v1643_v32  ;;  %8637 = vmatpush3.msk.msra.mxu0 %vm1606_vm6, %v1689_v20  ;;  %v1499_v24 = vpop.permute.xlu1 %1498  ;;  %v1599_v3 = vsel %vm1595_vm8, 0.0, %v1578_v54  ;;  %v1291_v54 = vld [vmem:[%s9590_s29 + $0x40] sm:$0xff]  ;;  %v1293_v32 = vld [vmem:[%s9590_s29 + $0x50] sm:$0xff] }
 0x261   : > { %8603 = vmatpush3.msk.msra.mxu1 %vm10128_vm4, %v10017_v23  ;;  %8638 = vmatprep.subr.msk.mxu0 %vm1765_vm5, %v10100_v53  ;;  %v1727_v26 = vsel %vm1724_vm10, %v10219_v38, 0.0  ;;  %v1290_v38 = vld [vmem:[%s9590_s29 + $0x38] sm:$0xff] }
 0x262   : > { %8604 = vmatprep.subr.msk.mxu1 %vm1606_vm6, %v1603_v45  ;;  %8639 = vmatpush3.msk.msra.mxu0 %vm1606_vm6, %v1688_v39 }
 0x263   : > { %8605 = vmatpush3.msk.msra.mxu1 %vm1526_vm2, %v1524_v19  ;;  %8640 = vmatprep.subr.msk.mxu0 %vm1765_vm5, %v10046_v36 }
 0x264   : > { %v1584_v23 = vpop.permute.xlu0 %1583  ;;  %8641 = vmatpush3.msk.msra.mxu0 %vm1606_vm6, %v1687_v46  ;;  %v1707_v53 = vpop.permute.xlu1 %1706  ;;  %v1298_v46 = vld [vmem:[%s9590_s29 + $0x78] sm:$0xff] }
 0x265   : > { %v1602_v61 = vsel %vm1595_vm8, 0.0, %v1584_v23  ;;  %8642 = vmatprep.subr.msk.mxu0 %vm1765_vm5, %v10064_v41  ;;  %v1684_v41 = vsel %vm1683_vm7, %v10029_v29, 0.0  ;;  %v1522_v29 = vsel %vm1516_vm9, 0.0, %v10098_v52  ;;  %v1728_v7 = vsel %vm1724_vm10, %v1707_v53, 0.0  ;;  %v1295_v53 = vld [vmem:[%s9590_s29 + $0x60] sm:$0xff] }
 0x266   : > { %8606 = vmatprep.subr.msk.mxu1 %vm1606_vm6, %v1602_v61  ;;  %8643 = vmatpush3.msk.msra.mxu0 %vm1606_vm6, %v1686_v60  ;;  %v1301_v60 = vld [vmem:[%s9590_s29 + $0x90] sm:$0xff]  ;;  %v1287_v61 = vld [vmem:[%s9590_s29 + $0x20] sm:$0xff] }
 0x267   : > { %8644 = vmatprep.subr.msk.mxu0 %vm1765_vm5, %v10011_v22  ;;  %v1732_v22 = vsel %vm1724_vm10, %v10155_v6, 0.0  ;;  %v1519_v6 = vsel %vm1516_vm9, 0.0, %v10182_v31 }
 0x268   : > { %v1505_v36 = vpop.permute.xlu0 %1504  ;;  %8645 = vmatpush3.msk.msra.mxu0 %vm1606_vm6, %v1685_v35  ;;  %v1574_v40 = vpop.permute.xlu1 %1573 }
 0x269   : > { %v1523_v62 = vsel %vm1516_vm9, 0.0, %v1505_v36  ;;  %8646 = vmatprep.subr.msk.mxu0 %vm1765_vm5, %v10027_v28  ;;  %v1600_v28 = vsel %vm1595_vm8, 0.0, %v10109_v56  ;;  %v1520_v56 = vsel %vm1516_vm9, 0.0, %v1499_v24  ;;  %v1296_v24 = vld [vmem:[%s9590_s29 + $0x68] sm:$0xff] }
 0x26a   : > { %8607 = vmatpush3.msk.msra.mxu1 %vm1526_vm2, %v1523_v62  ;;  %8647 = vmatpush3.msk.msra.mxu0 %vm1606_vm6, %v1684_v41  ;;  %v1300_v62 = vld [vmem:[%s9590_s29 + $0x88] sm:$0xff] }
 0x26b   : > { %8608 = vmatprep.subr.msk.mxu1 %vm1606_vm6, %v1601_v21  ;;  %8648 = vmatprep.subr.msk.mxu0 %vm1526_vm2, %v1732_v22  ;;  %v1292_v22 = vld [vmem:[%s9590_s29 + $0x48] sm:$0xff] }
 0x26c   : > { %v1713_v49 = vpop.permute.xlu0 %1712  ;;  %8609 = vmatpush3.msk.msra.mxu1 %vm1526_vm2, %v1522_v29  ;;  %8649 = vmatpush3.msra.mxu0 %v9935_v15  ;;  %v1495_v1 = vpop.permute.xlu1 %1494  ;;  %v1730_v15 = vsel %vm1724_vm10, %v10107_v55, 0.0  ;;  %v1729_v55 = vsel %vm1724_vm10, %v10161_v8, 0.0  ;;  %v1297_v29 = vld [vmem:[%s9590_s29 + $0x70] sm:$0xff] }
 0x26d   : > { %v1731_v52 = vsel %vm1724_vm10, %v1713_v49, 0.0  ;;  %8610 = vmatprep.subr.msk.mxu1 %vm1606_vm6, %v1600_v28  ;;  %v1518_v8 = vsel %vm1516_vm9, 0.0, %v1495_v1  ;;  %v1302_v28 = vld [vmem:[%s9590_s29 + $0x98] sm:$0xff] }
 0x26e   : > { %8611 = vmatpush3.msk.msra.mxu1 %vm1526_vm2, %v1521_v2  ;;  %8650 = vmatprep.subr.msk.mxu0 %vm1526_vm2, %v1731_v52 }
 0x26f   : > { %8612 = vmatprep.subr.msk.mxu1 %vm1606_vm6, %v1599_v3  ;;  %8651 = vmatpush3.msra.mxu0 %v9953_v16  ;;  %v1597_v16 = vsel %vm1595_vm8, 0.0, %v1574_v40 }
 0x270   : > { %v1572_v4 = vpop.permute.xlu0 %1571  ;;  %8613 = vmatpush3.msk.msra.mxu1 %vm1526_vm2, %v1520_v56  ;;  %8652 = vmatprep.subr.msk.mxu0 %vm1526_vm2, %v1730_v15  ;;  %v1703_v5 = vpop.permute.xlu1 %1702 }
 0x271   : > { %8614 = vmatprep.subr.msk.mxu1 %vm1606_vm6, %v1598_v59  ;;  %8653 = vmatpush3.msra.mxu0 %v9907_v13  ;;  %v1596_v13 = vsel %vm1595_vm8, 0.0, %v1572_v4  ;;  %v1726_v30 = vsel %vm1724_vm10, %v1703_v5, 0.0 }
 0x272   : > { %8615 = vmatpush3.msk.msra.mxu1 %vm1526_vm2, %v1519_v6  ;;  %8654 = vmatprep.subr.msk.mxu0 %vm1526_vm2, %v1729_v55 }
 0x273   : > { %8616 = vmatprep.subr.msk.mxu1 %vm1606_vm6, %v1597_v16  ;;  %8655 = vmatpush3.msra.mxu0 %v9917_v14  ;;  %v1289_v14 = vld [vmem:[%s9590_s29 + $0x30] sm:$0xff] }
 0x274   : > { %v1493_v17 = vpop.permute.xlu0 %1492  ;;  %8617 = vmatpush3.msk.msra.mxu1 %vm1526_vm2, %v1518_v8  ;;  %8656 = vmatprep.subr.msk.mxu0 %vm1526_vm2, %v1728_v7  ;;  %v1701_v18 = vpop.permute.xlu1 %1700 }
 0x275   : > { %v1517_v27 = vsel %vm1516_vm9, 0.0, %v1493_v17  ;;  %8618 = vmatprep.subr.msk.mxu1 %vm1606_vm6, %v1596_v13  ;;  %8657 = vmatpush3.msra.mxu0 %v9887_v11  ;;  %v1725_v47 = vsel %vm1724_vm10, %v1701_v18, 0.0 }
 0x276   : > { %8619 = vmatpush3.msk.msra.mxu1 %vm1526_vm2, %v1517_v27  ;;  %8658 = vmatprep.subr.msk.mxu0 %vm1526_vm2, %v1727_v26 }
 0x277   : > { %1913 = vmatmul.mubr.f32.vlgmr.msra.gmra.mxu1 %v1283_v25  ;;  %8659 = vmatpush3.msra.mxu0 %v9897_v12  ;;  %v1294_v12 = vld [vmem:[%s9590_s29 + $0x58] sm:$0xff] }
 0x278   : > { %v1789_v31 = vpop.permute.xlu0 %1788  ;;  %8660 = vmatprep.subr.msk.mxu0 %vm1526_vm2, %v1726_v30  ;;  %v1787_v11 = vpop.permute.xlu1 %1786  ;;  %1917 = vmatprep.mubr.f32.mxu1 %v1289_v14 }
 0x279   : > { %v1806_v50 = vsel %vm1798_vm11, %v1789_v31, 0.0  ;;  %8661 = vmatpush3.msra.mxu0 %v9867_v9  ;;  %v1805_v33 = vsel %vm1798_vm11, %v1787_v11, 0.0 }
 0x27a   : > { %8662 = vmatprep.subr.msk.mxu0 %vm1526_vm2, %v1725_v47  ;;  %8948 = vmatprep.subr.msk.mxu1 %vm1606_vm6, %v1806_v50 }
 0x27b   : > { %1918 = vmatmul.mubr.f32.gmra.mxu1 %v1288_v44  ;;  %8663 = vmatpush3.msra.mxu0 %v9877_v10  ;;  %v1299_v10 = vld [vmem:[%s9590_s29 + $0x80] sm:$0xff] }
 0x27c   : > { %8949 = vmatpush3.msk.msra.mxu1 %vm1606_vm6, %v1806_v50  ;;  %v1785_v9 = vpop.permute.xlu0 %1784  ;;  %1998 = vmatmul.mubr.f32.vlgmr.msra.gmra.mxu0 %v1285_v43  ;;  %v1783_v58 = vpop.permute.xlu1 %1782 }
 0x27d   : > { %v1804_v20 = vsel %vm1798_vm11, %v1785_v9, 0.0  ;;  %8950 = vmatprep.subr.msk.mxu1 %vm1606_vm6, %v1805_v33  ;;  %1922 = vmatprep.mubr.f32.mxu1 %v1294_v12  ;;  %v1803_v39 = vsel %vm1798_vm11, %v1783_v58, 0.0 }
 0x27e   : > { %8951 = vmatpush3.msk.msra.mxu1 %vm1606_vm6, %v1805_v33  ;;  %2002 = vmatprep.mubr.f32.mxu0 %v1291_v54 }
 0x27f   : > { %8952 = vmatprep.subr.msk.mxu1 %vm1606_vm6, %v1804_v20  ;;  %1923 = vmatmul.mubr.f32.gmra.mxu1 %v1293_v32 }
 0x280   : > { %8953 = vmatpush3.msk.msra.mxu1 %vm1606_vm6, %v1804_v20  ;;  %v1781_v45 = vpop.permute.xlu0 %1780  ;;  %2003 = vmatmul.mubr.f32.gmra.mxu0 %v1290_v38  ;;  %v1779_v19 = vpop.permute.xlu1 %1778 }
 0x281   : > { %v1802_v23 = vsel %vm1798_vm11, %v1781_v45, 0.0  ;;  %8954 = vmatprep.subr.msk.mxu1 %vm1606_vm6, %v1803_v39  ;;  %1927 = vmatprep.mubr.f32.mxu1 %v1299_v10  ;;  %v1801_v35 = vsel %vm1798_vm11, %v1779_v19, 0.0 }
 0x282   : > { %8955 = vmatpush3.msk.msra.mxu1 %vm1606_vm6, %v1803_v39  ;;  %2007 = vmatprep.mubr.f32.mxu0 %v1296_v24 }
 0x283   : > { %8956 = vmatprep.subr.msk.mxu1 %vm1606_vm6, %v1802_v23  ;;  %1928 = vmatmul.mubr.f32.gmra.mxu1 %v1298_v46 }
 0x284   : > { %8957 = vmatpush3.msk.msra.mxu1 %vm1606_vm6, %v1802_v23  ;;  %v1777_v36 = vpop.permute.xlu0 %1776  ;;  %2008 = vmatmul.mubr.f32.gmra.mxu0 %v1295_v53  ;;  %v1775_v41 = vpop.permute.xlu1 %1774 }
 0x285   : > { %v1800_v40 = vsel %vm1798_vm11, %v1777_v36, 0.0  ;;  %8958 = vmatprep.subr.msk.mxu1 %vm1606_vm6, %v1801_v35  ;;  %2012 = vmatprep.mubr.f32.mxu0 %v1301_v60  ;;  %v1799_v21 = vsel %vm1798_vm11, %v1775_v41, 0.0 }
 0x286   : > { %8959 = vmatpush3.msk.msra.mxu1 %vm1606_vm6, %v1801_v35  ;;  %8964 = vmatprep.mubr.msk.f32.mxu1 %vm1835_vm12, %v1287_v61 }
 0x287   : > { %8960 = vmatprep.subr.msk.mxu1 %vm1606_vm6, %v1800_v40 }
 0x288   : > { %8961 = vmatpush3.msk.msra.mxu1 %vm1606_vm6, %v1800_v40  ;;  %2013 = vmatmul.mubr.f32.gmra.mxu0 %v1300_v62 }
 0x289   : > { %8962 = vmatprep.subr.msk.mxu1 %vm1606_vm6, %v1799_v21 }
 0x28a   : > { %8963 = vmatpush3.msk.msra.mxu1 %vm1606_vm6, %v1799_v21 }
 0x28b   : > { %8965 = vmatmul.mubr.msk.f32.vlgmr.msra.gmra.mxu1 %vm1835_vm12, %v1292_v22 }
 0x28c   : > { %8967 = vmatprep.mubr.msk.f32.mxu1 %vm1835_vm12, %v1297_v29 }
 0x28f   : > { %8968 = vmatmul.mubr.msk.f32.gmra.mxu1 %vm1835_vm12, %v1302_v28 }
 0x291   : > { %v10410_v49 = vpop.permute.xlu1 %1827  ;;  %v10412_v2 = vpop.permute.xlu0 %1832 }
 0x295   : > { %v1823_v1 = vpop.permute.xlu1 %1822  ;;  %v1818_v15 = vpop.permute.xlu0 %1817 }
 0x299   : > { %v2242_v52 = vpop.permute.xlu1 %2241  ;;  %v2170_v4 = vpop.permute.xlu0 %2169 }
 0x29a   : > { %v2258_v3 = vsel %vm1642_vm3, 0.0, %v2242_v52 }
 0x29b   : > { %8688 = vmatprep.subr.msk.mxu0 %vm1526_vm2, %v2258_v3 }
 0x29c   : > { %8689 = vmatpush3.msk.msra.mxu0 %vm10128_vm4, %v2170_v4 }
 0x29d   : > { %v2240_v56 = vpop.permute.xlu1 %2239  ;;  %v2282_v55 = vpop.permute.xlu0 %2281 }
 0x29e   : > { %v2257_v59 = vsel %vm1642_vm3, 0.0, %v2240_v56  ;;  %v2298_v16 = vsel %vm1683_vm7, %v2282_v55, 0.0 }
 0x29f   : > { %8690 = vmatprep.subr.msk.mxu0 %vm1526_vm2, %v2257_v59 }
 0x2a1   : > { %v2362_v5 = vpop.permute.xlu1 %2361  ;;  %v2168_v8 = vpop.permute.xlu0 %2167 }
 0x2a2   : > { %8732 = vmatprep.subr.msk.mxu1 %vm1765_vm5, %v2362_v5  ;;  %8691 = vmatpush3.msk.msra.mxu0 %vm10128_vm4, %v2168_v8 }
 0x2a3   : > { %8733 = vmatpush3.msk.msra.mxu1 %vm1606_vm6, %v2298_v16 }
 0x2a5   : > { %v2238_v6 = vpop.permute.xlu1 %2237  ;;  %v2280_v17 = vpop.permute.xlu0 %2279 }
 0x2a6   : > { %v2256_v7 = vsel %vm1642_vm3, 0.0, %v2238_v6  ;;  %v2297_v25 = vsel %vm1683_vm7, %v2280_v17, 0.0  ;;  %v1308_v17 = vld [vmem:[%s9600_s8 + $0x8] sm:$0xff] }
 0x2a7   : > { %8692 = vmatprep.subr.msk.mxu0 %vm1526_vm2, %v2256_v7  ;;  %2515 = vmatprep.mubr.f32.mxu0 %v1308_v17 }
 0x2a9   : > { %v2360_v13 = vpop.permute.xlu1 %2359  ;;  %v2166_v27 = vpop.permute.xlu0 %2165 }
 0x2aa   : > { %8734 = vmatprep.subr.msk.mxu1 %vm1765_vm5, %v2360_v13  ;;  %8693 = vmatpush3.msk.msra.mxu0 %vm10128_vm4, %v2166_v27 }
 0x2ab   : > { %8735 = vmatpush3.msk.msra.mxu1 %vm1606_vm6, %v2297_v25  ;;  %v1330_v25 = vld [vmem:[%s13389_s0 + $0x18] sm:$0xff] }
 0x2ad   : > { %v2236_v18 = vpop.permute.xlu1 %2235  ;;  %v2278_v30 = vpop.permute.xlu0 %2277 }
 0x2ae   : > { %v2255_v26 = vsel %vm1642_vm3, 0.0, %v2236_v18  ;;  %v2296_v31 = vsel %vm1683_vm7, %v2278_v30, 0.0  ;;  %v1310_v18 = vld [vmem:[%s9600_s8 + $0x18] sm:$0xff]  ;;  %v1327_v30 = vld [vmem:[%s13389_s0] sm:$0xff] }
 0x2af   : > { %8694 = vmatprep.subr.msk.mxu0 %vm1526_vm2, %v2255_v26  ;;  %2600 = vmatprep.mubr.f32.mxu1 %v1310_v18  ;;  %v1328_v26 = vld [vmem:[%s13389_s0 + $0x8] sm:$0xff] }
 0x2b1   : > { %v2358_v14 = vpop.permute.xlu1 %2357  ;;  %v2164_v44 = vpop.permute.xlu0 %2163 }
 0x2b2   : > { %8736 = vmatprep.subr.msk.mxu1 %vm1765_vm5, %v2358_v14  ;;  %8695 = vmatpush3.msk.msra.mxu0 %vm10128_vm4, %v2164_v44  ;;  %v1329_v14 = vld [vmem:[%s13389_s0 + $0x10] sm:$0xff]  ;;  %s13397_s0 = smov 120  }
 0x2b3   : > { %8737 = vmatpush3.msk.msra.mxu1 %vm1606_vm6, %v2296_v31 }
 0x2b5   : > { %v2356_v11 = vpop.permute.xlu1 %2355  ;;  %v2276_v47 = vpop.permute.xlu0 %2275 }
 0x2b6   : > { %8738 = vmatprep.subr.msk.mxu1 %vm1765_vm5, %v2356_v11  ;;  %v2295_v50 = vsel %vm1683_vm7, %v2276_v47, 0.0 }
 0x2b7   : > { %8739 = vmatpush3.msk.msra.mxu1 %vm1606_vm6, %v2295_v50 }
 0x2b9   : > { %v2202_v27 = vpop.permute.xlu1 %2201  ;;  %v2130_v11 = vpop.permute.xlu0 %2129 }
 0x2bd   : > { %v2200_v31 = vpop.permute.xlu1 %2199  ;;  %v2322_v47 = vpop.permute.xlu0 %2321 }
 0x2be   : > { %v2338_v18 = vsel %vm1724_vm10, %v2322_v47, 0.0 }
 0x2c1   : > { %v2128_v44 = vpop.permute.xlu1 %2127 }
 0x2c5   : > { %v10538_v50 = vpop.permute.xlu1 %2319 }
 0x337   : > { %v8620_v43 = vpop.f32.mrf.mxu1 }
 0x339   : > { %v8621_v12 = vpop.f32.mrf.mxu1 }
 0x33a   : > { %v8622_v60 = vadd.f32 %v8621_v12, %v8620_v43  ;;  %v2198_v43 = vpop.permute.xlu0 %2197  ;;  %v10540_v12 = vpop.permute.xlu1 %2195 }
 0x33b   : > { %v8623_v54 = vpop.f32.mrf.mxu1 }
 0x33c   : > { %v8664_v33 = vpop.f32.mrf.mxu0  ;;  %v1915_v62 = vadd.f32 %v8622_v60, %v1818_v15 }
 0x33d   : > { %v8624_v9 = vpop.f32.mrf.mxu1 }
 0x33e   : > { %v8665_v58 = vpop.f32.mrf.mxu0  ;;  %v8625_v24 = vadd.f32 %v8624_v9, %v8623_v54  ;;  %v2126_v54 = vpop.permute.xlu0 %2125 }
 0x33f   : > { %v8626_v32 = vpop.f32.mrf.mxu1  ;;  %v8666_v40 = vadd.f32 %v8665_v58, %v8664_v33  ;;  %v10542_v33 = vpop.permute.xlu1 %2123 }
 0x340   : > { %v8667_v20 = vpop.f32.mrf.mxu0  ;;  %v1920_v23 = vadd.f32 %v8625_v24, %v1823_v1 }
 0x341   : > { %v8627_v38 = vpop.f32.mrf.mxu1  ;;  %v2000_v52 = vadd.f32 %v8666_v40, %v1915_v62 }
 0x342   : > { %v8668_v10 = vpop.f32.mrf.mxu0  ;;  %v8628_v5 = vadd.f32 %v8627_v38, %v8626_v32  ;;  %v10544_v9 = vpop.permute.xlu0 %2317 }
 0x343   : > { %v8629_v45 = vpop.f32.mrf.mxu1  ;;  %v8669_v19 = vadd.f32 %v8668_v10, %v8667_v20  ;;  %v10546_v58 = vpop.permute.xlu1 %2315 }
 0x344   : > { %v8670_v39 = vpop.f32.mrf.mxu0 }
 0x345   : > { %v8630_v53 = vpop.f32.mrf.mxu1  ;;  %v2005_v61 = vadd.f32 %v8669_v19, %v1920_v23 }
 0x346   : > { %v8671_v46 = vpop.f32.mrf.mxu0  ;;  %v8631_v28 = vadd.f32 %v8630_v53, %v8629_v45 }
 0x347   : > { %v8672_v6 = vadd.f32 %v8671_v46, %v8670_v39 }
 0x348   : > { %v8673_v35 = vpop.f32.mrf.mxu0  ;;  %v1930_v56 = vadd.f32 %v8631_v28, %v10412_v2  ;;  %v1925_v2 = vadd.f32 %v8628_v5, %v10410_v49  ;;  %v2146_v5 = vsel %vm1516_vm9, 0.0, %v2130_v11 }
 0x34a   : > { %v8674_v22 = vpop.f32.mrf.mxu0  ;;  %v2010_v8 = vadd.f32 %v8672_v6, %v1925_v2  ;;  %v2145_v2 = vsel %vm1516_vm9, 0.0, %v2128_v44  ;;  %v2336_v44 = vsel %vm1724_vm10, %v10544_v9, 0.0 }
 0x34b   : > { %v8966_v36 = vpop.f32.mrf.mxu1  ;;  %v8675_v1 = vadd.f32 %v8674_v22, %v8673_v35 }
 0x34c   : > { %v2090_v41 = vadd.f32 %v8966_v36, %v2005_v61 }
 0x34d   : > { %v2084_v29 = vpop.f32.mrf.mxu1  ;;  %v2015_v59 = vadd.f32 %v8675_v1, %v1930_v56 }
 0x34e   : > { %v10450_v21 = vmax.f32 %v2090_v41, 0.0  ;;  %v2085_v3 = vadd.f32 %v2084_v29, %v2000_v52 }
 0x34f   : > { %v8969_v4 = vpop.f32.mrf.mxu1 }
 0x350   : > { %2157 = vrot.lane.b32.xlu0 %v10450_v21, %s9524_s18  ;;  %2229 = vrot.lane.b32.xlu1 %v10450_v21, %s13309_s1  ;;  %v10461_v15 = vmax.f32 %v2085_v3, 0.0  ;;  %v2100_v55 = vadd.f32 %v8969_v4, %v2015_v59  ;;  %v2218_v59 = vsel %vm1595_vm8, 0.0, %v2202_v27  ;;  %v2337_v27 = vsel %vm1724_vm10, %v10538_v50, 0.0 }
 0x351   : > { %v2094_v7 = vpop.f32.mrf.mxu1  ;;  %v2335_v50 = vsel %vm1724_vm10, %v10546_v58, 0.0  ;;  %v1307_v58 = vld [vmem:[%s9600_s8] sm:$0xff] }
 0x352   : > { %v10472_v16 = vmax.f32 %v2100_v55, 0.0  ;;  %v2095_v13 = vadd.f32 %v2094_v7, %v2010_v8  ;;  %v2217_v55 = vsel %vm1595_vm8, 0.0, %v2200_v31 }
 0x354   : > { %2269 = vrot.lane.b32.xlu0 %v10450_v21, %s13307_s11  ;;  %2349 = vrot.lane.b32.xlu1 %v10450_v21, %s9527_s4  ;;  %v10482_v49 = vmax.f32 %v2095_v13, 0.0  ;;  %v2216_v13 = vsel %vm1595_vm8, 0.0, %v2198_v43 }
 0x358   : > { %2155 = vrot.lane.b32.xlu0 %v10461_v15, %s9524_s18  ;;  %2227 = vrot.lane.b32.xlu1 %v10461_v15, %s13309_s1 }
 0x35c   : > { %2347 = vrot.lane.b32.xlu0 %v10461_v15, %s9527_s4  ;;  %2267 = vrot.lane.b32.xlu1 %v10461_v15, %s13307_s11 }
 0x360   : > { %2161 = vrot.lane.b32.xlu0 %v10472_v16, %s9524_s18  ;;  %2233 = vrot.lane.b32.xlu1 %v10472_v16, %s13309_s1 }
 0x364   : > { %2273 = vrot.lane.b32.xlu0 %v10472_v16, %s13307_s11  ;;  %2353 = vrot.lane.b32.xlu1 %v10472_v16, %s9527_s4 }
 0x368   : > { %2193 = vrot.lane.b32.xlu0 %v10472_v16, %s9528_s10  ;;  %2231 = vrot.lane.b32.xlu1 %v10482_v49, %s13309_s1 }
 0x36c   : > { %2121 = vrot.lane.b32.xlu0 %v10472_v16, %s9529_s15  ;;  %2187 = vrot.lane.b32.xlu1 %v10461_v15, %s9528_s10 }
 0x370   : > { %2159 = vrot.lane.b32.xlu0 %v10482_v49, %s9524_s18  ;;  %2351 = vrot.lane.b32.xlu1 %v10482_v49, %s9527_s4 }
 0x374   : > { %2271 = vrot.lane.b32.xlu0 %v10482_v49, %s13307_s11  ;;  %2115 = vrot.lane.b32.xlu1 %v10461_v15, %s9529_s15 }
 0x378   : > { %2313 = vrot.lane.b32.xlu0 %v10472_v16, %s9530_s16  ;;  %2191 = vrot.lane.b32.xlu1 %v10482_v49, %s9528_s10 }
 0x37c   : > { %2189 = vrot.lane.b32.xlu0 %v10450_v21, %s9528_s10  ;;  %2119 = vrot.lane.b32.xlu1 %v10482_v49, %s9529_s15 }
 0x380   : > { %2117 = vrot.lane.b32.xlu0 %v10450_v21, %s9529_s15  ;;  %2311 = vrot.lane.b32.xlu1 %v10482_v49, %s9530_s16 }
 0x384   : > { %2309 = vrot.lane.b32.xlu0 %v10450_v21, %s9530_s16  ;;  %2393 = vrot.lane.b32.xlu1 %v10042_v34, %s9531_s26 }
 0x388   : > { %2307 = vrot.lane.b32.xlu0 %v10461_v15, %s9530_s16  ;;  %2389 = vrot.lane.b32.xlu1 %v10070_v42, %s9531_s26 }
 0x38c   : > { %2391 = vrot.lane.b32.xlu0 %v10052_v37, %s9531_s26  ;;  %2385 = vrot.lane.b32.xlu1 %v10472_v16, %s9531_s26 }
 0x390   : > { %2387 = vrot.lane.b32.xlu0 %v10088_v48, %s9531_s26  ;;  %2381 = vrot.lane.b32.xlu1 %v10450_v21, %s9531_s26 }
 0x394   : > { %2383 = vrot.lane.b32.xlu0 %v10482_v49, %s9531_s26  ;;  %2436 = vperm.xlu1 %9207, %v1330_v25   ;;  %v2144_v25 = vsel %vm1516_vm9, 0.0, %v2126_v54 }
 0x398   : > { %2379 = vrot.lane.b32.xlu0 %v10461_v15, %s9531_s26  ;;  %2426 = vperm.xlu1 %9207, %v1328_v26   ;;  %v2215_v26 = vsel %vm1595_vm8, 0.0, %v10540_v12 }
 0x39c   : > { %2431 = vperm.xlu0 %9206, %v1329_v14   ;;  %v2143_v14 = vsel %vm1516_vm9, 0.0, %v10542_v33 }
 0x3a0   : > { %2421 = vperm.xlu0 %9206, %v1327_v30  }
 0x3c2   : > { %v2158_v32 = vpop.permute.xlu0 %2157  ;;  %v2230_v20 = vpop.permute.xlu1 %2229 }
 0x3c3   : > { %v2252_v52 = vsel %vm1642_vm3, 0.0, %v2230_v20 }
 0x3c6   : > { %v2270_v38 = vpop.permute.xlu0 %2269  ;;  %v2350_v10 = vpop.permute.xlu1 %2349 }
 0x3c7   : > { %v2292_v6 = vsel %vm1683_vm7, %v2270_v38, 0.0 }
 0x3ca   : > { %v2156_v24 = vpop.permute.xlu0 %2155  ;;  %v2228_v39 = vpop.permute.xlu1 %2227 }
 0x3cb   : > { %v2251_v1 = vsel %vm1642_vm3, 0.0, %v2228_v39 }
 0x3ce   : > { %v2348_v45 = vpop.permute.xlu0 %2347  ;;  %v2268_v19 = vpop.permute.xlu1 %2267 }
 0x3cf   : > { %v2291_v17 = vsel %vm1683_vm7, %v2268_v19, 0.0 }
 0x3d2   : > { %v2162_v46 = vpop.permute.xlu0 %2161  ;;  %v2234_v23 = vpop.permute.xlu1 %2233 }
 0x3d3   : > { %v2254_v53 = vsel %vm1642_vm3, 0.0, %v2234_v23 }
 0x3d4   : > { %8696 = vmatprep.subr.msk.mxu0 %vm1526_vm2, %v2254_v53  ;;  %v1309_v53 = vld [vmem:[%s9600_s8 + $0x10] sm:$0xff] }
 0x3d5   : > { %8697 = vmatpush3.msk.msra.mxu0 %vm10128_vm4, %v2162_v46  ;;  %v1318_v46 = vld [vmem:[%s9600_s8 + $0x58] sm:$0xff] }
 0x3d6   : > { %v2274_v60 = vpop.permute.xlu0 %2273  ;;  %v2354_v61 = vpop.permute.xlu1 %2353 }
 0x3d7   : > { %v2294_v35 = vsel %vm1683_vm7, %v2274_v60, 0.0  ;;  %8740 = vmatprep.subr.msk.mxu1 %vm1765_vm5, %v2354_v61  ;;  %v1323_v61 = vld [vmem:[%s9600_s8 + $0x80] sm:$0xff] }
 0x3d8   : > { %8741 = vmatpush3.msk.msra.mxu1 %vm1606_vm6, %v2294_v35 }
 0x3da   : > { %v2194_v36 = vpop.permute.xlu0 %2193  ;;  %v2232_v40 = vpop.permute.xlu1 %2231 }
 0x3db   : > { %v2253_v41 = vsel %vm1642_vm3, 0.0, %v2232_v40  ;;  %v2214_v11 = vsel %vm1595_vm8, 0.0, %v2194_v36  ;;  %v1314_v40 = vld [vmem:[%s9600_s8 + $0x38] sm:$0xff] }
 0x3dc   : > { %8698 = vmatprep.subr.msk.mxu0 %vm1526_vm2, %v2253_v41 }
 0x3de   : > { %v2122_v62 = vpop.permute.xlu0 %2121  ;;  %v10560_v22 = vpop.permute.xlu1 %2187 }
 0x3df   : > { %v2142_v47 = vsel %vm1516_vm9, 0.0, %v2122_v62  ;;  %v1322_v62 = vld [vmem:[%s9600_s8 + $0x78] sm:$0xff] }
 0x3e2   : > { %v2160_v29 = vpop.permute.xlu0 %2159  ;;  %v2352_v28 = vpop.permute.xlu1 %2351 }
 0x3e3   : > { %8699 = vmatpush3.msk.msra.mxu0 %vm10128_vm4, %v2160_v29  ;;  %8742 = vmatprep.subr.msk.mxu1 %vm1765_vm5, %v2352_v28  ;;  %v1311_v29 = vld [vmem:[%s9600_s8 + $0x20] sm:$0xff] }
 0x3e4   : > { %8700 = vmatprep.subr.msk.mxu0 %vm1526_vm2, %v2252_v52  ;;  %v1319_v52 = vld [vmem:[%s9600_s8 + $0x60] sm:$0xff] }
 0x3e5   : > { %8701 = vmatpush3.msk.msra.mxu0 %vm10128_vm4, %v2158_v32 }
 0x3e6   : > { %v2272_v3 = vpop.permute.xlu0 %2271  ;;  %8702 = vmatprep.subr.msk.mxu0 %vm1526_vm2, %v2251_v1  ;;  %v2116_v56 = vpop.permute.xlu1 %2115  ;;  %v1325_v1 = vld [vmem:[%s9600_s8 + $0x90] sm:$0xff] }
 0x3e7   : > { %v2293_v4 = vsel %vm1683_vm7, %v2272_v3, 0.0  ;;  %8703 = vmatpush3.msk.msra.mxu0 %vm10128_vm4, %v2156_v24  ;;  %v2139_v32 = vsel %vm1516_vm9, 0.0, %v2116_v56 }
 0x3e8   : > { %8704 = vmatprep.subr.msk.mxu0 %vm1606_vm6, %v2218_v59  ;;  %8743 = vmatpush3.msk.msra.mxu1 %vm1606_vm6, %v2293_v4 }
 0x3e9   : > { %8705 = vmatpush3.msk.msra.mxu0 %vm1526_vm2, %v2146_v5  ;;  %8744 = vmatprep.subr.msk.mxu1 %vm1765_vm5, %v2350_v10  ;;  %v1313_v10 = vld [vmem:[%s9600_s8 + $0x30] sm:$0xff]  ;;  %v1324_v5 = vld [vmem:[%s9600_s8 + $0x88] sm:$0xff] }
 0x3ea   : > { %v2314_v7 = vpop.permute.xlu0 %2313  ;;  %8706 = vmatprep.subr.msk.mxu0 %vm1606_vm6, %v2217_v55  ;;  %8745 = vmatpush3.msk.msra.mxu1 %vm1606_vm6, %v2292_v6  ;;  %v2192_v8 = vpop.permute.xlu1 %2191 }
 0x3eb   : > { %8707 = vmatpush3.msk.msra.mxu0 %vm1526_vm2, %v2145_v2  ;;  %8746 = vmatprep.subr.msk.mxu1 %vm1765_vm5, %v2348_v45  ;;  %v2334_v9 = vsel %vm1724_vm10, %v2314_v7, 0.0  ;;  %v1316_v7 = vld [vmem:[%s9600_s8 + $0x48] sm:$0xff] }
 0x3ec   : > { %8708 = vmatprep.subr.msk.mxu0 %vm1606_vm6, %v2216_v13  ;;  %8747 = vmatpush3.msk.msra.mxu1 %vm1606_vm6, %v2291_v17  ;;  %v1326_v13 = vld [vmem:[%s9600_s8 + $0x98] sm:$0xff] }
 0x3ed   : > { %8709 = vmatpush3.msk.msra.mxu0 %vm1526_vm2, %v2144_v25  ;;  %8748 = vmatprep.subr.msk.mxu1 %vm1526_vm2, %v2338_v18 }
 0x3ee   : > { %v2190_v30 = vpop.permute.xlu0 %2189  ;;  %8710 = vmatprep.subr.msk.mxu0 %vm1606_vm6, %v2215_v26  ;;  %8749 = vmatpush3.msra.mxu1 %v10042_v34  ;;  %v2120_v31 = vpop.permute.xlu1 %2119  ;;  %v2213_v34 = vsel %vm1595_vm8, 0.0, %v2192_v8  ;;  %v1321_v8 = vld [vmem:[%s9600_s8 + $0x70] sm:$0xff] }
 0x3ef   : > { %8711 = vmatpush3.msk.msra.mxu0 %vm1526_vm2, %v2143_v14  ;;  %8750 = vmatprep.subr.msk.mxu1 %vm1526_vm2, %v2337_v27  ;;  %v2141_v43 = vsel %vm1516_vm9, 0.0, %v2120_v31  ;;  %v2212_v54 = vsel %vm1595_vm8, 0.0, %v2190_v30 }
 0x3f0   : > { %8712 = vmatprep.subr.msk.mxu0 %vm1606_vm6, %v2214_v11  ;;  %8751 = vmatpush3.msra.mxu1 %v10052_v37 }
 0x3f1   : > { %8713 = vmatpush3.msk.msra.mxu0 %vm1526_vm2, %v2142_v47  ;;  %8752 = vmatprep.subr.msk.mxu1 %vm1526_vm2, %v2336_v44 }
 0x3f2   : > { %v2118_v12 = vpop.permute.xlu0 %2117  ;;  %8714 = vmatprep.subr.msk.mxu0 %vm1606_vm6, %v2213_v34  ;;  %8753 = vmatpush3.msra.mxu1 %v10070_v42  ;;  %v2312_v37 = vpop.permute.xlu1 %2311  ;;  %v2211_v42 = vsel %vm1595_vm8, 0.0, %v10560_v22 }
 0x3f3   : > { %v2140_v33 = vsel %vm1516_vm9, 0.0, %v2118_v12  ;;  %8715 = vmatpush3.msk.msra.mxu0 %vm1526_vm2, %v2141_v43  ;;  %8754 = vmatprep.subr.msk.mxu1 %vm1526_vm2, %v2335_v50  ;;  %v2333_v20 = vsel %vm1724_vm10, %v2312_v37, 0.0 }
 0x3f4   : > { %8716 = vmatprep.subr.msk.mxu0 %vm1606_vm6, %v2212_v54  ;;  %8755 = vmatpush3.msra.mxu1 %v10088_v48 }
 0x3f5   : > { %8717 = vmatpush3.msk.msra.mxu0 %vm1526_vm2, %v2140_v33  ;;  %8756 = vmatprep.subr.msk.mxu1 %vm1526_vm2, %v2334_v9 }
 0x3f6   : > { %v2310_v38 = vpop.permute.xlu0 %2309  ;;  %8718 = vmatprep.subr.msk.mxu0 %vm1606_vm6, %v2211_v42  ;;  %8757 = vmatpush3.msra.mxu1 %v10472_v16  ;;  %v2394_v48 = vpop.permute.xlu1 %2393  ;;  %v1312_v16 = vld [vmem:[%s9600_s8 + $0x28] sm:$0xff] }
 0x3f7   : > { %v2332_v24 = vsel %vm1724_vm10, %v2310_v38, 0.0  ;;  %v2410_v39 = vsel %vm1798_vm11, %v2394_v48, 0.0  ;;  %8719 = vmatpush3.msk.msra.mxu0 %vm1526_vm2, %v2139_v32  ;;  %8758 = vmatprep.subr.msk.mxu1 %vm1526_vm2, %v2333_v20 }
 0x3f8   : > { %2516 = vmatmul.mubr.f32.vlgmr.msra.gmra.mxu0 %v1307_v58  ;;  %8759 = vmatpush3.msra.mxu1 %v10482_v49  ;;  %v1315_v49 = vld [vmem:[%s9600_s8 + $0x40] sm:$0xff] }
 0x3f9   : > { %8760 = vmatprep.subr.msk.mxu1 %vm1526_vm2, %v2332_v24  ;;  %2520 = vmatprep.mubr.f32.mxu0 %v1313_v10 }
 0x3fa   : > { %v2308_v45 = vpop.permute.xlu0 %2307  ;;  %8761 = vmatpush3.msra.mxu1 %v10450_v21  ;;  %v2390_v19 = vpop.permute.xlu1 %2389  ;;  %8970 = vmatprep.subr.msk.mxu0 %vm1606_vm6, %v2410_v39  ;;  %v1317_v21 = vld [vmem:[%s9600_s8 + $0x50] sm:$0xff] }
 0x3fb   : > { %v2331_v23 = vsel %vm1724_vm10, %v2308_v45, 0.0  ;;  %8971 = vmatpush3.msk.msra.mxu0 %vm1606_vm6, %v2410_v39  ;;  %v2408_v35 = vsel %vm1798_vm11, %v2390_v19, 0.0 }
 0x3fc   : > { %2521 = vmatmul.mubr.f32.gmra.mxu0 %v1312_v16  ;;  %8762 = vmatprep.subr.msk.mxu1 %vm1526_vm2, %v2331_v23 }
 0x3fd   : > { %8763 = vmatpush3.msra.mxu1 %v10461_v15  ;;  %2525 = vmatprep.mubr.f32.mxu0 %v1318_v46  ;;  %v1320_v15 = vld [vmem:[%s9600_s8 + $0x68] sm:$0xff] }
 0x3fe   : > { %v2392_v60 = vpop.permute.xlu0 %2391  ;;  %2601 = vmatmul.mubr.f32.vlgmr.msra.gmra.mxu1 %v1309_v53  ;;  %v2386_v41 = vpop.permute.xlu1 %2385 }
 0x3ff   : > { %v2409_v36 = vsel %vm1798_vm11, %v2392_v60, 0.0  ;;  %2605 = vmatprep.mubr.f32.mxu1 %v1315_v49  ;;  %v2406_v3 = vsel %vm1798_vm11, %v2386_v41, 0.0 }
 0x400   : > { %2526 = vmatmul.mubr.f32.gmra.mxu0 %v1317_v21  ;;  %8972 = vmatprep.subr.msk.mxu0 %vm1606_vm6, %v2409_v36 }
 0x401   : > { %8973 = vmatpush3.msk.msra.mxu0 %vm1606_vm6, %v2409_v36  ;;  %2530 = vmatprep.mubr.f32.mxu0 %v1323_v61 }
 0x402   : > { %v2388_v22 = vpop.permute.xlu0 %2387  ;;  %2606 = vmatmul.mubr.f32.gmra.mxu1 %v1314_v40  ;;  %8974 = vmatprep.subr.msk.mxu0 %vm1606_vm6, %v2408_v35  ;;  %v2382_v56 = vpop.permute.xlu1 %2381 }
 0x403   : > { %v2407_v28 = vsel %vm1798_vm11, %v2388_v22, 0.0  ;;  %8975 = vmatpush3.msk.msra.mxu0 %vm1606_vm6, %v2408_v35  ;;  %2610 = vmatprep.mubr.f32.mxu1 %v1320_v15  ;;  %v2404_v55 = vsel %vm1798_vm11, %v2382_v56, 0.0 }
 0x404   : > { %2531 = vmatmul.mubr.f32.gmra.mxu0 %v1322_v62  ;;  %8976 = vmatprep.subr.msk.mxu0 %vm1606_vm6, %v2407_v28 }
 0x405   : > { %8977 = vmatpush3.msk.msra.mxu0 %vm1606_vm6, %v2407_v28  ;;  %8986 = vmatprep.mubr.msk.f32.mxu0 %vm1835_vm12, %v1311_v29 }
 0x406   : > { %v2384_v59 = vpop.permute.xlu0 %2383  ;;  %2611 = vmatmul.mubr.f32.gmra.mxu1 %v1319_v52  ;;  %8978 = vmatprep.subr.msk.mxu0 %vm1606_vm6, %v2406_v3 }
 0x407   : > { %v2405_v4 = vsel %vm1798_vm11, %v2384_v59, 0.0  ;;  %8979 = vmatpush3.msk.msra.mxu0 %vm1606_vm6, %v2406_v3  ;;  %2615 = vmatprep.mubr.f32.mxu1 %v1325_v1  ;;  %v1332_v1 = vld [vmem:[%s13390_s7 + $0x8] sm:$0xff]  ;;  %v1333_v3 = vld [vmem:[%s13390_s7 + $0x10] sm:$0xff] }
 0x408   : > { %8980 = vmatprep.subr.msk.mxu0 %vm1606_vm6, %v2405_v4 }
 0x409   : > { %8981 = vmatpush3.msk.msra.mxu0 %vm1606_vm6, %v2405_v4 }
 0x40a   : > { %v2380_v6 = vpop.permute.xlu0 %2379  ;;  %2616 = vmatmul.mubr.f32.gmra.mxu1 %v1324_v5  ;;  %8982 = vmatprep.subr.msk.mxu0 %vm1606_vm6, %v2404_v55 }
 0x40b   : > { %v2403_v2 = vsel %vm1798_vm11, %v2380_v6, 0.0  ;;  %8983 = vmatpush3.msk.msra.mxu0 %vm1606_vm6, %v2404_v55  ;;  %2963 = vmatprep.mubr.f32.mxu1 %v1332_v1 }
 0x40c   : > { %8984 = vmatprep.subr.msk.mxu0 %vm1606_vm6, %v2403_v2 }
 0x40d   : > { %8985 = vmatpush3.msk.msra.mxu0 %vm1606_vm6, %v2403_v2 }
 0x40e   : > { %8987 = vmatmul.mubr.msk.f32.vlgmr.msra.gmra.mxu0 %vm1835_vm12, %v1316_v7 }
 0x40f   : > { %8989 = vmatprep.mubr.msk.f32.mxu0 %vm1835_vm12, %v1321_v8  ;;  %v2437_v11 = vpop.permute.xlu1 %2436 }
 0x412   : > { %8990 = vmatmul.mubr.msk.f32.gmra.mxu0 %vm1835_vm12, %v1326_v13 }
 0x413   : > { %v2427_v37 = vpop.permute.xlu1 %2426  ;;  %9000 = vmatprep.mubr.msk.f32.mxu0 %vm2886_vm13, %v1333_v3 }
 0x417   : > { %v2432_v54 = vpop.permute.xlu0 %2431 }
 0x41b   : > { %v2422_v10 = vpop.permute.xlu0 %2421 }
 0x4b8   : > { %v8720_v17 = vpop.f32.mrf.mxu0 }
 0x4ba   : > { %v8721_v18 = vpop.f32.mrf.mxu0 }
 0x4bb   : > { %v8722_v58 = vadd.f32 %v8721_v18, %v8720_v17 }
 0x4bc   : > { %v8723_v25 = vpop.f32.mrf.mxu0 }
 0x4bd   : > { %v2518_v39 = vadd.f32 %v8722_v58, %v2422_v10 }
 0x4be   : > { %v8724_v26 = vpop.f32.mrf.mxu0  ;;  %v8764_v27 = vpop.f32.mrf.mxu1 }
 0x4bf   : > { %v8725_v34 = vadd.f32 %v8724_v26, %v8723_v25 }
 0x4c0   : > { %v8726_v14 = vpop.f32.mrf.mxu0  ;;  %v8765_v30 = vpop.f32.mrf.mxu1 }
 0x4c1   : > { %v2523_v33 = vadd.f32 %v8725_v34, %v2427_v37  ;;  %v8766_v38 = vadd.f32 %v8765_v30, %v8764_v27 }
 0x4c2   : > { %v8767_v31 = vpop.f32.mrf.mxu1  ;;  %v8727_v44 = vpop.f32.mrf.mxu0 }
 0x4c3   : > { %v2603_v19 = vadd.f32 %v8766_v38, %v2518_v39  ;;  %v8728_v36 = vadd.f32 %v8727_v44, %v8726_v14 }
 0x4c4   : > { %v8768_v47 = vpop.f32.mrf.mxu1  ;;  %v8729_v50 = vpop.f32.mrf.mxu0 }
 0x4c5   : > { %v8769_v12 = vadd.f32 %v8768_v47, %v8767_v31  ;;  %v2528_v15 = vadd.f32 %v8728_v36, %v2432_v54 }
 0x4c6   : > { %v8770_v43 = vpop.f32.mrf.mxu1  ;;  %v8730_v9 = vpop.f32.mrf.mxu0 }
 0x4c7   : > { %v2608_v32 = vadd.f32 %v8769_v12, %v2523_v33  ;;  %v8731_v23 = vadd.f32 %v8730_v9, %v8729_v50 }
 0x4c8   : > { %v8771_v42 = vpop.f32.mrf.mxu1 }
 0x4c9   : > { %v2533_v21 = vadd.f32 %v8731_v23, %v2437_v11  ;;  %v8772_v41 = vadd.f32 %v8771_v42, %v8770_v43 }
 0x4ca   : > { %v8773_v24 = vpop.f32.mrf.mxu1 }
 0x4cb   : > { %v2613_v29 = vadd.f32 %v8772_v41, %v2528_v15  ;;  %v1331_v15 = vld [vmem:[%s13390_s7] sm:$0xff] }
 0x4cc   : > { %v8774_v46 = vpop.f32.mrf.mxu1 }
 0x4cd   : > { %v8775_v49 = vadd.f32 %v8774_v46, %v8773_v24 }
 0x4ce   : > { %v8988_v20 = vpop.f32.mrf.mxu0 }
 0x4cf   : > { %v2693_v48 = vadd.f32 %v8988_v20, %v2608_v32  ;;  %v2618_v35 = vadd.f32 %v8775_v49, %v2533_v21 }
 0x4d0   : > { %v2687_v45 = vpop.f32.mrf.mxu0 }
 0x4d1   : > { %v10734_v16 = vmax.f32 %v2693_v48, 0.0  ;;  %v2688_v53 = vadd.f32 %v2687_v45, %v2603_v19 }
 0x4d2   : > { %v8991_v61 = vpop.f32.mrf.mxu0 }
 0x4d3   : > { %2832 = vrot.lane.b32.xlu0 %v10734_v16, %s9527_s4  ;;  %2772 = vrot.lane.b32.xlu1 %v10734_v16, %s13309_s1  ;;  %v10744_v60 = vmax.f32 %v2688_v53, 0.0  ;;  %v2703_v40 = vadd.f32 %v8991_v61, %v2618_v35 }
 0x4d4   : > { %v2697_v22 = vpop.f32.mrf.mxu0 }
 0x4d5   : > { %v10754_v62 = vmax.f32 %v2703_v40, 0.0  ;;  %v2698_v28 = vadd.f32 %v2697_v22, %v2613_v29  ;;  %v1335_v22 = vld [vmem:[%s13390_s7 + $0x20] sm:$0xff] }
 0x4d7   : > { %2752 = vrot.lane.b32.xlu0 %v10734_v16, %s9528_s10  ;;  %2812 = vrot.lane.b32.xlu1 %v10734_v16, %s9530_s16  ;;  %v10764_v52 = vmax.f32 %v2698_v28, 0.0 }
 0x4db   : > { %2830 = vrot.lane.b32.xlu0 %v10744_v60, %s9527_s4  ;;  %2770 = vrot.lane.b32.xlu1 %v10744_v60, %s13309_s1 }
 0x4df   : > { %2750 = vrot.lane.b32.xlu0 %v10744_v60, %s9528_s10  ;;  %2810 = vrot.lane.b32.xlu1 %v10744_v60, %s9530_s16 }
 0x4e3   : > { %2836 = vrot.lane.b32.xlu0 %v10754_v62, %s9527_s4  ;;  %2776 = vrot.lane.b32.xlu1 %v10754_v62, %s13309_s1 }
 0x4e7   : > { %2756 = vrot.lane.b32.xlu0 %v10754_v62, %s9528_s10  ;;  %2816 = vrot.lane.b32.xlu1 %v10754_v62, %s9530_s16 }
 0x4eb   : > { %2834 = vrot.lane.b32.xlu0 %v10764_v52, %s9527_s4  ;;  %2774 = vrot.lane.b32.xlu1 %v10764_v52, %s13309_s1  ;;  %s13391_s4 = sld [smem:[#allocation28_spill]] }
 0x4ef   : > { %2740 = vrot.lane.b32.xlu0 %v10754_v62, %s9524_s18  ;;  %2796 = vrot.lane.b32.xlu1 %v10754_v62, %s13307_s11 }
 0x4f1   : > { %v1344_v56 = vld [vmem:[%s13391_s4 + $0x8] sm:$0xff]  ;;  %v1343_v59 = vld [vmem:[%s13391_s4] sm:$0xff]  ;;  %v1346_v4 = vld [vmem:[%s13391_s4 + $0x18] sm:$0xff] }
 0x4f2   : > { %v1345_v5 = vld [vmem:[%s13391_s4 + $0x10] sm:$0xff]  ;;  %s13405_s4 = smov 9  }
 0x4f3   : > { %2754 = vrot.lane.b32.xlu0 %v10764_v52, %s9528_s10  ;;  %2814 = vrot.lane.b32.xlu1 %v10764_v52, %s9530_s16  ;;  %s13303_s10 = smov 120   ;;  %s13301_s16 = smov 121  }
 0x4f7   : > { %2736 = vrot.lane.b32.xlu0 %v10734_v16, %s9524_s18  ;;  %2792 = vrot.lane.b32.xlu1 %v10734_v16, %s13307_s11 }
 0x4fb   : > { %2738 = vrot.lane.b32.xlu0 %v10764_v52, %s9524_s18  ;;  %2794 = vrot.lane.b32.xlu1 %v10764_v52, %s13307_s11 }
 0x4ff   : > { %2734 = vrot.lane.b32.xlu0 %v10744_v60, %s9524_s18  ;;  %2790 = vrot.lane.b32.xlu1 %v10744_v60, %s13307_s11  ;;  %s13392_s18 = sld [smem:[#allocation29_spill]] }
 0x503   : > { %2718 = vrot.lane.b32.xlu0 %v10764_v52, %s9529_s15  ;;  %2720 = vrot.lane.b32.xlu1 %v10754_v62, %s9529_s15 }
 0x507   : > { %2714 = vrot.lane.b32.xlu0 %v10744_v60, %s9529_s15  ;;  %2716 = vrot.lane.b32.xlu1 %v10734_v16, %s9529_s15  ;;  %s13299_s15 = smov 7  }
 0x50b   : > { %2850 = vrot.lane.b32.xlu0 %v10764_v52, %s9531_s26  ;;  %2852 = vrot.lane.b32.xlu1 %v10754_v62, %s9531_s26 }
 0x50f   : > { %2846 = vrot.lane.b32.xlu0 %v10744_v60, %s9531_s26  ;;  %2848 = vrot.lane.b32.xlu1 %v10734_v16, %s9531_s26  ;;  %s13393_s26 = sld [smem:[#allocation30_spill]] }
 0x513   : > { %2873 = vperm.xlu0 %9206, %v1344_v56   ;;  %2868 = vperm.xlu1 %9207, %v1343_v59   ;;  %v1337_v59 = vld [vmem:[%s13390_s7 + $0x30] sm:$0xff] }
 0x517   : > { %2883 = vperm.xlu0 %9206, %v1346_v4   ;;  %2878 = vperm.xlu1 %9207, %v1345_v5   ;;  %v1336_v5 = vld [vmem:[%s13390_s7 + $0x28] sm:$0xff] }
 0x545   : > { %v2833_v55 = vpop.permute.xlu0 %2832  ;;  %v2773_v6 = vpop.permute.xlu1 %2772 }
 0x546   : > { %v2783_v47 = vsel %vm1642_vm3, 0.0, %v2773_v6  ;;  %v1339_v6 = vld [vmem:[%s13390_s7 + $0x40] sm:$0xff] }
 0x549   : > { %v2753_v2 = vpop.permute.xlu0 %2752  ;;  %v2813_v7 = vpop.permute.xlu1 %2812 }
 0x54a   : > { %v2823_v58 = vsel %vm1724_vm10, %v2813_v7, 0.0  ;;  %v2763_v32 = vsel %vm1595_vm8, 0.0, %v2753_v2  ;;  %v1340_v2 = vld [vmem:[%s13390_s7 + $0x48] sm:$0xff]  ;;  %v1342_v7 = vld [vmem:[%s13390_s7 + $0x58] sm:$0xff] }
 0x54d   : > { %v2831_v8 = vpop.permute.xlu0 %2830  ;;  %v2771_v13 = vpop.permute.xlu1 %2770 }
 0x54e   : > { %v2782_v43 = vsel %vm1642_vm3, 0.0, %v2771_v13  ;;  %v3075_v13 = vld [vmem:[%s13392_s18] sm:$0xff] }
 0x551   : > { %v2751_v17 = vpop.permute.xlu0 %2750  ;;  %v2811_v18 = vpop.permute.xlu1 %2810 }
 0x552   : > { %v2822_v48 = vsel %vm1724_vm10, %v2811_v18, 0.0  ;;  %v2762_v10 = vsel %vm1595_vm8, 0.0, %v2751_v17 }
 0x555   : > { %v2837_v25 = vpop.permute.xlu0 %2836  ;;  %v2777_v26 = vpop.permute.xlu1 %2776 }
 0x556   : > { %v2785_v27 = vsel %vm1642_vm3, 0.0, %v2777_v26  ;;  %8788 = vmatprep.subr.msk.mxu1 %vm1765_vm5, %v2837_v25 }
 0x557   : > { %8789 = vmatpush3.msk.msra.mxu1 %vm1526_vm2, %v2785_v27 }
 0x559   : > { %v2757_v14 = vpop.permute.xlu0 %2756  ;;  %v2817_v30 = vpop.permute.xlu1 %2816 }
 0x55a   : > { %v2825_v12 = vsel %vm1724_vm10, %v2817_v30, 0.0  ;;  %v2765_v37 = vsel %vm1595_vm8, 0.0, %v2757_v14 }
 0x55d   : > { %v2835_v31 = vpop.permute.xlu0 %2834  ;;  %v2775_v11 = vpop.permute.xlu1 %2774 }
 0x55e   : > { %v2784_v44 = vsel %vm1642_vm3, 0.0, %v2775_v11  ;;  %8790 = vmatprep.subr.msk.mxu1 %vm1765_vm5, %v2835_v31 }
 0x55f   : > { %8791 = vmatpush3.msk.msra.mxu1 %vm1526_vm2, %v2784_v44 }
 0x560   : > { %8792 = vmatprep.subr.msk.mxu1 %vm1765_vm5, %v2833_v55  ;;  %v1341_v55 = vld [vmem:[%s13390_s7 + $0x50] sm:$0xff] }
 0x561   : > { %v2741_v34 = vpop.permute.xlu0 %2740  ;;  %8793 = vmatpush3.msk.msra.mxu1 %vm1526_vm2, %v2783_v47  ;;  %v2797_v50 = vpop.permute.xlu1 %2796 }
 0x562   : > { %8794 = vmatprep.subr.msk.mxu1 %vm1765_vm5, %v2831_v8  ;;  %v2805_v24 = vsel %vm1683_vm7, %v2797_v50, 0.0  ;;  %v3076_v8 = vld [vmem:[%s13392_s18 + $0x8] sm:$0xff] }
 0x563   : > { %8795 = vmatpush3.msk.msra.mxu1 %vm1526_vm2, %v2782_v43 }
 0x564   : > { %8796 = vmatprep.subr.msk.mxu1 %vm1526_vm2, %v2825_v12 }
 0x565   : > { %v2755_v54 = vpop.permute.xlu0 %2754  ;;  %8797 = vmatpush3.msk.msra.mxu1 %vm1606_vm6, %v2765_v37  ;;  %v2815_v33 = vpop.permute.xlu1 %2814 }
 0x566   : > { %v2764_v9 = vsel %vm1595_vm8, 0.0, %v2755_v54  ;;  %v2824_v42 = vsel %vm1724_vm10, %v2815_v33, 0.0  ;;  %vm3241_vm8 = vcmask 64512  }
 0x567   : > { %8798 = vmatprep.subr.msk.mxu1 %vm1526_vm2, %v2824_v42  ;;  %vm11076_vm10 = vmneg %vm3241_vm8  ;;  %vm3364_vm8 = vcmask 449536  }
 0x568   : > { %8799 = vmatpush3.msk.msra.mxu1 %vm1606_vm6, %v2764_v9 }
 0x569   : > { %v2737_v20 = vpop.permute.xlu0 %2736  ;;  %8800 = vmatprep.subr.msk.mxu1 %vm1526_vm2, %v2823_v58  ;;  %v2793_v38 = vpop.permute.xlu1 %2792 }
 0x56a   : > { %8801 = vmatpush3.msk.msra.mxu1 %vm1606_vm6, %v2763_v32  ;;  %v2803_v46 = vsel %vm1683_vm7, %v2793_v38, 0.0 }
 0x56b   : > { %8802 = vmatprep.subr.msk.mxu1 %vm1526_vm2, %v2822_v48 }
 0x56c   : > { %8803 = vmatpush3.msk.msra.mxu1 %vm1606_vm6, %v2762_v10 }
 0x56d   : > { %v2739_v39 = vpop.permute.xlu0 %2738  ;;  %8804 = vmatprep.subr.msk.mxu1 %vm1606_vm6, %v2805_v24  ;;  %v2795_v45 = vpop.permute.xlu1 %2794 }
 0x56e   : > { %v2804_v19 = vsel %vm1683_vm7, %v2795_v45, 0.0  ;;  %8805 = vmatpush3.msk.msra.mxu1 %vm10128_vm4, %v2741_v34 }
 0x56f   : > { %8806 = vmatprep.subr.msk.mxu1 %vm1606_vm6, %v2804_v19 }
 0x570   : > { %8807 = vmatpush3.msk.msra.mxu1 %vm10128_vm4, %v2739_v39 }
 0x571   : > { %v2735_v23 = vpop.permute.xlu0 %2734  ;;  %8808 = vmatprep.subr.msk.mxu1 %vm1606_vm6, %v2803_v46  ;;  %v2791_v53 = vpop.permute.xlu1 %2790 }
 0x572   : > { %v2802_v49 = vsel %vm1683_vm7, %v2791_v53, 0.0  ;;  %8809 = vmatpush3.msk.msra.mxu1 %vm10128_vm4, %v2737_v20 }
 0x573   : > { %8810 = vmatprep.subr.msk.mxu1 %vm1606_vm6, %v2802_v49 }
 0x574   : > { %8811 = vmatpush3.msk.msra.mxu1 %vm10128_vm4, %v2735_v23  ;;  %vm3326_vm4 = vcmask 465920  }
 0x575   : > { %v2719_v21 = vpop.permute.xlu0 %2718  ;;  %8812 = vmatprep.subr.mxu1 %v10754_v62  ;;  %v2721_v61 = vpop.permute.xlu1 %2720 }
 0x576   : > { %v2729_v35 = vsel %vm1516_vm9, 0.0, %v2721_v61  ;;  %v2728_v36 = vsel %vm1516_vm9, 0.0, %v2719_v21  ;;  %v3078_v61 = vld [vmem:[%s13393_s26 + $0x8] sm:$0xff] }
 0x577   : > { %8813 = vmatpush3.msk.msra.mxu1 %vm1526_vm2, %v2729_v35  ;;  %v3079_v35 = vld [vmem:[%s13393_s26 + $0x10] sm:$0xff] }
 0x578   : > { %8814 = vmatprep.subr.mxu1 %v10764_v52 }
 0x579   : > { %v2715_v40 = vpop.permute.xlu0 %2714  ;;  %8815 = vmatpush3.msk.msra.mxu1 %vm1526_vm2, %v2728_v36  ;;  %v2717_v63 = vpop.permute.xlu1 %2716 }
 0x57a   : > { %v2727_v41 = vsel %vm1516_vm9, 0.0, %v2717_v63  ;;  %8816 = vmatprep.subr.mxu1 %v10734_v16  ;;  %v2726_v62 = vsel %vm1516_vm9, 0.0, %v2715_v40  ;;  %v1334_v16 = vld [vmem:[%s13390_s7 + $0x18] sm:$0xff]  ;;  %vm3305_vm9 = vcmask 515072  }
 0x57b   : > { %8817 = vmatpush3.msk.msra.mxu1 %vm1526_vm2, %v2727_v41 }
 0x57c   : > { %8818 = vmatprep.subr.mxu1 %v10744_v60 }
 0x57d   : > { %v2851_v29 = vpop.permute.xlu0 %2850  ;;  %8819 = vmatpush3.msk.msra.mxu1 %vm1526_vm2, %v2726_v62  ;;  %v2853_v28 = vpop.permute.xlu1 %2852 }
 0x57e   : > { %v2861_v52 = vsel %vm1798_vm11, %v2853_v28, 0.0  ;;  %2964 = vmatmul.mubr.f32.vlgmr.msra.gmra.mxu1 %v1331_v15  ;;  %v2860_v1 = vsel %vm1798_vm11, %v2851_v29, 0.0  ;;  %v3197_v28 = vand.u32 7, %v10096_v51 }
 0x57f   : > { %8992 = vmatprep.subr.msk.mxu0 %vm1606_vm6, %v2861_v52  ;;  %2968 = vmatprep.mubr.f32.mxu1 %v1335_v22 }
 0x580   : > { %8993 = vmatpush3.msk.msra.mxu0 %vm1606_vm6, %v2861_v52 }
 0x581   : > { %v2847_v60 = vpop.permute.xlu0 %2846  ;;  %8994 = vmatprep.subr.msk.mxu0 %vm1606_vm6, %v2860_v1  ;;  %v2849_v3 = vpop.permute.xlu1 %2848 }
 0x582   : > { %v2859_v56 = vsel %vm1798_vm11, %v2849_v3, 0.0  ;;  %2969 = vmatmul.mubr.f32.gmra.mxu1 %v1334_v16  ;;  %8995 = vmatpush3.msk.msra.mxu0 %vm1606_vm6, %v2860_v1  ;;  %v2858_v4 = vsel %vm1798_vm11, %v2847_v60, 0.0  ;;  %v11032_v1 = vadd.s32 4294967295, %v3197_v28  ;;  %vm3214_vm11 = vcmask 72704  }
 0x583   : > { %8996 = vmatprep.subr.msk.mxu0 %vm1606_vm6, %v2859_v56  ;;  %2973 = vmatprep.mubr.f32.mxu1 %v1338_v57 }
 0x584   : > { %8997 = vmatpush3.msk.msra.mxu0 %vm1606_vm6, %v2859_v56  ;;  %vm3220_vm2 = vcmp.ge.s32.totalorder %v11032_v1, 0  ;;  %v3095_v1 = vld [vmem:[#allocation4 + $0x10] sm:$0xff] }
 0x585   : > { %8998 = vmatprep.subr.msk.mxu0 %vm1606_vm6, %v2858_v4 }
 0x586   : > { %2974 = vmatmul.mubr.f32.gmra.mxu1 %v1337_v59  ;;  %8999 = vmatpush3.msk.msra.mxu0 %vm1606_vm6, %v2858_v4  ;;  %vm3258_vm6 = vcmask 56320  }
 0x587   : > { %9001 = vmatmul.mubr.msk.f32.vlgmr.msra.gmra.mxu0 %vm2886_vm13, %v1336_v5  ;;  %2978 = vmatprep.mubr.f32.mxu1 %v1341_v55 }
 0x588   : > { %9003 = vmatprep.mubr.msk.f32.mxu0 %vm2886_vm13, %v1339_v6  ;;  %9006 = vmatprep.subr.mxu0 %v3076_v8 }
 0x589   : > { %9007 = vmatpush3.msra.mxu0 %v3076_v8 }
 0x58a   : > { %2979 = vmatmul.mubr.f32.gmra.mxu1 %v1340_v2  ;;  %9008 = vmatprep.subr.mxu0 %v3075_v13  ;;  %v11039_v2 = vadd.s32 1, %v3197_v28 }
 0x58b   : > { %9004 = vmatmul.mubr.msk.f32.gmra.mxu0 %vm2886_vm13, %v1342_v7  ;;  %9024 = vmatprep.mubr.msk.f32.mxu1 %vm2886_vm13, %v3079_v35 }
 0x58c   : > { %9009 = vmatpush3.msra.mxu0 %v3075_v13  ;;  %vm3265_vm5 = vcmp.lt.s32.totalorder %v11039_v2, 8 }
 0x58e   : > { %v2869_v25 = vpop.permute.xlu1 %2868  ;;  %v2874_v30 = vpop.permute.xlu0 %2873 }
 0x592   : > { %v2879_v37 = vpop.permute.xlu1 %2878  ;;  %v2884_v10 = vpop.permute.xlu0 %2883 }
 0x63e   : > { %v8820_v17 = vpop.f32.mrf.mxu1 }
 0x640   : > { %v8821_v18 = vpop.f32.mrf.mxu1 }
 0x641   : > { %v8822_v26 = vadd.f32 %v8821_v18, %v8820_v17 }
 0x642   : > { %v8823_v0 = vpop.f32.mrf.mxu1 }
 0x643   : > { %v2966_v34 = vadd.f32 %v8822_v26, %v2869_v25 }
 0x644   : > { %v8824_v27 = vpop.f32.mrf.mxu1 }
 0x645   : > { %v8825_v14 = vadd.f32 %v8824_v27, %v8823_v0 }
 0x646   : > { %v8826_v31 = vpop.f32.mrf.mxu1 }
 0x647   : > { %v2971_v11 = vadd.f32 %v8825_v14, %v2874_v30  ;;  %v9002_v44 = vpop.f32.mrf.mxu0 }
 0x648   : > { %v8827_v47 = vpop.f32.mrf.mxu1 }
 0x649   : > { %v3056_v50 = vadd.f32 %v9002_v44, %v2971_v11  ;;  %v8828_v43 = vadd.f32 %v8827_v47, %v8826_v31  ;;  %v3050_v12 = vpop.f32.mrf.mxu0 }
 0x64a   : > { %v3051_v54 = vadd.f32 %v3050_v12, %v2966_v34  ;;  %v8829_v33 = vpop.f32.mrf.mxu1 }
 0x64b   : > { %v9005_v9 = vpop.f32.mrf.mxu0  ;;  %v2976_v42 = vadd.f32 %v8828_v43, %v2879_v37  ;;  %v3070_v20 = vmax.f32 %v3056_v50, 0.0 }
 0x64c   : > { %v3069_v58 = vmax.f32 %v3051_v54, 0.0  ;;  %v8830_v32 = vpop.f32.mrf.mxu1 }
 0x64d   : > { %v8831_v38 = vadd.f32 %v8830_v32, %v8829_v33  ;;  %v3060_v48 = vpop.f32.mrf.mxu0 }
 0x64e   : > { %v3061_v24 = vadd.f32 %v3060_v48, %v2976_v42  ;;  %9010 = vmatprep.mubr.msk.f32.mxu0 %vm3099_vm14, %v3069_v58 }
 0x64f   : > { %v2981_v39 = vadd.f32 %v8831_v38, %v2884_v10  ;;  %9011 = vmatmul.mubr.msk.f32.vlgmr.msra.gmra.mxu0 %vm3099_vm14, %v3070_v20 }
 0x650   : > { %v3071_v45 = vmax.f32 %v3061_v24, 0.0 }
 0x651   : > { %v3066_v19 = vadd.f32 %v9005_v9, %v2981_v39 }
 0x652   : > { %9013 = vmatprep.mubr.msk.f32.mxu0 %vm3099_vm14, %v3071_v45 }
 0x653   : > { %v3072_v46 = vmax.f32 %v3066_v19, 0.0  ;;  %v3077_v19 = vld [vmem:[%s13393_s26] sm:$0xff] }
 0x655   : > { %9014 = vmatmul.mubr.msk.f32.gmra.mxu0 %vm3099_vm14, %v3072_v46 }
 0x656   : > { %3453 = vmatprep.mubr.f32.mxu0 %v3078_v61 }
 0x70f   : > { %v10928_v23 = vpop.f32.mrf.mxu0 }
 0x710   : > { %3337 = vrot.lane.b32.xlu0 %v10928_v23, %s13303_s10  ;;  %3275 = vrot.lane.b32.xlu1 %v10928_v23, %s13309_s1 }
 0x711   : > { %v10938_v53 = vpop.f32.mrf.mxu0 }
 0x714   : > { %3248 = vrot.lane.b32.xlu0 %v10928_v23, %s13299_s15  ;;  %3316 = vrot.lane.b32.xlu1 %v10928_v23, %s13301_s16 }
 0x715   : > { %v10948_v49 = vpop.f32.mrf.mxu0 }
 0x717   : > { %v10958_v21 = vpop.f32.mrf.mxu0 }
 0x718   : > { %3335 = vrot.lane.b32.xlu0 %v10938_v53, %s13303_s10  ;;  %3273 = vrot.lane.b32.xlu1 %v10938_v53, %s13309_s1 }
 0x71c   : > { %3246 = vrot.lane.b32.xlu0 %v10938_v53, %s13299_s15  ;;  %3314 = vrot.lane.b32.xlu1 %v10938_v53, %s13301_s16 }
 0x720   : > { %3341 = vrot.lane.b32.xlu0 %v10948_v49, %s13303_s10  ;;  %3279 = vrot.lane.b32.xlu1 %v10948_v49, %s13309_s1 }
 0x724   : > { %3252 = vrot.lane.b32.xlu0 %v10948_v49, %s13299_s15  ;;  %3320 = vrot.lane.b32.xlu1 %v10948_v49, %s13301_s16 }
 0x728   : > { %3339 = vrot.lane.b32.xlu0 %v10958_v21, %s13303_s10  ;;  %3277 = vrot.lane.b32.xlu1 %v10958_v21, %s13309_s1  ;;  %s13311_s10 = smov 9  }
 0x72c   : > { %3235 = vrot.lane.b32.xlu0 %v10948_v49, %s13305_s23  ;;  %3299 = vrot.lane.b32.xlu1 %v10948_v49, %s13307_s11 }
 0x730   : > { %3250 = vrot.lane.b32.xlu0 %v10958_v21, %s13299_s15  ;;  %3318 = vrot.lane.b32.xlu1 %v10958_v21, %s13301_s16  ;;  %s13394_s15 = sld [smem:[#allocation31_spill]] }
 0x731   : > { %s13395_s16 = sld [smem:[#allocation22_spill]] }
 0x734   : > { %3231 = vrot.lane.b32.xlu0 %v10928_v23, %s13305_s23  ;;  %3295 = vrot.lane.b32.xlu1 %v10928_v23, %s13307_s11 }
 0x736   : > { %v3083_v36 = vld [vmem:[%s13394_s15] sm:$0xff]  ;;  %v3084_v40 = vld [vmem:[%s13394_s15 + $0x8] sm:$0xff] }
 0x738   : > { %3233 = vrot.lane.b32.xlu0 %v10958_v21, %s13305_s23  ;;  %3297 = vrot.lane.b32.xlu1 %v10958_v21, %s13307_s11 }
 0x73c   : > { %3229 = vrot.lane.b32.xlu0 %v10938_v53, %s13305_s23  ;;  %3293 = vrot.lane.b32.xlu1 %v10938_v53, %s13307_s11  ;;  %s13314_s23 = smov 119   ;;  %s13316_s11 = sshll.u32 %s13595_s28, 4 }
 0x73d   : > { %s1254_s1 = scalar_lea.vmem %s13395_s16, %s13316_s11  ;;  %s13399_s16 = smov 7  }
 0x73e   : > { %v11009_v63 = vld [vmem:[%s1254_s1 + $0x8] sm:$0xff]  ;;  %v11015_v41 = vld [vmem:[%s1254_s1] sm:$0xff]  ;;  %s13400_s1 = smov 127   ;;  %s13403_s11 = smov 8  }
 0x740   : > { %3206 = vrot.lane.b32.xlu0 %v10958_v21, %s13311_s10  ;;  %3208 = vrot.lane.b32.xlu1 %v10948_v49, %s13311_s10 }
 0x744   : > { %3202 = vrot.lane.b32.xlu0 %v10938_v53, %s13311_s10  ;;  %3204 = vrot.lane.b32.xlu1 %v10928_v23, %s13311_s10  ;;  %s13396_s10 = smov 1  }
 0x748   : > { %3356 = vrot.lane.b32.xlu0 %v10958_v21, %s13314_s23  ;;  %3358 = vrot.lane.b32.xlu1 %v10948_v49, %s13314_s23 }
 0x74c   : > { %3352 = vrot.lane.b32.xlu0 %v10938_v53, %s13314_s23  ;;  %3354 = vrot.lane.b32.xlu1 %v10928_v23, %s13314_s23  ;;  %s13398_s23 = smov 121  }
 0x750   : > { %3375 = vperm.xlu0 %9206, %v3083_v36   ;;  %3380 = vperm.xlu1 %9207, %v3084_v40  }
 0x754   : > { %3607 = vrot.lane.b32.xlu1 %v11009_v63, %s13396_s10  ;;  %3667 = vrot.lane.b32.xlu0 %v11009_v63, %s13397_s0 }
 0x758   : > { %3605 = vrot.lane.b32.xlu1 %v11015_v41, %s13396_s10  ;;  %3665 = vrot.lane.b32.xlu0 %v11015_v41, %s13397_s0 }
 0x75c   : > { %3647 = vrot.lane.b32.xlu1 %v11009_v63, %s13398_s23  ;;  %3587 = vrot.lane.b32.xlu0 %v11009_v63, %s13399_s16 }
 0x760   : > { %3645 = vrot.lane.b32.xlu1 %v11015_v41, %s13398_s23  ;;  %3585 = vrot.lane.b32.xlu0 %v11015_v41, %s13399_s16 }
 0x764   : > { %3627 = vrot.lane.b32.xlu1 %v11009_v63, %s13400_s1 }
 0x782   : > { %v3338_v15 = vpop.permute.xlu0 %3337  ;;  %v3276_v62 = vpop.permute.xlu1 %3275 }
 0x783   : > { %v3286_v8 = vsel %vm1642_vm3, 0.0, %v3276_v62 }
 0x786   : > { %v3249_v22 = vpop.permute.xlu0 %3248  ;;  %v3317_v29 = vpop.permute.xlu1 %3316 }
 0x787   : > { %v3328_v31 = vsel %vm3326_vm4, %v3317_v29, 0.0  ;;  %v3260_v11 = vsel %vm3258_vm6, 0.0, %v3249_v22  ;;  %v3082_v22 = vld [vmem:[%s13393_s26 + $0x28] sm:$0xff] }
 0x78a   : > { %v3336_v52 = vpop.permute.xlu0 %3335  ;;  %v3274_v16 = vpop.permute.xlu1 %3273 }
 0x78b   : > { %v3285_v18 = vsel %vm1642_vm3, 0.0, %v3274_v16 }
 0x78e   : > { %v3247_v57 = vpop.permute.xlu0 %3246  ;;  %v3315_v60 = vpop.permute.xlu1 %3314 }
 0x78f   : > { %v3327_v34 = vsel %vm3326_vm4, %v3315_v60, 0.0  ;;  %v3259_v50 = vsel %vm3258_vm6, 0.0, %v3247_v57 }
 0x792   : > { %v3342_v3 = vpop.permute.xlu0 %3341  ;;  %v3280_v56 = vpop.permute.xlu1 %3279 }
 0x793   : > { %v3288_v59 = vsel %vm1642_vm3, 0.0, %v3280_v56  ;;  %8846 = vmatprep.subr.msk.mxu0 %vm3347_vm15, %v3342_v3 }
 0x794   : > { %8847 = vmatpush3.msk.msra.mxu0 %vm3220_vm2, %v3288_v59 }
 0x796   : > { %v3253_v4 = vpop.permute.xlu0 %3252  ;;  %v3321_v5 = vpop.permute.xlu1 %3320 }
 0x797   : > { %v3330_v0 = vsel %vm3326_vm4, %v3321_v5, 0.0  ;;  %v3262_v25 = vsel %vm3258_vm6, 0.0, %v3253_v4 }
 0x79a   : > { %v3340_v55 = vpop.permute.xlu0 %3339  ;;  %v3278_v6 = vpop.permute.xlu1 %3277 }
 0x79b   : > { %v3287_v7 = vsel %vm1642_vm3, 0.0, %v3278_v6  ;;  %8848 = vmatprep.subr.msk.mxu0 %vm3347_vm15, %v3340_v55 }
 0x79c   : > { %8849 = vmatpush3.msk.msra.mxu0 %vm3220_vm2, %v3287_v7 }
 0x79d   : > { %8850 = vmatprep.subr.msk.mxu0 %vm3347_vm15, %v3338_v15 }
 0x79e   : > { %v3236_v13 = vpop.permute.xlu0 %3235  ;;  %8851 = vmatpush3.msk.msra.mxu0 %vm3220_vm2, %v3286_v8  ;;  %v3300_v17 = vpop.permute.xlu1 %3299 }
 0x79f   : > { %8852 = vmatprep.subr.msk.mxu0 %vm3347_vm15, %v3336_v52  ;;  %v3309_v12 = vsel %vm3305_vm9, %v3300_v17, 0.0 }
 0x7a0   : > { %8853 = vmatpush3.msk.msra.mxu0 %vm3220_vm2, %v3285_v18 }
 0x7a1   : > { %8854 = vmatprep.subr.msk.mxu0 %vm3220_vm2, %v3330_v0 }
 0x7a2   : > { %v3251_v26 = vpop.permute.xlu0 %3250  ;;  %8855 = vmatpush3.msk.msra.mxu0 %vm3265_vm5, %v3262_v25  ;;  %v3319_v27 = vpop.permute.xlu1 %3318 }
 0x7a3   : > { %v3261_v14 = vsel %vm3258_vm6, 0.0, %v3251_v26  ;;  %v3329_v30 = vsel %vm3326_vm4, %v3319_v27, 0.0 }
 0x7a4   : > { %8856 = vmatprep.subr.msk.mxu0 %vm3220_vm2, %v3329_v30  ;;  %v3087_v30 = vld [vmem:[#allocation2 + $0x10] sm:$0xff] }
 0x7a5   : > { %8857 = vmatpush3.msk.msra.mxu0 %vm3265_vm5, %v3261_v14  ;;  %v3086_v14 = vld [vmem:[#allocation2 + $0x8] sm:$0xff] }
 0x7a6   : > { %v3232_v44 = vpop.permute.xlu0 %3231  ;;  %8858 = vmatprep.subr.msk.mxu0 %vm3220_vm2, %v3328_v31  ;;  %v3296_v47 = vpop.permute.xlu1 %3295  ;;  %v3092_v31 = vld [vmem:[%s13404_s3 + $0x8] sm:$0xff] }
 0x7a7   : > { %8859 = vmatpush3.msk.msra.mxu0 %vm3265_vm5, %v3260_v11  ;;  %v3307_v9 = vsel %vm3305_vm9, %v3296_v47, 0.0  ;;  %v3091_v11 = vld [vmem:[%s13404_s3] sm:$0xff]  ;;  %s13407_s3 = sld [smem:[#allocation35_spill]] }
 0x7a8   : > { %8860 = vmatprep.subr.msk.mxu0 %vm3220_vm2, %v3327_v34 }
 0x7a9   : > { %8861 = vmatpush3.msk.msra.mxu0 %vm3265_vm5, %v3259_v50 }
 0x7aa   : > { %v3234_v37 = vpop.permute.xlu0 %3233  ;;  %8862 = vmatprep.subr.msk.mxu0 %vm3265_vm5, %v3309_v12  ;;  %v3298_v54 = vpop.permute.xlu1 %3297 }
 0x7ab   : > { %v3308_v33 = vsel %vm3305_vm9, %v3298_v54, 0.0  ;;  %8863 = vmatpush3.msk.msra.mxu0 %vm11076_vm10, %v3236_v13 }
 0x7ac   : > { %8864 = vmatprep.subr.msk.mxu0 %vm3265_vm5, %v3308_v33 }
 0x7ad   : > { %8865 = vmatpush3.msk.msra.mxu0 %vm11076_vm10, %v3234_v37 }
 0x7ae   : > { %v3230_v42 = vpop.permute.xlu0 %3229  ;;  %8866 = vmatprep.subr.msk.mxu0 %vm3265_vm5, %v3307_v9  ;;  %v3294_v58 = vpop.permute.xlu1 %3293 }
 0x7af   : > { %v3306_v32 = vsel %vm3305_vm9, %v3294_v58, 0.0  ;;  %8867 = vmatpush3.msk.msra.mxu0 %vm11076_vm10, %v3232_v44 }
 0x7b0   : > { %8868 = vmatprep.subr.msk.mxu0 %vm3265_vm5, %v3306_v32 }
 0x7b1   : > { %8869 = vmatpush3.msk.msra.mxu0 %vm11076_vm10, %v3230_v42 }
 0x7b2   : > { %v3207_v20 = vpop.permute.xlu0 %3206  ;;  %8870 = vmatprep.subr.mxu0 %v10948_v49  ;;  %v3209_v38 = vpop.permute.xlu1 %3208  ;;  %v3081_v49 = vld [vmem:[%s13393_s26 + $0x20] sm:$0xff] }
 0x7b3   : > { %v3218_v48 = vsel %vm3214_vm11, 0.0, %v3209_v38  ;;  %v3217_v10 = vsel %vm3214_vm11, 0.0, %v3207_v20 }
 0x7b4   : > { %8871 = vmatpush3.msk.msra.mxu0 %vm3220_vm2, %v3218_v48 }
 0x7b5   : > { %8872 = vmatprep.subr.mxu0 %v10958_v21 }
 0x7b6   : > { %v3203_v24 = vpop.permute.xlu0 %3202  ;;  %8873 = vmatpush3.msk.msra.mxu0 %vm3220_vm2, %v3217_v10  ;;  %v3205_v39 = vpop.permute.xlu1 %3204 }
 0x7b7   : > { %v3216_v45 = vsel %vm3214_vm11, 0.0, %v3205_v39  ;;  %8874 = vmatprep.subr.mxu0 %v10928_v23  ;;  %v3215_v46 = vsel %vm3214_vm11, 0.0, %v3203_v24  ;;  %v3080_v23 = vld [vmem:[%s13393_s26 + $0x18] sm:$0xff] }
 0x7b8   : > { %8875 = vmatpush3.msk.msra.mxu0 %vm3220_vm2, %v3216_v45 }
 0x7b9   : > { %8876 = vmatprep.subr.mxu0 %v10938_v53 }
 0x7ba   : > { %v3357_v21 = vpop.permute.xlu0 %3356  ;;  %8877 = vmatpush3.msk.msra.mxu0 %vm3220_vm2, %v3215_v46  ;;  %v3359_v61 = vpop.permute.xlu1 %3358 }
 0x7bb   : > { %v3368_v35 = vsel %vm3364_vm8, %v3359_v61, 0.0  ;;  %3454 = vmatmul.mubr.f32.vlgmr.msra.gmra.mxu0 %v3077_v19  ;;  %v3367_v36 = vsel %vm3364_vm8, %v3357_v21, 0.0 }
 0x7bc   : > { %9016 = vmatprep.subr.msk.mxu1 %vm3265_vm5, %v3368_v35  ;;  %3458 = vmatprep.mubr.f32.mxu0 %v3081_v49 }
 0x7bd   : > { %9017 = vmatpush3.msk.msra.mxu1 %vm3265_vm5, %v3368_v35 }
 0x7be   : > { %v3353_v53 = vpop.permute.xlu0 %3352  ;;  %9018 = vmatprep.subr.msk.mxu1 %vm3265_vm5, %v3367_v36  ;;  %v3355_v40 = vpop.permute.xlu1 %3354 }
 0x7bf   : > { %v3366_v15 = vsel %vm3364_vm8, %v3355_v40, 0.0  ;;  %3459 = vmatmul.mubr.f32.gmra.mxu0 %v3080_v23  ;;  %9019 = vmatpush3.msk.msra.mxu1 %vm3265_vm5, %v3367_v36  ;;  %v3365_v62 = vsel %vm3364_vm8, %v3353_v53, 0.0 }
 0x7c0   : > { %9020 = vmatprep.subr.msk.mxu1 %vm3265_vm5, %v3366_v15  ;;  %9035 = vmatprep.mubr.msk.f32.mxu0 %vm2886_vm13, %v3087_v30 }
 0x7c1   : > { %9021 = vmatpush3.msk.msra.mxu1 %vm3265_vm5, %v3366_v15 }
 0x7c2   : > { %9022 = vmatprep.subr.msk.mxu1 %vm3265_vm5, %v3365_v62 }
 0x7c3   : > { %9023 = vmatpush3.msk.msra.mxu1 %vm3265_vm5, %v3365_v62 }
 0x7c4   : > { %9025 = vmatmul.mubr.msk.f32.vlgmr.msra.gmra.mxu1 %vm2886_vm13, %v3082_v22 }
 0x7c5   : > { %3777 = vmatprep.mubr.f32.mxu1 %v3086_v14 }
 0x7cb   : > { %v3376_v29 = vpop.permute.xlu0 %3375  ;;  %v3381_v28 = vpop.permute.xlu1 %3380 }
 0x7cf   : > { %v3608_v52 = vpop.permute.xlu1 %3607  ;;  %v3668_v16 = vpop.permute.xlu0 %3667 }
 0x7d0   : > { %v3616_v57 = vsel %vm1642_vm3, 0.0, %v3608_v52  ;;  %8890 = vmatprep.subr.msk.mxu1 %vm3347_vm15, %v3668_v16 }
 0x7d1   : > { %8891 = vmatpush3.msk.msra.mxu1 %vm3220_vm2, %v3616_v57 }
 0x7d3   : > { %v3606_v60 = vpop.permute.xlu1 %3605  ;;  %v3666_v3 = vpop.permute.xlu0 %3665 }
 0x7d4   : > { %v3615_v56 = vsel %vm1642_vm3, 0.0, %v3606_v60  ;;  %8892 = vmatprep.subr.msk.mxu1 %vm3347_vm15, %v3666_v3 }
 0x7d5   : > { %8893 = vmatpush3.msk.msra.mxu1 %vm3220_vm2, %v3615_v56 }
 0x7d7   : > { %v3648_v44 = vpop.permute.xlu1 %3647  ;;  %v3588_v47 = vpop.permute.xlu0 %3587 }
 0x7d8   : > { %v3656_v38 = vsel %vm3326_vm4, %v3648_v44, 0.0  ;;  %v3596_v24 = vsel %vm3258_vm6, 0.0, %v3588_v47 }
 0x7db   : > { %v3646_v34 = vpop.permute.xlu1 %3645  ;;  %v3586_v50 = vpop.permute.xlu0 %3585 }
 0x7dc   : > { %v3655_v39 = vsel %vm3326_vm4, %v3646_v34, 0.0  ;;  %v3595_v45 = vsel %vm3258_vm6, 0.0, %v3586_v50 }
 0x7df   : > { %v3628_v12 = vpop.permute.xlu1 %3627 }
 0x7e0   : > { %v3636_v23 = vsel %vm3305_vm9, %v3628_v12, 0.0 }
 0x87b   : > { %v8878_v59 = vpop.f32.mrf.mxu0 }
 0x87d   : > { %v8879_v4 = vpop.f32.mrf.mxu0 }
 0x87e   : > { %v8880_v55 = vadd.f32 %v8879_v4, %v8878_v59  ;;  %v3085_v4 = vld [vmem:[#allocation2] sm:$0xff] }
 0x87f   : > { %v8881_v5 = vpop.f32.mrf.mxu0 }
 0x880   : > { %v3456_v13 = vadd.f32 %v8880_v55, %v3376_v29 }
 0x881   : > { %v8882_v6 = vpop.f32.mrf.mxu0 }
 0x882   : > { %v8883_v8 = vadd.f32 %v8882_v6, %v8881_v5 }
 0x884   : > { %v9026_v7 = vpop.f32.mrf.mxu1  ;;  %v3461_v0 = vadd.f32 %v8883_v8, %v3381_v28  ;;  %v3088_v8 = vld [vmem:[#allocation2 + $0x18] sm:$0xff] }
 0x886   : > { %v3530_v17 = vpop.f32.mrf.mxu1  ;;  %v3536_v26 = vadd.f32 %v9026_v7, %v3461_v0 }
 0x887   : > { %v3531_v18 = vadd.f32 %v3530_v17, %v3456_v13 }
 0x888   : > { %v11161_v27 = vmax.f32 %v3536_v26, 0.0  ;;  %v9539_v26 = vmov 0.0  }
 0x889   : > { %v11151_v25 = vmax.f32 %v3531_v18, 0.0 }
 0x88b   : > { %3661 = vrot.lane.b32.xlu0 %v11151_v25, %s13397_s0  ;;  %3601 = vrot.lane.b32.xlu1 %v11151_v25, %s13396_s10 }
 0x88f   : > { %3581 = vrot.lane.b32.xlu0 %v11151_v25, %s13399_s16  ;;  %3641 = vrot.lane.b32.xlu1 %v11151_v25, %s13398_s23 }
 0x893   : > { %3663 = vrot.lane.b32.xlu0 %v11161_v27, %s13397_s0  ;;  %3603 = vrot.lane.b32.xlu1 %v11161_v27, %s13396_s10 }
 0x897   : > { %3571 = vrot.lane.b32.xlu0 %v11009_v63, %s13403_s11  ;;  %3643 = vrot.lane.b32.xlu1 %v11161_v27, %s13398_s23 }
 0x89b   : > { %3583 = vrot.lane.b32.xlu0 %v11161_v27, %s13399_s16  ;;  %3625 = vrot.lane.b32.xlu1 %v11015_v41, %s13400_s1 }
 0x89f   : > { %3569 = vrot.lane.b32.xlu0 %v11015_v41, %s13403_s11  ;;  %3623 = vrot.lane.b32.xlu1 %v11161_v27, %s13400_s1 }
 0x8a3   : > { %3567 = vrot.lane.b32.xlu0 %v11161_v27, %s13403_s11  ;;  %3621 = vrot.lane.b32.xlu1 %v11151_v25, %s13400_s1 }
 0x8a7   : > { %3565 = vrot.lane.b32.xlu0 %v11151_v25, %s13403_s11  ;;  %3551 = vrot.lane.b32.xlu1 %v11009_v63, %s13405_s4 }
 0x8ab   : > { %3549 = vrot.lane.b32.xlu0 %v11015_v41, %s13405_s4  ;;  %3547 = vrot.lane.b32.xlu1 %v11161_v27, %s13405_s4 }
 0x8af   : > { %3545 = vrot.lane.b32.xlu0 %v11151_v25, %s13405_s4  ;;  %3683 = vrot.lane.b32.xlu1 %v11009_v63, %s13406_s5 }
 0x8b3   : > { %3681 = vrot.lane.b32.xlu0 %v11015_v41, %s13406_s5  ;;  %3679 = vrot.lane.b32.xlu1 %v11161_v27, %s13406_s5 }
 0x8b7   : > { %3677 = vrot.lane.b32.xlu0 %v11151_v25, %s13406_s5  ;;  %3704 = vperm.xlu1 %9207, %v3092_v31  }
 0x8bb   : > { %3699 = vperm.xlu0 %9206, %v3091_v11  }
 0x8fd   : > { %v3662_v37 = vpop.permute.xlu0 %3661  ;;  %v3602_v54 = vpop.permute.xlu1 %3601 }
 0x8fe   : > { %v3613_v20 = vsel %vm1642_vm3, 0.0, %v3602_v54 }
 0x901   : > { %v3582_v33 = vpop.permute.xlu0 %3581  ;;  %v3642_v9 = vpop.permute.xlu1 %3641 }
 0x902   : > { %v3653_v61 = vsel %vm3326_vm4, %v3642_v9, 0.0  ;;  %v3593_v35 = vsel %vm3258_vm6, 0.0, %v3582_v33 }
 0x905   : > { %v3664_v42 = vpop.permute.xlu0 %3663  ;;  %v3604_v58 = vpop.permute.xlu1 %3603 }
 0x906   : > { %v3614_v32 = vsel %vm1642_vm3, 0.0, %v3604_v58  ;;  %8894 = vmatprep.subr.msk.mxu1 %vm3347_vm15, %v3664_v42 }
 0x907   : > { %8895 = vmatpush3.msk.msra.mxu1 %vm3220_vm2, %v3614_v32  ;;  %v3094_v32 = vld [vmem:[#allocation4 + $0x8] sm:$0xff] }
 0x908   : > { %8896 = vmatprep.subr.msk.mxu1 %vm3347_vm15, %v3662_v37 }
 0x909   : > { %v3572_v48 = vpop.permute.xlu0 %3571  ;;  %8897 = vmatpush3.msk.msra.mxu1 %vm3220_vm2, %v3613_v20  ;;  %v3644_v10 = vpop.permute.xlu1 %3643  ;;  %v4053_v20 = vld [vmem:[%s13407_s3 + $0x78] sm:$0xff] }
 0x90a   : > { %8898 = vmatprep.subr.msk.mxu1 %vm3220_vm2, %v3656_v38  ;;  %v3654_v19 = vsel %vm3326_vm4, %v3644_v10, 0.0  ;;  %v4052_v38 = vld [vmem:[%s13407_s3 + $0x70] sm:$0xff]  ;;  %v3097_v10 = vld [vmem:[%s13408_s6] sm:$0xff] }
 0x90b   : > { %8899 = vmatpush3.msk.msra.mxu1 %vm3265_vm5, %v3596_v24  ;;  %v4050_v24 = vld [vmem:[%s13407_s3 + $0x60] sm:$0xff] }
 0x90c   : > { %8900 = vmatprep.subr.msk.mxu1 %vm3220_vm2, %v3655_v39  ;;  %v3098_v39 = vld [vmem:[%s13408_s6 + $0x8] sm:$0xff] }
 0x90d   : > { %v3584_v46 = vpop.permute.xlu0 %3583  ;;  %8901 = vmatpush3.msk.msra.mxu1 %vm3265_vm5, %v3595_v45  ;;  %v3626_v49 = vpop.permute.xlu1 %3625  ;;  %v4049_v45 = vld [vmem:[%s13407_s3 + $0x58] sm:$0xff] }
 0x90e   : > { %v3594_v21 = vsel %vm3258_vm6, 0.0, %v3584_v46  ;;  %8902 = vmatprep.subr.msk.mxu1 %vm3220_vm2, %v3654_v19  ;;  %v3635_v40 = vsel %vm3305_vm9, %v3626_v49, 0.0  ;;  %v4048_v19 = vld [vmem:[%s13407_s3 + $0x50] sm:$0xff]  ;;  %v4047_v46 = vld [vmem:[%s13407_s3 + $0x48] sm:$0xff]  ;;  %v4046_v49 = vld [vmem:[%s13407_s3 + $0x40] sm:$0xff] }
 0x90f   : > { %8903 = vmatpush3.msk.msra.mxu1 %vm3265_vm5, %v3594_v21  ;;  %v4045_v21 = vld [vmem:[%s13407_s3 + $0x38] sm:$0xff] }
 0x910   : > { %8904 = vmatprep.subr.msk.mxu1 %vm3220_vm2, %v3653_v61  ;;  %v4044_v61 = vld [vmem:[%s13407_s3 + $0x30] sm:$0xff] }
 0x911   : > { %v3570_v36 = vpop.permute.xlu0 %3569  ;;  %8905 = vmatpush3.msk.msra.mxu1 %vm3265_vm5, %v3593_v35  ;;  %v3624_v53 = vpop.permute.xlu1 %3623  ;;  %v4043_v35 = vld [vmem:[%s13407_s3 + $0x28] sm:$0xff] }
 0x912   : > { %8906 = vmatprep.subr.msk.mxu1 %vm3265_vm5, %v3636_v23  ;;  %v3634_v15 = vsel %vm3305_vm9, %v3624_v53, 0.0 }
 0x913   : > { %8907 = vmatpush3.msk.msra.mxu1 %vm11076_vm10, %v3572_v48  ;;  %v4051_v48 = vld [vmem:[%s13407_s3 + $0x68] sm:$0xff] }
 0x914   : > { %8908 = vmatprep.subr.msk.mxu1 %vm3265_vm5, %v3635_v40 }
 0x915   : > { %v3568_v62 = vpop.permute.xlu0 %3567  ;;  %8909 = vmatpush3.msk.msra.mxu1 %vm11076_vm10, %v3570_v36  ;;  %v3622_v22 = vpop.permute.xlu1 %3621 }
 0x916   : > { %v3633_v29 = vsel %vm3305_vm9, %v3622_v22, 0.0  ;;  %8910 = vmatprep.subr.msk.mxu1 %vm3265_vm5, %v3634_v15 }
 0x917   : > { %8911 = vmatpush3.msk.msra.mxu1 %vm11076_vm10, %v3568_v62 }
 0x918   : > { %8912 = vmatprep.subr.msk.mxu1 %vm3265_vm5, %v3633_v29 }
 0x919   : > { %v3566_v28 = vpop.permute.xlu0 %3565  ;;  %v3552_v52 = vpop.permute.xlu1 %3551 }
 0x91a   : > { %v3560_v16 = vsel %vm3214_vm11, 0.0, %v3552_v52  ;;  %8913 = vmatpush3.msk.msra.mxu1 %vm11076_vm10, %v3566_v28 }
 0x91b   : > { %8914 = vmatprep.subr.mxu1 %v11009_v63 }
 0x91c   : > { %8915 = vmatpush3.msk.msra.mxu1 %vm3220_vm2, %v3560_v16 }
 0x91d   : > { %v3550_v57 = vpop.permute.xlu0 %3549  ;;  %v3548_v60 = vpop.permute.xlu1 %3547  ;;  %8916 = vmatprep.subr.mxu1 %v11015_v41  ;;  %v3089_v41 = vld [vmem:[#allocation2 + $0x20] sm:$0xff] }
 0x91e   : > { %v3559_v3 = vsel %vm3214_vm11, 0.0, %v3550_v57  ;;  %v3558_v56 = vsel %vm3214_vm11, 0.0, %v3548_v60 }
 0x91f   : > { %8917 = vmatpush3.msk.msra.mxu1 %vm3220_vm2, %v3559_v3 }
 0x920   : > { %8918 = vmatprep.subr.mxu1 %v11161_v27 }
 0x921   : > { %v3546_v59 = vpop.permute.xlu0 %3545  ;;  %8919 = vmatpush3.msk.msra.mxu1 %vm3220_vm2, %v3558_v56  ;;  %v3684_v63 = vpop.permute.xlu1 %3683 }
 0x922   : > { %v3557_v5 = vsel %vm3214_vm11, 0.0, %v3546_v59  ;;  %v3692_v55 = vsel %vm3364_vm8, %v3684_v63, 0.0  ;;  %8920 = vmatprep.subr.mxu1 %v11151_v25  ;;  %v3090_v25 = vld [vmem:[#allocation2 + $0x28] sm:$0xff] }
 0x923   : > { %8921 = vmatpush3.msk.msra.mxu1 %vm3220_vm2, %v3557_v5  ;;  %9027 = vmatprep.subr.msk.mxu0 %vm3265_vm5, %v3692_v55 }
 0x924   : > { %3778 = vmatmul.mubr.f32.vlgmr.msra.gmra.mxu1 %v3085_v4  ;;  %9028 = vmatpush3.msk.msra.mxu0 %vm3265_vm5, %v3692_v55 }
 0x925   : > { %v3682_v6 = vpop.permute.xlu0 %3681  ;;  %v3680_v7 = vpop.permute.xlu1 %3679  ;;  %3782 = vmatprep.mubr.f32.mxu1 %v3089_v41  ;;  %4084 = vmatprep.subr.mxu1 %v4053_v20 }
 0x926   : > { %v3691_v13 = vsel %vm3364_vm8, %v3682_v6, 0.0  ;;  %v3690_v17 = vsel %vm3364_vm8, %v3680_v7, 0.0  ;;  %4085 = vmatpush1.msra.mxu1 %v4052_v38  ;;  %v4055_v38 = vld [vmem:[#allocation6 + $0x8] sm:$0xff] }
 0x927   : > { %9029 = vmatprep.subr.msk.mxu0 %vm3265_vm5, %v3691_v13  ;;  %4086 = vmatprep.subr.mxu1 %v4051_v48 }
 0x928   : > { %3783 = vmatmul.mubr.f32.gmra.mxu1 %v3088_v8  ;;  %9030 = vmatpush3.msk.msra.mxu0 %vm3265_vm5, %v3691_v13 }
 0x929   : > { %v3678_v18 = vpop.permute.xlu0 %3677  ;;  %9031 = vmatprep.subr.msk.mxu0 %vm3265_vm5, %v3690_v17  ;;  %4132 = vmatprep.mubr.f32.mxu1 %v9539_v26 }
 0x92a   : > { %v3689_v0 = vsel %vm3364_vm8, %v3678_v18, 0.0  ;;  %9032 = vmatpush3.msk.msra.mxu0 %vm3265_vm5, %v3690_v17  ;;  %4087 = vmatpush1.msra.mxu1 %v4050_v24  ;;  %v3093_v18 = vld [vmem:[#allocation4] sm:$0xff] }
 0x92b   : > { %9033 = vmatprep.subr.msk.mxu0 %vm3265_vm5, %v3689_v0  ;;  %4088 = vmatprep.subr.mxu1 %v4049_v45 }
 0x92c   : > { %9034 = vmatpush3.msk.msra.mxu0 %vm3265_vm5, %v3689_v0  ;;  %4089 = vmatpush1.msra.mxu1 %v4048_v19 }
 0x92d   : > { %9036 = vmatmul.mubr.msk.f32.vlgmr.msra.gmra.mxu0 %vm2886_vm13, %v3090_v25  ;;  %3959 = vmatprep.subr.mxu0 %v9539_v26  ;;  %v3096_v25 = vld [vmem:[#allocation4 + $0x18] sm:$0xff] }
 0x92e   : > { %8355 = vmatprep.mubr.msk.f32.mxu0 %vm3099_vm14, %v3094_v32  ;;  %4090 = vmatprep.subr.mxu1 %v4047_v46 }
 0x92f   : > { %4091 = vmatpush1.msra.mxu1 %v4046_v49 }
 0x930   : > { %4092 = vmatprep.subr.mxu1 %v4045_v21 }
 0x931   : > { %4093 = vmatpush1.msra.mxu1 %v4044_v61 }
 0x932   : > { %v3705_v47 = vpop.permute.xlu1 %3704  ;;  %4094 = vmatprep.subr.mxu1 %v4043_v35 }
 0x936   : > { %v3700_v34 = vpop.permute.xlu0 %3699 }
 0x9e4   : > { %v8922_v27 = vpop.f32.mrf.mxu1 }
 0x9e6   : > { %v8923_v14 = vpop.f32.mrf.mxu1 }
 0x9e7   : > { %v8924_v31 = vadd.f32 %v8923_v14, %v8922_v27  ;;  %v4042_v27 = vld [vmem:[%s13407_s3 + $0x20] sm:$0xff]  ;;  %v4041_v14 = vld [vmem:[%s13407_s3 + $0x18] sm:$0xff] }
 0x9e8   : > { %v8925_v30 = vpop.f32.mrf.mxu1  ;;  %4095 = vmatpush1.msra.mxu1 %v4042_v27 }
 0x9e9   : > { %v3780_v37 = vadd.f32 %v8924_v31, %v3700_v34  ;;  %4096 = vmatprep.subr.mxu1 %v4041_v14  ;;  %v4039_v31 = vld [vmem:[%s13407_s3 + $0x8] sm:$0xff] }
 0x9ea   : > { %v8926_v11 = vpop.f32.mrf.mxu1 }
 0x9eb   : > { %v8927_v44 = vadd.f32 %v8926_v11, %v8925_v30  ;;  %v4040_v30 = vld [vmem:[%s13407_s3 + $0x10] sm:$0xff]  ;;  %v4038_v11 = vld [vmem:[%s13407_s3] sm:$0xff] }
 0x9ec   : > { %4097 = vmatpush1.msra.mxu1 %v4040_v30 }
 0x9ed   : > { %v3785_v50 = vadd.f32 %v8927_v44, %v3705_v47  ;;  %v9037_v12 = vpop.f32.mrf.mxu0  ;;  %4098 = vmatprep.subr.mxu1 %v4039_v31 }
 0x9ee   : > { %4099 = vmatpush1.msra.mxu1 %v4038_v11 }
 0x9ef   : > { %v3860_v54 = vadd.f32 %v9037_v12, %v3785_v50  ;;  %v3854_v33 = vpop.f32.mrf.mxu0 }
 0x9f0   : > { %v3855_v9 = vadd.f32 %v3854_v33, %v3780_v37 }
 0x9f1   : > { %v11295_v42 = vmax.f32 %v3860_v54, 0.0 }
 0x9f2   : > { %v11297_v58 = vmax.f32 %v3855_v9, 0.0 }
 0x9f3   : > { %3927 = vrot.lane.b32.xlu1 %v11295_v42, %s13397_s0 }
 0x9f4   : > { %3925 = vrot.lane.b32.xlu0 %v11297_v58, %s13397_s0  ;;  %s13324_s0 = smov 15  }
 0x9f7   : > { %3917 = vrot.lane.b32.xlu1 %v11295_v42, %s13398_s23 }
 0x9f8   : > { %3915 = vrot.lane.b32.xlu0 %v11297_v58, %s13398_s23  ;;  %s13409_s23 = sld [smem:[#allocation23_spill]] }
 0x9fb   : > { %3907 = vrot.lane.b32.xlu1 %v11295_v42, %s13400_s1 }
 0x9fc   : > { %3905 = vrot.lane.b32.xlu0 %v11297_v58, %s13400_s1 }
 0x9ff   : > { %3897 = vrot.lane.b32.xlu1 %v11295_v42, %s13396_s10 }
 0xa00   : > { %3895 = vrot.lane.b32.xlu0 %v11297_v58, %s13396_s10 }
 0xa03   : > { %3887 = vrot.lane.b32.xlu1 %v11295_v42, %s13399_s16 }
 0xa04   : > { %3885 = vrot.lane.b32.xlu0 %v11297_v58, %s13399_s16  ;;  %s13327_s16 = smov 17  }
 0xa07   : > { %3879 = vrot.lane.b32.xlu1 %v11295_v42, %s13403_s11 }
 0xa08   : > { %3877 = vrot.lane.b32.xlu0 %v11297_v58, %s13403_s11  ;;  %s13322_s11 = smov 112  }
 0xa0b   : > { %3869 = vrot.lane.b32.xlu1 %v11295_v42, %s13405_s4 }
 0xa0c   : > { %3867 = vrot.lane.b32.xlu0 %v11297_v58, %s13405_s4  ;;  %s9543_s4 = smov 16  }
 0xa0f   : > { %3935 = vrot.lane.b32.xlu1 %v11295_v42, %s13406_s5 }
 0xa10   : > { %3933 = vrot.lane.b32.xlu0 %v11297_v58, %s13406_s5  ;;  %s13320_s5 = smov 113  }
 0xa13   : > { %3945 = vperm.xlu1 %9207, %v3097_v10  }
 0xa14   : > { %3950 = vperm.xlu0 %9206, %v3098_v39  }
 0xa65   : > { %v3928_v23 = vpop.permute.xlu1 %3927 }
 0xa66   : > { %v3926_v36 = vpop.permute.xlu0 %3925  ;;  %8337 = vmatpush1.msk.msra.mxu0 %vm3347_vm15, %v3928_v23  ;;  %v11519_v23 = vadd.s32 128, %v10096_v51 }
 0xa67   : > { %3961 = vmatprep.subr.mxu0 %v9539_v26 }
 0xa68   : > { %8338 = vmatpush1.msk.msra.mxu0 %vm3347_vm15, %v3926_v36 }
 0xa69   : > { %v3918_v53 = vpop.permute.xlu1 %3917  ;;  %3963 = vmatprep.subr.mxu0 %v9539_v26 }
 0xa6a   : > { %v3922_v40 = vsel %vm3326_vm4, %v3918_v53, 0.0  ;;  %v3916_v15 = vpop.permute.xlu0 %3915 }
 0xa6b   : > { %v3921_v62 = vsel %vm3326_vm4, %v3916_v15, 0.0  ;;  %8339 = vmatpush1.msk.msra.mxu0 %vm3220_vm2, %v3922_v40  ;;  %v4147_v40 = vand.u32 15, %v11519_v23 }
 0xa6c   : > { %3965 = vmatprep.subr.mxu0 %v9539_v26 }
 0xa6d   : > { %8340 = vmatpush1.msk.msra.mxu0 %vm3220_vm2, %v3921_v62  ;;  %v3908_v22 = vpop.permute.xlu1 %3907 }
 0xa6e   : > { %v3912_v29 = vsel %vm3305_vm9, %v3908_v22, 0.0  ;;  %v3906_v28 = vpop.permute.xlu0 %3905  ;;  %3967 = vmatprep.subr.mxu0 %v9539_v26  ;;  %v4146_v22 = vand.u32 15, %v10096_v51 }
 0xa6f   : > { %v3911_v52 = vsel %vm3305_vm9, %v3906_v28, 0.0  ;;  %8341 = vmatpush1.msk.msra.mxu0 %vm3265_vm5, %v3912_v29  ;;  %v11523_v29 = vadd.s32 4294967295, %v4147_v40 }
 0xa70   : > { %3969 = vmatprep.subr.mxu0 %v9539_v26 }
 0xa71   : > { %8342 = vmatpush1.msk.msra.mxu0 %vm3265_vm5, %v3911_v52  ;;  %v3898_v16 = vpop.permute.xlu1 %3897  ;;  %vm4172_vm15 = vcmp.ge.s32.totalorder %v11523_v29, 0  ;;  %v4906_v29 = vld [vmem:[#allocation9 + $0x2d8] sm:$0xff] }
 0xa72   : > { %v3896_v57 = vpop.permute.xlu0 %3895  ;;  %3971 = vmatprep.subr.mxu0 %v9539_v26  ;;  %v3902_v3 = vsel %vm1642_vm3, 0.0, %v3898_v16  ;;  %v11525_v16 = vadd.s32 4294967295, %v4146_v22 }
 0xa73   : > { %3972 = vmatpush1.msra.mxu0 %v11295_v42  ;;  %v3901_v59 = vsel %vm1642_vm3, 0.0, %v3896_v57 }
 0xa74   : > { %3973 = vmatprep.subr.mxu0 %v9539_v26  ;;  %vm4171_vm4 = vcmp.ge.s32.totalorder %v11525_v16, 0  ;;  %v4898_v16 = vld [vmem:[#allocation9 + $0x298] sm:$0xff] }
 0xa75   : > { %3974 = vmatpush1.msra.mxu0 %v11297_v58  ;;  %v3888_v60 = vpop.permute.xlu1 %3887 }
 0xa76   : > { %v3886_v56 = vpop.permute.xlu0 %3885  ;;  %3975 = vmatprep.subr.mxu0 %v9539_v26  ;;  %v3892_v4 = vsel %vm3258_vm6, 0.0, %v3888_v60 }
 0xa77   : > { %8343 = vmatpush1.msk.msra.mxu0 %vm3220_vm2, %v3902_v3  ;;  %v3891_v55 = vsel %vm3258_vm6, 0.0, %v3886_v56  ;;  %v11532_v3 = vadd.s32 1, %v4147_v40  ;;  %vm4261_vm6 = vcmask 1039360  }
 0xa78   : > { %3977 = vmatprep.subr.mxu0 %v9539_v26 }
 0xa79   : > { %8344 = vmatpush1.msk.msra.mxu0 %vm3220_vm2, %v3901_v59  ;;  %v3880_v63 = vpop.permute.xlu1 %3879 }
 0xa7a   : > { %v3878_v5 = vpop.permute.xlu0 %3877  ;;  %3979 = vmatprep.subr.mxu0 %v9539_v26 }
 0xa7b   : > { %8345 = vmatpush1.msk.msra.mxu0 %vm3265_vm5, %v3892_v4 }
 0xa7c   : > { %3981 = vmatprep.subr.mxu0 %v9539_v26 }
 0xa7d   : > { %8346 = vmatpush1.msk.msra.mxu0 %vm3265_vm5, %v3891_v55  ;;  %v3870_v41 = vpop.permute.xlu1 %3869 }
 0xa7e   : > { %3983 = vmatprep.subr.mxu0 %v9539_v26  ;;  %v3868_v6 = vpop.permute.xlu0 %3867  ;;  %v3874_v7 = vsel %vm3214_vm11, 0.0, %v3870_v41 }
 0xa7f   : > { %8348 = vmatpush1.msk.msra.mxu0 %vm11076_vm10, %v3880_v63  ;;  %v3873_v13 = vsel %vm3214_vm11, 0.0, %v3868_v6  ;;  %v11535_v63 = vadd.s32 1, %v4146_v22  ;;  %vm4160_vm11 = vcmask 138240  }
 0xa80   : > { %3985 = vmatprep.subr.mxu0 %v9539_v26 }
 0xa81   : > { %8350 = vmatpush1.msk.msra.mxu0 %vm11076_vm10, %v3878_v5  ;;  %v3936_v8 = vpop.permute.xlu1 %3935  ;;  %vm4221_vm9 = vcmp.lt.s32.totalorder %v11535_v63, 16  ;;  %vm11592_vm10 = vmneg %vm3099_vm14  ;;  %v4937_v63 = vld [vmem:[#allocation9 + $0x3d0] sm:$0xff] }
 0xa82   : > { %3987 = vmatprep.subr.mxu0 %v9539_v26  ;;  %v3934_v17 = vpop.permute.xlu0 %3933  ;;  %v3940_v43 = vsel %vm3364_vm8, %v3936_v8, 0.0 }
 0xa83   : > { %8351 = vmatpush1.msk.msra.mxu0 %vm3220_vm2, %v3874_v7  ;;  %v3939_v0 = vsel %vm3364_vm8, %v3934_v17, 0.0  ;;  %vm4320_vm8 = vcmask 908288  }
 0xa84   : > { %3989 = vmatprep.subr.mxu0 %v9539_v26 }
 0xa85   : > { %8352 = vmatpush1.msk.msra.mxu0 %vm3220_vm2, %v3873_v13  ;;  %vm4282_vm2 = vcmask 924672  }
 0xa86   : > { %4019 = vmatprep.subr.mxu0 %v9539_v26 }
 0xa87   : > { %8353 = vmatpush2.msk.msra.mxu0 %vm3265_vm5, %v3940_v43 }
 0xa88   : > { %4021 = vmatprep.subr.mxu0 %v9539_v26 }
 0xa89   : > { %8354 = vmatpush2.msk.msra.mxu0 %vm3265_vm5, %v3939_v0  ;;  %vm4222_vm5 = vcmp.lt.s32.totalorder %v11532_v3, 16  ;;  %v4938_v3 = vld [vmem:[#allocation9 + $0x3d8] sm:$0xff] }
 0xa8a   : > { %4024 = vmatmul.mubr.f32.vlgmr.msra.gmra.mxu0 %v3093_v18 }
 0xa8b   : > { %8356 = vmatprep.mubr.msk.f32.mxu0 %vm3099_vm14, %v3096_v25 }
 0xa8e   : > { %4029 = vmatmul.mubr.f32.gmra.mxu0 %v3095_v1  ;;  %v3946_v44 = vpop.permute.xlu1 %3945 }
 0xa8f   : > { %v3951_v12 = vpop.permute.xlu0 %3950  ;;  %8389 = vmatprep.mubr.msk.f32.mxu0 %vm3099_vm14, %v4055_v38 }
 0xb4a   : > { %v4025_v47 = vpop.f32.mrf.mxu0 }
 0xb4b   : > { %v4026_v34 = vadd.f32 %v4025_v47, %v3946_v44 }
 0xb4c   : > { %v4027_v2 = vpop.f32.mrf.mxu0 }
 0xb4d   : > { %v4034_v50 = vmax.f32 %v4026_v34, 0.0 }
 0xb4e   : > { %v4030_v37 = vpop.f32.mrf.mxu0 }
 0xb4f   : > { %v4031_v54 = vadd.f32 %v4030_v37, %v3951_v12  ;;  %8357 = vmatmul.mubr.msk.f32.vlgmr.msra.gmra.mxu1 %vm1835_vm12, %v4034_v50 }
 0xb50   : > { %4138 = vmatprep.mubr.f32.mxu1 %v9539_v26  ;;  %v4032_v33 = vpop.f32.mrf.mxu0 }
 0xb51   : > { %v4035_v9 = vmax.f32 %v4031_v54, 0.0  ;;  %v4929_v54 = vld [vmem:[#allocation9 + $0x390] sm:$0xff] }
 0xb53   : > { %8358 = vmatmul.mubr.msk.f32.gmra.mxu1 %vm1835_vm12, %v4035_v9  ;;  %vm4303_vm12 = vcmask 916480  }
 0xc0f   : > { %v11415_v42 = vpop.f32.mrf.mxu1 }
 0xc10   : > { %4274 = vrot.lane.b32.xlu0 %v11415_v42, %s13320_s5  ;;  %4295 = vrot.lane.b32.xlu1 %v11415_v42, %s13322_s11 }
 0xc11   : > { %v11425_v58 = vpop.f32.mrf.mxu1 }
 0xc13   : > { %v11435_v32 = vpop.f32.mrf.mxu1 }
 0xc14   : > { %4253 = vrot.lane.b32.xlu0 %v11415_v42, %s13400_s1  ;;  %4233 = vrot.lane.b32.xlu1 %v11415_v42, %s13396_s10 }
 0xc15   : > { %v11445_v20 = vpop.f32.mrf.mxu1 }
 0xc18   : > { %4276 = vrot.lane.b32.xlu1 %v11425_v58, %s13320_s5  ;;  %4297 = vrot.lane.b32.xlu0 %v11425_v58, %s13322_s11 }
 0xc1c   : > { %4255 = vrot.lane.b32.xlu1 %v11425_v58, %s13400_s1  ;;  %4235 = vrot.lane.b32.xlu0 %v11425_v58, %s13396_s10 }
 0xc20   : > { %4278 = vrot.lane.b32.xlu0 %v11435_v32, %s13320_s5  ;;  %4299 = vrot.lane.b32.xlu1 %v11435_v32, %s13322_s11 }
 0xc24   : > { %4257 = vrot.lane.b32.xlu0 %v11435_v32, %s13400_s1  ;;  %4237 = vrot.lane.b32.xlu1 %v11435_v32, %s13396_s10 }
 0xc28   : > { %4205 = vrot.lane.b32.xlu1 %v11435_v32, %s13324_s0  ;;  %4301 = vrot.lane.b32.xlu0 %v11445_v20, %s13322_s11  ;;  %s9545_s11 = smov 111  }
 0xc2c   : > { %4280 = vrot.lane.b32.xlu1 %v11445_v20, %s13320_s5  ;;  %4203 = vrot.lane.b32.xlu0 %v11425_v58, %s13324_s0  ;;  %s13410_s5 = sld [smem:[#allocation36_spill]] }
 0xc30   : > { %4259 = vrot.lane.b32.xlu1 %v11445_v20, %s13400_s1  ;;  %4187 = vrot.lane.b32.xlu0 %v11425_v58, %s9543_s4 }
 0xc32   : > { %v4056_v48 = vld [vmem:[%s13410_s5] sm:$0xff]  ;;  %s13417_s5 = smov 17  }
 0xc34   : > { %4201 = vrot.lane.b32.xlu1 %v11415_v42, %s13324_s0  ;;  %4154 = vrot.lane.b32.xlu0 %v11425_v58, %s13327_s16 }
 0xc38   : > { %4189 = vrot.lane.b32.xlu1 %v11435_v32, %s9543_s4  ;;  %4239 = vrot.lane.b32.xlu0 %v11445_v20, %s13396_s10 }
 0xc3c   : > { %4185 = vrot.lane.b32.xlu1 %v11415_v42, %s9543_s4  ;;  %4207 = vrot.lane.b32.xlu0 %v11445_v20, %s13324_s0  ;;  %s13411_s0 = sshll.u32 %s13595_s28, 4  ;;  %s13413_s28 = smov 113  }
 0xc3d   : > { %s1259_s3 = scalar_lea.vmem %s13409_s23, %s13411_s0  ;;  %s13418_s0 = sld [smem:[#allocation37_spill]] }
 0xc3e   : > { %v11492_v10 = vld [vmem:[%s1259_s3] sm:$0xff]  ;;  %v11496_v24 = vld [vmem:[%s1259_s3 + $0x8] sm:$0xff]  ;;  %s13414_s3 = smov 15   ;;  %s13419_s23 = sld [smem:[#allocation39_spill]] }
 0xc40   : > { %4156 = vrot.lane.b32.xlu1 %v11435_v32, %s13327_s16  ;;  %4191 = vrot.lane.b32.xlu0 %v11445_v20, %s9543_s4 }
 0xc44   : > { %4152 = vrot.lane.b32.xlu1 %v11415_v42, %s13327_s16  ;;  %4158 = vrot.lane.b32.xlu0 %v11445_v20, %s13327_s16  ;;  %s13412_s16 = smov 112  }
 0xc48   : > { %4318 = vrot.lane.b32.xlu1 %v11445_v20, %s9545_s11  ;;  %4316 = vrot.lane.b32.xlu0 %v11435_v32, %s9545_s11 }
 0xc4c   : > { %4314 = vrot.lane.b32.xlu1 %v11425_v58, %s9545_s11  ;;  %4312 = vrot.lane.b32.xlu0 %v11415_v42, %s9545_s11 }
 0xc50   : > { %4335 = vperm.xlu1 %9207, %v4056_v48   ;;  %4538 = vrot.lane.b32.xlu0 %v11492_v10, %s13412_s16 }
 0xc54   : > { %4540 = vrot.lane.b32.xlu1 %v11496_v24, %s13412_s16  ;;  %4520 = vrot.lane.b32.xlu0 %v11496_v24, %s13413_s28 }
 0xc58   : > { %4518 = vrot.lane.b32.xlu1 %v11492_v10, %s13413_s28  ;;  %4500 = vrot.lane.b32.xlu0 %v11496_v24, %s13400_s1 }
 0xc5c   : > { %4498 = vrot.lane.b32.xlu1 %v11492_v10, %s13400_s1  ;;  %4478 = vrot.lane.b32.xlu0 %v11492_v10, %s13396_s10 }
 0xc60   : > { %4480 = vrot.lane.b32.xlu1 %v11496_v24, %s13396_s10  ;;  %4458 = vrot.lane.b32.xlu0 %v11492_v10, %s13414_s3 }
 0xc64   : > { %4460 = vrot.lane.b32.xlu1 %v11496_v24, %s13414_s3 }
 0xc82   : > { %v4275_v39 = vpop.permute.xlu0 %4274  ;;  %v4296_v45 = vpop.permute.xlu1 %4295 }
 0xc86   : > { %v4254_v19 = vpop.permute.xlu0 %4253  ;;  %v11516_v46 = vpop.permute.xlu1 %4233 }
 0xc87   : > { %v4247_v31 = vsel %vm1642_vm3, 0.0, %v11516_v46 }
 0xc8a   : > { %v4277_v49 = vpop.permute.xlu1 %4276  ;;  %v4298_v21 = vpop.permute.xlu0 %4297 }
 0xc8b   : > { %v4304_v60 = vsel %vm4303_vm12, %v4296_v45, %v4298_v21  ;;  %v4289_v55 = vsel %vm4282_vm2, %v4277_v49, 0.0  ;;  %v4283_v41 = vsel %vm4282_vm2, %v4275_v39, %v4277_v49 }
 0xc8e   : > { %v4256_v61 = vpop.permute.xlu1 %4255  ;;  %v4236_v35 = vpop.permute.xlu0 %4235 }
 0xc8f   : > { %v4268_v17 = vsel %vm4261_vm6, %v4256_v61, 0.0  ;;  %v4262_v43 = vsel %vm4261_vm6, %v4254_v19, %v4256_v61  ;;  %v4241_v30 = vsel %vm1642_vm3, %v11516_v46, %v4236_v35 }
 0xc92   : > { %v4279_v36 = vpop.permute.xlu0 %4278  ;;  %v4300_v53 = vpop.permute.xlu1 %4299 }
 0xc96   : > { %v4258_v15 = vpop.permute.xlu0 %4257  ;;  %v4238_v62 = vpop.permute.xlu1 %4237 }
 0xc97   : > { %v4248_v14 = vsel %vm1642_vm3, 0.0, %v4238_v62 }
 0xc9a   : > { %v4206_v28 = vpop.permute.xlu1 %4205  ;;  %v4302_v52 = vpop.permute.xlu0 %4301 }
 0xc9b   : > { %8359 = vmatprep.subr.msk.mxu0 %vm4303_vm12, %v4302_v52  ;;  %v4305_v57 = vsel %vm4303_vm12, %v4300_v53, %v4302_v52  ;;  %v4216_v34 = vsel %vm1683_vm7, 0.0, %v4206_v28 }
 0xc9c   : > { %4342 = vmatpush1.msra.mxu0 %v4305_v57 }
 0xc9d   : > { %8360 = vmatprep.subr.msk.mxu0 %vm4303_vm12, %v4298_v21 }
 0xc9e   : > { %v4281_v56 = vpop.permute.xlu1 %4280  ;;  %4344 = vmatpush1.msra.mxu0 %v4304_v60  ;;  %v4204_v59 = vpop.permute.xlu0 %4203 }
 0xc9f   : > { %v4284_v4 = vsel %vm4282_vm2, %v4279_v36, %v4281_v56  ;;  %v4290_v5 = vsel %vm4282_vm2, %v4281_v56, 0.0  ;;  %v4054_v36 = vld [vmem:[#allocation6] sm:$0xff] }
 0xca0   : > { %8361 = vmatprep.subr.msk.mxu0 %vm4172_vm15, %v4290_v5 }
 0xca1   : > { %8362 = vmatpush1.msk.msra.mxu0 %vm4171_vm4, %v4284_v4  ;;  %v4059_v4 = vld [vmem:[%s13418_s0] sm:$0xff]  ;;  %s9551_s0 = smov 33  }
 0xca2   : > { %v4260_v6 = vpop.permute.xlu1 %4259  ;;  %8363 = vmatprep.subr.msk.mxu0 %vm4172_vm15, %v4289_v55  ;;  %v4188_v7 = vpop.permute.xlu0 %4187 }
 0xca3   : > { %v4263_v8 = vsel %vm4261_vm6, %v4258_v15, %v4260_v6  ;;  %8364 = vmatpush1.msk.msra.mxu0 %vm4171_vm4, %v4283_v41  ;;  %v4269_v13 = vsel %vm4261_vm6, %v4260_v6, 0.0 }
 0xca4   : > { %8365 = vmatprep.subr.msk.mxu0 %vm4222_vm5, %v4269_v13 }
 0xca5   : > { %8366 = vmatpush1.msk.msra.mxu0 %vm4221_vm9, %v4263_v8 }
 0xca6   : > { %v4202_v18 = vpop.permute.xlu1 %4201  ;;  %8367 = vmatprep.subr.msk.mxu0 %vm4222_vm5, %v4268_v17  ;;  %v4155_v0 = vpop.permute.xlu0 %4154 }
 0xca7   : > { %8368 = vmatpush1.msk.msra.mxu0 %vm4221_vm9, %v4262_v43  ;;  %v4209_v2 = vsel %vm1683_vm7, %v4202_v18, %v4204_v59  ;;  %v4215_v50 = vsel %vm1683_vm7, 0.0, %v4202_v18  ;;  %v4058_v59 = vld [vmem:[#allocation7 + $0x8] sm:$0xff] }
 0xca8   : > { %4353 = vmatprep.subr.mxu0 %v11445_v20  ;;  %8420 = vmatprep.mubr.msk.f32.mxu1 %vm3099_vm14, %v4058_v59 }
 0xca9   : > { %4354 = vmatpush1.msra.mxu0 %v11435_v32 }
 0xcaa   : > { %v4190_v25 = vpop.permute.xlu1 %4189  ;;  %4355 = vmatprep.subr.mxu0 %v11425_v58  ;;  %v4240_v1 = vpop.permute.xlu0 %4239 }
 0xcab   : > { %v4242_v27 = vsel %vm1642_vm3, %v4238_v62, %v4240_v1  ;;  %4356 = vmatpush1.msra.mxu0 %v11415_v42 }
 0xcac   : > { %8369 = vmatprep.subr.msk.mxu0 %vm4172_vm15, %v4242_v27 }
 0xcad   : > { %8370 = vmatpush1.msk.msra.mxu0 %vm4171_vm4, %v4248_v14 }
 0xcae   : > { %v4186_v11 = vpop.permute.xlu1 %4185  ;;  %8371 = vmatprep.subr.msk.mxu0 %vm4172_vm15, %v4241_v30  ;;  %v4208_v44 = vpop.permute.xlu0 %4207 }
 0xcaf   : > { %v4210_v47 = vsel %vm1683_vm7, %v4206_v28, %v4208_v44  ;;  %8372 = vmatpush1.msk.msra.mxu0 %vm4171_vm4, %v4247_v31  ;;  %v4193_v9 = vsel %vm3099_vm14, %v4186_v11, %v4188_v7 }
 0xcb0   : > { %8373 = vmatprep.subr.msk.mxu0 %vm4222_vm5, %v4210_v47 }
 0xcb1   : > { %8374 = vmatpush1.msk.msra.mxu0 %vm4221_vm9, %v4216_v34 }
 0xcb2   : > { %v4157_v12 = vpop.permute.xlu1 %4156  ;;  %8375 = vmatprep.subr.msk.mxu0 %vm4222_vm5, %v4209_v2  ;;  %v4192_v37 = vpop.permute.xlu0 %4191 }
 0xcb3   : > { %8376 = vmatpush1.msk.msra.mxu0 %vm4221_vm9, %v4215_v50  ;;  %v4194_v33 = vsel %vm3099_vm14, %v4190_v25, %v4192_v37  ;;  %v4168_v20 = vsel %vm4160_vm11, 0.0, %v4157_v12 }
 0xcb4   : > { %4365 = vmatprep.subr.mxu0 %v4194_v33 }
 0xcb5   : > { %8378 = vmatpush1.msk.msra.mxu0 %vm11592_vm10, %v4190_v25 }
 0xcb6   : > { %v4153_v42 = vpop.permute.xlu1 %4152  ;;  %4367 = vmatprep.subr.mxu0 %v4193_v9  ;;  %v4159_v58 = vpop.permute.xlu0 %4158 }
 0xcb7   : > { %v4162_v32 = vsel %vm4160_vm11, %v4157_v12, %v4159_v58  ;;  %8380 = vmatpush1.msk.msra.mxu0 %vm11592_vm10, %v4186_v11  ;;  %v4161_v38 = vsel %vm4160_vm11, %v4153_v42, %v4155_v0  ;;  %v4167_v48 = vsel %vm4160_vm11, 0.0, %v4153_v42 }
 0xcb8   : > { %8381 = vmatprep.subr.msk.mxu0 %vm4172_vm15, %v4162_v32 }
 0xcb9   : > { %8382 = vmatpush1.msk.msra.mxu0 %vm4171_vm4, %v4168_v20 }
 0xcba   : > { %v4319_v39 = vpop.permute.xlu1 %4318  ;;  %8383 = vmatprep.subr.msk.mxu0 %vm4172_vm15, %v4161_v38  ;;  %v4317_v45 = vpop.permute.xlu0 %4316 }
 0xcbb   : > { %v4322_v19 = vsel %vm4320_vm8, %v4317_v45, %v4319_v39  ;;  %8384 = vmatpush1.msk.msra.mxu0 %vm4171_vm4, %v4167_v48  ;;  %v4328_v46 = vsel %vm4320_vm8, %v4319_v39, 0.0 }
 0xcbc   : > { %8385 = vmatprep.subr.msk.mxu0 %vm4222_vm5, %v4328_v46 }
 0xcbd   : > { %8386 = vmatpush2.msk.msra.mxu0 %vm4221_vm9, %v4322_v19 }
 0xcbe   : > { %v4315_v49 = vpop.permute.xlu1 %4314  ;;  %v4313_v21 = vpop.permute.xlu0 %4312 }
 0xcbf   : > { %v4321_v61 = vsel %vm4320_vm8, %v4313_v21, %v4315_v49  ;;  %v4327_v35 = vsel %vm4320_vm8, %v4315_v49, 0.0 }
 0xcc0   : > { %8387 = vmatprep.subr.msk.mxu0 %vm4222_vm5, %v4327_v35 }
 0xcc1   : > { %8388 = vmatpush2.msk.msra.mxu0 %vm4221_vm9, %v4321_v61 }
 0xcc2   : > { %4406 = vmatmul.mubr.f32.vlgmr.msra.gmra.mxu0 %v4054_v36  ;;  %v4539_v15 = vpop.permute.xlu0 %4538 }
 0xcc3   : > { %4802 = vmatprep.mubr.f32.mxu0 %v9539_v26 }
 0xcc6   : > { %v4521_v55 = vpop.permute.xlu0 %4520 }
 0xcc7   : > { %v4529_v30 = vsel %vm4282_vm2, %v4521_v55, 0.0 }
 0xcca   : > { %v4501_v6 = vpop.permute.xlu0 %4500 }
 0xccb   : > { %v4336_v53 = vpop.permute.xlu1 %4335  ;;  %v4509_v2 = vsel %vm4261_vm6, %v4501_v6, 0.0 }
 0xcce   : > { %v4479_v8 = vpop.permute.xlu0 %4478 }
 0xccf   : > { %v4541_v40 = vpop.permute.xlu1 %4540  ;;  %v4489_v20 = vsel %vm1642_vm3, 0.0, %v4479_v8 }
 0xcd0   : > { %v4543_v62 = vsel %vm4303_vm12, %v4539_v15, %v4541_v40  ;;  %8390 = vmatprep.subr.msk.mxu1 %vm4303_vm12, %v4541_v40 }
 0xcd1   : > { %4579 = vmatpush1.msra.mxu1 %v4543_v62 }
 0xcd2   : > { %v4459_v17 = vpop.permute.xlu0 %4458 }
 0xcd3   : > { %v4519_v5 = vpop.permute.xlu1 %4518  ;;  %v4469_v45 = vsel %vm1683_vm7, 0.0, %v4459_v17 }
 0xcd4   : > { %v4523_v31 = vsel %vm4282_vm2, %v4519_v5, %v4521_v55  ;;  %v4057_v55 = vld [vmem:[#allocation7] sm:$0xff] }
 0xcd7   : > { %v4499_v41 = vpop.permute.xlu1 %4498 }
 0xcd8   : > { %v4503_v50 = vsel %vm4261_vm6, %v4499_v41, %v4501_v6 }
 0xcdb   : > { %v4481_v7 = vpop.permute.xlu1 %4480 }
 0xcdc   : > { %v4483_v32 = vsel %vm1642_vm3, %v4479_v8, %v4481_v7 }
 0xcdf   : > { %v4461_v13 = vpop.permute.xlu1 %4460 }
 0xd82   : > { %v4407_v22 = vpop.f32.mrf.mxu0 }
 0xd83   : > { %v4408_v28 = vadd.f32 %v4407_v22, %v4336_v53 }
 0xd84   : > { %v4409_v57 = vpop.f32.mrf.mxu0 }
 0xd85   : > { %v11631_v52 = vmax.f32 %v4408_v28, 0.0  ;;  %v4410_v60 = vadd.f32 %v4409_v57, %v4336_v53 }
 0xd87   : > { %4514 = vrot.lane.b32.xlu1 %v11631_v52, %s13413_s28  ;;  %4534 = vrot.lane.b32.xlu0 %v11631_v52, %s13412_s16  ;;  %v11641_v56 = vmax.f32 %v4410_v60, 0.0 }
 0xd8b   : > { %4494 = vrot.lane.b32.xlu1 %v11631_v52, %s13400_s1  ;;  %4474 = vrot.lane.b32.xlu0 %v11631_v52, %s13396_s10 }
 0xd8f   : > { %4536 = vrot.lane.b32.xlu1 %v11641_v56, %s13412_s16  ;;  %4454 = vrot.lane.b32.xlu0 %v11631_v52, %s13414_s3 }
 0xd93   : > { %4444 = vrot.lane.b32.xlu1 %v11496_v24, %s9543_s4  ;;  %4516 = vrot.lane.b32.xlu0 %v11641_v56, %s13413_s28 }
 0xd97   : > { %4424 = vrot.lane.b32.xlu1 %v11496_v24, %s13417_s5  ;;  %4496 = vrot.lane.b32.xlu0 %v11641_v56, %s13400_s1 }
 0xd9b   : > { %4476 = vrot.lane.b32.xlu1 %v11641_v56, %s13396_s10  ;;  %4442 = vrot.lane.b32.xlu0 %v11492_v10, %s9543_s4 }
 0xd9f   : > { %4456 = vrot.lane.b32.xlu1 %v11641_v56, %s13414_s3  ;;  %4438 = vrot.lane.b32.xlu0 %v11631_v52, %s9543_s4 }
 0xda3   : > { %4440 = vrot.lane.b32.xlu1 %v11641_v56, %s9543_s4  ;;  %4422 = vrot.lane.b32.xlu0 %v11492_v10, %s13417_s5 }
 0xda7   : > { %4420 = vrot.lane.b32.xlu1 %v11641_v56, %s13417_s5  ;;  %4418 = vrot.lane.b32.xlu0 %v11631_v52, %s13417_s5 }
 0xdab   : > { %4554 = vrot.lane.b32.xlu1 %v11492_v10, %s9545_s11  ;;  %4556 = vrot.lane.b32.xlu0 %v11496_v24, %s9545_s11 }
 0xdaf   : > { %4550 = vrot.lane.b32.xlu1 %v11631_v52, %s9545_s11  ;;  %4552 = vrot.lane.b32.xlu0 %v11641_v56, %s9545_s11 }
 0xdb3   : > { %4572 = vperm.xlu0 %9206, %v4059_v4  }
 0xdf9   : > { %v4515_v43 = vpop.permute.xlu1 %4514  ;;  %v4535_v18 = vpop.permute.xlu0 %4534 }
 0xdfd   : > { %v4495_v0 = vpop.permute.xlu1 %4494  ;;  %v4475_v25 = vpop.permute.xlu0 %4474 }
 0xe01   : > { %v4537_v1 = vpop.permute.xlu1 %4536  ;;  %v4455_v27 = vpop.permute.xlu0 %4454 }
 0xe02   : > { %8391 = vmatprep.subr.msk.mxu1 %vm4303_vm12, %v4537_v1  ;;  %v4542_v14 = vsel %vm4303_vm12, %v4535_v18, %v4537_v1  ;;  %v4468_v21 = vsel %vm1683_vm7, 0.0, %v4455_v27  ;;  %v4936_v18 = vld [vmem:[#allocation9 + $0x3c8] sm:$0xff]  ;;  %v4061_v1 = vld [vmem:[%s13419_s23] sm:$0xff]  ;;  %s13421_s23 = sld [smem:[#allocation41_spill]] }
 0xe03   : > { %4581 = vmatpush1.msra.mxu1 %v4542_v14  ;;  %v4920_v14 = vld [vmem:[#allocation9 + $0x348] sm:$0xff] }
 0xe04   : > { %8392 = vmatprep.subr.msk.mxu1 %vm4172_vm15, %v4529_v30  ;;  %v4919_v30 = vld [vmem:[#allocation9 + $0x340] sm:$0xff] }
 0xe05   : > { %v4445_v11 = vpop.permute.xlu1 %4444  ;;  %8393 = vmatpush1.msk.msra.mxu1 %vm4171_vm4, %v4523_v31  ;;  %v4517_v44 = vpop.permute.xlu0 %4516  ;;  %v4912_v31 = vld [vmem:[#allocation9 + $0x308] sm:$0xff] }
 0xe06   : > { %v4522_v47 = vsel %vm4282_vm2, %v4515_v43, %v4517_v44  ;;  %v4528_v34 = vsel %vm4282_vm2, %v4517_v44, 0.0  ;;  %v4904_v44 = vld [vmem:[#allocation9 + $0x2c8] sm:$0xff] }
 0xe07   : > { %8394 = vmatprep.subr.msk.mxu1 %vm4172_vm15, %v4528_v34  ;;  %v4896_v34 = vld [vmem:[#allocation9 + $0x288] sm:$0xff] }
 0xe08   : > { %8395 = vmatpush1.msk.msra.mxu1 %vm4171_vm4, %v4522_v47  ;;  %v4903_v47 = vld [vmem:[#allocation9 + $0x2c0] sm:$0xff] }
 0xe09   : > { %v4425_v12 = vpop.permute.xlu1 %4424  ;;  %8396 = vmatprep.subr.msk.mxu1 %vm4222_vm5, %v4509_v2  ;;  %v4497_v37 = vpop.permute.xlu0 %4496  ;;  %v4895_v2 = vld [vmem:[#allocation9 + $0x280] sm:$0xff] }
 0xe0a   : > { %v4502_v33 = vsel %vm4261_vm6, %v4495_v0, %v4497_v37  ;;  %8397 = vmatpush1.msk.msra.mxu1 %vm4221_vm9, %v4503_v50  ;;  %v4508_v9 = vsel %vm4261_vm6, %v4497_v37, 0.0  ;;  %v4935_v0 = vld [vmem:[#allocation9 + $0x3c0] sm:$0xff]  ;;  %v4888_v50 = vld [vmem:[#allocation9 + $0x248] sm:$0xff] }
 0xe0b   : > { %8398 = vmatprep.subr.msk.mxu1 %vm4222_vm5, %v4508_v9  ;;  %v4880_v37 = vld [vmem:[#allocation9 + $0x208] sm:$0xff] }
 0xe0c   : > { %8399 = vmatpush1.msk.msra.mxu1 %vm4221_vm9, %v4502_v33  ;;  %v4879_v33 = vld [vmem:[#allocation9 + $0x200] sm:$0xff]  ;;  %v4872_v9 = vld [vmem:[#allocation9 + $0x1c8] sm:$0xff] }
 0xe0d   : > { %v4477_v42 = vpop.permute.xlu1 %4476  ;;  %4590 = vmatprep.subr.mxu1 %v11496_v24  ;;  %v4443_v58 = vpop.permute.xlu0 %4442  ;;  %v4463_v24 = vsel %vm1683_vm7, %v4459_v17, %v4461_v13 }
 0xe0e   : > { %4591 = vmatpush1.msra.mxu1 %v11492_v10  ;;  %v4482_v39 = vsel %vm1642_vm3, %v4475_v25, %v4477_v42  ;;  %v4488_v10 = vsel %vm1642_vm3, 0.0, %v4475_v25  ;;  %v4447_v61 = vsel %vm3099_vm14, %v4443_v58, %v4445_v11  ;;  %v4928_v25 = vld [vmem:[#allocation9 + $0x388] sm:$0xff]  ;;  %v4911_v11 = vld [vmem:[#allocation9 + $0x300] sm:$0xff] }
 0xe0f   : > { %4592 = vmatprep.subr.mxu1 %v11641_v56  ;;  %v4871_v42 = vld [vmem:[#allocation9 + $0x1c0] sm:$0xff] }
 0xe10   : > { %4593 = vmatpush1.msra.mxu1 %v11631_v52 }
 0xe11   : > { %v4457_v38 = vpop.permute.xlu1 %4456  ;;  %8400 = vmatprep.subr.msk.mxu1 %vm4172_vm15, %v4483_v32  ;;  %v4439_v48 = vpop.permute.xlu0 %4438  ;;  %v4863_v32 = vld [vmem:[#allocation9 + $0x180] sm:$0xff] }
 0xe12   : > { %8401 = vmatpush1.msk.msra.mxu1 %vm4171_vm4, %v4489_v20  ;;  %v4462_v49 = vsel %vm1683_vm7, %v4455_v27, %v4457_v38  ;;  %v4927_v27 = vld [vmem:[#allocation9 + $0x380] sm:$0xff]  ;;  %v4856_v20 = vld [vmem:[#allocation9 + $0x148] sm:$0xff] }
 0xe13   : > { %8402 = vmatprep.subr.msk.mxu1 %vm4172_vm15, %v4482_v39  ;;  %v4855_v38 = vld [vmem:[#allocation9 + $0x140] sm:$0xff] }
 0xe14   : > { %8403 = vmatpush1.msk.msra.mxu1 %vm4171_vm4, %v4488_v10  ;;  %v4847_v39 = vld [vmem:[#allocation9 + $0x100] sm:$0xff]  ;;  %v4840_v10 = vld [vmem:[#allocation9 + $0xc8] sm:$0xff] }
 0xe15   : > { %v4441_v19 = vpop.permute.xlu1 %4440  ;;  %8404 = vmatprep.subr.msk.mxu1 %vm4222_vm5, %v4463_v24  ;;  %v4423_v46 = vpop.permute.xlu0 %4422  ;;  %v4839_v24 = vld [vmem:[#allocation9 + $0xc0] sm:$0xff] }
 0xe16   : > { %8405 = vmatpush1.msk.msra.mxu1 %vm4221_vm9, %v4469_v45  ;;  %v4446_v53 = vsel %vm3099_vm14, %v4439_v48, %v4441_v19  ;;  %v4427_v40 = vsel %vm4160_vm11, %v4423_v46, %v4425_v12  ;;  %v4433_v15 = vsel %vm4160_vm11, 0.0, %v4423_v46  ;;  %v4887_v12 = vld [vmem:[#allocation9 + $0x240] sm:$0xff]  ;;  %v4832_v45 = vld [vmem:[#allocation9 + $0x88] sm:$0xff] }
 0xe17   : > { %8406 = vmatprep.subr.msk.mxu1 %vm4222_vm5, %v4462_v49  ;;  %v4831_v19 = vld [vmem:[#allocation9 + $0x80] sm:$0xff]  ;;  %v4824_v46 = vld [vmem:[#allocation9 + $0x48] sm:$0xff] }
 0xe18   : > { %8407 = vmatpush1.msk.msra.mxu1 %vm4221_vm9, %v4468_v21  ;;  %v4823_v49 = vld [vmem:[#allocation9 + $0x40] sm:$0xff]  ;;  %v4816_v21 = vld [vmem:[#allocation9 + $0x8] sm:$0xff] }
 0xe19   : > { %v4421_v35 = vpop.permute.xlu1 %4420  ;;  %4602 = vmatprep.subr.mxu1 %v4447_v61  ;;  %v4419_v36 = vpop.permute.xlu0 %4418  ;;  %v4815_v61 = vld [vmem:[#allocation9] sm:$0xff] }
 0xe1a   : > { %8409 = vmatpush1.msk.msra.mxu1 %vm11592_vm10, %v4443_v58  ;;  %v4426_v28 = vsel %vm4160_vm11, %v4419_v36, %v4421_v35  ;;  %v4432_v52 = vsel %vm4160_vm11, 0.0, %v4419_v36  ;;  %v4864_v58 = vld [vmem:[#allocation9 + $0x188] sm:$0xff]  ;;  %v5063_v36 = vld [vmem:[#allocation9 + $0x7c0] sm:$0xff] }
 0xe1b   : > { %4604 = vmatprep.subr.mxu1 %v4446_v53  ;;  %v5064_v35 = vld [vmem:[#allocation9 + $0x7c8] sm:$0xff] }
 0xe1c   : > { %8411 = vmatpush1.msk.msra.mxu1 %vm11592_vm10, %v4439_v48  ;;  %v4848_v48 = vld [vmem:[#allocation9 + $0x108] sm:$0xff] }
 0xe1d   : > { %v4555_v62 = vpop.permute.xlu1 %4554  ;;  %8412 = vmatprep.subr.msk.mxu1 %vm4172_vm15, %v4427_v40  ;;  %v4557_v22 = vpop.permute.xlu0 %4556  ;;  %v5056_v53 = vld [vmem:[#allocation9 + $0x788] sm:$0xff]  ;;  %v5055_v40 = vld [vmem:[#allocation9 + $0x780] sm:$0xff] }
 0xe1e   : > { %8413 = vmatpush1.msk.msra.mxu1 %vm4171_vm4, %v4433_v15  ;;  %v4565_v57 = vsel %vm4320_vm8, %v4557_v22, 0.0  ;;  %v4559_v60 = vsel %vm4320_vm8, %v4555_v62, %v4557_v22  ;;  %v5048_v15 = vld [vmem:[#allocation9 + $0x748] sm:$0xff]  ;;  %v5047_v62 = vld [vmem:[#allocation9 + $0x740] sm:$0xff] }
 0xe1f   : > { %8414 = vmatprep.subr.msk.mxu1 %vm4172_vm15, %v4426_v28  ;;  %v5040_v22 = vld [vmem:[#allocation9 + $0x708] sm:$0xff]  ;;  %v5039_v28 = vld [vmem:[#allocation9 + $0x700] sm:$0xff] }
 0xe20   : > { %8415 = vmatpush1.msk.msra.mxu1 %vm4171_vm4, %v4432_v52  ;;  %v5032_v52 = vld [vmem:[#allocation9 + $0x6c8] sm:$0xff] }
 0xe21   : > { %v4551_v56 = vpop.permute.xlu1 %4550  ;;  %8416 = vmatprep.subr.msk.mxu1 %vm4222_vm5, %v4565_v57  ;;  %v4553_v59 = vpop.permute.xlu0 %4552  ;;  %v5031_v57 = vld [vmem:[#allocation9 + $0x6c0] sm:$0xff] }
 0xe22   : > { %v4558_v4 = vsel %vm4320_vm8, %v4551_v56, %v4553_v59  ;;  %8417 = vmatpush2.msk.msra.mxu1 %vm4221_vm9, %v4559_v60  ;;  %v4564_v5 = vsel %vm4320_vm8, %v4553_v59, 0.0  ;;  %v5024_v60 = vld [vmem:[#allocation9 + $0x688] sm:$0xff]  ;;  %v5023_v56 = vld [vmem:[#allocation9 + $0x680] sm:$0xff] }
 0xe23   : > { %8418 = vmatprep.subr.msk.mxu1 %vm4222_vm5, %v4564_v5  ;;  %v5016_v59 = vld [vmem:[#allocation9 + $0x648] sm:$0xff] }
 0xe24   : > { %8419 = vmatpush2.msk.msra.mxu1 %vm4221_vm9, %v4558_v4  ;;  %v5015_v4 = vld [vmem:[#allocation9 + $0x640] sm:$0xff]  ;;  %v5008_v5 = vld [vmem:[#allocation9 + $0x608] sm:$0xff] }
 0xe25   : > { %4643 = vmatmul.mubr.f32.vlgmr.msra.gmra.mxu1 %v4057_v55  ;;  %5077 = vmatprep.subr.mxu1 %v4936_v18  ;;  %v5007_v55 = vld [vmem:[#allocation9 + $0x600] sm:$0xff] }
 0xe26   : > { %5078 = vmatpush1.msra.mxu1 %v4935_v0  ;;  %v4983_v18 = vld [vmem:[#allocation9 + $0x540] sm:$0xff]  ;;  %v4976_v0 = vld [vmem:[#allocation9 + $0x508] sm:$0xff] }
 0xe27   : > { %5079 = vmatprep.subr.mxu1 %v4928_v25  ;;  %v4975_v25 = vld [vmem:[#allocation9 + $0x500] sm:$0xff] }
 0xe28   : > { %5080 = vmatpush1.msra.mxu1 %v4927_v27 }
 0xe29   : > { %5081 = vmatprep.subr.mxu1 %v4920_v14 }
 0xe2a   : > { %5082 = vmatpush1.msra.mxu1 %v4919_v30 }
 0xe2b   : > { %5083 = vmatprep.subr.mxu1 %v4912_v31 }
 0xe2c   : > { %5084 = vmatpush1.msra.mxu1 %v4911_v11 }
 0xe2d   : > { %5085 = vmatprep.subr.mxu1 %v4904_v44 }
 0xe2e   : > { %v4573_v41 = vpop.permute.xlu0 %4572  ;;  %5086 = vmatpush1.msra.mxu1 %v4903_v47 }
 0xe2f   : > { %5087 = vmatprep.subr.mxu1 %v4896_v34 }
 0xe30   : > { %5088 = vmatpush1.msra.mxu1 %v4895_v2 }
 0xe31   : > { %5089 = vmatprep.subr.mxu1 %v4888_v50 }
 0xe32   : > { %5090 = vmatpush1.msra.mxu1 %v4887_v12 }
 0xe33   : > { %5091 = vmatprep.subr.mxu1 %v4880_v37 }
 0xe34   : > { %5092 = vmatpush1.msra.mxu1 %v4879_v33 }
 0xe35   : > { %5093 = vmatprep.subr.mxu1 %v4872_v9 }
 0xe36   : > { %5094 = vmatpush1.msra.mxu1 %v4871_v42 }
 0xe37   : > { %5095 = vmatprep.subr.mxu1 %v4864_v58 }
 0xe38   : > { %5096 = vmatpush1.msra.mxu1 %v4863_v32 }
 0xe39   : > { %5097 = vmatprep.subr.mxu1 %v4856_v20 }
 0xe3a   : > { %5098 = vmatpush1.msra.mxu1 %v4855_v38 }
 0xe3b   : > { %5099 = vmatprep.subr.mxu1 %v4848_v48 }
 0xe3c   : > { %5100 = vmatpush1.msra.mxu1 %v4847_v39 }
 0xe3d   : > { %5101 = vmatprep.subr.mxu1 %v4840_v10 }
 0xe3e   : > { %5102 = vmatpush1.msra.mxu1 %v4839_v24 }
 0xe3f   : > { %5103 = vmatprep.subr.mxu1 %v4832_v45 }
 0xe40   : > { %5104 = vmatpush1.msra.mxu1 %v4831_v19 }
 0xe41   : > { %5105 = vmatprep.subr.mxu1 %v4824_v46 }
 0xe42   : > { %5106 = vmatpush1.msra.mxu1 %v4823_v49 }
 0xe43   : > { %5107 = vmatprep.subr.mxu1 %v4816_v21 }
 0xe44   : > { %5108 = vmatpush1.msra.mxu1 %v4815_v61 }
 0xe45   : > { %5109 = vmatprep.subr.mxu1 %v5064_v35  ;;  %v4930_v35 = vld [vmem:[#allocation9 + $0x398] sm:$0xff] }
 0xe46   : > { %5110 = vmatpush2.msra.mxu1 %v5063_v36  ;;  %v4922_v36 = vld [vmem:[#allocation9 + $0x358] sm:$0xff] }
 0xe47   : > { %5111 = vmatprep.subr.mxu1 %v5056_v53  ;;  %v4921_v53 = vld [vmem:[#allocation9 + $0x350] sm:$0xff] }
 0xe48   : > { %5112 = vmatpush2.msra.mxu1 %v5055_v40  ;;  %v4914_v40 = vld [vmem:[#allocation9 + $0x318] sm:$0xff] }
 0xe49   : > { %5113 = vmatprep.subr.mxu1 %v5048_v15  ;;  %v4913_v15 = vld [vmem:[#allocation9 + $0x310] sm:$0xff] }
 0xe4a   : > { %5114 = vmatpush2.msra.mxu1 %v5047_v62  ;;  %v4905_v62 = vld [vmem:[#allocation9 + $0x2d0] sm:$0xff] }
 0xe4b   : > { %5115 = vmatprep.subr.mxu1 %v5040_v22  ;;  %v4897_v22 = vld [vmem:[#allocation9 + $0x290] sm:$0xff] }
 0xe4c   : > { %5116 = vmatpush2.msra.mxu1 %v5039_v28  ;;  %v4890_v28 = vld [vmem:[#allocation9 + $0x258] sm:$0xff] }
 0xe4d   : > { %5117 = vmatprep.subr.mxu1 %v5032_v52  ;;  %v4889_v52 = vld [vmem:[#allocation9 + $0x250] sm:$0xff] }
 0xe4e   : > { %5118 = vmatpush2.msra.mxu1 %v5031_v57  ;;  %v4882_v57 = vld [vmem:[#allocation9 + $0x218] sm:$0xff] }
 0xe4f   : > { %5119 = vmatprep.subr.mxu1 %v5024_v60  ;;  %v4881_v60 = vld [vmem:[#allocation9 + $0x210] sm:$0xff] }
 0xe50   : > { %5120 = vmatpush2.msra.mxu1 %v5023_v56  ;;  %v4874_v56 = vld [vmem:[#allocation9 + $0x1d8] sm:$0xff] }
 0xe51   : > { %5121 = vmatprep.subr.mxu1 %v5016_v59  ;;  %v4873_v59 = vld [vmem:[#allocation9 + $0x1d0] sm:$0xff] }
 0xe52   : > { %5122 = vmatpush2.msra.mxu1 %v5015_v4  ;;  %v4866_v4 = vld [vmem:[#allocation9 + $0x198] sm:$0xff] }
 0xe53   : > { %5123 = vmatprep.subr.mxu1 %v5008_v5  ;;  %v4865_v5 = vld [vmem:[#allocation9 + $0x190] sm:$0xff] }
 0xe54   : > { %5124 = vmatpush2.msra.mxu1 %v5007_v55  ;;  %v4858_v55 = vld [vmem:[#allocation9 + $0x158] sm:$0xff] }
 0xee5   : > { %v4644_v6 = vpop.f32.mrf.mxu1 }
 0xee6   : > { %v4645_v7 = vadd.f32 %v4644_v6, %v4573_v41  ;;  %v4999_v6 = vld [vmem:[#allocation9 + $0x5c0] sm:$0xff] }
 0xee7   : > { %v4646_v13 = vpop.f32.mrf.mxu1 }
 0xee8   : > { %v11765_v8 = vmax.f32 %v4645_v7, 0.0  ;;  %v4647_v17 = vadd.f32 %v4646_v13, %v4573_v41  ;;  %v5000_v41 = vld [vmem:[#allocation9 + $0x5c8] sm:$0xff]  ;;  %v4991_v13 = vld [vmem:[#allocation9 + $0x580] sm:$0xff] }
 0xee9   : > { %v4992_v7 = vld [vmem:[#allocation9 + $0x588] sm:$0xff]  ;;  %5125 = vmatprep.subr.mxu1 %v5000_v41  ;;  %v4857_v41 = vld [vmem:[#allocation9 + $0x150] sm:$0xff] }
 0xeea   : > { %4711 = vrot.lane.b32.xlu1 %v11765_v8, %s13412_s16  ;;  %4719 = vrot.lane.b32.xlu0 %v11765_v8, %s9545_s11  ;;  %v11775_v43 = vmax.f32 %v4647_v17, 0.0  ;;  %v4984_v17 = vld [vmem:[#allocation9 + $0x548] sm:$0xff] }
 0xeeb   : > { %5126 = vmatpush2.msra.mxu1 %v4999_v6  ;;  %v4850_v6 = vld [vmem:[#allocation9 + $0x118] sm:$0xff] }
 0xeec   : > { %5127 = vmatprep.subr.mxu1 %v4992_v7  ;;  %v4849_v7 = vld [vmem:[#allocation9 + $0x110] sm:$0xff] }
 0xeed   : > { %5128 = vmatpush2.msra.mxu1 %v4991_v13  ;;  %v4842_v13 = vld [vmem:[#allocation9 + $0xd8] sm:$0xff] }
 0xeee   : > { %4681 = vrot.lane.b32.xlu1 %v11765_v8, %s13396_s10  ;;  %4701 = vrot.lane.b32.xlu0 %v11765_v8, %s13413_s28 }
 0xeef   : > { %5129 = vmatprep.subr.mxu1 %v4984_v17  ;;  %v4841_v17 = vld [vmem:[#allocation9 + $0xd0] sm:$0xff] }
 0xef0   : > { %5130 = vmatpush2.msra.mxu1 %v4983_v18  ;;  %v4834_v18 = vld [vmem:[#allocation9 + $0x98] sm:$0xff] }
 0xef1   : > { %5131 = vmatprep.subr.mxu1 %v4976_v0  ;;  %v4833_v0 = vld [vmem:[#allocation9 + $0x90] sm:$0xff] }
 0xef2   : > { %4721 = vrot.lane.b32.xlu1 %v11775_v43, %s9545_s11  ;;  %4691 = vrot.lane.b32.xlu0 %v11765_v8, %s13400_s1  ;;  %s13420_s11 = sld [smem:[#allocation38_spill]] }
 0xef3   : > { %5132 = vmatpush2.msra.mxu1 %v4975_v25  ;;  %v4826_v25 = vld [vmem:[#allocation9 + $0x58] sm:$0xff] }
 0xef6   : > { %4703 = vrot.lane.b32.xlu1 %v11775_v43, %s13413_s28  ;;  %4713 = vrot.lane.b32.xlu0 %v11775_v43, %s13412_s16  ;;  %s9547_s16 = smov 96   ;;  %s9548_s28 = smov 97  }
 0xef8   : > { %v4060_v61 = vld [vmem:[%s13420_s11] sm:$0xff]  ;;  %s13426_s11 = sld [smem:[#allocation24_spill]] }
 0xefa   : > { %4693 = vrot.lane.b32.xlu1 %v11775_v43, %s13400_s1  ;;  %4683 = vrot.lane.b32.xlu0 %v11775_v43, %s13396_s10 }
 0xefe   : > { %4671 = vrot.lane.b32.xlu1 %v11765_v8, %s13414_s3  ;;  %4673 = vrot.lane.b32.xlu0 %v11775_v43, %s13414_s3  ;;  %s9549_s3 = smov 31  }
 0xf02   : > { %4663 = vrot.lane.b32.xlu1 %v11765_v8, %s9543_s4  ;;  %4665 = vrot.lane.b32.xlu0 %v11775_v43, %s9543_s4  ;;  %s9546_s4 = smov 95  }
 0xf06   : > { %4653 = vrot.lane.b32.xlu1 %v11765_v8, %s13417_s5  ;;  %4655 = vrot.lane.b32.xlu0 %v11775_v43, %s13417_s5  ;;  %s9550_s5 = smov 32  }
 0xf0a   : > { %4731 = vperm.xlu1 %9207, %v4061_v1   ;;  %v4968_v1 = vld [vmem:[#allocation9 + $0x4c8] sm:$0xff] }
 0xf0b   : > { %5133 = vmatprep.subr.mxu1 %v4968_v1  ;;  %v4825_v1 = vld [vmem:[#allocation9 + $0x50] sm:$0xff] }
 0xf5c   : > { %v4712_v27 = vpop.permute.xlu1 %4711  ;;  %v4720_v14 = vpop.permute.xlu0 %4719 }
 0xf60   : > { %v4682_v30 = vpop.permute.xlu1 %4681  ;;  %v4702_v31 = vpop.permute.xlu0 %4701 }
 0xf61   : > { %v4688_v39 = vsel %vm1642_vm3, 0.0, %v4682_v30 }
 0xf64   : > { %v4722_v11 = vpop.permute.xlu1 %4721  ;;  %v4692_v44 = vpop.permute.xlu0 %4691 }
 0xf65   : > { %v4723_v47 = vsel %vm4320_vm8, %v4720_v14, %v4722_v11  ;;  %v4726_v34 = vsel %vm4320_vm8, %v4722_v11, 0.0  ;;  %v4817_v14 = vld [vmem:[#allocation9 + $0x10] sm:$0xff]  ;;  %v5058_v11 = vld [vmem:[#allocation9 + $0x798] sm:$0xff]  ;;  %vm5399_vm8 = vcmask 269312  }
 0xf66   : > { %8421 = vmatprep.subr.msk.mxu0 %vm4222_vm5, %v4726_v34  ;;  %v5049_v34 = vld [vmem:[#allocation9 + $0x750] sm:$0xff] }
 0xf67   : > { %8422 = vmatpush1.msk.msra.mxu0 %vm4221_vm9, %v4723_v47  ;;  %v5050_v47 = vld [vmem:[#allocation9 + $0x758] sm:$0xff] }
 0xf68   : > { %v4704_v2 = vpop.permute.xlu1 %4703  ;;  %v4714_v50 = vpop.permute.xlu0 %4713 }
 0xf69   : > { %8423 = vmatprep.subr.msk.mxu0 %vm4303_vm12, %v4714_v50  ;;  %v4715_v12 = vsel %vm4303_vm12, %v4712_v27, %v4714_v50  ;;  %v4708_v37 = vsel %vm4282_vm2, %v4704_v2, 0.0  ;;  %v4705_v33 = vsel %vm4282_vm2, %v4702_v31, %v4704_v2  ;;  %v4818_v27 = vld [vmem:[#allocation9 + $0x18] sm:$0xff]  ;;  %v5065_v31 = vld [vmem:[#allocation9 + $0x7d0] sm:$0xff]  ;;  %vm5730_vm2 = vcmask 785408  }
 0xf6a   : > { %4755 = vmatpush1.msra.mxu0 %v4715_v12  ;;  %v5042_v2 = vld [vmem:[#allocation9 + $0x718] sm:$0xff]  ;;  %v5041_v50 = vld [vmem:[#allocation9 + $0x710] sm:$0xff] }
 0xf6b   : > { %8424 = vmatprep.subr.msk.mxu0 %vm4172_vm15, %v4708_v37  ;;  %v5034_v12 = vld [vmem:[#allocation9 + $0x6d8] sm:$0xff]  ;;  %v5033_v37 = vld [vmem:[#allocation9 + $0x6d0] sm:$0xff] }
 0xf6c   : > { %v4694_v9 = vpop.permute.xlu1 %4693  ;;  %8425 = vmatpush1.msk.msra.mxu0 %vm4171_vm4, %v4705_v33  ;;  %v4684_v42 = vpop.permute.xlu0 %4683  ;;  %v5026_v33 = vld [vmem:[#allocation9 + $0x698] sm:$0xff] }
 0xf6d   : > { %v4695_v58 = vsel %vm4261_vm6, %v4692_v44, %v4694_v9  ;;  %v4698_v32 = vsel %vm4261_vm6, %v4694_v9, 0.0  ;;  %v4685_v48 = vsel %vm1642_vm3, %v4682_v30, %v4684_v42  ;;  %v5066_v30 = vld [vmem:[#allocation9 + $0x7d8] sm:$0xff]  ;;  %v5057_v44 = vld [vmem:[#allocation9 + $0x790] sm:$0xff] }
 0xf6e   : > { %8426 = vmatprep.subr.msk.mxu0 %vm4222_vm5, %v4698_v32  ;;  %v5025_v9 = vld [vmem:[#allocation9 + $0x690] sm:$0xff]  ;;  %v5018_v42 = vld [vmem:[#allocation9 + $0x658] sm:$0xff] }
 0xf6f   : > { %8427 = vmatpush1.msk.msra.mxu0 %vm4221_vm9, %v4695_v58  ;;  %v5017_v58 = vld [vmem:[#allocation9 + $0x650] sm:$0xff]  ;;  %v5010_v32 = vld [vmem:[#allocation9 + $0x618] sm:$0xff] }
 0xf70   : > { %v4672_v20 = vpop.permute.xlu1 %4671  ;;  %4760 = vmatprep.subr.mxu0 %v11775_v43  ;;  %v4674_v38 = vpop.permute.xlu0 %4673 }
 0xf71   : > { %4761 = vmatpush1.msra.mxu0 %v11765_v8  ;;  %v4675_v10 = vsel %vm1683_vm7, %v4672_v20, %v4674_v38  ;;  %v4678_v24 = vsel %vm1683_vm7, 0.0, %v4672_v20  ;;  %vm4734_vm7 = vcmask 588800   ;;  %v5009_v20 = vld [vmem:[#allocation9 + $0x610] sm:$0xff]  ;;  %v5002_v38 = vld [vmem:[#allocation9 + $0x5d8] sm:$0xff] }
 0xf72   : > { %8428 = vmatprep.subr.msk.mxu0 %vm4172_vm15, %v4685_v48  ;;  %v5001_v48 = vld [vmem:[#allocation9 + $0x5d0] sm:$0xff] }
 0xf73   : > { %8429 = vmatpush1.msk.msra.mxu0 %vm4171_vm4, %v4688_v39  ;;  %v4994_v39 = vld [vmem:[#allocation9 + $0x598] sm:$0xff] }
 0xf74   : > { %v4664_v45 = vpop.permute.xlu1 %4663  ;;  %8430 = vmatprep.subr.msk.mxu0 %vm4222_vm5, %v4675_v10  ;;  %v4666_v43 = vpop.permute.xlu0 %4665  ;;  %v4993_v10 = vld [vmem:[#allocation9 + $0x590] sm:$0xff] }
 0xf75   : > { %8431 = vmatpush1.msk.msra.mxu0 %vm4221_vm9, %v4678_v24  ;;  %v4667_v8 = vsel %vm3099_vm14, %v4664_v45, %v4666_v43  ;;  %v4986_v24 = vld [vmem:[#allocation9 + $0x558] sm:$0xff]  ;;  %vm13339_vm14 = vcmask 777216  }
 0xf76   : > { %4766 = vmatprep.subr.mxu0 %v4667_v8  ;;  %v4978_v43 = vld [vmem:[#allocation9 + $0x518] sm:$0xff]  ;;  %v4977_v8 = vld [vmem:[#allocation9 + $0x510] sm:$0xff] }
 0xf77   : > { %8433 = vmatpush1.msk.msra.mxu0 %vm11592_vm10, %v4664_v45  ;;  %v4985_v45 = vld [vmem:[#allocation9 + $0x550] sm:$0xff]  ;;  %vm13340_vm10 = vcmask 252928  }
 0xf78   : > { %v4654_v19 = vpop.permute.xlu1 %4653  ;;  %v4656_v46 = vpop.permute.xlu0 %4655 }
 0xf79   : > { %v4660_v49 = vsel %vm4160_vm11, 0.0, %v4654_v19  ;;  %v4657_v21 = vsel %vm4160_vm11, %v4654_v19, %v4656_v46  ;;  %v4970_v19 = vld [vmem:[#allocation9 + $0x4d8] sm:$0xff]  ;;  %v4967_v46 = vld [vmem:[#allocation9 + $0x4c0] sm:$0xff]  ;;  %vm12099_vm11 = vmneg %vm2886_vm13 }
 0xf7a   : > { %8434 = vmatprep.subr.msk.mxu0 %vm4172_vm15, %v4657_v21  ;;  %5134 = vmatpush2.msra.mxu1 %v4967_v46  ;;  %v4960_v21 = vld [vmem:[#allocation9 + $0x488] sm:$0xff] }
 0xf7b   : > { %8435 = vmatpush1.msk.msra.mxu0 %vm4171_vm4, %v4660_v49  ;;  %v4969_v49 = vld [vmem:[#allocation9 + $0x4d0] sm:$0xff]  ;;  %5135 = vmatprep.subr.mxu1 %v4960_v21  ;;  %v4860_v46 = vld [vmem:[#allocation9 + $0x168] sm:$0xff]  ;;  %v4859_v21 = vld [vmem:[#allocation9 + $0x160] sm:$0xff]  ;;  %vm5689_vm4 = vcmask 793600  }
 0xf7c   : > { %8436 = vmatmul.mubr.msk.f32.vlgmr.msra.gmra.mxu0 %vm4734_vm7, %v4060_v61  ;;  %5148 = vmatprep.subr.mxu0 %v4938_v3  ;;  %v4962_v61 = vld [vmem:[#allocation9 + $0x498] sm:$0xff]  ;;  %v4959_v3 = vld [vmem:[#allocation9 + $0x480] sm:$0xff] }
 0xf7d   : > { %5149 = vmatpush1.msra.mxu0 %v4937_v63  ;;  %v4961_v63 = vld [vmem:[#allocation9 + $0x490] sm:$0xff]  ;;  %5136 = vmatpush2.msra.mxu1 %v4959_v3  ;;  %v4852_v3 = vld [vmem:[#allocation9 + $0x128] sm:$0xff] }
 0xf7e   : > { %5150 = vmatprep.subr.mxu0 %v4930_v35  ;;  %v4952_v35 = vld [vmem:[#allocation9 + $0x448] sm:$0xff] }
 0xf7f   : > { %5151 = vmatpush1.msra.mxu0 %v4929_v54  ;;  %v4954_v54 = vld [vmem:[#allocation9 + $0x458] sm:$0xff]  ;;  %5137 = vmatprep.subr.mxu1 %v4952_v35  ;;  %v4851_v35 = vld [vmem:[#allocation9 + $0x120] sm:$0xff] }
 0xf80   : > { %5152 = vmatprep.subr.mxu0 %v4922_v36  ;;  %v4951_v36 = vld [vmem:[#allocation9 + $0x440] sm:$0xff] }
 0xf81   : > { %5153 = vmatpush1.msra.mxu0 %v4921_v53  ;;  %v4953_v53 = vld [vmem:[#allocation9 + $0x450] sm:$0xff]  ;;  %5138 = vmatpush2.msra.mxu1 %v4951_v36  ;;  %v4844_v36 = vld [vmem:[#allocation9 + $0xe8] sm:$0xff] }
 0xf82   : > { %5154 = vmatprep.subr.mxu0 %v4914_v40  ;;  %v4944_v40 = vld [vmem:[#allocation9 + $0x408] sm:$0xff] }
 0xf83   : > { %5155 = vmatpush1.msra.mxu0 %v4913_v15  ;;  %v4946_v15 = vld [vmem:[#allocation9 + $0x418] sm:$0xff]  ;;  %5139 = vmatprep.subr.mxu1 %v4944_v40  ;;  %v4843_v40 = vld [vmem:[#allocation9 + $0xe0] sm:$0xff] }
 0xf84   : > { %5156 = vmatprep.subr.mxu0 %v4906_v29  ;;  %v4943_v29 = vld [vmem:[#allocation9 + $0x400] sm:$0xff] }
 0xf85   : > { %5157 = vmatpush1.msra.mxu0 %v4905_v62  ;;  %v4945_v62 = vld [vmem:[#allocation9 + $0x410] sm:$0xff]  ;;  %5140 = vmatpush2.msra.mxu1 %v4943_v29  ;;  %v4836_v29 = vld [vmem:[#allocation9 + $0xa8] sm:$0xff] }
 0xf86   : > { %5158 = vmatprep.subr.mxu0 %v4898_v16  ;;  %v4940_v16 = vld [vmem:[#allocation9 + $0x3e8] sm:$0xff] }
 0xf87   : > { %5159 = vmatpush1.msra.mxu0 %v4897_v22  ;;  %v4942_v22 = vld [vmem:[#allocation9 + $0x3f8] sm:$0xff]  ;;  %5219 = vmatprep.subr.mxu1 %v4940_v16  ;;  %v4835_v16 = vld [vmem:[#allocation9 + $0xa0] sm:$0xff] }
 0xf88   : > { %5160 = vmatprep.subr.mxu0 %v4890_v28 }
 0xf89   : > { %5161 = vmatpush1.msra.mxu0 %v4889_v52  ;;  %v4732_v52 = vpop.permute.xlu1 %4731 }
 0xf8a   : > { %5162 = vmatprep.subr.mxu0 %v4882_v57 }
 0xf8b   : > { %5163 = vmatpush1.msra.mxu0 %v4881_v60 }
 0xf8c   : > { %5164 = vmatprep.subr.mxu0 %v4874_v56 }
 0xf8d   : > { %5165 = vmatpush1.msra.mxu0 %v4873_v59 }
 0xf8e   : > { %5166 = vmatprep.subr.mxu0 %v4866_v4 }
 0xf8f   : > { %5167 = vmatpush1.msra.mxu0 %v4865_v5  ;;  %v4939_v5 = vld [vmem:[#allocation9 + $0x3e0] sm:$0xff] }
 0xf90   : > { %5168 = vmatprep.subr.mxu0 %v4858_v55  ;;  %v4941_v55 = vld [vmem:[#allocation9 + $0x3f0] sm:$0xff] }
 0xf91   : > { %5169 = vmatpush1.msra.mxu0 %v4857_v41  ;;  %v4932_v41 = vld [vmem:[#allocation9 + $0x3a8] sm:$0xff] }
 0xf92   : > { %5170 = vmatprep.subr.mxu0 %v4850_v6  ;;  %v4934_v6 = vld [vmem:[#allocation9 + $0x3b8] sm:$0xff] }
 0xf93   : > { %5171 = vmatpush1.msra.mxu0 %v4849_v7  ;;  %v4931_v7 = vld [vmem:[#allocation9 + $0x3a0] sm:$0xff] }
 0xf94   : > { %5172 = vmatprep.subr.mxu0 %v4842_v13  ;;  %v4933_v13 = vld [vmem:[#allocation9 + $0x3b0] sm:$0xff] }
 0xf95   : > { %5173 = vmatpush1.msra.mxu0 %v4841_v17  ;;  %v4924_v17 = vld [vmem:[#allocation9 + $0x368] sm:$0xff] }
 0xf96   : > { %5174 = vmatprep.subr.mxu0 %v4834_v18  ;;  %v4926_v18 = vld [vmem:[#allocation9 + $0x378] sm:$0xff] }
 0xf97   : > { %5175 = vmatpush1.msra.mxu0 %v4833_v0  ;;  %v4923_v0 = vld [vmem:[#allocation9 + $0x360] sm:$0xff] }
 0xf98   : > { %5176 = vmatprep.subr.mxu0 %v4826_v25  ;;  %v4925_v25 = vld [vmem:[#allocation9 + $0x370] sm:$0xff] }
 0xf99   : > { %5177 = vmatpush1.msra.mxu0 %v4825_v1  ;;  %v4916_v1 = vld [vmem:[#allocation9 + $0x328] sm:$0xff] }
 0xf9a   : > { %5178 = vmatprep.subr.mxu0 %v4818_v27  ;;  %v4918_v27 = vld [vmem:[#allocation9 + $0x338] sm:$0xff] }
 0xf9b   : > { %5179 = vmatpush1.msra.mxu0 %v4817_v14  ;;  %v4915_v14 = vld [vmem:[#allocation9 + $0x320] sm:$0xff] }
 0xf9c   : > { %5180 = vmatprep.subr.mxu0 %v5066_v30  ;;  %v4917_v30 = vld [vmem:[#allocation9 + $0x330] sm:$0xff] }
 0xf9d   : > { %5181 = vmatpush2.msra.mxu0 %v5065_v31  ;;  %v4908_v31 = vld [vmem:[#allocation9 + $0x2e8] sm:$0xff] }
 0xf9e   : > { %5182 = vmatprep.subr.mxu0 %v5058_v11  ;;  %v4910_v11 = vld [vmem:[#allocation9 + $0x2f8] sm:$0xff] }
 0xf9f   : > { %5183 = vmatpush2.msra.mxu0 %v5057_v44  ;;  %v4907_v44 = vld [vmem:[#allocation9 + $0x2e0] sm:$0xff] }
 0xfa0   : > { %5184 = vmatprep.subr.mxu0 %v5050_v47  ;;  %v4909_v47 = vld [vmem:[#allocation9 + $0x2f0] sm:$0xff] }
 0xfa1   : > { %5185 = vmatpush2.msra.mxu0 %v5049_v34  ;;  %v4900_v34 = vld [vmem:[#allocation9 + $0x2a8] sm:$0xff] }
 0xfa2   : > { %5186 = vmatprep.subr.mxu0 %v5042_v2  ;;  %v4902_v2 = vld [vmem:[#allocation9 + $0x2b8] sm:$0xff] }
 0xfa3   : > { %5187 = vmatpush2.msra.mxu0 %v5041_v50  ;;  %v4899_v50 = vld [vmem:[#allocation9 + $0x2a0] sm:$0xff] }
 0xfa4   : > { %5188 = vmatprep.subr.mxu0 %v5034_v12  ;;  %v4901_v12 = vld [vmem:[#allocation9 + $0x2b0] sm:$0xff] }
 0xfa5   : > { %5189 = vmatpush2.msra.mxu0 %v5033_v37  ;;  %v4892_v37 = vld [vmem:[#allocation9 + $0x268] sm:$0xff] }
 0xfa6   : > { %5190 = vmatprep.subr.mxu0 %v5026_v33  ;;  %v4894_v33 = vld [vmem:[#allocation9 + $0x278] sm:$0xff] }
 0xfa7   : > { %5191 = vmatpush2.msra.mxu0 %v5025_v9  ;;  %v4891_v9 = vld [vmem:[#allocation9 + $0x260] sm:$0xff] }
 0xfa8   : > { %5192 = vmatprep.subr.mxu0 %v5018_v42  ;;  %v4893_v42 = vld [vmem:[#allocation9 + $0x270] sm:$0xff] }
 0xfa9   : > { %5193 = vmatpush2.msra.mxu0 %v5017_v58  ;;  %v4884_v58 = vld [vmem:[#allocation9 + $0x228] sm:$0xff] }
 0xfaa   : > { %5194 = vmatprep.subr.mxu0 %v5010_v32  ;;  %v4886_v32 = vld [vmem:[#allocation9 + $0x238] sm:$0xff] }
 0xfab   : > { %5195 = vmatpush2.msra.mxu0 %v5009_v20  ;;  %v4883_v20 = vld [vmem:[#allocation9 + $0x220] sm:$0xff] }
 0xfac   : > { %5196 = vmatprep.subr.mxu0 %v5002_v38  ;;  %v4885_v38 = vld [vmem:[#allocation9 + $0x230] sm:$0xff] }
 0xfad   : > { %5197 = vmatpush2.msra.mxu0 %v5001_v48  ;;  %v4876_v48 = vld [vmem:[#allocation9 + $0x1e8] sm:$0xff] }
 0xfae   : > { %5198 = vmatprep.subr.mxu0 %v4994_v39  ;;  %v4878_v39 = vld [vmem:[#allocation9 + $0x1f8] sm:$0xff] }
 0xfaf   : > { %5199 = vmatpush2.msra.mxu0 %v4993_v10  ;;  %v4875_v10 = vld [vmem:[#allocation9 + $0x1e0] sm:$0xff] }
 0xfb0   : > { %5200 = vmatprep.subr.mxu0 %v4986_v24  ;;  %v4877_v24 = vld [vmem:[#allocation9 + $0x1f0] sm:$0xff] }
 0xfb1   : > { %5201 = vmatpush2.msra.mxu0 %v4985_v45  ;;  %v4868_v45 = vld [vmem:[#allocation9 + $0x1a8] sm:$0xff] }
 0xfb2   : > { %5202 = vmatprep.subr.mxu0 %v4978_v43  ;;  %v4870_v43 = vld [vmem:[#allocation9 + $0x1b8] sm:$0xff] }
 0xfb3   : > { %5203 = vmatpush2.msra.mxu0 %v4977_v8  ;;  %v4867_v8 = vld [vmem:[#allocation9 + $0x1a0] sm:$0xff] }
 0xfb4   : > { %5204 = vmatprep.subr.mxu0 %v4970_v19  ;;  %v4869_v19 = vld [vmem:[#allocation9 + $0x1b0] sm:$0xff] }
 0xfb5   : > { %5205 = vmatpush2.msra.mxu0 %v4969_v49  ;;  %v4862_v49 = vld [vmem:[#allocation9 + $0x178] sm:$0xff] }
 0xfb6   : > { %5206 = vmatprep.subr.mxu0 %v4962_v61  ;;  %v4861_v61 = vld [vmem:[#allocation9 + $0x170] sm:$0xff] }
 0xfb7   : > { %5207 = vmatpush2.msra.mxu0 %v4961_v63  ;;  %v4854_v63 = vld [vmem:[#allocation9 + $0x138] sm:$0xff] }
 0xfb8   : > { %5208 = vmatprep.subr.mxu0 %v4954_v54  ;;  %v4853_v54 = vld [vmem:[#allocation9 + $0x130] sm:$0xff] }
 0xfb9   : > { %5209 = vmatpush2.msra.mxu0 %v4953_v53  ;;  %v4846_v53 = vld [vmem:[#allocation9 + $0xf8] sm:$0xff] }
 0xfba   : > { %5210 = vmatprep.subr.mxu0 %v4946_v15  ;;  %v4845_v15 = vld [vmem:[#allocation9 + $0xf0] sm:$0xff] }
 0xfbb   : > { %5211 = vmatpush2.msra.mxu0 %v4945_v62  ;;  %v4838_v62 = vld [vmem:[#allocation9 + $0xb8] sm:$0xff] }
 0xfbc   : > { %5290 = vmatprep.subr.mxu0 %v4942_v22  ;;  %v4837_v22 = vld [vmem:[#allocation9 + $0xb0] sm:$0xff] }
0x103c   : > { %v4804_v28 = vpop.f32.mrf.mxu0 }
0x103d   : > { %v4805_v57 = vadd.f32 %v4804_v28, %v4732_v52  ;;  %v4828_v28 = vld [vmem:[#allocation9 + $0x68] sm:$0xff] }
0x103e   : > { %v4806_v60 = vpop.f32.mrf.mxu0 }
0x103f   : > { %v4807_v56 = vadd.f32 %v4806_v60, %v4732_v52  ;;  %v11847_v4 = vmax.f32 %v4805_v57, 0.0  ;;  %v4830_v52 = vld [vmem:[#allocation9 + $0x78] sm:$0xff]  ;;  %v4827_v57 = vld [vmem:[#allocation9 + $0x60] sm:$0xff]  ;;  %v4829_v60 = vld [vmem:[#allocation9 + $0x70] sm:$0xff] }
0x1041   : > { %v4810_v59 = vmax.f32 %v4807_v56, 0.0  ;;  %v4820_v56 = vld [vmem:[#allocation9 + $0x28] sm:$0xff] }
0x1043   : > { %5141 = vmatprep.mubr.f32.mxu1 %v4810_v59  ;;  %5212 = vmatprep.mubr.f32.mxu0 %v4810_v59 }
0x1044   : > { %5142 = vmatmul.mubr.f32.vlgmr.msra.gmra.mxu1 %v11847_v4  ;;  %5213 = vmatmul.mubr.f32.vlgmr.msra.gmra.mxu0 %v11847_v4 }
0x1045   : > { %5220 = vmatpush1.msra.mxu1 %v4939_v5  ;;  %5291 = vmatpush1.msra.mxu0 %v4941_v55  ;;  %v4819_v5 = vld [vmem:[#allocation9 + $0x20] sm:$0xff]  ;;  %v4821_v55 = vld [vmem:[#allocation9 + $0x30] sm:$0xff] }
0x1046   : > { %5221 = vmatprep.subr.mxu1 %v4932_v41  ;;  %5283 = vmatprep.mubr.f32.mxu1 %v4810_v59  ;;  %v5068_v41 = vld [vmem:[#allocation9 + $0x7e8] sm:$0xff] }
0x1047   : > { %5292 = vmatprep.subr.mxu0 %v4934_v6  ;;  %5354 = vmatprep.mubr.f32.mxu0 %v4810_v59  ;;  %v4822_v59 = vld [vmem:[#allocation9 + $0x38] sm:$0xff] }
0x1048   : > { %5222 = vmatpush1.msra.mxu1 %v4931_v7  ;;  %5293 = vmatpush1.msra.mxu0 %v4933_v13  ;;  %v5070_v6 = vld [vmem:[#allocation9 + $0x7f8] sm:$0xff]  ;;  %v5067_v7 = vld [vmem:[#allocation9 + $0x7e0] sm:$0xff]  ;;  %v5069_v13 = vld [vmem:[#allocation9 + $0x7f0] sm:$0xff] }
0x1049   : > { %5223 = vmatprep.subr.mxu1 %v4924_v17  ;;  %5294 = vmatprep.subr.mxu0 %v4926_v18  ;;  %v5060_v17 = vld [vmem:[#allocation9 + $0x7a8] sm:$0xff]  ;;  %v5062_v18 = vld [vmem:[#allocation9 + $0x7b8] sm:$0xff] }
0x104a   : > { %5224 = vmatpush1.msra.mxu1 %v4923_v0  ;;  %5295 = vmatpush1.msra.mxu0 %v4925_v25  ;;  %v5059_v0 = vld [vmem:[#allocation9 + $0x7a0] sm:$0xff]  ;;  %v5061_v25 = vld [vmem:[#allocation9 + $0x7b0] sm:$0xff] }
0x104b   : > { %5225 = vmatprep.subr.mxu1 %v4916_v1  ;;  %5296 = vmatprep.subr.mxu0 %v4918_v27  ;;  %v5052_v1 = vld [vmem:[#allocation9 + $0x768] sm:$0xff]  ;;  %v5054_v27 = vld [vmem:[#allocation9 + $0x778] sm:$0xff] }
0x104c   : > { %5226 = vmatpush1.msra.mxu1 %v4915_v14  ;;  %5297 = vmatpush1.msra.mxu0 %v4917_v30  ;;  %v5051_v14 = vld [vmem:[#allocation9 + $0x760] sm:$0xff]  ;;  %v5053_v30 = vld [vmem:[#allocation9 + $0x770] sm:$0xff] }
0x104d   : > { %5227 = vmatprep.subr.mxu1 %v4908_v31  ;;  %5298 = vmatprep.subr.mxu0 %v4910_v11  ;;  %v5044_v31 = vld [vmem:[#allocation9 + $0x728] sm:$0xff]  ;;  %v5046_v11 = vld [vmem:[#allocation9 + $0x738] sm:$0xff] }
0x104e   : > { %5228 = vmatpush1.msra.mxu1 %v4907_v44  ;;  %5299 = vmatpush1.msra.mxu0 %v4909_v47  ;;  %v5043_v44 = vld [vmem:[#allocation9 + $0x720] sm:$0xff]  ;;  %v5045_v47 = vld [vmem:[#allocation9 + $0x730] sm:$0xff] }
0x104f   : > { %5229 = vmatprep.subr.mxu1 %v4900_v34  ;;  %5300 = vmatprep.subr.mxu0 %v4902_v2  ;;  %v5036_v34 = vld [vmem:[#allocation9 + $0x6e8] sm:$0xff]  ;;  %v5038_v2 = vld [vmem:[#allocation9 + $0x6f8] sm:$0xff] }
0x1050   : > { %5230 = vmatpush1.msra.mxu1 %v4899_v50  ;;  %5301 = vmatpush1.msra.mxu0 %v4901_v12  ;;  %v5035_v50 = vld [vmem:[#allocation9 + $0x6e0] sm:$0xff]  ;;  %v5037_v12 = vld [vmem:[#allocation9 + $0x6f0] sm:$0xff] }
0x1051   : > { %5231 = vmatprep.subr.mxu1 %v4892_v37  ;;  %5302 = vmatprep.subr.mxu0 %v4894_v33  ;;  %v5028_v37 = vld [vmem:[#allocation9 + $0x6a8] sm:$0xff]  ;;  %v5030_v33 = vld [vmem:[#allocation9 + $0x6b8] sm:$0xff] }
0x1052   : > { %5232 = vmatpush1.msra.mxu1 %v4891_v9  ;;  %5303 = vmatpush1.msra.mxu0 %v4893_v42  ;;  %v5027_v9 = vld [vmem:[#allocation9 + $0x6a0] sm:$0xff]  ;;  %v5029_v42 = vld [vmem:[#allocation9 + $0x6b0] sm:$0xff] }
0x1053   : > { %5233 = vmatprep.subr.mxu1 %v4884_v58  ;;  %5304 = vmatprep.subr.mxu0 %v4886_v32  ;;  %v5020_v58 = vld [vmem:[#allocation9 + $0x668] sm:$0xff]  ;;  %v5022_v32 = vld [vmem:[#allocation9 + $0x678] sm:$0xff] }
0x1054   : > { %5234 = vmatpush1.msra.mxu1 %v4883_v20  ;;  %5305 = vmatpush1.msra.mxu0 %v4885_v38  ;;  %v5019_v20 = vld [vmem:[#allocation9 + $0x660] sm:$0xff]  ;;  %v5021_v38 = vld [vmem:[#allocation9 + $0x670] sm:$0xff] }
0x1055   : > { %5235 = vmatprep.subr.mxu1 %v4876_v48  ;;  %5306 = vmatprep.subr.mxu0 %v4878_v39  ;;  %v5012_v48 = vld [vmem:[#allocation9 + $0x628] sm:$0xff]  ;;  %v5014_v39 = vld [vmem:[#allocation9 + $0x638] sm:$0xff] }
0x1056   : > { %5236 = vmatpush1.msra.mxu1 %v4875_v10  ;;  %5307 = vmatpush1.msra.mxu0 %v4877_v24  ;;  %v5011_v10 = vld [vmem:[#allocation9 + $0x620] sm:$0xff]  ;;  %v5013_v24 = vld [vmem:[#allocation9 + $0x630] sm:$0xff] }
0x1057   : > { %5237 = vmatprep.subr.mxu1 %v4868_v45  ;;  %5308 = vmatprep.subr.mxu0 %v4870_v43  ;;  %v5004_v45 = vld [vmem:[#allocation9 + $0x5e8] sm:$0xff]  ;;  %v5006_v43 = vld [vmem:[#allocation9 + $0x5f8] sm:$0xff] }
0x1058   : > { %5238 = vmatpush1.msra.mxu1 %v4867_v8  ;;  %5309 = vmatpush1.msra.mxu0 %v4869_v19  ;;  %v5003_v8 = vld [vmem:[#allocation9 + $0x5e0] sm:$0xff]  ;;  %v5005_v19 = vld [vmem:[#allocation9 + $0x5f0] sm:$0xff] }
0x1059   : > { %5239 = vmatprep.subr.mxu1 %v4860_v46  ;;  %5310 = vmatprep.subr.mxu0 %v4862_v49  ;;  %v4996_v46 = vld [vmem:[#allocation9 + $0x5a8] sm:$0xff]  ;;  %v4998_v49 = vld [vmem:[#allocation9 + $0x5b8] sm:$0xff] }
0x105a   : > { %5240 = vmatpush1.msra.mxu1 %v4859_v21  ;;  %5311 = vmatpush1.msra.mxu0 %v4861_v61  ;;  %v4995_v21 = vld [vmem:[#allocation9 + $0x5a0] sm:$0xff]  ;;  %v4997_v61 = vld [vmem:[#allocation9 + $0x5b0] sm:$0xff] }
0x105b   : > { %5241 = vmatprep.subr.mxu1 %v4852_v3  ;;  %5312 = vmatprep.subr.mxu0 %v4854_v63  ;;  %v4988_v3 = vld [vmem:[#allocation9 + $0x568] sm:$0xff]  ;;  %v4990_v63 = vld [vmem:[#allocation9 + $0x578] sm:$0xff] }
0x105c   : > { %5242 = vmatpush1.msra.mxu1 %v4851_v35  ;;  %5313 = vmatpush1.msra.mxu0 %v4853_v54  ;;  %v4987_v35 = vld [vmem:[#allocation9 + $0x560] sm:$0xff]  ;;  %v4989_v54 = vld [vmem:[#allocation9 + $0x570] sm:$0xff] }
0x105d   : > { %5243 = vmatprep.subr.mxu1 %v4844_v36  ;;  %5314 = vmatprep.subr.mxu0 %v4846_v53  ;;  %v4980_v36 = vld [vmem:[#allocation9 + $0x528] sm:$0xff]  ;;  %v4982_v53 = vld [vmem:[#allocation9 + $0x538] sm:$0xff] }
0x105e   : > { %5244 = vmatpush1.msra.mxu1 %v4843_v40  ;;  %5315 = vmatpush1.msra.mxu0 %v4845_v15  ;;  %v4979_v40 = vld [vmem:[#allocation9 + $0x520] sm:$0xff]  ;;  %v4981_v15 = vld [vmem:[#allocation9 + $0x530] sm:$0xff] }
0x105f   : > { %5245 = vmatprep.subr.mxu1 %v4836_v29  ;;  %5316 = vmatprep.subr.mxu0 %v4838_v62  ;;  %v4972_v29 = vld [vmem:[#allocation9 + $0x4e8] sm:$0xff]  ;;  %v4974_v62 = vld [vmem:[#allocation9 + $0x4f8] sm:$0xff] }
0x1060   : > { %5246 = vmatpush1.msra.mxu1 %v4835_v16  ;;  %5317 = vmatpush1.msra.mxu0 %v4837_v22  ;;  %v4971_v16 = vld [vmem:[#allocation9 + $0x4e0] sm:$0xff]  ;;  %v4973_v22 = vld [vmem:[#allocation9 + $0x4f0] sm:$0xff] }
0x1061   : > { %5247 = vmatprep.subr.mxu1 %v4828_v28  ;;  %5318 = vmatprep.subr.mxu0 %v4830_v52  ;;  %v4964_v28 = vld [vmem:[#allocation9 + $0x4a8] sm:$0xff]  ;;  %v4966_v52 = vld [vmem:[#allocation9 + $0x4b8] sm:$0xff] }
0x1062   : > { %5248 = vmatpush1.msra.mxu1 %v4827_v57  ;;  %5319 = vmatpush1.msra.mxu0 %v4829_v60  ;;  %v4963_v57 = vld [vmem:[#allocation9 + $0x4a0] sm:$0xff]  ;;  %v4965_v60 = vld [vmem:[#allocation9 + $0x4b0] sm:$0xff] }
0x1063   : > { %5249 = vmatprep.subr.mxu1 %v4820_v56  ;;  %5320 = vmatprep.subr.mxu0 %v4822_v59  ;;  %v4956_v56 = vld [vmem:[#allocation9 + $0x468] sm:$0xff]  ;;  %v4958_v59 = vld [vmem:[#allocation9 + $0x478] sm:$0xff] }
0x1064   : > { %5250 = vmatpush1.msra.mxu1 %v4819_v5  ;;  %5321 = vmatpush1.msra.mxu0 %v4821_v55  ;;  %v4955_v5 = vld [vmem:[#allocation9 + $0x460] sm:$0xff]  ;;  %v4957_v55 = vld [vmem:[#allocation9 + $0x470] sm:$0xff] }
0x1065   : > { %5251 = vmatprep.subr.mxu1 %v5068_v41  ;;  %5322 = vmatprep.subr.mxu0 %v5070_v6  ;;  %v4948_v41 = vld [vmem:[#allocation9 + $0x428] sm:$0xff]  ;;  %v4950_v6 = vld [vmem:[#allocation9 + $0x438] sm:$0xff] }
0x1066   : > { %5252 = vmatpush2.msra.mxu1 %v5067_v7  ;;  %5323 = vmatpush2.msra.mxu0 %v5069_v13  ;;  %v4947_v7 = vld [vmem:[#allocation9 + $0x420] sm:$0xff]  ;;  %v4949_v13 = vld [vmem:[#allocation9 + $0x430] sm:$0xff] }
0x1067   : > { %5253 = vmatprep.subr.mxu1 %v5060_v17  ;;  %5324 = vmatprep.subr.mxu0 %v5062_v18 }
0x1068   : > { %5254 = vmatpush2.msra.mxu1 %v5059_v0  ;;  %5325 = vmatpush2.msra.mxu0 %v5061_v25 }
0x1069   : > { %5255 = vmatprep.subr.mxu1 %v5052_v1  ;;  %5326 = vmatprep.subr.mxu0 %v5054_v27 }
0x106a   : > { %5256 = vmatpush2.msra.mxu1 %v5051_v14  ;;  %5327 = vmatpush2.msra.mxu0 %v5053_v30 }
0x106b   : > { %5257 = vmatprep.subr.mxu1 %v5044_v31  ;;  %5328 = vmatprep.subr.mxu0 %v5046_v11 }
0x106c   : > { %5258 = vmatpush2.msra.mxu1 %v5043_v44  ;;  %5329 = vmatpush2.msra.mxu0 %v5045_v47 }
0x106d   : > { %5259 = vmatprep.subr.mxu1 %v5036_v34  ;;  %5330 = vmatprep.subr.mxu0 %v5038_v2  ;;  %v5072_v2 = vld [vmem:[%s13421_s23] sm:$0xf]  ;;  %s12342_s23 = scalar_lea.vmem %s13426_s11, %s10032_s2  ;;  %s13432_s11 = sld [smem:[#allocation42_spill]] }
0x106e   : > { %5260 = vmatpush2.msra.mxu1 %v5035_v50  ;;  %5331 = vmatpush2.msra.mxu0 %v5037_v12 }
0x106f   : > { %5261 = vmatprep.subr.mxu1 %v5028_v37  ;;  %5332 = vmatprep.subr.mxu0 %v5030_v33 }
0x1070   : > { %5262 = vmatpush2.msra.mxu1 %v5027_v9  ;;  %5333 = vmatpush2.msra.mxu0 %v5029_v42 }
0x1071   : > { %5263 = vmatprep.subr.mxu1 %v5020_v58  ;;  %5334 = vmatprep.subr.mxu0 %v5022_v32 }
0x1072   : > { %5264 = vmatpush2.msra.mxu1 %v5019_v20  ;;  %5335 = vmatpush2.msra.mxu0 %v5021_v38 }
0x1073   : > { %5265 = vmatprep.subr.mxu1 %v5012_v48  ;;  %5336 = vmatprep.subr.mxu0 %v5014_v39 }
0x1074   : > { %5266 = vmatpush2.msra.mxu1 %v5011_v10  ;;  %5337 = vmatpush2.msra.mxu0 %v5013_v24 }
0x1075   : > { %5267 = vmatprep.subr.mxu1 %v5004_v45  ;;  %5338 = vmatprep.subr.mxu0 %v5006_v43  ;;  %v5368_v45 = vand.u32 31, %v11519_v23 }
0x1076   : > { %5268 = vmatpush2.msra.mxu1 %v5003_v8  ;;  %5339 = vmatpush2.msra.mxu0 %v5005_v19  ;;  %v5367_v8 = vand.u32 31, %v10096_v51 }
0x1077   : > { %5269 = vmatprep.subr.mxu1 %v4996_v46  ;;  %5340 = vmatprep.subr.mxu0 %v4998_v49  ;;  %v12032_v46 = vadd.s32 1, %v5368_v45 }
0x1078   : > { %5270 = vmatpush2.msra.mxu1 %v4995_v21  ;;  %5341 = vmatpush2.msra.mxu0 %v4997_v61  ;;  %v12036_v21 = vadd.s32 1, %v5367_v8  ;;  %v12039_v61 = vadd.s32 4294967295, %v5368_v45  ;;  %v12042_v23 = vadd.s32 4294967295, %v5367_v8 }
0x1079   : > { %5271 = vmatprep.subr.mxu1 %v4988_v3  ;;  %5342 = vmatprep.subr.mxu0 %v4990_v63  ;;  %vm13330_vm12 = vcmp.lt.s32.totalorder %v12032_v46, 32 }
0x107a   : > { %5272 = vmatpush2.msra.mxu1 %v4987_v35  ;;  %5343 = vmatpush2.msra.mxu0 %v4989_v54  ;;  %vm13333_vm15 = vcmp.lt.s32.totalorder %v12036_v21, 32  ;;  %vm13332_vm5 = vcmp.ge.s32.totalorder %v12039_v61, 0  ;;  %vm13331_vm9 = vcmp.ge.s32.totalorder %v12042_v23, 0 }
0x107b   : > { %5273 = vmatprep.subr.mxu1 %v4980_v36  ;;  %5344 = vmatprep.subr.mxu0 %v4982_v53 }
0x107c   : > { %5274 = vmatpush2.msra.mxu1 %v4979_v40  ;;  %5345 = vmatpush2.msra.mxu0 %v4981_v15  ;;  %v5362_v15 = vadd.s32 384, %v10096_v51 }
0x107d   : > { %5275 = vmatprep.subr.mxu1 %v4972_v29  ;;  %5346 = vmatprep.subr.mxu0 %v4974_v62 }
0x107e   : > { %5276 = vmatpush2.msra.mxu1 %v4971_v16  ;;  %5347 = vmatpush2.msra.mxu0 %v4973_v22  ;;  %v5361_v16 = vadd.s32 256, %v10096_v51 }
0x107f   : > { %5277 = vmatprep.subr.mxu1 %v4964_v28  ;;  %5348 = vmatprep.subr.mxu0 %v4966_v52 }
0x1080   : > { %5278 = vmatpush2.msra.mxu1 %v4963_v57  ;;  %5349 = vmatpush2.msra.mxu0 %v4965_v60  ;;  %v5370_v60 = vand.u32 31, %v5362_v15 }
0x1081   : > { %5279 = vmatprep.subr.mxu1 %v4956_v56  ;;  %5350 = vmatprep.subr.mxu0 %v4958_v59  ;;  %v5369_v56 = vand.u32 31, %v5361_v16 }
0x1082   : > { %5280 = vmatpush2.msra.mxu1 %v4955_v5  ;;  %5351 = vmatpush2.msra.mxu0 %v4957_v55 }
0x1083   : > { %5281 = vmatprep.subr.mxu1 %v4948_v41  ;;  %5352 = vmatprep.subr.mxu0 %v4950_v6  ;;  %v12083_v41 = vadd.s32 1, %v5370_v60  ;;  %v12135_v45 = vadd.s32 4294967295, %v5369_v56 }
0x1084   : > { %5282 = vmatpush2.msra.mxu1 %v4947_v7  ;;  %5353 = vmatpush2.msra.mxu0 %v4949_v13  ;;  %v12092_v13 = vadd.s32 1, %v5369_v56 }
0x1085   : > { %5284 = vmatmul.mubr.f32.vlgmr.msra.gmra.mxu1 %v11847_v4  ;;  %5355 = vmatmul.mubr.f32.vlgmr.msra.gmra.mxu0 %v11847_v4  ;;  %vm13338_vm1 = vcmp.lt.s32.totalorder %v12083_v41, 32 }
0x1086   : > { %5860 = vmatprep.mubr.f32.mxu1 %v9539_v26  ;;  %5931 = vmatprep.mubr.f32.mxu0 %v9539_v26 }
0x1104   : > { %v11855_v17 = vpop.f32.mrf.mxu1  ;;  %v11857_v18 = vpop.f32.mrf.mxu0 }
0x1105   : > { %5751 = vrot.lane.b32.xlu1 %v11857_v18, %s9546_s4  ;;  %5747 = vrot.lane.b32.xlu0 %v11855_v17, %s9546_s4 }
0x1106   : > { %v11875_v4 = vpop.f32.mrf.mxu1  ;;  %v11901_v0 = vpop.f32.mrf.mxu0 }
0x1109   : > { %5714 = vrot.lane.b32.xlu1 %v11855_v17, %s9547_s16  ;;  %5718 = vrot.lane.b32.xlu0 %v11857_v18, %s9547_s16 }
0x110d   : > { %5677 = vrot.lane.b32.xlu1 %v11857_v18, %s9548_s28  ;;  %5673 = vrot.lane.b32.xlu0 %v11855_v17, %s9548_s28 }
0x1111   : > { %5633 = vrot.lane.b32.xlu1 %v11855_v17, %s13400_s1  ;;  %5637 = vrot.lane.b32.xlu0 %v11857_v18, %s13400_s1 }
0x1115   : > { %5593 = vrot.lane.b32.xlu0 %v11855_v17, %s13396_s10  ;;  %5716 = vrot.lane.b32.xlu1 %v11875_v4, %s9547_s16 }
0x1119   : > { %5504 = vrot.lane.b32.xlu0 %v11855_v17, %s9549_s3  ;;  %5635 = vrot.lane.b32.xlu1 %v11875_v4, %s13400_s1 }
0x111d   : > { %5472 = vrot.lane.b32.xlu0 %v11855_v17, %s9550_s5  ;;  %5595 = vrot.lane.b32.xlu1 %v11875_v4, %s13396_s10 }
0x1121   : > { %5383 = vrot.lane.b32.xlu0 %v11855_v17, %s9551_s0  ;;  %5506 = vrot.lane.b32.xlu1 %v11875_v4, %s9549_s3 }
0x1125   : > { %5597 = vrot.lane.b32.xlu0 %v11857_v18, %s13396_s10  ;;  %5474 = vrot.lane.b32.xlu1 %v11875_v4, %s9550_s5 }
0x1129   : > { %5508 = vrot.lane.b32.xlu0 %v11857_v18, %s9549_s3  ;;  %5385 = vrot.lane.b32.xlu1 %v11875_v4, %s9551_s0 }
0x112d   : > { %5476 = vrot.lane.b32.xlu0 %v11857_v18, %s9550_s5  ;;  %5599 = vrot.lane.b32.xlu1 %v11901_v0, %s13396_s10 }
0x1131   : > { %5387 = vrot.lane.b32.xlu0 %v11857_v18, %s9551_s0  ;;  %5510 = vrot.lane.b32.xlu1 %v11901_v0, %s9549_s3 }
0x1135   : > { %5478 = vrot.lane.b32.xlu1 %v11901_v0, %s9550_s5  ;;  %5749 = vrot.lane.b32.xlu0 %v11875_v4, %s9546_s4 }
0x1139   : > { %5389 = vrot.lane.b32.xlu1 %v11901_v0, %s9551_s0  ;;  %5675 = vrot.lane.b32.xlu0 %v11875_v4, %s9548_s28 }
0x113d   : > { %5753 = vrot.lane.b32.xlu0 %v11901_v0, %s9546_s4 }
0x1141   : > { %5720 = vrot.lane.b32.xlu0 %v11901_v0, %s9547_s16 }
0x1145   : > { %v11923_v25 = vpop.f32.mrf.mxu1  ;;  %5679 = vrot.lane.b32.xlu0 %v11901_v0, %s9548_s28  ;;  %v11941_v1 = vpop.f32.mrf.mxu0 }
0x1146   : > { %5755 = vrot.lane.b32.xlu1 %v11923_v25, %s9546_s4 }
0x1147   : > { %v11947_v27 = vpop.f32.mrf.mxu1  ;;  %v11965_v14 = vpop.f32.mrf.mxu0 }
0x1149   : > { %5639 = vrot.lane.b32.xlu0 %v11901_v0, %s13400_s1 }
0x114a   : > { %5722 = vrot.lane.b32.xlu1 %v11923_v25, %s9547_s16 }
0x114d   : > { %5601 = vrot.lane.b32.xlu0 %v11923_v25, %s13396_s10 }
0x114e   : > { %5681 = vrot.lane.b32.xlu1 %v11923_v25, %s9548_s28 }
0x1151   : > { %5480 = vrot.lane.b32.xlu0 %v11923_v25, %s9550_s5 }
0x1152   : > { %5641 = vrot.lane.b32.xlu1 %v11923_v25, %s13400_s1 }
0x1155   : > { %5605 = vrot.lane.b32.xlu0 %v11941_v1, %s13396_s10 }
0x1156   : > { %5759 = vrot.lane.b32.xlu1 %v11941_v1, %s9546_s4 }
0x1159   : > { %5757 = vrot.lane.b32.xlu0 %v11947_v27, %s9546_s4 }
0x115a   : > { %5726 = vrot.lane.b32.xlu1 %v11941_v1, %s9547_s16 }
0x115d   : > { %5724 = vrot.lane.b32.xlu0 %v11947_v27, %s9547_s16 }
0x115e   : > { %5685 = vrot.lane.b32.xlu1 %v11941_v1, %s9548_s28 }
0x1161   : > { %5683 = vrot.lane.b32.xlu0 %v11947_v27, %s9548_s28 }
0x1162   : > { %5645 = vrot.lane.b32.xlu1 %v11941_v1, %s13400_s1 }
0x1165   : > { %5643 = vrot.lane.b32.xlu0 %v11947_v27, %s13400_s1 }
0x1166   : > { %5512 = vrot.lane.b32.xlu1 %v11923_v25, %s9549_s3 }
0x1169   : > { %5761 = vrot.lane.b32.xlu0 %v11965_v14, %s9546_s4 }
0x116a   : > { %5391 = vrot.lane.b32.xlu1 %v11923_v25, %s9551_s0 }
0x116d   : > { %5514 = vrot.lane.b32.xlu0 %v11947_v27, %s9549_s3 }
0x116e   : > { %5603 = vrot.lane.b32.xlu1 %v11947_v27, %s13396_s10 }
0x1171   : > { %5687 = vrot.lane.b32.xlu0 %v11965_v14, %s9548_s28 }
0x1172   : > { %5728 = vrot.lane.b32.xlu1 %v11965_v14, %s9547_s16 }
0x1175   : > { %5393 = vrot.lane.b32.xlu0 %v11947_v27, %s9551_s0 }
0x1176   : > { %5482 = vrot.lane.b32.xlu1 %v11947_v27, %s9550_s5 }
0x1177   : > { %v11983_v30 = vpop.permute.xlu1 %5751  ;;  %v5748_v31 = vpop.permute.xlu0 %5747 }
0x1179   : > { %5516 = vrot.lane.b32.xlu0 %v11941_v1, %s9549_s3 }
0x117a   : > { %5647 = vrot.lane.b32.xlu1 %v11965_v14, %s13400_s1 }
0x117b   : > { %v5715_v11 = vpop.permute.xlu1 %5714  ;;  %v11989_v44 = vpop.permute.xlu0 %5718 }
0x117d   : > { %5484 = vrot.lane.b32.xlu0 %v11941_v1, %s9550_s5 }
0x117e   : > { %5607 = vrot.lane.b32.xlu1 %v11965_v14, %s13396_s10 }
0x117f   : > { %v11995_v47 = vpop.permute.xlu1 %5677  ;;  %v5674_v34 = vpop.permute.xlu0 %5673 }
0x1181   : > { %5395 = vrot.lane.b32.xlu0 %v11941_v1, %s9551_s0 }
0x1182   : > { %5518 = vrot.lane.b32.xlu1 %v11965_v14, %s9549_s3 }
0x1183   : > { %v5634_v50 = vpop.permute.xlu1 %5633  ;;  %v12002_v12 = vpop.permute.xlu0 %5637 }
0x1185   : > { %5790 = vperm.xlu0 %9206, %v5072_v2  }
0x1186   : > { %5486 = vrot.lane.b32.xlu1 %v11965_v14, %s9550_s5 }
0x1187   : > { %v5594_v37 = vpop.permute.xlu0 %5593  ;;  %v5717_v33 = vpop.permute.xlu1 %5716 }
0x1188   : > { %v5732_v36 = vsel %vm5730_vm2, %v5717_v33, %v11989_v44  ;;  %v5731_v40 = vsel %vm5730_vm2, %v5715_v11, %v5717_v33  ;;  %v5624_v5 = vsel %vm1642_vm3, 0.0, %v5594_v37 }
0x118a   : > { %5397 = vrot.lane.b32.xlu1 %v11965_v14, %s9551_s0 }
0x118b   : > { %v12008_v9 = vpop.permute.xlu0 %5504  ;;  %v5636_v42 = vpop.permute.xlu1 %5635 }
0x118c   : > { %v5650_v28 = vsel %vm4261_vm6, %v5636_v42, %v12002_v12  ;;  %v5649_v52 = vsel %vm4261_vm6, %v5634_v50, %v5636_v42  ;;  %v12116_v50 = vld [vmem:[#allocation10] sm:$0xf] }
0x118f   : > { %v12010_v58 = vpop.permute.xlu0 %5472  ;;  %v12012_v32 = vpop.permute.xlu1 %5595 }
0x1190   : > { %v5609_v59 = vsel %vm1642_vm3, %v5594_v37, %v12012_v32 }
0x1193   : > { %v12014_v20 = vpop.permute.xlu0 %5383  ;;  %v12016_v38 = vpop.permute.xlu1 %5506 }
0x1194   : > { %v5521_v7 = vsel %vm13340_vm10, %v12008_v9, %v12016_v38  ;;  %v5415_v37 = vsel %vm5399_vm8, 0.0, %v12014_v20 }
0x1197   : > { %v12018_v48 = vpop.permute.xlu0 %5597  ;;  %v12020_v39 = vpop.permute.xlu1 %5474 }
0x1198   : > { %v5610_v56 = vsel %vm1642_vm3, %v12012_v32, %v12018_v48 }
0x119b   : > { %v12022_v10 = vpop.permute.xlu0 %5508  ;;  %v12024_v24 = vpop.permute.xlu1 %5385 }
0x119c   : > { %v5400_v2 = vsel %vm5399_vm8, %v12014_v20, %v12024_v24 }
0x119f   : > { %v12027_v43 = vpop.permute.xlu0 %5476  ;;  %v12030_v19 = vpop.permute.xlu1 %5599 }
0x11a3   : > { %v12034_v49 = vpop.permute.xlu0 %5387  ;;  %v12044_v63 = vpop.permute.xlu1 %5510 }
0x11a7   : > { %v5750_v3 = vpop.permute.xlu0 %5749  ;;  %v12065_v22 = vpop.permute.xlu1 %5478 }
0x11a8   : > { %v5764_v35 = vsel %vm13339_vm14, %v5748_v31, %v5750_v3  ;;  %v5765_v54 = vsel %vm13339_vm14, %v5750_v3, %v11983_v30  ;;  %v5488_v31 = vsel %vm2886_vm13, %v12010_v58, %v12020_v39  ;;  %v5364_v3 = vadd.s32 640, %v10096_v51 }
0x11a9   : > { %8437 = vmatprep.subr.msk.mxu1 %vm13330_vm12, %v5765_v54  ;;  %v5363_v54 = vadd.s32 512, %v10096_v51 }
0x11aa   : > { %8438 = vmatpush1.msk.msra.mxu1 %vm13333_vm15, %v5764_v35 }
0x11ab   : > { %5812 = vmatprep.subr.mxu1 %v5732_v36  ;;  %v5676_v53 = vpop.permute.xlu0 %5675  ;;  %v12085_v6 = vpop.permute.xlu1 %5389 }
0x11ac   : > { %v5690_v29 = vsel %vm5689_vm4, %v5674_v34, %v5676_v53  ;;  %5813 = vmatpush1.msra.mxu1 %v5731_v40  ;;  %v5691_v62 = vsel %vm5689_vm4, %v5676_v53, %v11995_v47 }
0x11ad   : > { %8439 = vmatprep.subr.msk.mxu1 %vm13332_vm5, %v5691_v62 }
0x11ae   : > { %8440 = vmatpush1.msk.msra.mxu1 %vm13331_vm9, %v5690_v29  ;;  %v5371_v29 = vand.u32 31, %v5363_v54 }
0x11af   : > { %8441 = vmatprep.subr.msk.mxu1 %vm13330_vm12, %v5650_v28  ;;  %v5754_v57 = vpop.permute.xlu0 %5753 }
0x11b0   : > { %8442 = vmatpush1.msk.msra.mxu1 %vm13333_vm15, %v5649_v52 }
0x11b1   : > { %5818 = vmatprep.subr.mxu1 %v11875_v4 }
0x11b2   : > { %5819 = vmatpush1.msra.mxu1 %v11855_v17  ;;  %v5536_v17 = vsel %vm13340_vm10, 0.0, %v12008_v9  ;;  %v5766_v9 = vsel %vm13339_vm14, %v11983_v30, %v5754_v57 }
0x11b3   : > { %8443 = vmatprep.subr.msk.mxu1 %vm13332_vm5, %v5609_v59  ;;  %v5721_v55 = vpop.permute.xlu0 %5720  ;;  %v5522_v59 = vsel %vm13340_vm10, %v12016_v38, %v12022_v10  ;;  %v5489_v38 = vsel %vm2886_vm13, %v12020_v39, %v12027_v43  ;;  %v5401_v39 = vsel %vm5399_vm8, %v12024_v24, %v12034_v49 }
0x11b4   : > { %8444 = vmatpush1.msk.msra.mxu1 %vm13331_vm9, %v5624_v5  ;;  %v5733_v8 = vsel %vm5730_vm2, %v11989_v44, %v5721_v55  ;;  %v5372_v44 = vand.u32 31, %v5364_v3 }
0x11b5   : > { %8445 = vmatprep.subr.msk.mxu1 %vm13330_vm12, %v5521_v7  ;;  %vm13335_vm12 = vcmp.lt.s32.totalorder %v12092_v13, 32  ;;  %v5366_v7 = vadd.s32 896, %v10096_v51 }
0x11b6   : > { %8446 = vmatpush1.msk.msra.mxu1 %vm13333_vm15, %v5536_v17  ;;  %v5402_v17 = vsel %vm5399_vm8, %v12034_v49, %v12085_v6 }
0x11b7   : > { %5824 = vmatprep.subr.mxu1 %v5488_v31  ;;  %v5680_v11 = vpop.permute.xlu0 %5679 }
0x11b8   : > { %v5756_v34 = vpop.permute.xlu1 %5755  ;;  %8448 = vmatpush1.msk.msra.mxu1 %vm12099_vm11, %v12010_v58  ;;  %v12133_v58 = vadd.s32 4294967295, %v5370_v60  ;;  %v5692_v40 = vsel %vm5689_vm4, %v11995_v47, %v5680_v11  ;;  %v12164_v47 = vadd.s32 1, %v5372_v44 }
0x11b9   : > { %v5767_v33 = vsel %vm13339_vm14, %v5754_v57, %v5756_v34  ;;  %8449 = vmatprep.subr.msk.mxu1 %vm13332_vm5, %v5400_v2  ;;  %vm13337_vm5 = vcmp.ge.s32.totalorder %v12135_v45, 0  ;;  %v12170_v57 = vadd.s32 1, %v5371_v29 }
0x11ba   : > { %8452 = vmatprep.subr.msk.mxu0 %vm13338_vm1, %v5767_v33  ;;  %8450 = vmatpush1.msk.msra.mxu1 %vm13331_vm9, %v5415_v37  ;;  %vm13336_vm9 = vcmp.ge.s32.totalorder %v12133_v58, 0  ;;  %vm5558_vm15 = vcmp.lt.s32.totalorder %v12164_v47, 32 }
0x11bb   : > { %8453 = vmatpush1.msk.msra.mxu0 %vm13335_vm12, %v5766_v9  ;;  %8451 = vmatmul.mubr.msk.f32.vlgmr.msra.gmra.mxu1 %vm4734_vm7, %v12116_v50  ;;  %v5640_v42 = vpop.permute.xlu0 %5639  ;;  %vm5557_vm0 = vcmp.lt.s32.totalorder %v12170_v57, 32 }
0x11bc   : > { %v5723_v20 = vpop.permute.xlu1 %5722  ;;  %6002 = vmatprep.mubr.f32.mxu1 %v9539_v26  ;;  %v5651_v28 = vsel %vm4261_vm6, %v12002_v12, %v5640_v42  ;;  %v5611_v12 = vsel %vm1642_vm3, %v12018_v48, %v12030_v19 }
0x11bd   : > { %v5734_v30 = vsel %vm5730_vm2, %v5721_v55, %v5723_v20  ;;  %v5490_v55 = vsel %vm2886_vm13, %v12027_v43, %v12065_v22 }
0x11be   : > { %5883 = vmatprep.subr.mxu0 %v5734_v30 }
0x11bf   : > { %5884 = vmatpush1.msra.mxu0 %v5733_v8  ;;  %v12142_v35 = vpop.permute.xlu0 %5601 }
0x11c0   : > { %v12146_v36 = vpop.permute.xlu1 %5681 }
0x11c1   : > { %v5693_v53 = vsel %vm5689_vm4, %v5680_v11, %v12146_v36  ;;  %v12216_v11 = vadd.s32 4294967295, %v5371_v29 }
0x11c2   : > { %8454 = vmatprep.subr.msk.mxu0 %vm13336_vm9, %v5693_v53 }
0x11c3   : > { %8455 = vmatpush1.msk.msra.mxu0 %vm13337_vm5, %v5692_v40  ;;  %v12157_v15 = vpop.permute.xlu0 %5480 }
0x11c4   : > { %v5642_v62 = vpop.permute.xlu1 %5641 }
0x11c5   : > { %v5652_v16 = vsel %vm4261_vm6, %v5640_v42, %v5642_v62 }
0x11c6   : > { %8456 = vmatprep.subr.msk.mxu0 %vm13338_vm1, %v5652_v16 }
0x11c7   : > { %8457 = vmatpush1.msk.msra.mxu0 %vm13335_vm12, %v5651_v28  ;;  %v12168_v52 = vpop.permute.xlu0 %5605 }
0x11c8   : > { %5889 = vmatprep.subr.mxu0 %v11901_v0  ;;  %v5760_v60 = vpop.permute.xlu1 %5759 }
0x11c9   : > { %5890 = vmatpush1.msra.mxu0 %v11857_v18  ;;  %v5523_v18 = vsel %vm13340_vm10, %v12022_v10, %v12044_v63  ;;  %v12210_v10 = vadd.s32 4294967295, %v5372_v44 }
0x11ca   : > { %8458 = vmatprep.subr.msk.mxu0 %vm13336_vm9, %v5611_v12 }
0x11cb   : > { %8459 = vmatpush1.msk.msra.mxu0 %vm13337_vm5, %v5610_v56  ;;  %v5758_v0 = vpop.permute.xlu0 %5757 }
0x11cc   : > { %8460 = vmatprep.subr.msk.mxu0 %vm13338_vm1, %v5523_v18  ;;  %v12194_v32 = vpop.permute.xlu1 %5726  ;;  %v5768_v48 = vsel %vm13339_vm14, %v5756_v34, %v5758_v0  ;;  %v5769_v5 = vsel %vm13339_vm14, %v5758_v0, %v5760_v60  ;;  %v5365_v34 = vadd.s32 768, %v10096_v51  ;;  %v5374_v51 = vand.u32 31, %v5366_v7 }
0x11cd   : > { %8461 = vmatpush1.msk.msra.mxu0 %vm13335_vm12, %v5522_v59  ;;  %8465 = vmatprep.subr.msk.mxu1 %vm5558_vm15, %v5769_v5  ;;  %vm13342_vm12 = vcmp.ge.s32.totalorder %v12210_v10, 0 }
0x11ce   : > { %5895 = vmatprep.subr.mxu0 %v5490_v55  ;;  %8466 = vmatpush1.msk.msra.mxu1 %vm5557_vm0, %v5768_v48  ;;  %v5373_v49 = vand.u32 31, %v5365_v34  ;;  %v12261_v28 = vadd.s32 4294967295, %v5374_v51 }
0x11cf   : > { %5896 = vmatpush1.msra.mxu0 %v5489_v38  ;;  %v5725_v31 = vpop.permute.xlu0 %5724 }
0x11d0   : > { %8462 = vmatprep.subr.msk.mxu0 %vm13336_vm9, %v5402_v17  ;;  %v5686_v43 = vpop.permute.xlu1 %5685  ;;  %v5736_v2 = vsel %vm5730_vm2, %v5725_v31, %v12194_v32  ;;  %v5735_v37 = vsel %vm5730_vm2, %v5723_v20, %v5725_v31  ;;  %vm13341_vm9 = vcmp.ge.s32.totalorder %v12216_v11, 0  ;;  %v12241_v20 = vadd.s32 1, %v5374_v51 }
0x11d1   : > { %8463 = vmatpush1.msk.msra.mxu0 %vm13337_vm5, %v5401_v39  ;;  %5954 = vmatprep.subr.mxu1 %v5736_v2  ;;  %v12243_v8 = vadd.s32 1, %v5373_v49 }
0x11d2   : > { %8464 = vmatmul.mubr.msk.f32.vlgmr.msra.gmra.mxu0 %vm4734_vm7, %v12116_v50  ;;  %5955 = vmatpush1.msra.mxu1 %v5735_v37  ;;  %vm13346_vm5 = vcmp.lt.s32.totalorder %v12241_v20, 32 }
0x11d3   : > { %v5684_v24 = vpop.permute.xlu0 %5683  ;;  %6073 = vmatprep.mubr.f32.mxu0 %v9539_v26  ;;  %vm13345_vm1 = vcmp.lt.s32.totalorder %v12243_v8, 32 }
0x11d4   : > { %v5646_v33 = vpop.permute.xlu1 %5645  ;;  %v5694_v9 = vsel %vm5689_vm4, %v12146_v36, %v5684_v24  ;;  %v5695_v42 = vsel %vm5689_vm4, %v5684_v24, %v5686_v43 }
0x11d5   : > { %8467 = vmatprep.subr.msk.mxu1 %vm13342_vm12, %v5695_v42 }
0x11d6   : > { %8468 = vmatpush1.msk.msra.mxu1 %vm13341_vm9, %v5694_v9  ;;  %v4811_v9 = vld [vmem:[%s12342_s23] sm:$0xff] }
0x11d7   : > { %v5644_v30 = vpop.permute.xlu0 %5643 }
0x11d8   : > { %v5513_v3 = vpop.permute.xlu1 %5512  ;;  %v5653_v54 = vsel %vm4261_vm6, %v5642_v62, %v5644_v30  ;;  %v5654_v53 = vsel %vm4261_vm6, %v5644_v30, %v5646_v33 }
0x11d9   : > { %8469 = vmatprep.subr.msk.mxu1 %vm5558_vm15, %v5654_v53  ;;  %v5524_v18 = vsel %vm13340_vm10, %v12044_v63, %v5513_v3 }
0x11da   : > { %8470 = vmatpush1.msk.msra.mxu1 %vm5557_vm0, %v5653_v54  ;;  %v6092_v54 = vcombine.low %v4811_v9, %v4811_v9 }
0x11db   : > { %5960 = vmatprep.subr.mxu1 %v11947_v27  ;;  %v5762_v36 = vpop.permute.xlu0 %5761 }
0x11dc   : > { %v5392_v40 = vpop.permute.xlu1 %5391  ;;  %v5770_v44 = vsel %vm13339_vm14, %v5760_v60, %v5762_v36  ;;  %5961 = vmatpush1.msra.mxu1 %v11923_v25  ;;  %v5779_v29 = vsel %vm13339_vm14, %v5762_v36, 0.0  ;;  %v12266_v60 = vadd.s32 4294967295, %v5373_v49  ;;  %v5612_v25 = vsel %vm1642_vm3, %v12030_v19, %v12142_v35 }
0x11dd   : > { %8478 = vmatprep.subr.msk.mxu0 %vm13346_vm5, %v5779_v29  ;;  %vm13344_vm14 = vcmp.ge.s32.totalorder %v12261_v28, 0  ;;  %v5403_v38 = vsel %vm5399_vm8, %v12085_v6, %v5392_v40 }
0x11de   : > { %8479 = vmatpush1.msk.msra.mxu0 %vm13345_vm1, %v5770_v44 }
0x11df   : > { %v5515_v62 = vpop.permute.xlu0 %5514 }
0x11e0   : > { %v5604_v16 = vpop.permute.xlu1 %5603  ;;  %v5525_v12 = vsel %vm13340_vm10, %v5513_v3, %v5515_v62  ;;  %vm13343_vm10 = vcmp.ge.s32.totalorder %v12266_v60, 0 }
0x11e1   : > { %v5613_v27 = vsel %vm1642_vm3, %v12142_v35, %v5604_v16  ;;  %v5614_v34 = vsel %vm1642_vm3, %v5604_v16, %v12168_v52 }
0x11e2   : > { %8471 = vmatprep.subr.msk.mxu1 %vm13342_vm12, %v5613_v27  ;;  %v4812_v27 = vld [vmem:[%s12342_s23 + $0x8] sm:$0xff] }
0x11e3   : > { %8472 = vmatpush1.msk.msra.mxu1 %vm13341_vm9, %v5612_v25  ;;  %v5688_v56 = vpop.permute.xlu0 %5687  ;;  %v6093_v25 = vcombine.low %v4812_v27, %v4812_v27 }
0x11e4   : > { %v5729_v0 = vpop.permute.xlu1 %5728  ;;  %8473 = vmatprep.subr.msk.mxu1 %vm5558_vm15, %v5525_v12  ;;  %v5705_v59 = vsel %vm5689_vm4, %v5688_v56, 0.0  ;;  %v5696_v19 = vsel %vm5689_vm4, %v5686_v43, %v5688_v56 }
0x11e5   : > { %8474 = vmatpush1.msk.msra.mxu1 %vm5557_vm0, %v5524_v18  ;;  %8480 = vmatprep.subr.msk.mxu0 %vm5730_vm2, %v5729_v0  ;;  %v5737_v35 = vsel %vm5730_vm2, %v12194_v32, %v5729_v0  ;;  %v5491_v32 = vsel %vm2886_vm13, %v12065_v22, %v12157_v15  ;;  %v4813_v18 = vld [vmem:[%s12342_s23 + $0x10] sm:$0xff] }
0x11e6   : > { %6026 = vmatpush1.msra.mxu0 %v5737_v35  ;;  %v6094_v35 = vcombine.low %v4813_v18, %v4813_v18 }
0x11e7   : > { %8481 = vmatprep.subr.msk.mxu0 %vm13344_vm14, %v5705_v59  ;;  %v5394_v63 = vpop.permute.xlu0 %5393 }
0x11e8   : > { %v5483_v48 = vpop.permute.xlu1 %5482  ;;  %8482 = vmatpush1.msk.msra.mxu0 %vm13343_vm10, %v5696_v19  ;;  %v5404_v55 = vsel %vm5399_vm8, %v5392_v40, %v5394_v63 }
0x11e9   : > { %v5492_v5 = vsel %vm2886_vm13, %v12157_v15, %v5483_v48 }
0x11ea   : > { %5966 = vmatprep.subr.mxu1 %v5492_v5 }
0x11eb   : > { %5967 = vmatpush1.msra.mxu1 %v5491_v32  ;;  %v5517_v22 = vpop.permute.xlu0 %5516 }
0x11ec   : > { %v5648_v7 = vpop.permute.xlu1 %5647  ;;  %8475 = vmatprep.subr.msk.mxu1 %vm13342_vm12, %v5404_v55 }
0x11ed   : > { %v5655_v17 = vsel %vm4261_vm6, %v5646_v33, %v5648_v7  ;;  %8476 = vmatpush1.msk.msra.mxu1 %vm13341_vm9, %v5403_v38  ;;  %v5664_v31 = vsel %vm4261_vm6, %v5648_v7, 0.0  ;;  %vm13424_vm9 = vcmask 252928  }
0x11ee   : > { %8477 = vmatmul.mubr.msk.f32.vlgmr.msra.gmra.mxu1 %vm4734_vm7, %v12116_v50  ;;  %8483 = vmatprep.subr.msk.mxu0 %vm13346_vm5, %v5664_v31  ;;  %vm13425_vm12 = vmmov %vm13424_vm9 }
0x11ef   : > { %8484 = vmatpush1.msk.msra.mxu0 %vm13345_vm1, %v5655_v17  ;;  %6492 = vmatprep.mubr.f32.mxu1 %v9539_v26  ;;  %v5485_v43 = vpop.permute.xlu0 %5484 }
0x11f0   : > { %v5608_v6 = vpop.permute.xlu1 %5607  ;;  %6031 = vmatprep.subr.mxu0 %v11965_v14  ;;  %v5526_v14 = vsel %vm13425_vm12, %v5515_v62, %v5517_v22  ;;  %v5493_v37 = vsel %vm2886_vm13, %v5483_v48, %v5485_v43  ;;  %vm13427_vm12 = vcmask 1043456  }
0x11f1   : > { %v5615_v15 = vsel %vm1642_vm3, %v12168_v52, %v5608_v6  ;;  %6032 = vmatpush1.msra.mxu0 %v11941_v1 }
0x11f2   : > { %8485 = vmatprep.subr.msk.mxu0 %vm13344_vm14, %v5615_v15  ;;  %v4814_v15 = vld [vmem:[%s12342_s23 + $0x18] sm:$0xff] }
0x11f3   : > { %8486 = vmatpush1.msk.msra.mxu0 %vm13343_vm10, %v5614_v34  ;;  %v5396_v51 = vpop.permute.xlu0 %5395 }
0x11f4   : > { %v5519_v39 = vpop.permute.xlu1 %5518  ;;  %v5405_v33 = vsel %vm5399_vm8, %v5394_v63, %v5396_v51 }
0x11f5   : > { %v5527_v2 = vsel %vm13424_vm9, %v5517_v22, %v5519_v39  ;;  %vm13428_vm9 = vmmov %vm13427_vm12  ;;  %v6095_v39 = vcombine.low %v4814_v15, %v4814_v15 }
0x11f6   : > { %8487 = vmatprep.subr.msk.mxu0 %vm13346_vm5, %v5527_v2  ;;  %vm13444_vm5 = vcmp.lt.s32.totalorder %v12036_v21, 32 }
0x11f7   : > { %8488 = vmatpush1.msk.msra.mxu0 %vm13345_vm1, %v5526_v14  ;;  %vm13443_vm1 = vcmp.lt.s32.totalorder %v12032_v46, 32 }
0x11f8   : > { %v5487_v1 = vpop.permute.xlu1 %5486 }
0x11f9   : > { %v5494_v52 = vsel %vm2886_vm13, %v5485_v43, %v5487_v1 }
0x11fa   : > { %6037 = vmatprep.subr.mxu0 %v5494_v52 }
0x11fb   : > { %6038 = vmatpush1.msra.mxu0 %v5493_v37 }
0x11fc   : > { %v5398_v24 = vpop.permute.xlu1 %5397 }
0x11fd   : > { %v5406_v49 = vsel %vm5399_vm8, %v5396_v51, %v5398_v24 }
0x11fe   : > { %8489 = vmatprep.subr.msk.mxu0 %vm13344_vm14, %v5406_v49  ;;  %vm13436_vm14 = vcmp.lt.s32.totalorder %v12036_v21, 32 }
0x11ff   : > { %8490 = vmatpush1.msk.msra.mxu0 %vm13343_vm10, %v5405_v33  ;;  %vm13435_vm10 = vcmp.lt.s32.totalorder %v12032_v46, 32 }
0x1200   : > { %8491 = vmatmul.mubr.msk.f32.vlgmr.msra.gmra.mxu0 %vm4734_vm7, %v12116_v50  ;;  %v12345_v42 = vpop.permute.xlu0 %5790 }
0x1201   : > { %6563 = vmatprep.mubr.f32.mxu0 %v9539_v26 }
0x127b   : > { %v5862_v30 = vpop.f32.mrf.mxu1 }
0x127c   : > { %v5863_v3 = vadd.f32 %v5862_v30, %v12345_v42 }
0x127d   : > { %v5864_v53 = vpop.f32.mrf.mxu1 }
0x127e   : > { %v6080_v36 = vmax.f32 %v5863_v3, 0.0  ;;  %v5865_v44 = vadd.f32 %v5864_v53, %v12345_v42 }
0x1280   : > { %v12349_v40 = vsel %vm13427_vm12, %v6080_v36, %v6092_v54  ;;  %v6081_v50 = vmax.f32 %v5865_v44, 0.0  ;;  %vm13429_vm12 = vmmov %vm13428_vm9 }
0x1281   : > { %6348 = vrot.lane.b32.xlu0 %v12349_v40, %s9547_s16  ;;  %6380 = vrot.lane.b32.xlu1 %v12349_v40, %s9546_s4 }
0x1282   : > { %v12361_v29 = vsel %vm13428_vm9, %v6081_v50, %v4811_v9 }
0x1285   : > { %6268 = vrot.lane.b32.xlu0 %v12349_v40, %s13400_s1  ;;  %6308 = vrot.lane.b32.xlu1 %v12349_v40, %s9548_s28 }
0x1289   : > { %6350 = vrot.lane.b32.xlu0 %v12361_v29, %s9547_s16  ;;  %6228 = vrot.lane.b32.xlu1 %v12349_v40, %s13396_s10 }
0x128d   : > { %6270 = vrot.lane.b32.xlu0 %v12361_v29, %s13400_s1  ;;  %6188 = vrot.lane.b32.xlu1 %v12349_v40, %s9549_s3 }
0x1291   : > { %6230 = vrot.lane.b32.xlu0 %v12361_v29, %s13396_s10  ;;  %6156 = vrot.lane.b32.xlu1 %v12349_v40, %s9550_s5 }
0x1292   : > { %v5933_v62 = vpop.f32.mrf.mxu0 }
0x1293   : > { %v5934_v16 = vadd.f32 %v5933_v62, %v12345_v42 }
0x1294   : > { %v5935_v0 = vpop.f32.mrf.mxu0 }
0x1295   : > { %6190 = vrot.lane.b32.xlu0 %v12361_v29, %s9549_s3  ;;  %6116 = vrot.lane.b32.xlu1 %v12349_v40, %s9551_s0  ;;  %v6082_v12 = vmax.f32 %v5934_v16, 0.0  ;;  %v5936_v63 = vadd.f32 %v5935_v0, %v12345_v42 }
0x1297   : > { %v12390_v56 = vsel %vm13429_vm12, %v6082_v12, %v6093_v25  ;;  %v6083_v55 = vmax.f32 %v5936_v63, 0.0  ;;  %vm13430_vm12 = vmmov %vm13428_vm9 }
0x1299   : > { %6158 = vrot.lane.b32.xlu0 %v12361_v29, %s9550_s5  ;;  %6382 = vrot.lane.b32.xlu1 %v12361_v29, %s9546_s4  ;;  %v12417_v32 = vsel %vm13430_vm12, %v6083_v55, %v4812_v27  ;;  %vm13431_vm12 = vmmov %vm13428_vm9 }
0x129d   : > { %6118 = vrot.lane.b32.xlu0 %v12361_v29, %s9551_s0  ;;  %6310 = vrot.lane.b32.xlu1 %v12361_v29, %s9548_s28 }
0x12a1   : > { %6384 = vrot.lane.b32.xlu0 %v12390_v56, %s9546_s4  ;;  %6352 = vrot.lane.b32.xlu1 %v12390_v56, %s9547_s16 }
0x12a5   : > { %6312 = vrot.lane.b32.xlu0 %v12390_v56, %s9548_s28  ;;  %6272 = vrot.lane.b32.xlu1 %v12390_v56, %s13400_s1 }
0x12a9   : > { %6232 = vrot.lane.b32.xlu1 %v12390_v56, %s13396_s10 }
0x12ad   : > { %6192 = vrot.lane.b32.xlu1 %v12390_v56, %s9549_s3 }
0x12ae   : > { %v6004_v59 = vpop.f32.mrf.mxu1 }
0x12af   : > { %v6005_v19 = vadd.f32 %v6004_v59, %v12345_v42 }
0x12b0   : > { %v6006_v38 = vpop.f32.mrf.mxu1 }
0x12b1   : > { %v6084_v48 = vmax.f32 %v6005_v19, 0.0  ;;  %6160 = vrot.lane.b32.xlu1 %v12390_v56, %s9550_s5  ;;  %v6007_v7 = vadd.f32 %v6006_v38, %v12345_v42 }
0x12b3   : > { %v12410_v5 = vsel %vm13428_vm9, %v6084_v48, %v6094_v35  ;;  %v6085_v17 = vmax.f32 %v6007_v7, 0.0 }
0x12b4   : > { %6388 = vrot.lane.b32.xlu0 %v12410_v5, %s9546_s4 }
0x12b5   : > { %6120 = vrot.lane.b32.xlu1 %v12390_v56, %s9551_s0  ;;  %v12445_v31 = vsel %vm13428_vm9, %v6085_v17, %v4813_v18 }
0x12b8   : > { %6356 = vrot.lane.b32.xlu0 %v12410_v5, %s9547_s16 }
0x12b9   : > { %6386 = vrot.lane.b32.xlu1 %v12417_v32, %s9546_s4 }
0x12bc   : > { %6316 = vrot.lane.b32.xlu0 %v12410_v5, %s9548_s28 }
0x12bd   : > { %6354 = vrot.lane.b32.xlu1 %v12417_v32, %s9547_s16 }
0x12c0   : > { %6276 = vrot.lane.b32.xlu0 %v12410_v5, %s13400_s1  ;;  %v6075_v22 = vpop.f32.mrf.mxu0 }
0x12c1   : > { %6314 = vrot.lane.b32.xlu1 %v12417_v32, %s9548_s28  ;;  %v6076_v6 = vadd.f32 %v6075_v22, %v12345_v42 }
0x12c2   : > { %v6077_v43 = vpop.f32.mrf.mxu0 }
0x12c3   : > { %v6086_v34 = vmax.f32 %v6076_v6, 0.0  ;;  %v6078_v14 = vadd.f32 %v6077_v43, %v12345_v42  ;;  %v5074_v42 = vld [vmem:[%s13432_s11] sm:$0xf] }
0x12c4   : > { %6234 = vrot.lane.b32.xlu0 %v12417_v32, %s13396_s10 }
0x12c5   : > { %6274 = vrot.lane.b32.xlu1 %v12417_v32, %s13400_s1  ;;  %v12470_v2 = vsel %vm13431_vm12, %v6086_v34, %v6095_v39  ;;  %v6087_v1 = vmax.f32 %v6078_v14, 0.0  ;;  %vm13433_vm12 = vcmask 777216   ;;  %v12561_v14 = vld [vmem:[#allocation12] sm:$0xf] }
0x12c7   : > { %v12482_v52 = vsel %vm13428_vm9, %v6087_v1, %v4814_v15  ;;  %vm13434_vm9 = vmmov %vm13433_vm12 }
0x12c8   : > { %6194 = vrot.lane.b32.xlu0 %v12417_v32, %s9549_s3 }
0x12c9   : > { %6196 = vrot.lane.b32.xlu1 %v12410_v5, %s9549_s3 }
0x12cc   : > { %6162 = vrot.lane.b32.xlu0 %v12417_v32, %s9550_s5 }
0x12cd   : > { %6124 = vrot.lane.b32.xlu1 %v12410_v5, %s9551_s0 }
0x12d0   : > { %6122 = vrot.lane.b32.xlu0 %v12417_v32, %s9551_s0 }
0x12d1   : > { %6390 = vrot.lane.b32.xlu1 %v12445_v31, %s9546_s4 }
0x12d4   : > { %6236 = vrot.lane.b32.xlu0 %v12410_v5, %s13396_s10 }
0x12d5   : > { %6358 = vrot.lane.b32.xlu1 %v12445_v31, %s9547_s16 }
0x12d8   : > { %6164 = vrot.lane.b32.xlu0 %v12410_v5, %s9550_s5 }
0x12d9   : > { %6318 = vrot.lane.b32.xlu1 %v12445_v31, %s9548_s28 }
0x12dc   : > { %6198 = vrot.lane.b32.xlu0 %v12445_v31, %s9549_s3 }
0x12dd   : > { %6278 = vrot.lane.b32.xlu1 %v12445_v31, %s13400_s1 }
0x12e0   : > { %6126 = vrot.lane.b32.xlu0 %v12445_v31, %s9551_s0 }
0x12e1   : > { %6238 = vrot.lane.b32.xlu1 %v12445_v31, %s13396_s10 }
0x12e4   : > { %6392 = vrot.lane.b32.xlu0 %v12470_v2, %s9546_s4 }
0x12e5   : > { %6166 = vrot.lane.b32.xlu1 %v12445_v31, %s9550_s5 }
0x12e8   : > { %6360 = vrot.lane.b32.xlu0 %v12470_v2, %s9547_s16 }
0x12e9   : > { %6240 = vrot.lane.b32.xlu1 %v12470_v2, %s13396_s10 }
0x12ec   : > { %6320 = vrot.lane.b32.xlu0 %v12470_v2, %s9548_s28 }
0x12ed   : > { %6394 = vrot.lane.b32.xlu1 %v12482_v52, %s9546_s4 }
0x12f0   : > { %6280 = vrot.lane.b32.xlu0 %v12470_v2, %s13400_s1 }
0x12f1   : > { %6322 = vrot.lane.b32.xlu1 %v12482_v52, %s9548_s28 }
0x12f3   : > { %v6349_v37 = vpop.permute.xlu0 %6348  ;;  %v6381_v51 = vpop.permute.xlu1 %6380 }
0x12f4   : > { %6362 = vrot.lane.b32.xlu0 %v12482_v52, %s9547_s16 }
0x12f5   : > { %6200 = vrot.lane.b32.xlu1 %v12470_v2, %s9549_s3 }
0x12f7   : > { %v6269_v24 = vpop.permute.xlu0 %6268  ;;  %v6309_v49 = vpop.permute.xlu1 %6308 }
0x12f8   : > { %6282 = vrot.lane.b32.xlu0 %v12482_v52, %s13400_s1 }
0x12f9   : > { %6168 = vrot.lane.b32.xlu1 %v12470_v2, %s9550_s5 }
0x12fb   : > { %v6351_v33 = vpop.permute.xlu0 %6350  ;;  %v6229_v9 = vpop.permute.xlu1 %6228 }
0x12fc   : > { %6242 = vrot.lane.b32.xlu0 %v12482_v52, %s13396_s10  ;;  %v6364_v63 = vsel %vm5730_vm2, %v6349_v37, %v6351_v33  ;;  %v6259_v6 = vsel %vm1642_vm3, 0.0, %v6229_v9 }
0x12fd   : > { %6128 = vrot.lane.b32.xlu1 %v12470_v2, %s9551_s0 }
0x12ff   : > { %v6271_v30 = vpop.permute.xlu0 %6270  ;;  %v6189_v3 = vpop.permute.xlu1 %6188 }
0x1300   : > { %6202 = vrot.lane.b32.xlu0 %v12482_v52, %s9549_s3  ;;  %v6284_v7 = vsel %vm4261_vm6, %v6269_v24, %v6271_v30 }
0x1301   : > { %6422 = vperm.xlu1 %9207, %v5074_v42  }
0x1303   : > { %v12507_v54 = vpop.permute.xlu0 %6230  ;;  %v6157_v53 = vpop.permute.xlu1 %6156 }
0x1304   : > { %6170 = vrot.lane.b32.xlu0 %v12482_v52, %s9550_s5  ;;  %v6244_v22 = vsel %vm1642_vm3, %v6229_v9, %v12507_v54 }
0x1307   : > { %v12511_v36 = vpop.permute.xlu0 %6190  ;;  %v6117_v44 = vpop.permute.xlu1 %6116 }
0x1308   : > { %6130 = vrot.lane.b32.xlu0 %v12482_v52, %s9551_s0  ;;  %v6147_v1 = vsel %vm5399_vm8, 0.0, %v6117_v44 }
0x130b   : > { %v12515_v50 = vpop.permute.xlu0 %6158  ;;  %v6383_v62 = vpop.permute.xlu1 %6382 }
0x130c   : > { %v6396_v0 = vsel %vm13434_vm9, %v6381_v51, %v6383_v62  ;;  %vm13440_vm9 = vcmp.lt.s32.totalorder %v12036_v21, 32 }
0x130f   : > { %v12517_v16 = vpop.permute.xlu0 %6118  ;;  %v6311_v27 = vpop.permute.xlu1 %6310 }
0x1310   : > { %v6324_v55 = vsel %vm5689_vm4, %v6309_v49, %v6311_v27  ;;  %v6132_v43 = vsel %vm5399_vm8, %v6117_v44, %v12517_v16 }
0x1313   : > { %v6385_v12 = vpop.permute.xlu0 %6384  ;;  %v6353_v25 = vpop.permute.xlu1 %6352 }
0x1314   : > { %v6397_v18 = vsel %vm13433_vm12, %v6383_v62, %v6385_v12  ;;  %v6365_v59 = vsel %vm5730_vm2, %v6351_v33, %v6353_v25  ;;  %vm13437_vm12 = vcmp.ge.s32.totalorder %v12039_v61, 0 }
0x1315   : > { %8492 = vmatprep.subr.msk.mxu1 %vm13435_vm10, %v6397_v18  ;;  %vm13438_vm10 = vcmp.ge.s32.totalorder %v12042_v23, 0 }
0x1316   : > { %8493 = vmatpush1.msk.msra.mxu1 %vm13436_vm14, %v6396_v0  ;;  %vm13439_vm14 = vcmp.lt.s32.totalorder %v12032_v46, 32 }
0x1317   : > { %v6313_v19 = vpop.permute.xlu0 %6312  ;;  %6444 = vmatprep.subr.mxu1 %v6365_v59  ;;  %v6273_v35 = vpop.permute.xlu1 %6272 }
0x1318   : > { %6445 = vmatpush1.msra.mxu1 %v6364_v63  ;;  %v6325_v48 = vsel %vm5689_vm4, %v6311_v27, %v6313_v19  ;;  %v6285_v38 = vsel %vm4261_vm6, %v6271_v30, %v6273_v35 }
0x1319   : > { %8494 = vmatprep.subr.msk.mxu1 %vm13437_vm12, %v6325_v48 }
0x131a   : > { %8495 = vmatpush1.msk.msra.mxu1 %vm13438_vm10, %v6324_v55 }
0x131b   : > { %8496 = vmatprep.subr.msk.mxu1 %vm13439_vm14, %v6285_v38  ;;  %v6233_v17 = vpop.permute.xlu1 %6232  ;;  %vm13441_vm14 = vcmask 252928  }
0x131c   : > { %8497 = vmatpush1.msk.msra.mxu1 %vm13440_vm9, %v6284_v7  ;;  %v6204_v34 = vsel %vm13441_vm14, %v6189_v3, %v12511_v36  ;;  %vm13442_vm9 = vmmov %vm13441_vm14  ;;  %vm13450_vm14 = vcmp.lt.s32.totalorder %v12092_v13, 32  ;;  %v6245_v63 = vsel %vm1642_vm3, %v12507_v54, %v6233_v17 }
0x131d   : > { %6450 = vmatprep.subr.mxu1 %v12361_v29  ;;  %v6219_v39 = vsel %vm13442_vm9, 0.0, %v6189_v3  ;;  %vm13451_vm9 = vcmp.ge.s32.totalorder %v12133_v58, 0 }
0x131e   : > { %6451 = vmatpush1.msra.mxu1 %v12349_v40  ;;  %v6172_v40 = vsel %vm2886_vm13, %v6157_v53, %v12515_v50 }
0x131f   : > { %8498 = vmatprep.subr.msk.mxu1 %vm13437_vm12, %v6244_v22  ;;  %v6193_v15 = vpop.permute.xlu1 %6192 }
0x1320   : > { %8499 = vmatpush1.msk.msra.mxu1 %vm13438_vm10, %v6259_v6 }
0x1321   : > { %8500 = vmatprep.subr.msk.mxu1 %vm13443_vm1, %v6204_v34  ;;  %vm13445_vm1 = vmmov %vm13437_vm12 }
0x1322   : > { %8501 = vmatpush1.msk.msra.mxu1 %vm13444_vm5, %v6219_v39  ;;  %vm13446_vm5 = vmmov %vm13438_vm10  ;;  %vm13449_vm10 = vcmp.lt.s32.totalorder %v12083_v41, 32 }
0x1323   : > { %6456 = vmatprep.subr.mxu1 %v6172_v40  ;;  %v6161_v29 = vpop.permute.xlu1 %6160 }
0x1324   : > { %8503 = vmatpush1.msk.msra.mxu1 %vm12099_vm11, %v6157_v53  ;;  %vm13447_vm11 = vcmask 777216   ;;  %v6173_v38 = vsel %vm2886_vm13, %v12515_v50, %v6161_v29 }
0x1325   : > { %8504 = vmatprep.subr.msk.mxu1 %vm13445_vm1, %v6132_v43  ;;  %vm13448_vm12 = vmmov %vm13447_vm11  ;;  %vm13452_vm1 = vcmp.ge.s32.totalorder %v12135_v45, 0 }
0x1326   : > { %v12566_v37 = vpop.permute.xlu0 %6388  ;;  %8505 = vmatpush1.msk.msra.mxu1 %vm13446_vm5, %v6147_v1  ;;  %vm13453_vm5 = vmmov %vm13449_vm10 }
0x1327   : > { %8506 = vmatmul.mubr.msk.f32.vlgmr.msra.gmra.mxu1 %vm4734_vm7, %v12561_v14  ;;  %v6121_v4 = vpop.permute.xlu1 %6120 }
0x1328   : > { %6634 = vmatprep.mubr.f32.mxu1 %v9539_v26  ;;  %v6133_v22 = vsel %vm5399_vm8, %v12517_v16, %v6121_v4 }
0x132a   : > { %v12573_v51 = vpop.permute.xlu0 %6356 }
0x132b   : > { %v6387_v24 = vpop.permute.xlu1 %6386 }
0x132c   : > { %v6398_v49 = vsel %vm13447_vm11, %v6385_v12, %v6387_v24  ;;  %v6399_v33 = vsel %vm13448_vm12, %v6387_v24, %v12566_v37  ;;  %vm13454_vm11 = vmmov %vm13450_vm14 }
0x132d   : > { %8507 = vmatprep.subr.msk.mxu0 %vm13449_vm10, %v6399_v33  ;;  %vm13455_vm12 = vmmov %vm13451_vm9 }
0x132e   : > { %v12580_v9 = vpop.permute.xlu0 %6316  ;;  %8508 = vmatpush1.msk.msra.mxu0 %vm13450_vm14, %v6398_v49  ;;  %vm13456_vm10 = vmmov %vm13452_vm1  ;;  %vm13457_vm14 = vcmask 252928  }
0x132f   : > { %v6355_v42 = vpop.permute.xlu1 %6354 }
0x1330   : > { %v6367_v30 = vsel %vm5730_vm2, %v6355_v42, %v12573_v51  ;;  %v6366_v3 = vsel %vm5730_vm2, %v6353_v25, %v6355_v42 }
0x1331   : > { %6515 = vmatprep.subr.mxu0 %v6367_v30 }
0x1332   : > { %v12587_v53 = vpop.permute.xlu0 %6276  ;;  %6516 = vmatpush1.msra.mxu0 %v6366_v3 }
0x1333   : > { %v6315_v44 = vpop.permute.xlu1 %6314 }
0x1334   : > { %v6326_v62 = vsel %vm5689_vm4, %v6313_v19, %v6315_v44  ;;  %v6327_v27 = vsel %vm5689_vm4, %v6315_v44, %v12580_v9 }
0x1335   : > { %8509 = vmatprep.subr.msk.mxu0 %vm13451_vm9, %v6327_v27  ;;  %vm13458_vm9 = vmmov %vm13457_vm14 }
0x1336   : > { %v12594_v12 = vpop.permute.xlu0 %6234  ;;  %8510 = vmatpush1.msk.msra.mxu0 %vm13452_vm1, %v6326_v62  ;;  %vm13459_vm1 = vmmov %vm13453_vm5 }
0x1337   : > { %v6275_v18 = vpop.permute.xlu1 %6274 }
0x1338   : > { %v6286_v25 = vsel %vm4261_vm6, %v6273_v35, %v6275_v18  ;;  %v6287_v0 = vsel %vm4261_vm6, %v6275_v18, %v12587_v53  ;;  %v6246_v35 = vsel %vm1642_vm3, %v6233_v17, %v12594_v12 }
0x1339   : > { %8511 = vmatprep.subr.msk.mxu0 %vm13453_vm5, %v6287_v0  ;;  %vm13460_vm5 = vmmov %vm13454_vm11 }
0x133a   : > { %v12603_v59 = vpop.permute.xlu0 %6194  ;;  %8512 = vmatpush1.msk.msra.mxu0 %vm13454_vm11, %v6286_v25  ;;  %vm13461_vm11 = vmmov %vm13455_vm12 }
0x133b   : > { %6521 = vmatprep.subr.mxu0 %v12417_v32  ;;  %v12608_v19 = vpop.permute.xlu1 %6196  ;;  %v6206_v32 = vsel %vm13457_vm14, %v6193_v15, %v12603_v59 }
0x133c   : > { %6522 = vmatpush1.msra.mxu0 %v12390_v56  ;;  %v6205_v56 = vsel %vm13458_vm9, %v12511_v36, %v6193_v15  ;;  %vm13465_vm9 = vcmp.ge.s32.totalorder %v12210_v10, 0 }
0x133d   : > { %8513 = vmatprep.subr.msk.mxu0 %vm13455_vm12, %v6246_v35  ;;  %vm13462_vm12 = vmmov %vm13456_vm10 }
0x133e   : > { %v12617_v48 = vpop.permute.xlu0 %6162  ;;  %8514 = vmatpush1.msk.msra.mxu0 %vm13456_vm10, %v6245_v63  ;;  %vm13463_vm10 = vcmask 777216  }
0x133f   : > { %8515 = vmatprep.subr.msk.mxu0 %vm13459_vm1, %v6206_v32  ;;  %v12627_v55 = vpop.permute.xlu1 %6124  ;;  %v6174_v54 = vsel %vm2886_vm13, %v6161_v29, %v12617_v48  ;;  %vm13464_vm14 = vmmov %vm13463_vm10 }
0x1340   : > { %8516 = vmatpush1.msk.msra.mxu0 %vm13460_vm5, %v6205_v56  ;;  %vm13466_vm1 = vmmov %vm13463_vm10 }
0x1341   : > { %6527 = vmatprep.subr.mxu0 %v6174_v54  ;;  %vm13467_vm5 = vmmov %vm13466_vm1 }
0x1342   : > { %v12635_v7 = vpop.permute.xlu0 %6122  ;;  %6528 = vmatpush1.msra.mxu0 %v6173_v38 }
0x1343   : > { %v6134_v36 = vsel %vm5399_vm8, %v6121_v4, %v12635_v7  ;;  %v6391_v17 = vpop.permute.xlu1 %6390 }
0x1344   : > { %8517 = vmatprep.subr.msk.mxu0 %vm13461_vm11, %v6134_v36  ;;  %v6400_v24 = vsel %vm13464_vm14, %v12566_v37, %v6391_v17  ;;  %vm13468_vm11 = vcmp.ge.s32.totalorder %v12216_v11, 0  ;;  %vm13471_vm14 = vmmov %vm13465_vm9 }
0x1345   : > { %8518 = vmatpush1.msk.msra.mxu0 %vm13462_vm12, %v6133_v22  ;;  %vm13469_vm12 = vcmp.lt.s32.totalorder %v12241_v20, 32 }
0x1346   : > { %v6237_v6 = vpop.permute.xlu0 %6236  ;;  %8519 = vmatmul.mubr.msk.f32.vlgmr.msra.gmra.mxu0 %vm4734_vm7, %v12561_v14 }
0x1347   : > { %v6359_v50 = vpop.permute.xlu1 %6358  ;;  %6705 = vmatprep.mubr.f32.mxu0 %v9539_v26 }
0x1348   : > { %v6368_v30 = vsel %vm5730_vm2, %v12573_v51, %v6359_v50 }
0x134a   : > { %v6165_v15 = vpop.permute.xlu0 %6164 }
0x134b   : > { %v6319_v34 = vpop.permute.xlu1 %6318 }
0x134c   : > { %v6328_v37 = vsel %vm5689_vm4, %v12580_v9, %v6319_v34 }
0x134e   : > { %v12648_v39 = vpop.permute.xlu0 %6198 }
0x134f   : > { %v6279_v40 = vpop.permute.xlu1 %6278 }
0x1350   : > { %v6288_v9 = vsel %vm4261_vm6, %v12587_v53, %v6279_v40  ;;  %v6247_v53 = vsel %vm1642_vm3, %v12594_v12, %v6237_v6 }
0x1352   : > { %v12650_v29 = vpop.permute.xlu0 %6126 }
0x1353   : > { %v12652_v16 = vpop.permute.xlu1 %6238 }
0x1354   : > { %v6248_v63 = vsel %vm1642_vm3, %v6237_v6, %v12652_v16  ;;  %v6135_v6 = vsel %vm5399_vm8, %v12635_v7, %v12627_v55 }
0x1356   : > { %v6393_v43 = vpop.permute.xlu0 %6392 }
0x1357   : > { %v6401_v1 = vsel %vm13463_vm10, %v6391_v17, %v6393_v43  ;;  %v12655_v4 = vpop.permute.xlu1 %6166  ;;  %vm13470_vm10 = vcmp.lt.s32.totalorder %v12243_v8, 32 }
0x1358   : > { %8520 = vmatprep.subr.msk.mxu1 %vm5558_vm15, %v6401_v1  ;;  %v6176_v17 = vsel %vm2886_vm13, %v6165_v15, %v12655_v4 }
0x1359   : > { %8521 = vmatpush1.msk.msra.mxu1 %vm5557_vm0, %v6400_v24 }
0x135a   : > { %v6361_v49 = vpop.permute.xlu0 %6360 }
0x135b   : > { %v6369_v33 = vsel %vm5730_vm2, %v6359_v50, %v6361_v49  ;;  %v6241_v42 = vpop.permute.xlu1 %6240 }
0x135c   : > { %6586 = vmatprep.subr.mxu1 %v6369_v33 }
0x135d   : > { %6587 = vmatpush1.msra.mxu1 %v6368_v30 }
0x135e   : > { %v6321_v3 = vpop.permute.xlu0 %6320 }
0x135f   : > { %v6329_v44 = vsel %vm5689_vm4, %v6319_v34, %v6321_v3  ;;  %v6395_v62 = vpop.permute.xlu1 %6394 }
0x1360   : > { %8522 = vmatprep.subr.msk.mxu1 %vm13465_vm9, %v6329_v44  ;;  %v6402_v27 = vsel %vm13466_vm1, %v6393_v43, %v6395_v62  ;;  %v6411_v18 = vsel %vm13467_vm5, %v6395_v62, 0.0  ;;  %vm13472_vm9 = vcmask 252928   ;;  %vm13473_vm1 = vmmov %vm13468_vm11  ;;  %vm13474_vm5 = vcmp.ge.s32.totalorder %v12261_v28, 0 }
0x1361   : > { %8523 = vmatpush1.msk.msra.mxu1 %vm13468_vm11, %v6328_v37  ;;  %8533 = vmatprep.subr.msk.mxu0 %vm13469_vm12, %v6411_v18  ;;  %vm13475_vm11 = vmmov %vm13472_vm9  ;;  %vm13476_vm12 = vcmp.ge.s32.totalorder %v12266_v60, 0 }
0x1362   : > { %v6281_v51 = vpop.permute.xlu0 %6280  ;;  %8534 = vmatpush1.msk.msra.mxu0 %vm13470_vm10, %v6402_v27  ;;  %vm13477_vm10 = vcmp.lt.s32.totalorder %v12241_v20, 32 }
0x1363   : > { %v6289_v25 = vsel %vm4261_vm6, %v6279_v40, %v6281_v51  ;;  %v6323_v0 = vpop.permute.xlu1 %6322 }
0x1364   : > { %8524 = vmatprep.subr.msk.mxu1 %vm5558_vm15, %v6289_v25  ;;  %v6339_v56 = vsel %vm5689_vm4, %v6323_v0, 0.0  ;;  %v6330_v54 = vsel %vm5689_vm4, %v6321_v3, %v6323_v0 }
0x1365   : > { %8525 = vmatpush1.msk.msra.mxu1 %vm5557_vm0, %v6288_v9 }
0x1366   : > { %v6363_v35 = vpop.permute.xlu0 %6362  ;;  %6592 = vmatprep.subr.mxu1 %v12445_v31  ;;  %v6208_v31 = vsel %vm13472_vm9, %v12608_v19, %v12648_v39  ;;  %vm13479_vm9 = vcmp.ge.s32.totalorder %v12210_v10, 0 }
0x1367   : > { %v6370_v32 = vsel %vm5730_vm2, %v6361_v49, %v6363_v35  ;;  %6593 = vmatpush1.msra.mxu1 %v12410_v5  ;;  %8535 = vmatprep.subr.msk.mxu0 %vm5730_vm2, %v6363_v35  ;;  %v6207_v5 = vsel %vm13475_vm11, %v12603_v59, %v12608_v19  ;;  %v6175_v59 = vsel %vm2886_vm13, %v12617_v48, %v6165_v15  ;;  %v6201_v22 = vpop.permute.xlu1 %6200  ;;  %vm13480_vm11 = vmmov %vm13476_vm12 }
0x1368   : > { %8526 = vmatprep.subr.msk.mxu1 %vm13471_vm14, %v6248_v63  ;;  %6658 = vmatpush1.msra.mxu0 %v6370_v32  ;;  %v6136_v19 = vsel %vm5399_vm8, %v12627_v55, %v12650_v29  ;;  %vm13478_vm14 = vcmp.lt.s32.totalorder %v12243_v8, 32  ;;  %v6249_v15 = vsel %vm1642_vm3, %v12652_v16, %v6241_v42 }
0x1369   : > { %8527 = vmatpush1.msk.msra.mxu1 %vm13473_vm1, %v6247_v53  ;;  %8536 = vmatprep.subr.msk.mxu0 %vm13474_vm5, %v6339_v56 }
0x136a   : > { %v6283_v12 = vpop.permute.xlu0 %6282  ;;  %8528 = vmatprep.subr.msk.mxu1 %vm5558_vm15, %v6208_v31  ;;  %8537 = vmatpush1.msk.msra.mxu0 %vm13476_vm12, %v6330_v54  ;;  %vm13481_vm12 = vcmask 252928  }
0x136b   : > { %v6290_v38 = vsel %vm4261_vm6, %v6281_v51, %v6283_v12  ;;  %v6299_v36 = vsel %vm4261_vm6, %v6283_v12, 0.0  ;;  %8529 = vmatpush1.msk.msra.mxu1 %vm5557_vm0, %v6207_v5  ;;  %v6169_v55 = vpop.permute.xlu1 %6168 }
0x136c   : > { %6598 = vmatprep.subr.mxu1 %v6176_v17  ;;  %8538 = vmatprep.subr.msk.mxu0 %vm13477_vm10, %v6299_v36  ;;  %vm13482_vm10 = vmmov %vm13481_vm12  ;;  %v6177_v16 = vsel %vm2886_vm13, %v12655_v4, %v6169_v55 }
0x136d   : > { %6599 = vmatpush1.msra.mxu1 %v6175_v59  ;;  %8539 = vmatpush1.msk.msra.mxu0 %vm13478_vm14, %v6290_v38  ;;  %vm13483_vm14 = vcmp.lt.s32.totalorder %v12241_v20, 32  ;;  %v5076_v59 = vld [vmem:[%s9720_s12] sm:$0xf] }
0x136e   : > { %v6243_v50 = vpop.permute.xlu0 %6242  ;;  %8530 = vmatprep.subr.msk.mxu1 %vm13479_vm9, %v6136_v19  ;;  %6663 = vmatprep.subr.mxu0 %v12482_v52  ;;  %vm13484_vm9 = vcmp.lt.s32.totalorder %v12243_v8, 32 }
0x136f   : > { %v6250_v48 = vsel %vm1642_vm3, %v6241_v42, %v6243_v50  ;;  %8531 = vmatpush1.msk.msra.mxu1 %vm13473_vm1, %v6135_v6  ;;  %6664 = vmatpush1.msra.mxu0 %v12470_v2  ;;  %v6209_v2 = vsel %vm13482_vm10, %v12648_v39, %v6201_v22  ;;  %v6129_v43 = vpop.permute.xlu1 %6128  ;;  %vm13485_vm1 = vmmov %vm13474_vm5  ;;  %vm13490_vm10 = vcmp.lt.s32.totalorder %v12036_v21, 32 }
0x1370   : > { %8532 = vmatmul.mubr.msk.f32.vlgmr.msra.gmra.mxu1 %vm4734_vm7, %v12561_v14  ;;  %8540 = vmatprep.subr.msk.mxu0 %vm13474_vm5, %v6250_v48  ;;  %v6137_v39 = vsel %vm5399_vm8, %v12650_v29, %v6129_v43  ;;  %vm13486_vm5 = vmmov %vm13480_vm11 }
0x1371   : > { %8541 = vmatpush1.msk.msra.mxu0 %vm13480_vm11, %v6249_v15  ;;  %7229 = vmatprep.mubr.f32.mxu1 %v9539_v26 }
0x1372   : > { %v6203_v52 = vpop.permute.xlu0 %6202 }
0x1373   : > { %v6210_v7 = vsel %vm13481_vm12, %v6201_v22, %v6203_v52  ;;  %vm13489_vm12 = vcmp.lt.s32.totalorder %v12032_v46, 32 }
0x1374   : > { %8542 = vmatprep.subr.msk.mxu0 %vm13483_vm14, %v6210_v7  ;;  %v7458_v7 = vld [vmem:[%s9730_s30] sm:$0x7]  ;;  %vm13491_vm14 = vcmask 1043456  }
0x1375   : > { %8543 = vmatpush1.msk.msra.mxu0 %vm13484_vm9, %v6209_v2  ;;  %vm13492_vm9 = vmmov %vm13491_vm14 }
0x1376   : > { %v6171_v34 = vpop.permute.xlu0 %6170 }
0x1377   : > { %v6178_v40 = vsel %vm2886_vm13, %v6169_v55, %v6171_v34 }
0x1378   : > { %6669 = vmatprep.subr.mxu0 %v6178_v40 }
0x1379   : > { %6670 = vmatpush1.msra.mxu0 %v6177_v16 }
0x137a   : > { %v6131_v1 = vpop.permute.xlu0 %6130 }
0x137b   : > { %v6138_v24 = vsel %vm5399_vm8, %v6129_v43, %v6131_v1 }
0x137c   : > { %8544 = vmatprep.subr.msk.mxu0 %vm13485_vm1, %v6138_v24  ;;  %v12766_v4 = vpop.permute.xlu1 %6422  ;;  %vm13493_vm1 = vmmov %vm13489_vm12 }
0x137d   : > { %8545 = vmatpush1.msk.msra.mxu0 %vm13486_vm5, %v6137_v39  ;;  %vm13494_vm5 = vmmov %vm13490_vm10 }
0x137e   : > { %8546 = vmatmul.mubr.msk.f32.vlgmr.msra.gmra.mxu0 %vm4734_vm7, %v12561_v14  ;;  %vm13487_vm7 = vcmask 777216  }
0x137f   : > { %7371 = vmatprep.mubr.f32.mxu0 %v9539_v26  ;;  %vm13488_vm11 = vmmov %vm13487_vm7 }
0x13e7   : > { %v6494_v49 = vpop.f32.mrf.mxu1 }
0x13e8   : > { %v6495_v33 = vadd.f32 %v6494_v49, %v12766_v4 }
0x13e9   : > { %v6496_v14 = vpop.f32.mrf.mxu1 }
0x13ea   : > { %v12769_v42 = vmax.f32 %v6495_v33, 0.0  ;;  %v6497_v29 = vadd.f32 %v6496_v14, %v12766_v4 }
0x13ec   : > { %6978 = vrot.lane.b32.xlu1 %v12769_v42, %s9546_s4  ;;  %6953 = vrot.lane.b32.xlu0 %v12769_v42, %s9547_s16  ;;  %v12788_v30 = vmax.f32 %v6497_v29, 0.0 }
0x13f0   : > { %6913 = vrot.lane.b32.xlu1 %v12769_v42, %s9548_s28  ;;  %6873 = vrot.lane.b32.xlu0 %v12769_v42, %s13400_s1 }
0x13f4   : > { %6833 = vrot.lane.b32.xlu0 %v12769_v42, %s13396_s10 }
0x13f8   : > { %6793 = vrot.lane.b32.xlu0 %v12769_v42, %s9549_s3 }
0x13fc   : > { %6768 = vrot.lane.b32.xlu0 %v12769_v42, %s9550_s5 }
0x1400   : > { %6728 = vrot.lane.b32.xlu0 %v12769_v42, %s9551_s0 }
0x1404   : > { %6955 = vrot.lane.b32.xlu0 %v12788_v30, %s9547_s16 }
0x1406   : > { %v6565_v3 = vpop.f32.mrf.mxu0 }
0x1407   : > { %v6566_v44 = vadd.f32 %v6565_v3, %v12766_v4 }
0x1408   : > { %6980 = vrot.lane.b32.xlu0 %v12788_v30, %s9546_s4  ;;  %v6567_v37 = vpop.f32.mrf.mxu0 }
0x1409   : > { %v12795_v62 = vmax.f32 %v6566_v44, 0.0  ;;  %v6568_v27 = vadd.f32 %v6567_v37, %v12766_v4 }
0x140b   : > { %6957 = vrot.lane.b32.xlu1 %v12795_v62, %s9547_s16  ;;  %v12822_v18 = vmax.f32 %v6568_v27, 0.0 }
0x140c   : > { %6875 = vrot.lane.b32.xlu0 %v12788_v30, %s13400_s1 }
0x140f   : > { %6982 = vrot.lane.b32.xlu1 %v12795_v62, %s9546_s4 }
0x1410   : > { %6915 = vrot.lane.b32.xlu0 %v12788_v30, %s9548_s28 }
0x1413   : > { %6877 = vrot.lane.b32.xlu1 %v12795_v62, %s13400_s1 }
0x1414   : > { %6837 = vrot.lane.b32.xlu0 %v12795_v62, %s13396_s10 }
0x1417   : > { %6917 = vrot.lane.b32.xlu1 %v12795_v62, %s9548_s28 }
0x1418   : > { %6797 = vrot.lane.b32.xlu0 %v12795_v62, %s9549_s3 }
0x141b   : > { %6835 = vrot.lane.b32.xlu1 %v12788_v30, %s13396_s10 }
0x141c   : > { %6772 = vrot.lane.b32.xlu0 %v12795_v62, %s9550_s5 }
0x141f   : > { %6795 = vrot.lane.b32.xlu1 %v12788_v30, %s9549_s3 }
0x1420   : > { %6732 = vrot.lane.b32.xlu0 %v12795_v62, %s9551_s0 }
0x1423   : > { %6770 = vrot.lane.b32.xlu1 %v12788_v30, %s9550_s5 }
0x1424   : > { %6959 = vrot.lane.b32.xlu0 %v12822_v18, %s9547_s16 }
0x1427   : > { %6730 = vrot.lane.b32.xlu1 %v12788_v30, %s9551_s0 }
0x1428   : > { %6984 = vrot.lane.b32.xlu0 %v12822_v18, %s9546_s4 }
0x142b   : > { %6839 = vrot.lane.b32.xlu1 %v12822_v18, %s13396_s10 }
0x142c   : > { %6879 = vrot.lane.b32.xlu0 %v12822_v18, %s13400_s1 }
0x142f   : > { %6799 = vrot.lane.b32.xlu1 %v12822_v18, %s9549_s3 }
0x1430   : > { %v6636_v51 = vpop.f32.mrf.mxu1  ;;  %6919 = vrot.lane.b32.xlu0 %v12822_v18, %s9548_s28 }
0x1431   : > { %v6637_v25 = vadd.f32 %v6636_v51, %v12766_v4 }
0x1432   : > { %v6638_v0 = vpop.f32.mrf.mxu1 }
0x1433   : > { %v12841_v9 = vmax.f32 %v6637_v25, 0.0  ;;  %6774 = vrot.lane.b32.xlu1 %v12822_v18, %s9550_s5  ;;  %v6639_v35 = vadd.f32 %v6638_v0, %v12766_v4 }
0x1435   : > { %6841 = vrot.lane.b32.xlu0 %v12841_v9, %s13396_s10  ;;  %v12856_v32 = vmax.f32 %v6639_v35, 0.0 }
0x1437   : > { %6734 = vrot.lane.b32.xlu1 %v12822_v18, %s9551_s0 }
0x1439   : > { %6801 = vrot.lane.b32.xlu0 %v12841_v9, %s9549_s3 }
0x143b   : > { %6961 = vrot.lane.b32.xlu1 %v12841_v9, %s9547_s16 }
0x143d   : > { %6776 = vrot.lane.b32.xlu0 %v12841_v9, %s9550_s5 }
0x143e   : > { %v6707_v63 = vpop.f32.mrf.mxu0 }
0x143f   : > { %v6708_v53 = vadd.f32 %v6707_v63, %v12766_v4  ;;  %6986 = vrot.lane.b32.xlu1 %v12841_v9, %s9546_s4 }
0x1440   : > { %v6709_v31 = vpop.f32.mrf.mxu0 }
0x1441   : > { %6963 = vrot.lane.b32.xlu0 %v12856_v32, %s9547_s16  ;;  %v12863_v56 = vmax.f32 %v6708_v53, 0.0  ;;  %v6710_v54 = vadd.f32 %v6709_v31, %v12766_v4 }
0x1443   : > { %6881 = vrot.lane.b32.xlu1 %v12841_v9, %s13400_s1  ;;  %v12890_v5 = vmax.f32 %v6710_v54, 0.0 }
0x1445   : > { %6990 = vrot.lane.b32.xlu0 %v12863_v56, %s9546_s4 }
0x1447   : > { %6921 = vrot.lane.b32.xlu1 %v12841_v9, %s9548_s28 }
0x1449   : > { %6883 = vrot.lane.b32.xlu0 %v12856_v32, %s13400_s1 }
0x144b   : > { %6965 = vrot.lane.b32.xlu1 %v12863_v56, %s9547_s16 }
0x144d   : > { %6925 = vrot.lane.b32.xlu0 %v12863_v56, %s9548_s28 }
0x144f   : > { %6988 = vrot.lane.b32.xlu1 %v12856_v32, %s9546_s4 }
0x1451   : > { %6845 = vrot.lane.b32.xlu0 %v12863_v56, %s13396_s10 }
0x1453   : > { %6885 = vrot.lane.b32.xlu1 %v12863_v56, %s13400_s1 }
0x1455   : > { %6805 = vrot.lane.b32.xlu0 %v12863_v56, %s9549_s3 }
0x1457   : > { %6923 = vrot.lane.b32.xlu1 %v12856_v32, %s9548_s28 }
0x1459   : > { %6780 = vrot.lane.b32.xlu0 %v12863_v56, %s9550_s5 }
0x145b   : > { %6843 = vrot.lane.b32.xlu1 %v12856_v32, %s13396_s10 }
0x145d   : > { %6967 = vrot.lane.b32.xlu0 %v12890_v5, %s9547_s16 }
0x145e   : > { %v6954_v12 = vpop.permute.xlu0 %6953  ;;  %v6979_v6 = vpop.permute.xlu1 %6978 }
0x145f   : > { %6803 = vrot.lane.b32.xlu1 %v12856_v32, %s9549_s3 }
0x1461   : > { %6887 = vrot.lane.b32.xlu0 %v12890_v5, %s13400_s1 }
0x1462   : > { %v6874_v38 = vpop.permute.xlu0 %6873  ;;  %v6914_v48 = vpop.permute.xlu1 %6913 }
0x1463   : > { %6778 = vrot.lane.b32.xlu1 %v12856_v32, %s9550_s5 }
0x1465   : > { %6736 = vrot.lane.b32.xlu0 %v12841_v9, %s9551_s0 }
0x1466   : > { %v6834_v36 = vpop.permute.xlu0 %6833 }
0x1467   : > { %6992 = vrot.lane.b32.xlu1 %v12890_v5, %s9546_s4 }
0x1469   : > { %6740 = vrot.lane.b32.xlu0 %v12863_v56, %s9551_s0 }
0x146a   : > { %v12908_v17 = vpop.permute.xlu0 %6793 }
0x146b   : > { %6738 = vrot.lane.b32.xlu1 %v12856_v32, %s9551_s0 }
0x146d   : > { %7134 = vperm.xlu0 %9206, %v5076_v59  }
0x146e   : > { %v12913_v19 = vpop.permute.xlu0 %6768 }
0x146f   : > { %6927 = vrot.lane.b32.xlu1 %v12890_v5, %s9548_s28 }
0x1472   : > { %v12917_v22 = vpop.permute.xlu0 %6728 }
0x1473   : > { %6847 = vrot.lane.b32.xlu1 %v12890_v5, %s13396_s10  ;;  %s1269_s10 = scalar_lea.vmem %s9735_s14, %s10032_s2 }
0x1476   : > { %v6956_v50 = vpop.permute.xlu0 %6955 }
0x1477   : > { %6807 = vrot.lane.b32.xlu1 %v12890_v5, %s9549_s3  ;;  %v6969_v3 = vsel %vm5730_vm2, %v6954_v12, %v6956_v50  ;;  %v6864_v12 = vsel %vm1642_vm3, 0.0, %v6834_v36 }
0x1478   : > { %v7084_v63 = vrot.slane %v6969_v3, 4 }
0x147a   : > { %v6981_v15 = vpop.permute.xlu0 %6980 }
0x147b   : > { %6782 = vrot.lane.b32.xlu1 %v12890_v5, %s9550_s5  ;;  %v6994_v2 = vsel %vm13487_vm7, %v6979_v6, %v6981_v15  ;;  %vm13495_vm7 = vcmp.ge.s32.totalorder %v12042_v23, 0 }
0x147c   : > { %v7010_v1 = vsel %vm13490_vm10, %v6994_v2, 0.0  ;;  %vm13498_vm10 = vmmov %vm13492_vm9  ;;  %v6865_v2 = vsel %vm13495_vm7, %v6864_v12, 0.0 }
0x147d   : > { %v12925_v52 = vpop.permute.xlu1 %6957 }
0x147e   : > { %v6876_v55 = vpop.permute.xlu0 %6875  ;;  %v6970_v33 = vsel %vm5730_vm2, %v6956_v50, %v12925_v52 }
0x147f   : > { %6742 = vrot.lane.b32.xlu1 %v12890_v5, %s9551_s0  ;;  %v6889_v24 = vsel %vm4261_vm6, %v6874_v38, %v6876_v55  ;;  %v7085_v27 = vrot.slane %v6970_v33, 4 }
0x1480   : > { %v6905_v44 = vsel %vm13494_vm5, %v6889_v24, 0.0  ;;  %vm13502_vm5 = vmmov %vm13498_vm10 }
0x1481   : > { %v12931_v34 = vpop.permute.xlu1 %6982  ;;  %v7067_v53 = vrot.slane %v6905_v44, 4 }
0x1482   : > { %v6995_v40 = vsel %vm13488_vm11, %v6981_v15, %v12931_v34  ;;  %v6916_v16 = vpop.permute.xlu0 %6915  ;;  %vm13496_vm11 = vcmp.ge.s32.totalorder %v12039_v61, 0 }
0x1483   : > { %v7011_v43 = vsel %vm13489_vm12, %v6995_v40, 0.0  ;;  %7461 = vperm.xlu1 %9207, %v7458_v7   ;;  %v6929_v14 = vsel %vm5689_vm4, %v6914_v48, %v6916_v16  ;;  %vm13497_vm12 = vmmov %vm13492_vm9  ;;  %v7116_v7 = vsel %vm13502_vm5, %v12769_v42, %v7067_v53  ;;  %v13011_v53 = vld [vmem:[#allocation13] sm:$0xf] }
0x1484   : > { %8547 = vmatprep.subr.msk.mxu1 %vm13491_vm14, %v7011_v43  ;;  %v6945_v51 = vsel %vm13495_vm7, %v6929_v14, 0.0  ;;  %vm13499_vm14 = vmmov %vm13492_vm9  ;;  %v6759_v14 = vsel %vm5399_vm8, 0.0, %v12917_v22 }
0x1485   : > { %v12941_v39 = vpop.permute.xlu1 %6877  ;;  %8548 = vmatpush1.msk.msra.mxu1 %vm13492_vm9, %v7010_v1  ;;  %v7124_v59 = vsel %vm13498_vm10, %v6945_v51, %v7084_v63  ;;  %vm13500_vm9 = vcmask 252928   ;;  %v7043_v1 = vrot.slane %v6865_v2, 4  ;;  %vm13505_vm10 = vcmp.lt.s32.totalorder %v12032_v46, 32 }
0x1486   : > { %v6890_v4 = vsel %vm4261_vm6, %v6876_v55, %v12941_v39  ;;  %v12946_v49 = vpop.permute.xlu0 %6837  ;;  %v6824_v15 = vsel %vm13500_vm9, 0.0, %v12908_v17  ;;  %v6792_v46 = vsel %vm2886_vm13, 0.0, %v12913_v19 }
0x1487   : > { %v6906_v29 = vsel %vm13493_vm1, %v6890_v4, 0.0  ;;  %vm13501_vm1 = vmmov %vm13496_vm11 }
0x1488   : > { %v7068_v25 = vrot.slane %v6906_v29, 4 }
0x1489   : > { %v12956_v37 = vpop.permute.xlu1 %6917 }
0x148a   : > { %v6930_v0 = vsel %vm5689_vm4, %v6916_v16, %v12956_v37  ;;  %v12962_v35 = vpop.permute.xlu0 %6797  ;;  %v7117_v50 = vsel %vm13499_vm14, %v12788_v30, %v7068_v25  ;;  %vm13506_vm14 = vmmov %vm13502_vm5  ;;  %v7019_v25 = vrot.slane %v6792_v46, 4 }
0x148b   : > { %v6946_v31 = vsel %vm13496_vm11, %v6930_v0, 0.0  ;;  %vm13503_vm11 = vcmp.lt.s32.totalorder %v12036_v21, 32 }
0x148c   : > { %v7125_v54 = vsel %vm13497_vm12, %v6946_v31, %v7085_v27  ;;  %v6825_v30 = vsel %vm13503_vm11, %v6824_v15, 0.0  ;;  %vm13504_vm12 = vmmov %vm13500_vm9  ;;  %vm7137_vm11 = vcmask 293888  }
0x148d   : > { %v12968_v38 = vpop.permute.xlu1 %6835  ;;  %7189 = vmatprep.subr.mxu1 %v7125_v54  ;;  %vm13507_vm9 = vmmov %vm13502_vm5  ;;  %vm13509_vm5 = vcmp.ge.s32.totalorder %v12039_v61, 0 }
0x148e   : > { %v6849_v6 = vsel %vm1642_vm3, %v6834_v36, %v12968_v38  ;;  %7190 = vmatpush1.msra.mxu1 %v7124_v59  ;;  %v12975_v48 = vpop.permute.xlu0 %6772  ;;  %v7108_v33 = vsel %vm13507_vm9, %v6825_v30, %v7043_v1 }
0x148f   : > { %v6866_v55 = vsel %vm13501_vm1, %v6849_v6, 0.0  ;;  %7191 = vmatprep.subr.mxu1 %v7117_v50  ;;  %vm13508_vm1 = vmmov %vm13495_vm7 }
0x1490   : > { %7192 = vmatpush1.msra.mxu1 %v7116_v7  ;;  %v7044_v40 = vrot.slane %v6866_v55, 4  ;;  %v6760_v3 = vsel %vm13508_vm1, %v6759_v14, 0.0  ;;  %vm13510_vm7 = vmmov %vm13507_vm9  ;;  %vm13514_vm9 = vcmp.lt.s32.totalorder %v12083_v41, 32  ;;  %vm13515_vm1 = vcmp.lt.s32.totalorder %v12092_v13, 32 }
0x1491   : > { %v6796_v36 = vpop.permute.xlu1 %6795 }
0x1492   : > { %v6809_v16 = vsel %vm13504_vm12, %v12908_v17, %v6796_v36  ;;  %v12989_v43 = vpop.permute.xlu0 %6732  ;;  %vm13511_vm12 = vmmov %vm13510_vm7 }
0x1493   : > { %v6826_v24 = vsel %vm13505_vm10, %v6809_v16, 0.0  ;;  %v7100_v23 = vsel %vm13511_vm12, %v6760_v3, %v7019_v25  ;;  %vm13512_vm10 = vcmask 777216   ;;  %vm13518_vm12 = vmmov %vm13514_vm9 }
0x1494   : > { %v7109_v42 = vsel %vm13506_vm14, %v6826_v24, %v7044_v40  ;;  %vm13513_vm14 = vmmov %vm13512_vm10 }
0x1495   : > { %v12994_v4 = vpop.permute.xlu1 %6770  ;;  %7193 = vmatprep.subr.mxu1 %v7109_v42 }
0x1496   : > { %7194 = vmatpush1.msra.mxu1 %v7108_v33  ;;  %v6960_v21 = vpop.permute.xlu0 %6959  ;;  %v6784_v17 = vsel %vm2886_vm13, %v12913_v19, %v12994_v4 }
0x1497   : > { %v7020_v44 = vrot.slane %v6784_v17, 4  ;;  %v6971_v46 = vsel %vm5730_vm2, %v12925_v52, %v6960_v21 }
0x1499   : > { %v6731_v29 = vpop.permute.xlu1 %6730 }
0x149a   : > { %v6744_v27 = vsel %vm5399_vm8, %v12917_v22, %v6731_v29  ;;  %v6985_v51 = vpop.permute.xlu0 %6984 }
0x149b   : > { %v6761_v0 = vsel %vm13509_vm5, %v6744_v27, 0.0  ;;  %v6996_v55 = vsel %vm13512_vm10, %v12931_v34, %v6985_v51  ;;  %vm13516_vm5 = vmmov %vm13510_vm7 }
0x149c   : > { %v7101_v63 = vsel %vm13510_vm7, %v6761_v0, %v7020_v44  ;;  %v7012_v16 = vsel %vm13515_vm1, %v6996_v55, 0.0  ;;  %vm13517_vm7 = vmmov %vm13516_vm5 }
0x149d   : > { %v13013_v31 = vpop.permute.xlu1 %6839  ;;  %7195 = vmatprep.subr.mxu1 %v7101_v63  ;;  %vm13519_vm10 = vmmov %vm13515_vm1  ;;  %vm13522_vm1 = vcmp.ge.s32.totalorder %v12135_v45, 0  ;;  %v7086_v63 = vrot.slane %v6971_v46, 4 }
0x149e   : > { %7196 = vmatpush1.msra.mxu1 %v7100_v23  ;;  %v6880_v19 = vpop.permute.xlu0 %6879 }
0x149f   : > { %8549 = vmatmul.mubr.msk.f32.vlgmr.msra.gmra.mxu1 %vm7137_vm11, %v13011_v53  ;;  %v6891_v1 = vsel %vm4261_vm6, %v12941_v39, %v6880_v19  ;;  %v6851_v39 = vsel %vm1642_vm3, %v12946_v49, %v13013_v31 }
0x14a0   : > { %7300 = vmatprep.mubr.f32.mxu1 %v9539_v26  ;;  %v6907_v3 = vsel %vm13519_vm10, %v6891_v1, 0.0  ;;  %vm13526_vm10 = vcmask 1043456  }
0x14a1   : > { %v13019_v22 = vpop.permute.xlu1 %6799 }
0x14a2   : > { %v6920_v61 = vpop.permute.xlu0 %6919 }
0x14a3   : > { %v6931_v42 = vsel %vm5689_vm4, %v12956_v37, %v6920_v61  ;;  %v6850_v37 = vsel %vm1642_vm3, %v12968_v38, %v12946_v49  ;;  %v7069_v38 = vrot.slane %v6907_v3, 4 }
0x14a4   : > { %v6947_v52 = vsel %vm13522_vm1, %v6931_v42, 0.0  ;;  %v6785_v42 = vsel %vm2886_vm13, %v12994_v4, %v12975_v48 }
0x14a5   : > { %v13021_v54 = vpop.permute.xlu1 %6774  ;;  %v7021_v4 = vrot.slane %v6785_v42, 4 }
0x14a7   : > { %v13023_v12 = vpop.permute.xlu0 %6841 }
0x14a9   : > { %v13025_v59 = vpop.permute.xlu1 %6734 }
0x14ab   : > { %v13027_v6 = vpop.permute.xlu0 %6801 }
0x14ad   : > { %v13029_v50 = vpop.permute.xlu1 %6961 }
0x14ae   : > { %v6972_v33 = vsel %vm5730_vm2, %v6960_v21, %v13029_v50 }
0x14af   : > { %v13031_v15 = vpop.permute.xlu0 %6776  ;;  %v7087_v21 = vrot.slane %v6972_v33, 4 }
0x14b1   : > { %v6987_v7 = vpop.permute.xlu1 %6986 }
0x14b2   : > { %v6997_v2 = vsel %vm13513_vm14, %v6985_v51, %v6987_v7  ;;  %vm13520_vm14 = vcmask 252928  }
0x14b3   : > { %v7013_v30 = vsel %vm13514_vm9, %v6997_v2, 0.0  ;;  %v13038_v40 = vpop.permute.xlu0 %6963  ;;  %v6810_v44 = vsel %vm13520_vm14, %v6796_v36, %v12962_v35  ;;  %vm13521_vm9 = vmmov %vm13520_vm14  ;;  %vm13527_vm14 = vcmp.lt.s32.totalorder %v12083_v41, 32 }
0x14b4   : > { %8550 = vmatprep.subr.msk.mxu1 %vm13516_vm5, %v7013_v30  ;;  %v6811_v27 = vsel %vm13521_vm9, %v12962_v35, %v13019_v22  ;;  %vm13523_vm5 = vcmp.ge.s32.totalorder %v12133_v58, 0  ;;  %v6786_v30 = vsel %vm2886_vm13, %v12975_v48, %v13021_v54  ;;  %vm13528_vm9 = vmmov %vm13526_vm10 }
0x14b5   : > { %v6882_v24 = vpop.permute.xlu1 %6881  ;;  %8551 = vmatpush1.msk.msra.mxu1 %vm13517_vm7, %v7012_v16  ;;  %v6868_v49 = vsel %vm13523_vm5, %v6851_v39, 0.0  ;;  %vm13524_vm7 = vmmov %vm13523_vm5  ;;  %v6828_v2 = vsel %vm13527_vm14, %v6811_v27, 0.0  ;;  %v7126_v1 = vsel %vm13528_vm9, %v6947_v52, %v7086_v63  ;;  %v7022_v39 = vrot.slane %v6786_v30, 4 }
0x14b6   : > { %v6892_v34 = vsel %vm4261_vm6, %v6880_v19, %v6882_v24  ;;  %v6746_v19 = vsel %vm5399_vm8, %v12989_v43, %v13025_v59  ;;  %vm13530_vm5 = vmmov %vm13528_vm9 }
0x14b7   : > { %v6908_v14 = vsel %vm13518_vm12, %v6892_v34, 0.0  ;;  %v13053_v17 = vpop.permute.xlu0 %6990  ;;  %vm13525_vm12 = vmmov %vm13522_vm1  ;;  %vm13529_vm1 = vcmp.lt.s32.totalorder %v12092_v13, 32  ;;  %v6763_v33 = vsel %vm13524_vm7, %v6746_v19, 0.0 }
0x14b8   : > { %v7070_v25 = vrot.slane %v6908_v14, 4  ;;  %v6867_v35 = vsel %vm13525_vm12, %v6850_v37, 0.0  ;;  %v6827_v34 = vsel %vm13529_vm1, %v6810_v44, 0.0  ;;  %vm13531_vm12 = vmmov %vm13530_vm5  ;;  %vm13535_vm1 = vcmask 777216  }
0x14b9   : > { %v13070_v51 = vpop.permute.xlu1 %6921  ;;  %v7118_v13 = vsel %vm13531_vm12, %v12795_v62, %v7069_v38  ;;  %vm13533_vm14 = vmmov %vm13530_vm5 }
0x14ba   : > { %v6932_v0 = vsel %vm5689_vm4, %v6920_v61, %v13070_v51  ;;  %v6745_v61 = vsel %vm5399_vm8, %v6731_v29, %v12989_v43  ;;  %v7046_v43 = vrot.slane %v6868_v49, 4  ;;  %v7119_v41 = vsel %vm13530_vm5, %v12822_v18, %v7070_v25  ;;  %vm13534_vm9 = vmmov %vm13530_vm5 }
0x14bb   : > { %v6948_v36 = vsel %vm13524_vm7, %v6932_v0, 0.0  ;;  %v6884_v23 = vpop.permute.xlu0 %6883  ;;  %v7045_v29 = vrot.slane %v6867_v35, 4  ;;  %vm13536_vm5 = vmmov %vm13535_vm1  ;;  %v6973_v25 = vsel %vm5730_vm2, %v13029_v50, %v13038_v40 }
0x14bc   : > { %v7127_v55 = vsel %vm13526_vm10, %v6948_v36, %v7087_v21  ;;  %vm13532_vm10 = vcmp.ge.s32.totalorder %v12135_v45, 0  ;;  %v7111_v48 = vsel %vm13533_vm14, %v6828_v2, %v7046_v43  ;;  %vm13537_vm7 = vmmov %vm13534_vm9  ;;  %v7088_v36 = vrot.slane %v6973_v25, 4 }
0x14bd   : > { %v13093_v16 = vpop.permute.xlu1 %6965  ;;  %7260 = vmatprep.subr.mxu1 %v7127_v55  ;;  %v6762_v46 = vsel %vm13532_vm10, %v6745_v61, 0.0  ;;  %v7110_v18 = vsel %vm13534_vm9, %v6827_v34, %v7045_v29  ;;  %v7103_v62 = vsel %vm13537_vm7, %v6763_v33, %v7022_v39  ;;  %vm13538_vm12 = vmmov %vm13537_vm7  ;;  %vm13541_vm9 = vcmp.ge.s32.totalorder %v12216_v11, 0 }
0x14be   : > { %7261 = vmatpush1.msra.mxu1 %v7126_v1  ;;  %v7102_v52 = vsel %vm13538_vm12, %v6762_v46, %v7021_v4  ;;  %vm13539_vm10 = vmmov %vm13537_vm7  ;;  %v6974_v63 = vsel %vm5730_vm2, %v13038_v40, %v13093_v16 }
0x14bf   : > { %7262 = vmatprep.subr.mxu1 %v7119_v41  ;;  %v13105_v14 = vpop.permute.xlu0 %6925  ;;  %vm13540_vm14 = vmmov %vm13537_vm7  ;;  %v7089_v19 = vrot.slane %v6974_v63, 4 }
0x14c0   : > { %7263 = vmatpush1.msra.mxu1 %v7118_v13 }
0x14c1   : > { %v6989_v3 = vpop.permute.xlu1 %6988  ;;  %7264 = vmatprep.subr.mxu1 %v7111_v48 }
0x14c2   : > { %v6998_v58 = vsel %vm13535_vm1, %v6987_v7, %v6989_v3  ;;  %v6999_v37 = vsel %vm13536_vm5, %v6989_v3, %v13053_v17  ;;  %7265 = vmatpush1.msra.mxu1 %v7110_v18  ;;  %v6893_v7 = vsel %vm4261_vm6, %v6882_v24, %v6884_v23  ;;  %vm13542_vm1 = vcmp.ge.s32.totalorder %v12210_v10, 0  ;;  %vm13543_vm5 = vmmov %vm13537_vm7 }
0x14c3   : > { %v7014_v45 = vsel %vm5557_vm0, %v6998_v58, 0.0  ;;  %v7015_v44 = vsel %vm5558_vm15, %v6999_v37, 0.0  ;;  %7266 = vmatprep.subr.mxu1 %v7103_v62  ;;  %v13121_v27 = vpop.permute.xlu0 %6845  ;;  %v6909_v38 = vsel %vm5557_vm0, %v6893_v7, 0.0  ;;  %vm13544_vm7 = vmmov %vm13543_vm5  ;;  %v6787_v7 = vsel %vm2886_vm13, %v13021_v54, %v13031_v15 }
0x14c4   : > { %7267 = vmatpush1.msra.mxu1 %v7102_v52  ;;  %8553 = vmatprep.subr.msk.mxu0 %vm13539_vm10, %v7015_v44  ;;  %v7071_v61 = vrot.slane %v6909_v38, 4  ;;  %vm13545_vm12 = vmmov %vm13543_vm5  ;;  %vm13546_vm10 = vcmask 252928  }
0x14c5   : > { %v6886_v21 = vpop.permute.xlu1 %6885  ;;  %8552 = vmatmul.mubr.msk.f32.vlgmr.msra.gmra.mxu1 %vm7137_vm11, %v13011_v53  ;;  %8554 = vmatpush1.msk.msra.mxu0 %vm13540_vm14, %v7014_v45  ;;  %v6812_v29 = vsel %vm13546_vm10, %v13019_v22, %v13027_v6  ;;  %vm13547_vm14 = vmmov %vm13542_vm1 }
0x14c6   : > { %v6894_v0 = vsel %vm4261_vm6, %v6884_v23, %v6886_v21  ;;  %7442 = vmatprep.mubr.f32.mxu1 %v9539_v26 }
0x14c7   : > { %v6910_v24 = vsel %vm5558_vm15, %v6894_v0, 0.0  ;;  %v13139_v49 = vpop.permute.xlu0 %6805 }
0x14c8   : > { %v7072_v50 = vrot.slane %v6910_v24, 4 }
0x14c9   : > { %v6924_v35 = vpop.permute.xlu1 %6923 }
0x14ca   : > { %v6933_v23 = vsel %vm5689_vm4, %v13070_v51, %v6924_v35  ;;  %v6934_v55 = vsel %vm5689_vm4, %v6924_v35, %v13105_v14  ;;  %v6852_v51 = vsel %vm1642_vm3, %v13013_v31, %v13023_v12  ;;  %v7121_v41 = vsel %vm13545_vm12, %v12856_v32, %v7072_v50  ;;  %vm13551_vm12 = vmmov %vm13544_vm7 }
0x14cb   : > { %v6949_v40 = vsel %vm13541_vm9, %v6933_v23, 0.0  ;;  %v6950_v2 = vsel %vm13542_vm1, %v6934_v55, 0.0  ;;  %v13151_v30 = vpop.permute.xlu0 %6780  ;;  %vm13548_vm9 = vmmov %vm13543_vm5  ;;  %vm13549_vm1 = vcmp.ge.s32.totalorder %v12216_v11, 0  ;;  %v6829_v32 = vsel %vm5557_vm0, %v6812_v29, 0.0 }
0x14cc   : > { %v7129_v1 = vsel %vm13543_vm5, %v6950_v2, %v7089_v19  ;;  %v7128_v34 = vsel %vm13544_vm7, %v6949_v40, %v7088_v36  ;;  %v7120_v13 = vsel %vm13548_vm9, %v12841_v9, %v7071_v61  ;;  %v6869_v46 = vsel %vm13549_vm1, %v6852_v51, 0.0  ;;  %vm13550_vm5 = vmmov %vm13546_vm10 }
0x14cd   : > { %v13158_v42 = vpop.permute.xlu1 %6843  ;;  %7331 = vmatprep.subr.mxu0 %v7129_v1  ;;  %v7047_v48 = vrot.slane %v6869_v46, 4  ;;  %vm13552_vm0 = vcmask 777216   ;;  %vm13556_vm9 = vmmov %vm13544_vm7  ;;  %v7023_v36 = vrot.slane %v6787_v7, 4 }
0x14ce   : > { %v6853_v43 = vsel %vm1642_vm3, %v13023_v12, %v13158_v42  ;;  %7332 = vmatpush1.msra.mxu0 %v7128_v34  ;;  %vm13553_vm10 = vmmov %vm13552_vm0 }
0x14cf   : > { %v6870_v33 = vsel %vm13547_vm14, %v6853_v43, 0.0  ;;  %7333 = vmatprep.subr.mxu0 %v7121_v41  ;;  %v6968_v31 = vpop.permute.xlu0 %6967  ;;  %v7112_v58 = vsel %vm13551_vm12, %v6829_v32, %v7047_v48  ;;  %vm13555_vm14 = vcmp.lt.s32.totalorder %v12241_v20, 32  ;;  %vm13557_vm1 = vmmov %vm13544_vm7 }
0x14d0   : > { %7334 = vmatpush1.msra.mxu0 %v7120_v13  ;;  %v7048_v39 = vrot.slane %v6870_v33, 4  ;;  %v6977_v54 = vsel %vm5730_vm2, %v6968_v31, 0.0 }
0x14d1   : > { %v6804_v12 = vpop.permute.xlu1 %6803  ;;  %v7091_v23 = vrot.slane %v6977_v54, 4 }
0x14d2   : > { %v6813_v22 = vsel %vm13550_vm5, %v13027_v6, %v6804_v12  ;;  %vm13558_vm5 = vcmp.ge.s32.totalorder %v12216_v11, 0 }
0x14d3   : > { %v6830_v4 = vsel %vm5558_vm15, %v6813_v22, 0.0  ;;  %v6888_v3 = vpop.permute.xlu0 %6887  ;;  %vm13554_vm15 = vcmp.lt.s32.totalorder %v12243_v8, 32 }
0x14d4   : > { %v7113_v18 = vsel %vm13544_vm7, %v6830_v4, %v7048_v39  ;;  %v6895_v25 = vsel %vm4261_vm6, %v6886_v21, %v6888_v3  ;;  %vm13559_vm7 = vmmov %vm13555_vm14 }
0x14d5   : > { %v13181_v9 = vpop.permute.xlu1 %6778  ;;  %7335 = vmatprep.subr.mxu0 %v7113_v18  ;;  %vm13561_vm12 = vmmov %vm13554_vm15 }
0x14d6   : > { %7336 = vmatpush1.msra.mxu0 %v7112_v58  ;;  %v6788_v47 = vsel %vm2886_vm13, %v13031_v15, %v13181_v9  ;;  %v6911_v35 = vsel %vm13561_vm12, %v6895_v25, 0.0 }
0x14d7   : > { %v6737_v37 = vpop.permute.xlu0 %6736  ;;  %v7024_v63 = vrot.slane %v6788_v47, 4 }
0x14d8   : > { %v6747_v45 = vsel %vm5399_vm8, %v13025_v59, %v6737_v37  ;;  %v6975_v59 = vsel %vm5730_vm2, %v13093_v16, %v6968_v31  ;;  %vm13564_vm2 = vcmp.ge.s32.totalorder %v12266_v60, 0 }
0x14d9   : > { %v6993_v57 = vpop.permute.xlu1 %6992  ;;  %v6764_v24 = vsel %vm13558_vm5, %v6747_v45, 0.0  ;;  %v7090_v19 = vrot.slane %v6975_v59, 4 }
0x14da   : > { %v7000_v62 = vsel %vm13552_vm0, %v13053_v17, %v6993_v57  ;;  %v7009_v6 = vsel %vm13553_vm10, %v6993_v57, 0.0  ;;  %v6904_v17 = vsel %vm4261_vm6, %v6888_v3, 0.0  ;;  %vm13560_vm6 = vcmp.ge.s32.totalorder %v12210_v10, 0  ;;  %vm13562_vm0 = vmmov %vm13557_vm1 }
0x14db   : > { %v7016_v44 = vsel %vm13554_vm15, %v7000_v62, 0.0  ;;  %v7017_v52 = vsel %vm13555_vm14, %v7009_v6, 0.0  ;;  %v6912_v15 = vsel %vm13559_vm7, %v6904_v17, 0.0  ;;  %vm13563_vm10 = vmmov %vm13562_vm0  ;;  %v7073_v10 = vrot.slane %v6911_v35, 4  ;;  %v6741_v4 = vpop.permute.xlu0 %6740 }
0x14dc   : > { %8556 = vmatprep.subr.msk.mxu1 %vm13556_vm9, %v7017_v52  ;;  %v7104_v11 = vsel %vm13563_vm10, %v6764_v24, %v7023_v36  ;;  %v7074_v55 = vrot.slane %v6912_v15, 4  ;;  %vm13565_vm15 = vcmp.ge.s32.totalorder %v12261_v28, 0  ;;  %vm13566_vm14 = vmmov %vm13562_vm0  ;;  %v7457_v28 = vld [vmem:[#allocation15] sm:$0x7] }
0x14dd   : > { %v6739_v0 = vpop.permute.xlu1 %6738  ;;  %8557 = vmatpush1.msk.msra.mxu1 %vm13557_vm1, %v7016_v44  ;;  %vm13567_vm9 = vmmov %vm13562_vm0  ;;  %vm13569_vm1 = vcmask 252928  }
0x14de   : > { %v6748_v38 = vsel %vm5399_vm8, %v6737_v37, %v6739_v0  ;;  %v6814_v33 = vsel %vm13569_vm1, %v6804_v12, %v13139_v49  ;;  %vm13570_vm5 = vmmov %vm13565_vm15  ;;  %v6749_v3 = vsel %vm5399_vm8, %v6739_v0, %v6741_v4 }
0x14df   : > { %v6765_v21 = vsel %vm13560_vm6, %v6748_v38, 0.0  ;;  %vm13571_vm7 = vmmov %vm13562_vm0 }
0x14e0   : > { %v7105_v16 = vsel %vm13562_vm0, %v6765_v21, %v7024_v63  ;;  %v7122_v13 = vsel %vm13571_vm7, %v12863_v56, %v7073_v10  ;;  %vm13572_vm6 = vmmov %vm13564_vm2 }
0x14e1   : > { %v6928_v50 = vpop.permute.xlu1 %6927  ;;  %7337 = vmatprep.subr.mxu0 %v7105_v16 }
0x14e2   : > { %v6935_v61 = vsel %vm5689_vm4, %v13105_v14, %v6928_v50  ;;  %v6944_v40 = vsel %vm5689_vm4, %v6928_v50, 0.0  ;;  %7338 = vmatpush1.msra.mxu0 %v7104_v11  ;;  %v6854_v14 = vsel %vm1642_vm3, %v13158_v42, %v13121_v27  ;;  %vm13568_vm4 = vmmov %vm13562_vm0  ;;  %vm13575_vm0 = vcmp.lt.s32.totalorder %v12241_v20, 32 }
0x14e3   : > { %v6951_v2 = vsel %vm13564_vm2, %v6935_v61, 0.0  ;;  %v6952_v1 = vsel %vm13565_vm15, %v6944_v40, 0.0  ;;  %8555 = vmatmul.mubr.msk.f32.vlgmr.msra.gmra.mxu0 %vm7137_vm11, %v13011_v53  ;;  %v7123_v29 = vsel %vm13568_vm4, %v12890_v5, %v7074_v55  ;;  %v6871_v42 = vsel %vm13572_vm6, %v6854_v14, 0.0  ;;  %vm13576_vm10 = vmmov %vm13568_vm4 }
0x14e4   : > { %v7131_v34 = vsel %vm13566_vm14, %v6952_v1, %v7091_v23  ;;  %v7130_v51 = vsel %vm13567_vm9, %v6951_v2, %v7090_v19  ;;  %7555 = vmatprep.mubr.f32.mxu0 %v9539_v26  ;;  %v7049_v12 = vrot.slane %v6871_v42, 4  ;;  %vm13577_vm2 = vmmov %vm13568_vm4 }
0x14e5   : > { %v6848_v43 = vpop.permute.xlu1 %6847  ;;  %7402 = vmatprep.subr.mxu1 %v7131_v34  ;;  %vm13578_vm15 = vmmov %vm13572_vm6 }
0x14e6   : > { %v6855_v41 = vsel %vm1642_vm3, %v13121_v27, %v6848_v43  ;;  %7403 = vmatpush1.msra.mxu1 %v7130_v51  ;;  %vm13573_vm3 = vmmov %vm13561_vm12  ;;  %v6766_v20 = vsel %vm13578_vm15, %v6749_v3, 0.0 }
0x14e7   : > { %v6872_v31 = vsel %vm13570_vm5, %v6855_v41, 0.0  ;;  %7404 = vmatprep.subr.mxu1 %v7123_v29  ;;  %v6831_v27 = vsel %vm13573_vm3, %v6814_v33, 0.0  ;;  %vm13574_vm12 = vmmov %vm13569_vm1  ;;  %vm13584_vm1 = vcmask 31744  }
0x14e8   : > { %7405 = vmatpush1.msra.mxu1 %v7122_v13  ;;  %v7050_v32 = vrot.slane %v6872_v31, 4  ;;  %v7114_v56 = vsel %vm13577_vm2, %v6831_v27, %v7049_v12  ;;  %vm13579_vm14 = vmmov %vm13570_vm5 }
0x14e9   : > { %v6808_v46 = vpop.permute.xlu1 %6807  ;;  %vm13580_vm9 = vmmov %vm13577_vm2 }
0x14ea   : > { %v6815_v5 = vsel %vm13574_vm12, %v13139_v49, %v6808_v46  ;;  %v6789_v49 = vsel %vm2886_vm13, %v13181_v9, %v13151_v30  ;;  %vm13581_vm4 = vmmov %vm13577_vm2 }
0x14eb   : > { %v6832_v39 = vsel %vm13575_vm0, %v6815_v5, 0.0  ;;  %v7025_v57 = vrot.slane %v6789_v49, 4  ;;  %vm13586_vm5 = vmmov %vm13577_vm2 }
0x14ec   : > { %v7115_v22 = vsel %vm13576_vm10, %v6832_v39, %v7050_v32  ;;  %vm13587_vm7 = vmmov %vm13584_vm1 }
0x14ed   : > { %v6783_v48 = vpop.permute.xlu1 %6782  ;;  %7406 = vmatprep.subr.mxu1 %v7115_v22  ;;  %v7106_v47 = vsel %vm13581_vm4, %v6766_v20, %v7025_v57  ;;  %vm13588_vm6 = vmmov %vm13577_vm2 }
0x14ee   : > { %7407 = vmatpush1.msra.mxu1 %v7114_v56  ;;  %v6790_v8 = vsel %vm2886_vm13, %v13151_v30, %v6783_v48  ;;  %v7135_v30 = vpop.permute.xlu0 %7134  ;;  %vm13582_vm13 = vmmov %vm13577_vm2 }
0x14ef   : > { %v7026_v58 = vrot.slane %v6790_v8, 4  ;;  %vm13589_vm3 = vmmov %vm13577_vm2 }
0x14f0   : > { %vm13590_vm12 = vmmov %vm13584_vm1 }
0x14f1   : > { %v6743_v18 = vpop.permute.xlu1 %6742  ;;  %vm13591_vm0 = vmmov %vm13577_vm2 }
0x14f2   : > { %v6750_v37 = vsel %vm5399_vm8, %v6741_v4, %v6743_v18  ;;  %vm13583_vm8 = vmmov %vm13577_vm2 }
0x14f3   : > { %v6767_v62 = vsel %vm13579_vm14, %v6750_v37, 0.0  ;;  %vm13592_vm10 = vmmov %vm13591_vm0 }
0x14f4   : > { %v7107_v6 = vsel %vm13580_vm9, %v6767_v62, %v7026_v58 }
0x14f5   : > { %7408 = vmatprep.subr.mxu1 %v7107_v6 }
0x14f6   : > { %7409 = vmatpush1.msra.mxu1 %v7106_v47 }
0x14f7   : > { %8558 = vmatmul.mubr.msk.f32.vlgmr.msra.gmra.mxu1 %vm7137_vm11, %v13011_v53  ;;  %vm13585_vm11 = vmmov %vm13577_vm2 }
0x14f8   : > { %7697 = vmatprep.mubr.f32.mxu1 %v9539_v26  ;;  %vm13593_vm2 = vmmov %vm13584_vm1 }
0x14fe   : > { %v7462_v55 = vpop.permute.xlu1 %7461 }
0x155f   : > { %v7231_v60 = vpop.f32.mrf.mxu1 }
0x1560   : > { %v7232_v9 = vadd.f32 %v7231_v60, %v7135_v30 }
0x1561   : > { %v7233_v45 = vpop.f32.mrf.mxu1 }
0x1562   : > { %v7234_v44 = vadd.f32 %v7233_v45, %v7135_v30  ;;  %v7449_v7 = vmax.f32 %v7232_v9, 0.0 }
0x1564   : > { %v7450_v52 = vmax.f32 %v7234_v44, 0.0 }
0x1566   : > { %8559 = vmatprep.subr.msk.mxu0 %vm13582_vm13, %v7450_v52 }
0x1567   : > { %8560 = vmatpush1.msk.msra.mxu0 %vm13583_vm8, %v7449_v7 }
0x1568   : > { %8561 = vmatmul.mubr.msk.f32.vlgmr.msra.gmra.mxu0 %vm13584_vm1, %v7457_v28 }
0x1569   : > { %7626 = vmatprep.mubr.f32.mxu0 %v9539_v26 }
0x1585   : > { %v7302_v17 = vpop.f32.mrf.mxu1 }
0x1586   : > { %v7303_v53 = vadd.f32 %v7302_v17, %v7135_v30 }
0x1587   : > { %v7304_v25 = vpop.f32.mrf.mxu1 }
0x1588   : > { %v7305_v0 = vadd.f32 %v7304_v25, %v7135_v30  ;;  %v7451_v63 = vmax.f32 %v7303_v53, 0.0 }
0x158a   : > { %v7452_v59 = vmax.f32 %v7305_v0, 0.0 }
0x158c   : > { %8562 = vmatprep.subr.msk.mxu0 %vm13585_vm11, %v7452_v59 }
0x158d   : > { %8563 = vmatpush1.msk.msra.mxu0 %vm13586_vm5, %v7451_v63 }
0x158e   : > { %8564 = vmatmul.mubr.msk.f32.vlgmr.msra.gmra.mxu0 %vm13587_vm7, %v7457_v28 }
0x158f   : > { %7768 = vmatprep.mubr.f32.mxu0 %v9539_v26 }
0x15a3   : > { %v7373_v24 = vpop.f32.mrf.mxu0 }
0x15a4   : > { %v7374_v38 = vadd.f32 %v7373_v24, %v7135_v30 }
0x15a5   : > { %v7375_v36 = vpop.f32.mrf.mxu0 }
0x15a6   : > { %v7376_v54 = vadd.f32 %v7375_v36, %v7135_v30  ;;  %v7453_v21 = vmax.f32 %v7374_v38, 0.0 }
0x15a8   : > { %v7454_v15 = vmax.f32 %v7376_v54, 0.0 }
0x15aa   : > { %8565 = vmatprep.subr.msk.mxu1 %vm13588_vm6, %v7454_v15 }
0x15ab   : > { %8566 = vmatpush1.msk.msra.mxu1 %vm13589_vm3, %v7453_v21 }
0x15ac   : > { %8567 = vmatmul.mubr.msk.f32.vlgmr.msra.gmra.mxu1 %vm13590_vm12, %v7457_v28 }
0x15b7   : > { %v7444_v35 = vpop.f32.mrf.mxu1 }
0x15b8   : > { %v7445_v16 = vadd.f32 %v7444_v35, %v7135_v30 }
0x15b9   : > { %v7446_v19 = vpop.f32.mrf.mxu1 }
0x15ba   : > { %v7447_v50 = vadd.f32 %v7446_v19, %v7135_v30  ;;  %v7455_v26 = vmax.f32 %v7445_v16, 0.0 }
0x15bc   : > { %v7456_v11 = vmax.f32 %v7447_v50, 0.0 }
0x15be   : > { %8568 = vmatprep.subr.msk.mxu0 %vm13591_vm0, %v7456_v11 }
0x15bf   : > { %8569 = vmatpush1.msk.msra.mxu0 %vm13592_vm10, %v7455_v26 }
0x15c0   : > { %8570 = vmatmul.mubr.msk.f32.vlgmr.msra.gmra.mxu0 %vm13593_vm2, %v7457_v28 }
0x1628   : > { %v7557_v23 = vpop.f32.mrf.mxu0 }
0x1629   : > { %v7558_v40 = vadd.f32 %v7557_v23, %v7462_v55 }
0x162a   : > { %v7559_v61 = vpop.f32.mrf.mxu0 }
0x162b   : > { %v7560_v10 = vadd.f32 %v7559_v61, %v7462_v55 }
0x162d   : > { %v7783_v2 = vcombine.low %v7558_v40, %v7560_v10 }
0x162f   : > { %7791 = vst [vmem:[%s1269_s10] sm:$0x77] %v7783_v2 }
0x164e   : > { %v7628_v1 = vpop.f32.mrf.mxu0 }
0x164f   : > { %v7629_v51 = vadd.f32 %v7628_v1, %v7462_v55 }
0x1650   : > { %v7630_v34 = vpop.f32.mrf.mxu0 }
0x1651   : > { %v7631_v14 = vadd.f32 %v7630_v34, %v7462_v55 }
0x1653   : > { %v7784_v43 = vcombine.low %v7629_v51, %v7631_v14 }
0x1655   : > { %7792 = vst [vmem:[%s1269_s10 + $0x8] sm:$0x77] %v7784_v43 }
0x166c   : > { %v7699_v41 = vpop.f32.mrf.mxu1 }
0x166d   : > { %v7700_v33 = vadd.f32 %v7699_v41, %v7462_v55 }
0x166e   : > { %v7701_v29 = vpop.f32.mrf.mxu1 }
0x166f   : > { %v7702_v31 = vadd.f32 %v7701_v29, %v7462_v55 }
0x1671   : > { %v7785_v13 = vcombine.low %v7700_v33, %v7702_v31 }
0x1673   : > { %7793 = vst [vmem:[%s1269_s10 + $0x10] sm:$0x77] %v7785_v13 }
0x1680   : > { %v7770_v42 = vpop.f32.mrf.mxu0 }
0x1681   : > { %v7771_v27 = vadd.f32 %v7770_v42, %v7462_v55 }
0x1682   : > { %v7772_v46 = vpop.f32.mrf.mxu0 }
0x1683   : > { %v7773_v32 = vadd.f32 %v7772_v46, %v7462_v55 }
0x1685   : > { %v7786_v5 = vcombine.low %v7771_v27, %v7773_v32 }
0x1687   : > { %7794 = vst [vmem:[%s1269_s10 + $0x18] sm:$0x77] %v7786_v5 }
0x1688 PF: > { %s86_s22 = sadd.s32 1, %s9472_s22  }
0x1689   : > { %p83_p10 = scmp.ge.s32.totalorder %s86_s22, 4  }
0x168b   :  { %85 = sbr.rel (!%p83_p10) target bundleno = 65 (0x41), region = 274 }
0x1690   :  { %7816 = vsyncpa [#allocation3], 1 }
0x1691   :  { %7818 = vsyncpa [#allocation3 + $0x1], 1 }
0x1692   :  { %7819 = vsyncpa [#allocation5], 1 }
0x1693   :  { %7820 = vsyncpa [#allocation8], 1 }
0x1694   :  { %7821 = vsyncpa [#allocation11], 1 }
0x1695   :  { %7822 = vsyncpa [#allocation14], 1 }

</bundles_post_ra>
